<compile_context>
chip_gen: v7x
topology: tpu7x:2x2x1
jax: 0.10.0
libtpu: 0.0.40
codegen_flags: <defaults>
</compile_context>

<pallas_src>
import math
from functools import partial

import jax
import jax.numpy as jnp
from jax.experimental import pallas as pl
from jax.experimental.pallas import tpu as pltpu


# ----------------------------------------------------------------------------
# In-kernel helpers (pure functions on jnp values inside Pallas kernels)
# ----------------------------------------------------------------------------
def _ln_f32(x, g, b, eps):
    mu = jnp.mean(x, axis=-1, keepdims=True)
    var = jnp.mean((x - mu) ** 2, axis=-1, keepdims=True)
    return (x - mu) * jax.lax.rsqrt(var + eps) * g + b


def _matmul_bias(x, w, b):
    # bf16 MXU operands, f32 accumulation, f32 bias add.
    return jnp.dot(x.astype(jnp.bfloat16), w, preferred_element_type=jnp.float32) + b


def _gelu(x):
    # TODO(synk): PyTorch nn.GELU / HF BERT use the exact erf GELU; tanh approximation here.
    return jax.nn.gelu(x, approximate=True)


def _mha(q, k, v, *, num_heads, scale, bias=None):
    """q: (Sq, D), k/v: (Sk, D) f32 -> (Sq, D) f32.  All heads handled in one grid step."""
    D = q.shape[-1]
    dh = D // num_heads
    outs = []
    for h in range(num_heads):
        sl = slice(h * dh, (h + 1) * dh)
        q_h = q[:, sl].astype(jnp.bfloat16)
        k_h = k[:, sl].astype(jnp.bfloat16)
        v_h = v[:, sl].astype(jnp.bfloat16)
        # contract the head dim of both operands: no in-kernel transpose of k
        s = jax.lax.dot_general(q_h, k_h, (((1,), (1,)), ((), ())),
                                preferred_element_type=jnp.float32) * scale
        if bias is not None:
            s = s + bias
        s = s - jnp.max(s, axis=-1, keepdims=True)
        p = jnp.exp(s)
        p = p * pl.reciprocal(jnp.sum(p, axis=-1, keepdims=True), approx=True)
        outs.append(jnp.dot(p.astype(jnp.bfloat16), v_h,
                            preferred_element_type=jnp.float32))
    return jnp.concatenate(outs, axis=-1)


# ----------------------------------------------------------------------------
# Pallas kernels
# ----------------------------------------------------------------------------
def _linear_kernel(x_ref, w_ref, b_ref, o_ref):
    o_ref[...] = _matmul_bias(x_ref[...], w_ref[...], b_ref[...])


def linear(x, w, b):
    """x: (M, K) f32, w: (K, N) bf16, b: (1, N) f32 -> (M, N) f32. Whole-slab kernel."""
    M, _ = x.shape
    N = w.shape[1]
    return pl.pallas_call(
        _linear_kernel,
        out_shape=jax.ShapeDtypeStruct((M, N), jnp.float32),
    )(x, w, b)


def _layernorm_kernel(x_ref, g_ref, b_ref, o_ref, *, eps):
    o_ref[...] = _ln_f32(x_ref[...], g_ref[...], b_ref[...], eps)


def layernorm(x, g, b, eps):
    """x: (..., D) f32; g/b: (1, D).  Standalone LN (only used twice per forward)."""
    shape = x.shape
    D = shape[-1]
    x2 = x.reshape(-1, D)
    out = pl.pallas_call(
        partial(_layernorm_kernel, eps=eps),
        out_shape=jax.ShapeDtypeStruct(x2.shape, jnp.float32),
    )(x2, g, b)
    return out.reshape(shape)


def _vit_block_kernel(x_ref, ln1_g, ln1_b, wqkv, bqkv, wo, bo,
                      ln2_g, ln2_b, w1, b1, w2, b2, o_ref, *, num_heads, eps):
    x = x_ref[0]                                            # (S, D) f32
    D = x.shape[-1]
    scale = 1.0 / math.sqrt(D // num_heads)

    # --- pre-LN multi-head self-attention (no mask on the ViT path) ---
    h = _ln_f32(x, ln1_g[...], ln1_b[...], eps)
    qkv = _matmul_bias(h, wqkv[...], bqkv[...])             # (S, 3D)
    q, k, v = qkv[:, :D], qkv[:, D:2 * D], qkv[:, 2 * D:]
    attn = _mha(q, k, v, num_heads=num_heads, scale=scale)
    attn = _matmul_bias(attn, wo[...], bo[...])
    x = x + attn

    # --- pre-LN MLP ---
    h = _ln_f32(x, ln2_g[...], ln2_b[...], eps)
    h = _gelu(_matmul_bias(h, w1[...], b1[...]))
    h = _matmul_bias(h, w2[...], b2[...])
    o_ref[0] = x + h


def vit_block(x, blk, *, num_heads):
    B, S, D = x.shape
    H = blk["w1"].shape[1]

    def rep(shape):
        return pl.BlockSpec(shape, lambda i: (0,) * len(shape))

    xs = pl.BlockSpec((1, S, D), lambda i: (i, 0, 0))
    return pl.pallas_call(
        partial(_vit_block_kernel, num_heads=num_heads, eps=1e-6),
        out_shape=jax.ShapeDtypeStruct((B, S, D), jnp.float32),
        grid=(B,),
        in_specs=[
            xs,
            rep((1, D)), rep((1, D)),
            rep((D, 3 * D)), rep((1, 3 * D)),
            rep((D, D)), rep((1, D)),
            rep((1, D)), rep((1, D)),
            rep((D, H)), rep((1, H)),
            rep((H, D)), rep((1, D)),
        ],
        out_specs=xs,
        compiler_params=pltpu.CompilerParams(dimension_semantics=("parallel",)),
    )(x, blk["ln1_g"], blk["ln1_b"], blk["wqkv"], blk["bqkv"],
      blk["wo"], blk["bo"], blk["ln2_g"], blk["ln2_b"],
      blk["w1"], blk["b1"], blk["w2"], blk["b2"])


def _bert_layer_kernel(x_ref, img_ref, mask_ref,
                       wqkv_s, bqkv_s, wo_s, bo_s, lns_g, lns_b,
                       wq_c, bq_c, wkv_c, bkv_c, wo_c, bo_c, lnc_g, lnc_b,
                       w1, b1, w2, b2, lnf_g, lnf_b,
                       o_ref, *, num_heads, eps):
    x = x_ref[0]                                            # (S, D) f32
    img = img_ref[0]                                        # (Simg, D) f32
    D = x.shape[-1]
    scale = 1.0 / math.sqrt(D // num_heads)
    # additive key-mask bias built in-kernel from the (1, S) 0/1 mask
    bias = (1.0 - mask_ref[0]) * -1e4                       # (1, S)

    # --- self attention (post-LN) ---
    qkv = _matmul_bias(x, wqkv_s[...], bqkv_s[...])         # (S, 3D)
    q, k, v = qkv[:, :D], qkv[:, D:2 * D], qkv[:, 2 * D:]
    h = _mha(q, k, v, num_heads=num_heads, scale=scale, bias=bias)
    h = _matmul_bias(h, wo_s[...], bo_s[...])
    x = _ln_f32(x + h, lns_g[...], lns_b[...], eps)

    # --- cross attention over image embeds (image_atts are all ones -> no bias) ---
    q = _matmul_bias(x, wq_c[...], bq_c[...])               # (S, D)
    kv = _matmul_bias(img, wkv_c[...], bkv_c[...])          # (Simg, 2D)
    k, v = kv[:, :D], kv[:, D:]
    h = _mha(q, k, v, num_heads=num_heads, scale=scale)
    h = _matmul_bias(h, wo_c[...], bo_c[...])
    x = _ln_f32(x + h, lnc_g[...], lnc_b[...], eps)

    # --- FFN (post-LN) ---
    h = _gelu(_matmul_bias(x, w1[...], b1[...]))
    h = _matmul_bias(h, w2[...], b2[...])
    o_ref[0] = _ln_f32(x + h, lnf_g[...], lnf_b[...], eps)


def bert_layer(x, img, mask, layer, *, num_heads):
    B, S, D = x.shape
    Simg = img.shape[1]
    H = layer["w1"].shape[1]

    def rep(shape):
        return pl.BlockSpec(shape, lambda i: (0,) * len(shape))

    xs = pl.BlockSpec((1, S, D), lambda i: (i, 0, 0))
    return pl.pallas_call(
        partial(_bert_layer_kernel, num_heads=num_heads, eps=1e-12),
        out_shape=jax.ShapeDtypeStruct((B, S, D), jnp.float32),
        grid=(B,),
        in_specs=[
            xs,
            pl.BlockSpec((1, Simg, D), lambda i: (i, 0, 0)),
            pl.BlockSpec((1, 1, S), lambda i: (i, 0, 0)),
            rep((D, 3 * D)), rep((1, 3 * D)), rep((D, D)), rep((1, D)),
            rep((1, D)), rep((1, D)),
            rep((D, D)), rep((1, D)), rep((D, 2 * D)), rep((1, 2 * D)),
            rep((D, D)), rep((1, D)), rep((1, D)), rep((1, D)),
            rep((D, H)), rep((1, H)), rep((H, D)), rep((1, D)),
            rep((1, D)), rep((1, D)),
        ],
        out_specs=xs,
        compiler_params=pltpu.CompilerParams(dimension_semantics=("parallel",)),
    )(x, img, mask,
      layer["wqkv_s"], layer["bqkv_s"], layer["wo_s"], layer["bo_s"],
      layer["lns_g"], layer["lns_b"],
      layer["wq_c"], layer["bq_c"], layer["wkv_c"], layer["bkv_c"],
      layer["wo_c"], layer["bo_c"], layer["lnc_g"], layer["lnc_b"],
      layer["w1"], layer["b1"], layer["w2"], layer["b2"],
      layer["lnf_g"], layer["lnf_b"])


def _classifier_kernel(x_ref, w1_ref, b1_ref, w2_ref, b2_ref, o_ref):
    # Linear(D, 2D) -> Dropout(identity @ eval) -> Linear(2D, n_labels) -> Dropout(identity)
    h = _matmul_bias(x_ref[...], w1_ref[...], b1_ref[...])
    o_ref[...] = _matmul_bias(h, w2_ref[...], b2_ref[...])


def classifier(x, p):
    B, _ = x.shape
    n_labels = p["w2"].shape[1]
    return pl.pallas_call(
        _classifier_kernel,
        out_shape=jax.ShapeDtypeStruct((B, n_labels), jnp.float32),
    )(x, p["w1"], p["b1"], p["w2"], p["b2"])


# ----------------------------------------------------------------------------
# Model forward (Pallas kernels + JAX glue)
# ----------------------------------------------------------------------------
def vit_forward(image, p, *, patch, num_heads):
    """VisionTransformer: conv-patch-embed (as matmul) + cls token + pos embed + pre-LN blocks."""
    B, C, Himg, Wimg = image.shape
    Hp, Wp = Himg // patch, Wimg // patch
    # patchify NCHW -> (B, Hp*Wp, C*patch*patch), flattened in (C, kh, kw) order
    # to match Conv2d(kernel=stride=patch) weight layout.
    x = image.reshape(B, C, Hp, patch, Wp, patch)
    x = x.transpose(0, 2, 4, 1, 3, 5).reshape(B, Hp * Wp, C * patch * patch)
    D = p["patch_w"].shape[1]
    N = Hp * Wp
    x = linear(x.reshape(B * N, -1), p["patch_w"], p["patch_b"]).reshape(B, N, D)

    cls = jnp.broadcast_to(p["cls_token"], (B, 1, D))
    x = jnp.concatenate([cls, x], axis=1) + p["pos_embed"]          # (B, N+1, D)

    for blk in p["blocks"]:
        x = vit_block(x, blk, num_heads=num_heads)                  # one fused kernel per block

    return layernorm(x, p["ln_f_g"], p["ln_f_b"], 1e-6)


def bert_forward(input_ids, attention_mask, image_embeds, p, *, num_heads):
    """BertModel with cross-attention (fusion) layers, post-LN."""
    B, S = input_ids.shape
    x = (jnp.take(p["word_emb"], input_ids, axis=0)
         + p["pos_emb"][:S][None, :, :]
         + p["type_emb"][0][None, None, :])
    x = layernorm(x, p["emb_ln_g"], p["emb_ln_b"], 1e-12)

    key_mask = attention_mask.astype(jnp.float32).reshape(B, 1, S)  # bias built in-kernel
    for layer in p["layers"]:
        x = bert_layer(x, image_embeds, key_mask, layer, num_heads=num_heads)
    return x


def question_answer_classifier(image, input_ids, attention_mask, params, *, patch, num_heads):
    image_embeds = vit_forward(image, params["vit"], patch=patch, num_heads=num_heads)
    # image_atts = ones(...) in the reference -> no masking on the cross-attn path,
    # so it is skipped entirely (no HBM bias tensor).
    last_hidden = bert_forward(input_ids, attention_mask, image_embeds,
                               params["bert"], num_heads=num_heads)
    cls_tok = last_hidden[:, 0, :]                                  # (B, D)
    return classifier(cls_tok, params["cls"])


# ----------------------------------------------------------------------------
# Deterministic parameter init (weights bf16 for the MXU, biases / LN / embeds f32)
# ----------------------------------------------------------------------------
def init_params(key, *, C, patch, n_patches, D, mlp_hidden, vit_depth,
                vocab, max_pos, bert_layers, n_labels):
    keys = iter(jax.random.split(key, 128))

    def w(fi, fo):
        return (jax.random.normal(next(keys), (fi, fo), jnp.float32) * 0.02).astype(jnp.bfloat16)

    def b(fo):
        return jnp.zeros((1, fo), jnp.float32)

    def g(d):
        return jnp.ones((1, d), jnp.float32)

    vit = {
        "patch_w": w(C * patch * patch, D), "patch_b": b(D),
        "cls_token": jax.random.normal(next(keys), (1, 1, D), jnp.float32) * 0.02,
        "pos_embed": jax.random.normal(next(keys), (1, n_patches + 1, D), jnp.float32) * 0.02,
        "blocks": [],
        "ln_f_g": g(D), "ln_f_b": b(D),
    }
    for _ in range(vit_depth):
        vit["blocks"].append({
            "ln1_g": g(D), "ln1_b": b(D),
            "wqkv": w(D, 3 * D), "bqkv": b(3 * D),
            "wo": w(D, D), "bo": b(D),
            "ln2_g": g(D), "ln2_b": b(D),
            "w1": w(D, mlp_hidden), "b1": b(mlp_hidden),
            "w2": w(mlp_hidden, D), "b2": b(D),
        })

    bert = {
        "word_emb": jax.random.normal(next(keys), (vocab, D), jnp.float32) * 0.02,
        "pos_emb": jax.random.normal(next(keys), (max_pos, D), jnp.float32) * 0.02,
        "type_emb": jax.random.normal(next(keys), (2, D), jnp.float32) * 0.02,
        "emb_ln_g": g(D), "emb_ln_b": b(D),
        "layers": [],
    }
    # TODO(synk): layer count / fusion_layer come from the external bert_config json;
    # a small fixed number of fusion (self+cross) layers is used here.
    for _ in range(bert_layers):
        bert["layers"].append({
            "wqkv_s": w(D, 3 * D), "bqkv_s": b(3 * D),
            "wo_s": w(D, D), "bo_s": b(D),
            "lns_g": g(D), "lns_b": b(D),
            "wq_c": w(D, D), "bq_c": b(D),
            "wkv_c": w(D, 2 * D), "bkv_c": b(2 * D),
            "wo_c": w(D, D), "bo_c": b(D),
            "lnc_g": g(D), "lnc_b": b(D),
            "w1": w(D, mlp_hidden), "b1": b(mlp_hidden),
            "w2": w(mlp_hidden, D), "b2": b(D),
            "lnf_g": g(D), "lnf_b": b(D),
        })

    cls = {"w1": w(D, 2 * D), "b1": b(2 * D),
           "w2": w(2 * D, n_labels), "b2": b(n_labels)}
    return {"vit": vit, "bert": bert, "cls": cls}


# ----------------------------------------------------------------------------
# Main
# ----------------------------------------------------------------------------
if __name__ == "__main__":
    # Small shapes consistent with the module (embed_dim, img_res, n_labels shrunk).
    B = 2
    C, IMG, PATCH = 3, 32, 16           # image_res=32, patch_size=16 -> 4 patches + 1 cls
    D = 128                             # embed_dim (shrunk from 768)
    NUM_HEADS = 2                       # as in the module
    MLP_HIDDEN = 4 * D                  # mlp_ratio=4
    VIT_DEPTH = 4                       # as in the module
    VOCAB, MAX_POS, SEQ = 100, 16, 8
    BERT_LAYERS = 2
    N_LABELS = 256                      # shrunk from 3129 (multiple of 128: lane-dense store)

    n_patches = (IMG // PATCH) ** 2

    root = jax.random.PRNGKey(0)
    k_param, k_img, k_ids = jax.random.split(root, 3)

    params = init_params(k_param, C=C, patch=PATCH, n_patches=n_patches, D=D,
                         mlp_hidden=MLP_HIDDEN, vit_depth=VIT_DEPTH,
                         vocab=VOCAB, max_pos=MAX_POS, bert_layers=BERT_LAYERS,
                         n_labels=N_LABELS)

    image = jax.random.normal(k_img, (B, C, IMG, IMG), jnp.float32)          # NCHW
    input_ids = jax.random.randint(k_ids, (B, SEQ), 0, VOCAB, dtype=jnp.int32)
    attention_mask = jnp.array([[1, 1, 1, 1, 1, 1, 1, 1],
                                [1, 1, 1, 1, 1, 0, 0, 0]], dtype=jnp.int32)  # (B, SEQ)

    fwd = jax.jit(partial(question_answer_classifier, patch=PATCH, num_heads=NUM_HEADS))
    logits = fwd(image, input_ids, attention_mask, params)
    jax.block_until_ready(logits)

    assert logits.shape == (B, N_LABELS), logits.shape
    assert bool(jnp.all(jnp.isfinite(logits)))
    print("KERNEL_OK")
</pallas_src>

<mosaic_0001>
module attributes {stable_mosaic.version = 11 : i64} {
  func.func @_linear_kernel(%arg0: memref<8x768xf32, #tpu.memory_space<vmem>>, %arg1: memref<768x128xbf16, #tpu.memory_space<vmem>>, %arg2: memref<1x128xf32, #tpu.memory_space<vmem>>, %arg3: memref<8x128xf32, #tpu.memory_space<vmem>>) attributes {dimension_semantics = [], scalar_prefetch = 0 : i64, scratch_operands = 0 : i64, tpu.core_type = #tpu.core_type<tc>} {
    %c0 = arith.constant 0 : index
    %c0_0 = arith.constant 0 : index
    %0 = vector.load %arg0[%c0, %c0_0] : memref<8x768xf32, #tpu.memory_space<vmem>>, vector<8x768xf32>
    %c0_1 = arith.constant 0 : index
    %c0_2 = arith.constant 0 : index
    %1 = vector.load %arg1[%c0_1, %c0_2] : memref<768x128xbf16, #tpu.memory_space<vmem>>, vector<768x128xbf16>
    %c0_3 = arith.constant 0 : index
    %c0_4 = arith.constant 0 : index
    %2 = vector.load %arg2[%c0_3, %c0_4] : memref<1x128xf32, #tpu.memory_space<vmem>>, vector<1x128xf32>
    %3 = arith.truncf %0 : vector<8x768xf32> to vector<8x768xbf16>
    %cst = arith.constant dense<0.000000e+00> : vector<8x128xf32>
    %4 = tpu.matmul %3, %1, %cst {dimension_numbers = #tpu.dot_dimension_numbers<[1], [0], [0], [1], [0, 0, 1, 1], [], []>} : vector<8x768xbf16>, vector<768x128xbf16>, vector<8x128xf32> -> vector<8x128xf32>
    %5 = vector.broadcast %2 : vector<1x128xf32> to vector<8x128xf32>
    %6 = arith.addf %4, %5 : vector<8x128xf32>
    %c0_5 = arith.constant 0 : index
    %c0_6 = arith.constant 0 : index
    %7 = vector.load %arg3[%c0_5, %c0_6] : memref<8x128xf32, #tpu.memory_space<vmem>>, vector<8x128xf32>
    tpu.vector_store %arg3[%c0_5, %c0_6], %6 {strides = array<i32>} : memref<8x128xf32, #tpu.memory_space<vmem>>, vector<8x128xf32>,
    return
  }
}

module attributes {stable_mosaic.version = 11 : i64} {
  func.func @_vit_block_kernel(%arg0: i32, %arg1: memref<1x5x128xf32, #tpu.memory_space<vmem>>, %arg2: memref<1x128xf32, #tpu.memory_space<vmem>>, %arg3: memref<1x128xf32, #tpu.memory_space<vmem>>, %arg4: memref<128x384xbf16, #tpu.memory_space<vmem>>, %arg5: memref<1x384xf32, #tpu.memory_space<vmem>>, %arg6: memref<128x128xbf16, #tpu.memory_space<vmem>>, %arg7: memref<1x128xf32, #tpu.memory_space<vmem>>, %arg8: memref<1x128xf32, #tpu.memory_space<vmem>>, %arg9: memref<1x128xf32, #tpu.memory_space<vmem>>, %arg10: memref<128x512xbf16, #tpu.memory_space<vmem>>, %arg11: memref<1x512xf32, #tpu.memory_space<vmem>>, %arg12: memref<512x128xbf16, #tpu.memory_space<vmem>>, %arg13: memref<1x128xf32, #tpu.memory_space<vmem>>, %arg14: memref<1x5x128xf32, #tpu.memory_space<vmem>>) attributes {dimension_semantics = [#tpu.dimension_semantics<parallel>], iteration_bounds = array<i64: 2>, scalar_prefetch = 0 : i64, scratch_operands = 0 : i64, tpu.core_type = #tpu.core_type<tc>, window_params = [{transform_indices = @transform_0, window_bounds = array<i64: 1, 5, 128>}, {pipeline_mode = #tpu.pipeline_mode<synchronous>, transform_indices = @transform_1, window_bounds = array<i64: 1, 128>}, {pipeline_mode = #tpu.pipeline_mode<synchronous>, transform_indices = @transform_2, window_bounds = array<i64: 1, 128>}, {pipeline_mode = #tpu.pipeline_mode<synchronous>, transform_indices = @transform_3, window_bounds = array<i64: 128, 384>}, {pipeline_mode = #tpu.pipeline_mode<synchronous>, transform_indices = @transform_4, window_bounds = array<i64: 1, 384>}, {pipeline_mode = #tpu.pipeline_mode<synchronous>, transform_indices = @transform_5, window_bounds = array<i64: 128, 128>}, {pipeline_mode = #tpu.pipeline_mode<synchronous>, transform_indices = @transform_6, window_bounds = array<i64: 1, 128>}, {pipeline_mode = #tpu.pipeline_mode<synchronous>, transform_indices = @transform_7, window_bounds = array<i64: 1, 128>}, {pipeline_mode = #tpu.pipeline_mode<synchronous>, transform_indices = @transform_8, window_bounds = array<i64: 1, 128>}, {pipeline_mode = #tpu.pipeline_mode<synchronous>, transform_indices = @transform_9, window_bounds = array<i64: 128, 512>}, {pipeline_mode = #tpu.pipeline_mode<synchronous>, transform_indices = @transform_10, window_bounds = array<i64: 1, 512>}, {pipeline_mode = #tpu.pipeline_mode<synchronous>, transform_indices = @transform_11, window_bounds = array<i64: 512, 128>}, {pipeline_mode = #tpu.pipeline_mode<synchronous>, transform_indices = @transform_12, window_bounds = array<i64: 1, 128>}, {transform_indices = @transform_13, window_bounds = array<i64: 1, 5, 128>}]} {
    %c0 = arith.constant 0 : index
    %c0_0 = arith.constant 0 : index
    %c0_1 = arith.constant 0 : index
    %0 = vector.load %arg1[%c0, %c0_0, %c0_1] : memref<1x5x128xf32, #tpu.memory_space<vmem>>, vector<1x5x128xf32>
    %1 = vector.shape_cast %0 : vector<1x5x128xf32> to vector<5x128xf32>
    %c0_2 = arith.constant 0 : index
    %c0_3 = arith.constant 0 : index
    %2 = vector.load %arg2[%c0_2, %c0_3] : memref<1x128xf32, #tpu.memory_space<vmem>>, vector<1x128xf32>
    %c0_4 = arith.constant 0 : index
    %c0_5 = arith.constant 0 : index
    %3 = vector.load %arg3[%c0_4, %c0_5] : memref<1x128xf32, #tpu.memory_space<vmem>>, vector<1x128xf32>
    %cst = arith.constant dense<0.000000e+00> : vector<5xf32>
    %4 = vector.multi_reduction <add>, %1, %cst [1] : vector<5x128xf32> to vector<5xf32>
    %5 = vector.shape_cast %4 : vector<5xf32> to vector<5x1xf32>
    %cst_6 = arith.constant 1.280000e+02 : f32
    %6 = vector.broadcast %cst_6 : f32 to vector<5x1xf32>
    %7 = arith.divf %5, %6 : vector<5x1xf32>
    %8 = vector.broadcast %7 : vector<5x1xf32> to vector<5x128xf32>
    %9 = arith.subf %1, %8 : vector<5x128xf32>
    %10 = arith.mulf %9, %9 : vector<5x128xf32>
    %cst_7 = arith.constant dense<0.000000e+00> : vector<5xf32>
    %11 = vector.multi_reduction <add>, %10, %cst_7 [1] : vector<5x128xf32> to vector<5xf32>
    %12 = vector.shape_cast %11 : vector<5xf32> to vector<5x1xf32>
    %cst_8 = arith.constant 1.280000e+02 : f32
    %13 = vector.broadcast %cst_8 : f32 to vector<5x1xf32>
    %14 = arith.divf %12, %13 : vector<5x1xf32>
    %15 = vector.broadcast %7 : vector<5x1xf32> to vector<5x128xf32>
    %16 = arith.subf %1, %15 : vector<5x128xf32>
    %cst_9 = arith.constant 9.99999997E-7 : f32
    %17 = vector.broadcast %cst_9 : f32 to vector<5x1xf32>
    %18 = arith.addf %14, %17 : vector<5x1xf32>
    %19 = math.rsqrt %18 : vector<5x1xf32>
    %20 = vector.broadcast %19 : vector<5x1xf32> to vector<5x128xf32>
    %21 = arith.mulf %16, %20 : vector<5x128xf32>
    %22 = vector.broadcast %2 : vector<1x128xf32> to vector<5x128xf32>
    %23 = arith.mulf %21, %22 : vector<5x128xf32>
    %24 = vector.broadcast %3 : vector<1x128xf32> to vector<5x128xf32>
    %25 = arith.addf %23, %24 : vector<5x128xf32>
    %c0_10 = arith.constant 0 : index
    %c0_11 = arith.constant 0 : index
    %26 = vector.load %arg4[%c0_10, %c0_11] : memref<128x384xbf16, #tpu.memory_space<vmem>>, vector<128x384xbf16>
    %c0_12 = arith.constant 0 : index
    %c0_13 = arith.constant 0 : index
    %27 = vector.load %arg5[%c0_12, %c0_13] : memref<1x384xf32, #tpu.memory_space<vmem>>, vector<1x384xf32>
    %28 = arith.truncf %25 : vector<5x128xf32> to vector<5x128xbf16>
    %cst_14 = arith.constant dense<0.000000e+00> : vector<5x384xf32>
    %29 = tpu.matmul %28, %26, %cst_14 {dimension_numbers = #tpu.dot_dimension_numbers<[1], [0], [0], [1], [0, 0, 1, 1], [], []>} : vector<5x128xbf16>, vector<128x384xbf16>, vector<5x384xf32> -> vector<5x384xf32>
    %30 = vector.broadcast %27 : vector<1x384xf32> to vector<5x384xf32>
    %31 = arith.addf %29, %30 : vector<5x384xf32>
    %32 = vector.extract_strided_slice %31 {offsets = [0, 0], sizes = [5, 128], strides = [1, 1]} : vector<5x384xf32> to vector<5x128xf32>
    %33 = vector.extract_strided_slice %31 {offsets = [0, 128], sizes = [5, 128], strides = [1, 1]} : vector<5x384xf32> to vector<5x128xf32>
    %34 = vector.extract_strided_slice %31 {offsets = [0, 256], sizes = [5, 128], strides = [1, 1]} : vector<5x384xf32> to vector<5x128xf32>
    %35 = vector.extract_strided_slice %32 {offsets = [0, 0], sizes = [5, 64], strides = [1, 1]} : vector<5x128xf32> to vector<5x64xf32>
    %36 = arith.truncf %35 : vector<5x64xf32> to vector<5x64xbf16>
    %37 = vector.extract_strided_slice %33 {offsets = [0, 0], sizes = [5, 64], strides = [1, 1]} : vector<5x128xf32> to vector<5x64xf32>
    %38 = arith.truncf %37 : vector<5x64xf32> to vector<5x64xbf16>
    %39 = vector.extract_strided_slice %34 {offsets = [0, 0], sizes = [5, 64], strides = [1, 1]} : vector<5x128xf32> to vector<5x64xf32>
    %40 = arith.truncf %39 : vector<5x64xf32> to vector<5x64xbf16>
    %cst_15 = arith.constant dense<0.000000e+00> : vector<5x5xf32>
    %41 = tpu.matmul %36, %38, %cst_15 {dimension_numbers = #tpu.dot_dimension_numbers<[1], [1], [0], [0], [0, 0, 1, 0], [], []>} : vector<5x64xbf16>, vector<5x64xbf16>, vector<5x5xf32> -> vector<5x5xf32>
    %cst_16 = arith.constant 1.250000e-01 : f32
    %42 = vector.broadcast %cst_16 : f32 to vector<5x5xf32>
    %43 = arith.mulf %41, %42 : vector<5x5xf32>
    %cst_17 = arith.constant dense<0xFF800000> : vector<5xf32>
    %44 = vector.multi_reduction <maximumf>, %43, %cst_17 [1] : vector<5x5xf32> to vector<5xf32>
    %45 = vector.shape_cast %44 : vector<5xf32> to vector<5x1xf32>
    %46 = vector.broadcast %45 : vector<5x1xf32> to vector<5x5xf32>
    %47 = arith.subf %43, %46 : vector<5x5xf32>
    %48 = math.exp %47 : vector<5x5xf32>
    %cst_18 = arith.constant dense<0.000000e+00> : vector<5xf32>
    %49 = vector.multi_reduction <add>, %48, %cst_18 [1] : vector<5x5xf32> to vector<5xf32>
    %50 = vector.shape_cast %49 : vector<5xf32> to vector<5x1xf32>
    %51 = tpu.reciprocal %50 {approx = true} : vector<5x1xf32> -> vector<5x1xf32>
    %52 = vector.broadcast %51 : vector<5x1xf32> to vector<5x5xf32>
    %53 = arith.mulf %48, %52 : vector<5x5xf32>
    %54 = arith.truncf %53 : vector<5x5xf32> to vector<5x5xbf16>
    %cst_19 = arith.constant dense<0.000000e+00> : vector<5x64xf32>
    %55 = tpu.matmul %54, %40, %cst_19 {dimension_numbers = #tpu.dot_dimension_numbers<[1], [0], [0], [1], [0, 0, 1, 1], [], []>} : vector<5x5xbf16>, vector<5x64xbf16>, vector<5x64xf32> -> vector<5x64xf32>
    %56 = vector.extract_strided_slice %32 {offsets = [0, 64], sizes = [5, 64], strides = [1, 1]} : vector<5x128xf32> to vector<5x64xf32>
    %57 = arith.truncf %56 : vector<5x64xf32> to vector<5x64xbf16>
    %58 = vector.extract_strided_slice %33 {offsets = [0, 64], sizes = [5, 64], strides = [1, 1]} : vector<5x128xf32> to vector<5x64xf32>
    %59 = arith.truncf %58 : vector<5x64xf32> to vector<5x64xbf16>
    %60 = vector.extract_strided_slice %34 {offsets = [0, 64], sizes = [5, 64], strides = [1, 1]} : vector<5x128xf32> to vector<5x64xf32>
    %61 = arith.truncf %60 : vector<5x64xf32> to vector<5x64xbf16>
    %cst_20 = arith.constant dense<0.000000e+00> : vector<5x5xf32>
    %62 = tpu.matmul %57, %59, %cst_20 {dimension_numbers = #tpu.dot_dimension_numbers<[1], [1], [0], [0], [0, 0, 1, 0], [], []>} : vector<5x64xbf16>, vector<5x64xbf16>, vector<5x5xf32> -> vector<5x5xf32>
    %cst_21 = arith.constant 1.250000e-01 : f32
    %63 = vector.broadcast %cst_21 : f32 to vector<5x5xf32>
    %64 = arith.mulf %62, %63 : vector<5x5xf32>
    %cst_22 = arith.constant dense<0xFF800000> : vector<5xf32>
    %65 = vector.multi_reduction <maximumf>, %64, %cst_22 [1] : vector<5x5xf32> to vector<5xf32>
    %66 = vector.shape_cast %65 : vector<5xf32> to vector<5x1xf32>
    %67 = vector.broadcast %66 : vector<5x1xf32> to vector<5x5xf32>
    %68 = arith.subf %64, %67 : vector<5x5xf32>
    %69 = math.exp %68 : vector<5x5xf32>
    %cst_23 = arith.constant dense<0.000000e+00> : vector<5xf32>
    %70 = vector.multi_reduction <add>, %69, %cst_23 [1] : vector<5x5xf32> to vector<5xf32>
    %71 = vector.shape_cast %70 : vector<5xf32> to vector<5x1xf32>
    %72 = tpu.reciprocal %71 {approx = true} : vector<5x1xf32> -> vector<5x1xf32>
    %73 = vector.broadcast %72 : vector<5x1xf32> to vector<5x5xf32>
    %74 = arith.mulf %69, %73 : vector<5x5xf32>
    %75 = arith.truncf %74 : vector<5x5xf32> to vector<5x5xbf16>
    %cst_24 = arith.constant dense<0.000000e+00> : vector<5x64xf32>
    %76 = tpu.matmul %75, %61, %cst_24 {dimension_numbers = #tpu.dot_dimension_numbers<[1], [0], [0], [1], [0, 0, 1, 1], [], []>} : vector<5x5xbf16>, vector<5x64xbf16>, vector<5x64xf32> -> vector<5x64xf32>
    %77 = tpu.concatenate %55, %76 in 1 : vector<5x64xf32>, vector<5x64xf32> -> vector<5x128xf32>
    %c0_25 = arith.constant 0 : index
    %c0_26 = arith.constant 0 : index
    %78 = vector.load %arg6[%c0_25, %c0_26] : memref<128x128xbf16, #tpu.memory_space<vmem>>, vector<128x128xbf16>
    %c0_27 = arith.constant 0 : index
    %c0_28 = arith.constant 0 : index
    %79 = vector.load %arg7[%c0_27, %c0_28] : memref<1x128xf32, #tpu.memory_space<vmem>>, vector<1x128xf32>
    %80 = arith.truncf %77 : vector<5x128xf32> to vector<5x128xbf16>
    %cst_29 = arith.constant dense<0.000000e+00> : vector<5x128xf32>
    %81 = tpu.matmul %80, %78, %cst_29 {dimension_numbers = #tpu.dot_dimension_numbers<[1], [0], [0], [1], [0, 0, 1, 1], [], []>} : vector<5x128xbf16>, vector<128x128xbf16>, vector<5x128xf32> -> vector<5x128xf32>
    %82 = vector.broadcast %79 : vector<1x128xf32> to vector<5x128xf32>
    %83 = arith.addf %81, %82 : vector<5x128xf32>
    %84 = arith.addf %1, %83 : vector<5x128xf32>
    %c0_30 = arith.constant 0 : index
    %c0_31 = arith.constant 0 : index
    %85 = vector.load %arg8[%c0_30, %c0_31] : memref<1x128xf32, #tpu.memory_space<vmem>>, vector<1x128xf32>
    %c0_32 = arith.constant 0 : index
    %c0_33 = arith.constant 0 : index
    %86 = vector.load %arg9[%c0_32, %c0_33] : memref<1x128xf32, #tpu.memory_space<vmem>>, vector<1x128xf32>
    %cst_34 = arith.constant dense<0.000000e+00> : vector<5xf32>
    %87 = vector.multi_reduction <add>, %84, %cst_34 [1] : vector<5x128xf32> to vector<5xf32>
    %88 = vector.shape_cast %87 : vector<5xf32> to vector<5x1xf32>
    %cst_35 = arith.constant 1.280000e+02 : f32
    %89 = vector.broadcast %cst_35 : f32 to vector<5x1xf32>
    %90 = arith.divf %88, %89 : vector<5x1xf32>
    %91 = vector.broadcast %90 : vector<5x1xf32> to vector<5x128xf32>
    %92 = arith.subf %84, %91 : vector<5x128xf32>
    %93 = arith.mulf %92, %92 : vector<5x128xf32>
    %cst_36 = arith.constant dense<0.000000e+00> : vector<5xf32>
    %94 = vector.multi_reduction <add>, %93, %cst_36 [1] : vector<5x128xf32> to vector<5xf32>
    %95 = vector.shape_cast %94 : vector<5xf32> to vector<5x1xf32>
    %cst_37 = arith.constant 1.280000e+02 : f32
    %96 = vector.broadcast %cst_37 : f32 to vector<5x1xf32>
    %97 = arith.divf %95, %96 : vector<5x1xf32>
    %98 = vector.broadcast %90 : vector<5x1xf32> to vector<5x128xf32>
    %99 = arith.subf %84, %98 : vector<5x128xf32>
    %cst_38 = arith.constant 9.99999997E-7 : f32
    %100 = vector.broadcast %cst_38 : f32 to vector<5x1xf32>
    %101 = arith.addf %97, %100 : vector<5x1xf32>
    %102 = math.rsqrt %101 : vector<5x1xf32>
    %103 = vector.broadcast %102 : vector<5x1xf32> to vector<5x128xf32>
    %104 = arith.mulf %99, %103 : vector<5x128xf32>
    %105 = vector.broadcast %85 : vector<1x128xf32> to vector<5x128xf32>
    %106 = arith.mulf %104, %105 : vector<5x128xf32>
    %107 = vector.broadcast %86 : vector<1x128xf32> to vector<5x128xf32>
    %108 = arith.addf %106, %107 : vector<5x128xf32>
    %c0_39 = arith.constant 0 : index
    %c0_40 = arith.constant 0 : index
    %109 = vector.load %arg10[%c0_39, %c0_40] : memref<128x512xbf16, #tpu.memory_space<vmem>>, vector<128x512xbf16>
    %c0_41 = arith.constant 0 : index
    %c0_42 = arith.constant 0 : index
    %110 = vector.load %arg11[%c0_41, %c0_42] : memref<1x512xf32, #tpu.memory_space<vmem>>, vector<1x512xf32>
    %111 = arith.truncf %108 : vector<5x128xf32> to vector<5x128xbf16>
    %cst_43 = arith.constant dense<0.000000e+00> : vector<5x512xf32>
    %112 = tpu.matmul %111, %109, %cst_43 {dimension_numbers = #tpu.dot_dimension_numbers<[1], [0], [0], [1], [0, 0, 1, 1], [], []>} : vector<5x128xbf16>, vector<128x512xbf16>, vector<5x512xf32> -> vector<5x512xf32>
    %113 = vector.broadcast %110 : vector<1x512xf32> to vector<5x512xf32>
    %114 = arith.addf %112, %113 : vector<5x512xf32>
    %115 = arith.mulf %114, %114 : vector<5x512xf32>
    %116 = arith.mulf %114, %115 : vector<5x512xf32>
    %cst_44 = arith.constant 4.471500e-02 : f32
    %117 = vector.broadcast %cst_44 : f32 to vector<5x512xf32>
    %118 = arith.mulf %117, %116 : vector<5x512xf32>
    %119 = arith.addf %114, %118 : vector<5x512xf32>
    %cst_45 = arith.constant 0.797884583 : f32
    %120 = vector.broadcast %cst_45 : f32 to vector<5x512xf32>
    %121 = arith.mulf %120, %119 : vector<5x512xf32>
    %122 = math.tanh %121 : vector<5x512xf32>
    %cst_46 = arith.constant 1.000000e+00 : f32
    %123 = vector.broadcast %cst_46 : f32 to vector<5x512xf32>
    %124 = arith.addf %123, %122 : vector<5x512xf32>
    %cst_47 = arith.constant 5.000000e-01 : f32
    %125 = vector.broadcast %cst_47 : f32 to vector<5x512xf32>
    %126 = arith.mulf %125, %124 : vector<5x512xf32>
    %127 = arith.mulf %114, %126 : vector<5x512xf32>
    %c0_48 = arith.constant 0 : index
    %c0_49 = arith.constant 0 : index
    %128 = vector.load %arg12[%c0_48, %c0_49] : memref<512x128xbf16, #tpu.memory_space<vmem>>, vector<512x128xbf16>
    %c0_50 = arith.constant 0 : index
    %c0_51 = arith.constant 0 : index
    %129 = vector.load %arg13[%c0_50, %c0_51] : memref<1x128xf32, #tpu.memory_space<vmem>>, vector<1x128xf32>
    %130 = arith.truncf %127 : vector<5x512xf32> to vector<5x512xbf16>
    %cst_52 = arith.constant dense<0.000000e+00> : vector<5x128xf32>
    %131 = tpu.matmul %130, %128, %cst_52 {dimension_numbers = #tpu.dot_dimension_numbers<[1], [0], [0], [1], [0, 0, 1, 1], [], []>} : vector<5x512xbf16>, vector<512x128xbf16>, vector<5x128xf32> -> vector<5x128xf32>
    %132 = vector.broadcast %129 : vector<1x128xf32> to vector<5x128xf32>
    %133 = arith.addf %131, %132 : vector<5x128xf32>
    %134 = arith.addf %84, %133 : vector<5x128xf32>
    %c0_53 = arith.constant 0 : index
    %c0_54 = arith.constant 0 : index
    %c0_55 = arith.constant 0 : index
    %135 = vector.load %arg14[%c0_53, %c0_54, %c0_55] : memref<1x5x128xf32, #tpu.memory_space<vmem>>, vector<1x5x128xf32>
    %136 = vector.shape_cast %135 : vector<1x5x128xf32> to vector<5x128xf32>
    %137 = vector.shape_cast %134 : vector<5x128xf32> to vector<1x5x128xf32>
    tpu.vector_store %arg14[%c0_53, %c0_54, %c0_55], %137 {strides = array<i32>} : memref<1x5x128xf32, #tpu.memory_space<vmem>>, vector<1x5x128xf32>,
    return
  }
  func.func @transform_0(%arg0: i32) -> (i32, i32, i32) {
    %c0_i32 = arith.constant 0 : i32
    %c0_i32_0 = arith.constant 0 : i32
    %c0_i32_1 = arith.constant 0 : i32
    return %arg0, %c0_i32, %c0_i32_0 : i32, i32, i32
  }
  func.func @transform_1(%arg0: i32) -> (i32, i32) {
    %c0_i32 = arith.constant 0 : i32
    %c0_i32_0 = arith.constant 0 : i32
    %c0_i32_1 = arith.constant 0 : i32
    return %c0_i32, %c0_i32_0 : i32, i32
  }
  func.func @transform_2(%arg0: i32) -> (i32, i32) {
    %c0_i32 = arith.constant 0 : i32
    %c0_i32_0 = arith.constant 0 : i32
    %c0_i32_1 = arith.constant 0 : i32
    return %c0_i32, %c0_i32_0 : i32, i32
  }
  func.func @transform_3(%arg0: i32) -> (i32, i32) {
    %c0_i32 = arith.constant 0 : i32
    %c0_i32_0 = arith.constant 0 : i32
    %c0_i32_1 = arith.constant 0 : i32
    return %c0_i32, %c0_i32_0 : i32, i32
  }
  func.func @transform_4(%arg0: i32) -> (i32, i32) {
    %c0_i32 = arith.constant 0 : i32
    %c0_i32_0 = arith.constant 0 : i32
    %c0_i32_1 = arith.constant 0 : i32
    return %c0_i32, %c0_i32_0 : i32, i32
  }
  func.func @transform_5(%arg0: i32) -> (i32, i32) {
    %c0_i32 = arith.constant 0 : i32
    %c0_i32_0 = arith.constant 0 : i32
    %c0_i32_1 = arith.constant 0 : i32
    return %c0_i32, %c0_i32_0 : i32, i32
  }
  func.func @transform_6(%arg0: i32) -> (i32, i32) {
    %c0_i32 = arith.constant 0 : i32
    %c0_i32_0 = arith.constant 0 : i32
    %c0_i32_1 = arith.constant 0 : i32
    return %c0_i32, %c0_i32_0 : i32, i32
  }
  func.func @transform_7(%arg0: i32) -> (i32, i32) {
    %c0_i32 = arith.constant 0 : i32
    %c0_i32_0 = arith.constant 0 : i32
    %c0_i32_1 = arith.constant 0 : i32
    return %c0_i32, %c0_i32_0 : i32, i32
  }
  func.func @transform_8(%arg0: i32) -> (i32, i32) {
    %c0_i32 = arith.constant 0 : i32
    %c0_i32_0 = arith.constant 0 : i32
    %c0_i32_1 = arith.constant 0 : i32
    return %c0_i32, %c0_i32_0 : i32, i32
  }
  func.func @transform_9(%arg0: i32) -> (i32, i32) {
    %c0_i32 = arith.constant 0 : i32
    %c0_i32_0 = arith.constant 0 : i32
    %c0_i32_1 = arith.constant 0 : i32
    return %c0_i32, %c0_i32_0 : i32, i32
  }
  func.func @transform_10(%arg0: i32) -> (i32, i32) {
    %c0_i32 = arith.constant 0 : i32
    %c0_i32_0 = arith.constant 0 : i32
    %c0_i32_1 = arith.constant 0 : i32
    return %c0_i32, %c0_i32_0 : i32, i32
  }
  func.func @transform_11(%arg0: i32) -> (i32, i32) {
    %c0_i32 = arith.constant 0 : i32
    %c0_i32_0 = arith.constant 0 : i32
    %c0_i32_1 = arith.constant 0 : i32
    return %c0_i32, %c0_i32_0 : i32, i32
  }
  func.func @transform_12(%arg0: i32) -> (i32, i32) {
    %c0_i32 = arith.constant 0 : i32
    %c0_i32_0 = arith.constant 0 : i32
    %c0_i32_1 = arith.constant 0 : i32
    return %c0_i32, %c0_i32_0 : i32, i32
  }
  func.func @transform_13(%arg0: i32) -> (i32, i32, i32) {
    %c0_i32 = arith.constant 0 : i32
    %c0_i32_0 = arith.constant 0 : i32
    %c0_i32_1 = arith.constant 0 : i32
    return %arg0, %c0_i32, %c0_i32_0 : i32, i32, i32
  }
}

module attributes {stable_mosaic.version = 11 : i64} {
  func.func @_vit_block_kernel(%arg0: i32, %arg1: memref<1x5x128xf32, #tpu.memory_space<vmem>>, %arg2: memref<1x128xf32, #tpu.memory_space<vmem>>, %arg3: memref<1x128xf32, #tpu.memory_space<vmem>>, %arg4: memref<128x384xbf16, #tpu.memory_space<vmem>>, %arg5: memref<1x384xf32, #tpu.memory_space<vmem>>, %arg6: memref<128x128xbf16, #tpu.memory_space<vmem>>, %arg7: memref<1x128xf32, #tpu.memory_space<vmem>>, %arg8: memref<1x128xf32, #tpu.memory_space<vmem>>, %arg9: memref<1x128xf32, #tpu.memory_space<vmem>>, %arg10: memref<128x512xbf16, #tpu.memory_space<vmem>>, %arg11: memref<1x512xf32, #tpu.memory_space<vmem>>, %arg12: memref<512x128xbf16, #tpu.memory_space<vmem>>, %arg13: memref<1x128xf32, #tpu.memory_space<vmem>>, %arg14: memref<1x5x128xf32, #tpu.memory_space<vmem>>) attributes {dimension_semantics = [#tpu.dimension_semantics<parallel>], iteration_bounds = array<i64: 2>, scalar_prefetch = 0 : i64, scratch_operands = 0 : i64, tpu.core_type = #tpu.core_type<tc>, window_params = [{transform_indices = @transform_0, window_bounds = array<i64: 1, 5, 128>}, {pipeline_mode = #tpu.pipeline_mode<synchronous>, transform_indices = @transform_1, window_bounds = array<i64: 1, 128>}, {pipeline_mode = #tpu.pipeline_mode<synchronous>, transform_indices = @transform_2, window_bounds = array<i64: 1, 128>}, {pipeline_mode = #tpu.pipeline_mode<synchronous>, transform_indices = @transform_3, window_bounds = array<i64: 128, 384>}, {pipeline_mode = #tpu.pipeline_mode<synchronous>, transform_indices = @transform_4, window_bounds = array<i64: 1, 384>}, {pipeline_mode = #tpu.pipeline_mode<synchronous>, transform_indices = @transform_5, window_bounds = array<i64: 128, 128>}, {pipeline_mode = #tpu.pipeline_mode<synchronous>, transform_indices = @transform_6, window_bounds = array<i64: 1, 128>}, {pipeline_mode = #tpu.pipeline_mode<synchronous>, transform_indices = @transform_7, window_bounds = array<i64: 1, 128>}, {pipeline_mode = #tpu.pipeline_mode<synchronous>, transform_indices = @transform_8, window_bounds = array<i64: 1, 128>}, {pipeline_mode = #tpu.pipeline_mode<synchronous>, transform_indices = @transform_9, window_bounds = array<i64: 128, 512>}, {pipeline_mode = #tpu.pipeline_mode<synchronous>, transform_indices = @transform_10, window_bounds = array<i64: 1, 512>}, {pipeline_mode = #tpu.pipeline_mode<synchronous>, transform_indices = @transform_11, window_bounds = array<i64: 512, 128>}, {pipeline_mode = #tpu.pipeline_mode<synchronous>, transform_indices = @transform_12, window_bounds = array<i64: 1, 128>}, {transform_indices = @transform_13, window_bounds = array<i64: 1, 5, 128>}]} {
    %c0 = arith.constant 0 : index
    %c0_0 = arith.constant 0 : index
    %c0_1 = arith.constant 0 : index
    %0 = vector.load %arg1[%c0, %c0_0, %c0_1] : memref<1x5x128xf32, #tpu.memory_space<vmem>>, vector<1x5x128xf32>
    %1 = vector.shape_cast %0 : vector<1x5x128xf32> to vector<5x128xf32>
    %c0_2 = arith.constant 0 : index
    %c0_3 = arith.constant 0 : index
    %2 = vector.load %arg2[%c0_2, %c0_3] : memref<1x128xf32, #tpu.memory_space<vmem>>, vector<1x128xf32>
    %c0_4 = arith.constant 0 : index
    %c0_5 = arith.constant 0 : index
    %3 = vector.load %arg3[%c0_4, %c0_5] : memref<1x128xf32, #tpu.memory_space<vmem>>, vector<1x128xf32>
    %cst = arith.constant dense<0.000000e+00> : vector<5xf32>
    %4 = vector.multi_reduction <add>, %1, %cst [1] : vector<5x128xf32> to vector<5xf32>
    %5 = vector.shape_cast %4 : vector<5xf32> to vector<5x1xf32>
    %cst_6 = arith.constant 1.280000e+02 : f32
    %6 = vector.broadcast %cst_6 : f32 to vector<5x1xf32>
    %7 = arith.divf %5, %6 : vector<5x1xf32>
    %8 = vector.broadcast %7 : vector<5x1xf32> to vector<5x128xf32>
    %9 = arith.subf %1, %8 : vector<5x128xf32>
    %10 = arith.mulf %9, %9 : vector<5x128xf32>
    %cst_7 = arith.constant dense<0.000000e+00> : vector<5xf32>
    %11 = vector.multi_reduction <add>, %10, %cst_7 [1] : vector<5x128xf32> to vector<5xf32>
    %12 = vector.shape_cast %11 : vector<5xf32> to vector<5x1xf32>
    %cst_8 = arith.constant 1.280000e+02 : f32
    %13 = vector.broadcast %cst_8 : f32 to vector<5x1xf32>
    %14 = arith.divf %12, %13 : vector<5x1xf32>
    %15 = vector.broadcast %7 : vector<5x1xf32> to vector<5x128xf32>
    %16 = arith.subf %1, %15 : vector<5x128xf32>
    %cst_9 = arith.constant 9.99999997E-7 : f32
    %17 = vector.broadcast %cst_9 : f32 to vector<5x1xf32>
    %18 = arith.addf %14, %17 : vector<5x1xf32>
    %19 = math.rsqrt %18 : vector<5x1xf32>
    %20 = vector.broadcast %19 : vector<5x1xf32> to vector<5x128xf32>
    %21 = arith.mulf %16, %20 : vector<5x128xf32>
    %22 = vector.broadcast %2 : vector<1x128xf32> to vector<5x128xf32>
    %23 = arith.mulf %21, %22 : vector<5x128xf32>
    %24 = vector.broadcast %3 : vector<1x128xf32> to vector<5x128xf32>
    %25 = arith.addf %23, %24 : vector<5x128xf32>
    %c0_10 = arith.constant 0 : index
    %c0_11 = arith.constant 0 : index
    %26 = vector.load %arg4[%c0_10, %c0_11] : memref<128x384xbf16, #tpu.memory_space<vmem>>, vector<128x384xbf16>
    %c0_12 = arith.constant 0 : index
    %c0_13 = arith.constant 0 : index
    %27 = vector.load %arg5[%c0_12, %c0_13] : memref<1x384xf32, #tpu.memory_space<vmem>>, vector<1x384xf32>
    %28 = arith.truncf %25 : vector<5x128xf32> to vector<5x128xbf16>
    %cst_14 = arith.constant dense<0.000000e+00> : vector<5x384xf32>
    %29 = tpu.matmul %28, %26, %cst_14 {dimension_numbers = #tpu.dot_dimension_numbers<[1], [0], [0], [1], [0, 0, 1, 1], [], []>} : vector<5x128xbf16>, vector<128x384xbf16>, vector<5x384xf32> -> vector<5x384xf32>
    %30 = vector.broadcast %27 : vector<1x384xf32> to vector<5x384xf32>
    %31 = arith.addf %29, %30 : vector<5x384xf32>
    %32 = vector.extract_strided_slice %31 {offsets = [0, 0], sizes = [5, 128], strides = [1, 1]} : vector<5x384xf32> to vector<5x128xf32>
    %33 = vector.extract_strided_slice %31 {offsets = [0, 128], sizes = [5, 128], strides = [1, 1]} : vector<5x384xf32> to vector<5x128xf32>
    %34 = vector.extract_strided_slice %31 {offsets = [0, 256], sizes = [5, 128], strides = [1, 1]} : vector<5x384xf32> to vector<5x128xf32>
    %35 = vector.extract_strided_slice %32 {offsets = [0, 0], sizes = [5, 64], strides = [1, 1]} : vector<5x128xf32> to vector<5x64xf32>
    %36 = arith.truncf %35 : vector<5x64xf32> to vector<5x64xbf16>
    %37 = vector.extract_strided_slice %33 {offsets = [0, 0], sizes = [5, 64], strides = [1, 1]} : vector<5x128xf32> to vector<5x64xf32>
    %38 = arith.truncf %37 : vector<5x64xf32> to vector<5x64xbf16>
    %39 = vector.extract_strided_slice %34 {offsets = [0, 0], sizes = [5, 64], strides = [1, 1]} : vector<5x128xf32> to vector<5x64xf32>
    %40 = arith.truncf %39 : vector<5x64xf32> to vector<5x64xbf16>
    %cst_15 = arith.constant dense<0.000000e+00> : vector<5x5xf32>
    %41 = tpu.matmul %36, %38, %cst_15 {dimension_numbers = #tpu.dot_dimension_numbers<[1], [1], [0], [0], [0, 0, 1, 0], [], []>} : vector<5x64xbf16>, vector<5x64xbf16>, vector<5x5xf32> -> vector<5x5xf32>
    %cst_16 = arith.constant 1.250000e-01 : f32
    %42 = vector.broadcast %cst_16 : f32 to vector<5x5xf32>
    %43 = arith.mulf %41, %42 : vector<5x5xf32>
    %cst_17 = arith.constant dense<0xFF800000> : vector<5xf32>
    %44 = vector.multi_reduction <maximumf>, %43, %cst_17 [1] : vector<5x5xf32> to vector<5xf32>
    %45 = vector.shape_cast %44 : vector<5xf32> to vector<5x1xf32>
    %46 = vector.broadcast %45 : vector<5x1xf32> to vector<5x5xf32>
    %47 = arith.subf %43, %46 : vector<5x5xf32>
    %48 = math.exp %47 : vector<5x5xf32>
    %cst_18 = arith.constant dense<0.000000e+00> : vector<5xf32>
    %49 = vector.multi_reduction <add>, %48, %cst_18 [1] : vector<5x5xf32> to vector<5xf32>
    %50 = vector.shape_cast %49 : vector<5xf32> to vector<5x1xf32>
    %51 = tpu.reciprocal %50 {approx = true} : vector<5x1xf32> -> vector<5x1xf32>
    %52 = vector.broadcast %51 : vector<5x1xf32> to vector<5x5xf32>
    %53 = arith.mulf %48, %52 : vector<5x5xf32>
    %54 = arith.truncf %53 : vector<5x5xf32> to vector<5x5xbf16>
    %cst_19 = arith.constant dense<0.000000e+00> : vector<5x64xf32>
    %55 = tpu.matmul %54, %40, %cst_19 {dimension_numbers = #tpu.dot_dimension_numbers<[1], [0], [0], [1], [0, 0, 1, 1], [], []>} : vector<5x5xbf16>, vector<5x64xbf16>, vector<5x64xf32> -> vector<5x64xf32>
    %56 = vector.extract_strided_slice %32 {offsets = [0, 64], sizes = [5, 64], strides = [1, 1]} : vector<5x128xf32> to vector<5x64xf32>
    %57 = arith.truncf %56 : vector<5x64xf32> to vector<5x64xbf16>
    %58 = vector.extract_strided_slice %33 {offsets = [0, 64], sizes = [5, 64], strides = [1, 1]} : vector<5x128xf32> to vector<5x64xf32>
    %59 = arith.truncf %58 : vector<5x64xf32> to vector<5x64xbf16>
    %60 = vector.extract_strided_slice %34 {offsets = [0, 64], sizes = [5, 64], strides = [1, 1]} : vector<5x128xf32> to vector<5x64xf32>
    %61 = arith.truncf %60 : vector<5x64xf32> to vector<5x64xbf16>
    %cst_20 = arith.constant dense<0.000000e+00> : vector<5x5xf32>
    %62 = tpu.matmul %57, %59, %cst_20 {dimension_numbers = #tpu.dot_dimension_numbers<[1], [1], [0], [0], [0, 0, 1, 0], [], []>} : vector<5x64xbf16>, vector<5x64xbf16>, vector<5x5xf32> -> vector<5x5xf32>
    %cst_21 = arith.constant 1.250000e-01 : f32
    %63 = vector.broadcast %cst_21 : f32 to vector<5x5xf32>
    %64 = arith.mulf %62, %63 : vector<5x5xf32>
    %cst_22 = arith.constant dense<0xFF800000> : vector<5xf32>
    %65 = vector.multi_reduction <maximumf>, %64, %cst_22 [1] : vector<5x5xf32> to vector<5xf32>
    %66 = vector.shape_cast %65 : vector<5xf32> to vector<5x1xf32>
    %67 = vector.broadcast %66 : vector<5x1xf32> to vector<5x5xf32>
    %68 = arith.subf %64, %67 : vector<5x5xf32>
    %69 = math.exp %68 : vector<5x5xf32>
    %cst_23 = arith.constant dense<0.000000e+00> : vector<5xf32>
    %70 = vector.multi_reduction <add>, %69, %cst_23 [1] : vector<5x5xf32> to vector<5xf32>
    %71 = vector.shape_cast %70 : vector<5xf32> to vector<5x1xf32>
    %72 = tpu.reciprocal %71 {approx = true} : vector<5x1xf32> -> vector<5x1xf32>
    %73 = vector.broadcast %72 : vector<5x1xf32> to vector<5x5xf32>
    %74 = arith.mulf %69, %73 : vector<5x5xf32>
    %75 = arith.truncf %74 : vector<5x5xf32> to vector<5x5xbf16>
    %cst_24 = arith.constant dense<0.000000e+00> : vector<5x64xf32>
    %76 = tpu.matmul %75, %61, %cst_24 {dimension_numbers = #tpu.dot_dimension_numbers<[1], [0], [0], [1], [0, 0, 1, 1], [], []>} : vector<5x5xbf16>, vector<5x64xbf16>, vector<5x64xf32> -> vector<5x64xf32>
    %77 = tpu.concatenate %55, %76 in 1 : vector<5x64xf32>, vector<5x64xf32> -> vector<5x128xf32>
    %c0_25 = arith.constant 0 : index
    %c0_26 = arith.constant 0 : index
    %78 = vector.load %arg6[%c0_25, %c0_26] : memref<128x128xbf16, #tpu.memory_space<vmem>>, vector<128x128xbf16>
    %c0_27 = arith.constant 0 : index
    %c0_28 = arith.constant 0 : index
    %79 = vector.load %arg7[%c0_27, %c0_28] : memref<1x128xf32, #tpu.memory_space<vmem>>, vector<1x128xf32>
    %80 = arith.truncf %77 : vector<5x128xf32> to vector<5x128xbf16>
    %cst_29 = arith.constant dense<0.000000e+00> : vector<5x128xf32>
    %81 = tpu.matmul %80, %78, %cst_29 {dimension_numbers = #tpu.dot_dimension_numbers<[1], [0], [0], [1], [0, 0, 1, 1], [], []>} : vector<5x128xbf16>, vector<128x128xbf16>, vector<5x128xf32> -> vector<5x128xf32>
    %82 = vector.broadcast %79 : vector<1x128xf32> to vector<5x128xf32>
    %83 = arith.addf %81, %82 : vector<5x128xf32>
    %84 = arith.addf %1, %83 : vector<5x128xf32>
    %c0_30 = arith.constant 0 : index
    %c0_31 = arith.constant 0 : index
    %85 = vector.load %arg8[%c0_30, %c0_31] : memref<1x128xf32, #tpu.memory_space<vmem>>, vector<1x128xf32>
    %c0_32 = arith.constant 0 : index
    %c0_33 = arith.constant 0 : index
    %86 = vector.load %arg9[%c0_32, %c0_33] : memref<1x128xf32, #tpu.memory_space<vmem>>, vector<1x128xf32>
    %cst_34 = arith.constant dense<0.000000e+00> : vector<5xf32>
    %87 = vector.multi_reduction <add>, %84, %cst_34 [1] : vector<5x128xf32> to vector<5xf32>
    %88 = vector.shape_cast %87 : vector<5xf32> to vector<5x1xf32>
    %cst_35 = arith.constant 1.280000e+02 : f32
    %89 = vector.broadcast %cst_35 : f32 to vector<5x1xf32>
    %90 = arith.divf %88, %89 : vector<5x1xf32>
    %91 = vector.broadcast %90 : vector<5x1xf32> to vector<5x128xf32>
    %92 = arith.subf %84, %91 : vector<5x128xf32>
    %93 = arith.mulf %92, %92 : vector<5x128xf32>
    %cst_36 = arith.constant dense<0.000000e+00> : vector<5xf32>
    %94 = vector.multi_reduction <add>, %93, %cst_36 [1] : vector<5x128xf32> to vector<5xf32>
    %95 = vector.shape_cast %94 : vector<5xf32> to vector<5x1xf32>
    %cst_37 = arith.constant 1.280000e+02 : f32
    %96 = vector.broadcast %cst_37 : f32 to vector<5x1xf32>
    %97 = arith.divf %95, %96 : vector<5x1xf32>
    %98 = vector.broadcast %90 : vector<5x1xf32> to vector<5x128xf32>
    %99 = arith.subf %84, %98 : vector<5x128xf32>
    %cst_38 = arith.constant 9.99999997E-7 : f32
    %100 = vector.broadcast %cst_38 : f32 to vector<5x1xf32>
    %101 = arith.addf %97, %100 : vector<5x1xf32>
    %102 = math.rsqrt %101 : vector<5x1xf32>
    %103 = vector.broadcast %102 : vector<5x1xf32> to vector<5x128xf32>
    %104 = arith.mulf %99, %103 : vector<5x128xf32>
    %105 = vector.broadcast %85 : vector<1x128xf32> to vector<5x128xf32>
    %106 = arith.mulf %104, %105 : vector<5x128xf32>
    %107 = vector.broadcast %86 : vector<1x128xf32> to vector<5x128xf32>
    %108 = arith.addf %106, %107 : vector<5x128xf32>
    %c0_39 = arith.constant 0 : index
    %c0_40 = arith.constant 0 : index
    %109 = vector.load %arg10[%c0_39, %c0_40] : memref<128x512xbf16, #tpu.memory_space<vmem>>, vector<128x512xbf16>
    %c0_41 = arith.constant 0 : index
    %c0_42 = arith.constant 0 : index
    %110 = vector.load %arg11[%c0_41, %c0_42] : memref<1x512xf32, #tpu.memory_space<vmem>>, vector<1x512xf32>
    %111 = arith.truncf %108 : vector<5x128xf32> to vector<5x128xbf16>
    %cst_43 = arith.constant dense<0.000000e+00> : vector<5x512xf32>
    %112 = tpu.matmul %111, %109, %cst_43 {dimension_numbers = #tpu.dot_dimension_numbers<[1], [0], [0], [1], [0, 0, 1, 1], [], []>} : vector<5x128xbf16>, vector<128x512xbf16>, vector<5x512xf32> -> vector<5x512xf32>
    %113 = vector.broadcast %110 : vector<1x512xf32> to vector<5x512xf32>
    %114 = arith.addf %112, %113 : vector<5x512xf32>
    %115 = arith.mulf %114, %114 : vector<5x512xf32>
    %116 = arith.mulf %114, %115 : vector<5x512xf32>
    %cst_44 = arith.constant 4.471500e-02 : f32
    %117 = vector.broadcast %cst_44 : f32 to vector<5x512xf32>
    %118 = arith.mulf %117, %116 : vector<5x512xf32>
    %119 = arith.addf %114, %118 : vector<5x512xf32>
    %cst_45 = arith.constant 0.797884583 : f32
    %120 = vector.broadcast %cst_45 : f32 to vector<5x512xf32>
    %121 = arith.mulf %120, %119 : vector<5x512xf32>
    %122 = math.tanh %121 : vector<5x512xf32>
    %cst_46 = arith.constant 1.000000e+00 : f32
    %123 = vector.broadcast %cst_46 : f32 to vector<5x512xf32>
    %124 = arith.addf %123, %122 : vector<5x512xf32>
    %cst_47 = arith.constant 5.000000e-01 : f32
    %125 = vector.broadcast %cst_47 : f32 to vector<5x512xf32>
    %126 = arith.mulf %125, %124 : vector<5x512xf32>
    %127 = arith.mulf %114, %126 : vector<5x512xf32>
    %c0_48 = arith.constant 0 : index
    %c0_49 = arith.constant 0 : index
    %128 = vector.load %arg12[%c0_48, %c0_49] : memref<512x128xbf16, #tpu.memory_space<vmem>>, vector<512x128xbf16>
    %c0_50 = arith.constant 0 : index
    %c0_51 = arith.constant 0 : index
    %129 = vector.load %arg13[%c0_50, %c0_51] : memref<1x128xf32, #tpu.memory_space<vmem>>, vector<1x128xf32>
    %130 = arith.truncf %127 : vector<5x512xf32> to vector<5x512xbf16>
    %cst_52 = arith.constant dense<0.000000e+00> : vector<5x128xf32>
    %131 = tpu.matmul %130, %128, %cst_52 {dimension_numbers = #tpu.dot_dimension_numbers<[1], [0], [0], [1], [0, 0, 1, 1], [], []>} : vector<5x512xbf16>, vector<512x128xbf16>, vector<5x128xf32> -> vector<5x128xf32>
    %132 = vector.broadcast %129 : vector<1x128xf32> to vector<5x128xf32>
    %133 = arith.addf %131, %132 : vector<5x128xf32>
    %134 = arith.addf %84, %133 : vector<5x128xf32>
    %c0_53 = arith.constant 0 : index
    %c0_54 = arith.constant 0 : index
    %c0_55 = arith.constant 0 : index
    %135 = vector.load %arg14[%c0_53, %c0_54, %c0_55] : memref<1x5x128xf32, #tpu.memory_space<vmem>>, vector<1x5x128xf32>
    %136 = vector.shape_cast %135 : vector<1x5x128xf32> to vector<5x128xf32>
    %137 = vector.shape_cast %134 : vector<5x128xf32> to vector<1x5x128xf32>
    tpu.vector_store %arg14[%c0_53, %c0_54, %c0_55], %137 {strides = array<i32>} : memref<1x5x128xf32, #tpu.memory_space<vmem>>, vector<1x5x128xf32>,
    return
  }
  func.func @transform_0(%arg0: i32) -> (i32, i32, i32) {
    %c0_i32 = arith.constant 0 : i32
    %c0_i32_0 = arith.constant 0 : i32
    %c0_i32_1 = arith.constant 0 : i32
    return %arg0, %c0_i32, %c0_i32_0 : i32, i32, i32
  }
  func.func @transform_1(%arg0: i32) -> (i32, i32) {
    %c0_i32 = arith.constant 0 : i32
    %c0_i32_0 = arith.constant 0 : i32
    %c0_i32_1 = arith.constant 0 : i32
    return %c0_i32, %c0_i32_0 : i32, i32
  }
  func.func @transform_2(%arg0: i32) -> (i32, i32) {
    %c0_i32 = arith.constant 0 : i32
    %c0_i32_0 = arith.constant 0 : i32
    %c0_i32_1 = arith.constant 0 : i32
    return %c0_i32, %c0_i32_0 : i32, i32
  }
  func.func @transform_3(%arg0: i32) -> (i32, i32) {
    %c0_i32 = arith.constant 0 : i32
    %c0_i32_0 = arith.constant 0 : i32
    %c0_i32_1 = arith.constant 0 : i32
    return %c0_i32, %c0_i32_0 : i32, i32
  }
  func.func @transform_4(%arg0: i32) -> (i32, i32) {
    %c0_i32 = arith.constant 0 : i32
    %c0_i32_0 = arith.constant 0 : i32
    %c0_i32_1 = arith.constant 0 : i32
    return %c0_i32, %c0_i32_0 : i32, i32
  }
  func.func @transform_5(%arg0: i32) -> (i32, i32) {
    %c0_i32 = arith.constant 0 : i32
    %c0_i32_0 = arith.constant 0 : i32
    %c0_i32_1 = arith.constant 0 : i32
    return %c0_i32, %c0_i32_0 : i32, i32
  }
  func.func @transform_6(%arg0: i32) -> (i32, i32) {
    %c0_i32 = arith.constant 0 : i32
    %c0_i32_0 = arith.constant 0 : i32
    %c0_i32_1 = arith.constant 0 : i32
    return %c0_i32, %c0_i32_0 : i32, i32
  }
  func.func @transform_7(%arg0: i32) -> (i32, i32) {
    %c0_i32 = arith.constant 0 : i32
    %c0_i32_0 = arith.constant 0 : i32
    %c0_i32_1 = arith.constant 0 : i32
    return %c0_i32, %c0_i32_0 : i32, i32
  }
  func.func @transform_8(%arg0: i32) -> (i32, i32) {
    %c0_i32 = arith.constant 0 : i32
    %c0_i32_0 = arith.constant 0 : i32
    %c0_i32_1 = arith.constant 0 : i32
    return %c0_i32, %c0_i32_0 : i32, i32
  }
  func.func @transform_9(%arg0: i32) -> (i32, i32) {
    %c0_i32 = arith.constant 0 : i32
    %c0_i32_0 = arith.constant 0 : i32
    %c0_i32_1 = arith.constant 0 : i32
    return %c0_i32, %c0_i32_0 : i32, i32
  }
  func.func @transform_10(%arg0: i32) -> (i32, i32) {
    %c0_i32 = arith.constant 0 : i32
    %c0_i32_0 = arith.constant 0 : i32
    %c0_i32_1 = arith.constant 0 : i32
    return %c0_i32, %c0_i32_0 : i32, i32
  }
  func.func @transform_11(%arg0: i32) -> (i32, i32) {
    %c0_i32 = arith.constant 0 : i32
    %c0_i32_0 = arith.constant 0 : i32
    %c0_i32_1 = arith.constant 0 : i32
    return %c0_i32, %c0_i32_0 : i32, i32
  }
  func.func @transform_12(%arg0: i32) -> (i32, i32) {
    %c0_i32 = arith.constant 0 : i32
    %c0_i32_0 = arith.constant 0 : i32
    %c0_i32_1 = arith.constant 0 : i32
    return %c0_i32, %c0_i32_0 : i32, i32
  }
  func.func @transform_13(%arg0: i32) -> (i32, i32, i32) {
    %c0_i32 = arith.constant 0 : i32
    %c0_i32_0 = arith.constant 0 : i32
    %c0_i32_1 = arith.constant 0 : i32
    return %arg0, %c0_i32, %c0_i32_0 : i32, i32, i32
  }
}

module attributes {stable_mosaic.version = 11 : i64} {
  func.func @_vit_block_kernel(%arg0: i32, %arg1: memref<1x5x128xf32, #tpu.memory_space<vmem>>, %arg2: memref<1x128xf32, #tpu.memory_space<vmem>>, %arg3: memref<1x128xf32, #tpu.memory_space<vmem>>, %arg4: memref<128x384xbf16, #tpu.memory_space<vmem>>, %arg5: memref<1x384xf32, #tpu.memory_space<vmem>>, %arg6: memref<128x128xbf16, #tpu.memory_space<vmem>>, %arg7: memref<1x128xf32, #tpu.memory_space<vmem>>, %arg8: memref<1x128xf32, #tpu.memory_space<vmem>>, %arg9: memref<1x128xf32, #tpu.memory_space<vmem>>, %arg10: memref<128x512xbf16, #tpu.memory_space<vmem>>, %arg11: memref<1x512xf32, #tpu.memory_space<vmem>>, %arg12: memref<512x128xbf16, #tpu.memory_space<vmem>>, %arg13: memref<1x128xf32, #tpu.memory_space<vmem>>, %arg14: memref<1x5x128xf32, #tpu.memory_space<vmem>>) attributes {dimension_semantics = [#tpu.dimension_semantics<parallel>], iteration_bounds = array<i64: 2>, scalar_prefetch = 0 : i64, scratch_operands = 0 : i64, tpu.core_type = #tpu.core_type<tc>, window_params = [{transform_indices = @transform_0, window_bounds = array<i64: 1, 5, 128>}, {pipeline_mode = #tpu.pipeline_mode<synchronous>, transform_indices = @transform_1, window_bounds = array<i64: 1, 128>}, {pipeline_mode = #tpu.pipeline_mode<synchronous>, transform_indices = @transform_2, window_bounds = array<i64: 1, 128>}, {pipeline_mode = #tpu.pipeline_mode<synchronous>, transform_indices = @transform_3, window_bounds = array<i64: 128, 384>}, {pipeline_mode = #tpu.pipeline_mode<synchronous>, transform_indices = @transform_4, window_bounds = array<i64: 1, 384>}, {pipeline_mode = #tpu.pipeline_mode<synchronous>, transform_indices = @transform_5, window_bounds = array<i64: 128, 128>}, {pipeline_mode = #tpu.pipeline_mode<synchronous>, transform_indices = @transform_6, window_bounds = array<i64: 1, 128>}, {pipeline_mode = #tpu.pipeline_mode<synchronous>, transform_indices = @transform_7, window_bounds = array<i64: 1, 128>}, {pipeline_mode = #tpu.pipeline_mode<synchronous>, transform_indices = @transform_8, window_bounds = array<i64: 1, 128>}, {pipeline_mode = #tpu.pipeline_mode<synchronous>, transform_indices = @transform_9, window_bounds = array<i64: 128, 512>}, {pipeline_mode = #tpu.pipeline_mode<synchronous>, transform_indices = @transform_10, window_bounds = array<i64: 1, 512>}, {pipeline_mode = #tpu.pipeline_mode<synchronous>, transform_indices = @transform_11, window_bounds = array<i64: 512, 128>}, {pipeline_mode = #tpu.pipeline_mode<synchronous>, transform_indices = @transform_12, window_bounds = array<i64: 1, 128>}, {transform_indices = @transform_13, window_bounds = array<i64: 1, 5, 128>}]} {
    %c0 = arith.constant 0 : index
    %c0_0 = arith.constant 0 : index
    %c0_1 = arith.constant 0 : index
    %0 = vector.load %arg1[%c0, %c0_0, %c0_1] : memref<1x5x128xf32, #tpu.memory_space<vmem>>, vector<1x5x128xf32>
    %1 = vector.shape_cast %0 : vector<1x5x128xf32> to vector<5x128xf32>
    %c0_2 = arith.constant 0 : index
    %c0_3 = arith.constant 0 : index
    %2 = vector.load %arg2[%c0_2, %c0_3] : memref<1x128xf32, #tpu.memory_space<vmem>>, vector<1x128xf32>
    %c0_4 = arith.constant 0 : index
    %c0_5 = arith.constant 0 : index
    %3 = vector.load %arg3[%c0_4, %c0_5] : memref<1x128xf32, #tpu.memory_space<vmem>>, vector<1x128xf32>
    %cst = arith.constant dense<0.000000e+00> : vector<5xf32>
    %4 = vector.multi_reduction <add>, %1, %cst [1] : vector<5x128xf32> to vector<5xf32>
    %5 = vector.shape_cast %4 : vector<5xf32> to vector<5x1xf32>
    %cst_6 = arith.constant 1.280000e+02 : f32
    %6 = vector.broadcast %cst_6 : f32 to vector<5x1xf32>
    %7 = arith.divf %5, %6 : vector<5x1xf32>
    %8 = vector.broadcast %7 : vector<5x1xf32> to vector<5x128xf32>
    %9 = arith.subf %1, %8 : vector<5x128xf32>
    %10 = arith.mulf %9, %9 : vector<5x128xf32>
    %cst_7 = arith.constant dense<0.000000e+00> : vector<5xf32>
    %11 = vector.multi_reduction <add>, %10, %cst_7 [1] : vector<5x128xf32> to vector<5xf32>
    %12 = vector.shape_cast %11 : vector<5xf32> to vector<5x1xf32>
    %cst_8 = arith.constant 1.280000e+02 : f32
    %13 = vector.broadcast %cst_8 : f32 to vector<5x1xf32>
    %14 = arith.divf %12, %13 : vector<5x1xf32>
    %15 = vector.broadcast %7 : vector<5x1xf32> to vector<5x128xf32>
    %16 = arith.subf %1, %15 : vector<5x128xf32>
    %cst_9 = arith.constant 9.99999997E-7 : f32
    %17 = vector.broadcast %cst_9 : f32 to vector<5x1xf32>
    %18 = arith.addf %14, %17 : vector<5x1xf32>
    %19 = math.rsqrt %18 : vector<5x1xf32>
    %20 = vector.broadcast %19 : vector<5x1xf32> to vector<5x128xf32>
    %21 = arith.mulf %16, %20 : vector<5x128xf32>
    %22 = vector.broadcast %2 : vector<1x128xf32> to vector<5x128xf32>
    %23 = arith.mulf %21, %22 : vector<5x128xf32>
    %24 = vector.broadcast %3 : vector<1x128xf32> to vector<5x128xf32>
    %25 = arith.addf %23, %24 : vector<5x128xf32>
    %c0_10 = arith.constant 0 : index
    %c0_11 = arith.constant 0 : index
    %26 = vector.load %arg4[%c0_10, %c0_11] : memref<128x384xbf16, #tpu.memory_space<vmem>>, vector<128x384xbf16>
    %c0_12 = arith.constant 0 : index
    %c0_13 = arith.constant 0 : index
    %27 = vector.load %arg5[%c0_12, %c0_13] : memref<1x384xf32, #tpu.memory_space<vmem>>, vector<1x384xf32>
    %28 = arith.truncf %25 : vector<5x128xf32> to vector<5x128xbf16>
    %cst_14 = arith.constant dense<0.000000e+00> : vector<5x384xf32>
    %29 = tpu.matmul %28, %26, %cst_14 {dimension_numbers = #tpu.dot_dimension_numbers<[1], [0], [0], [1], [0, 0, 1, 1], [], []>} : vector<5x128xbf16>, vector<128x384xbf16>, vector<5x384xf32> -> vector<5x384xf32>
    %30 = vector.broadcast %27 : vector<1x384xf32> to vector<5x384xf32>
    %31 = arith.addf %29, %30 : vector<5x384xf32>
    %32 = vector.extract_strided_slice %31 {offsets = [0, 0], sizes = [5, 128], strides = [1, 1]} : vector<5x384xf32> to vector<5x128xf32>
    %33 = vector.extract_strided_slice %31 {offsets = [0, 128], sizes = [5, 128], strides = [1, 1]} : vector<5x384xf32> to vector<5x128xf32>
    %34 = vector.extract_strided_slice %31 {offsets = [0, 256], sizes = [5, 128], strides = [1, 1]} : vector<5x384xf32> to vector<5x128xf32>
    %35 = vector.extract_strided_slice %32 {offsets = [0, 0], sizes = [5, 64], strides = [1, 1]} : vector<5x128xf32> to vector<5x64xf32>
    %36 = arith.truncf %35 : vector<5x64xf32> to vector<5x64xbf16>
    %37 = vector.extract_strided_slice %33 {offsets = [0, 0], sizes = [5, 64], strides = [1, 1]} : vector<5x128xf32> to vector<5x64xf32>
    %38 = arith.truncf %37 : vector<5x64xf32> to vector<5x64xbf16>
    %39 = vector.extract_strided_slice %34 {offsets = [0, 0], sizes = [5, 64], strides = [1, 1]} : vector<5x128xf32> to vector<5x64xf32>
    %40 = arith.truncf %39 : vector<5x64xf32> to vector<5x64xbf16>
    %cst_15 = arith.constant dense<0.000000e+00> : vector<5x5xf32>
    %41 = tpu.matmul %36, %38, %cst_15 {dimension_numbers = #tpu.dot_dimension_numbers<[1], [1], [0], [0], [0, 0, 1, 0], [], []>} : vector<5x64xbf16>, vector<5x64xbf16>, vector<5x5xf32> -> vector<5x5xf32>
    %cst_16 = arith.constant 1.250000e-01 : f32
    %42 = vector.broadcast %cst_16 : f32 to vector<5x5xf32>
    %43 = arith.mulf %41, %42 : vector<5x5xf32>
    %cst_17 = arith.constant dense<0xFF800000> : vector<5xf32>
    %44 = vector.multi_reduction <maximumf>, %43, %cst_17 [1] : vector<5x5xf32> to vector<5xf32>
    %45 = vector.shape_cast %44 : vector<5xf32> to vector<5x1xf32>
    %46 = vector.broadcast %45 : vector<5x1xf32> to vector<5x5xf32>
    %47 = arith.subf %43, %46 : vector<5x5xf32>
    %48 = math.exp %47 : vector<5x5xf32>
    %cst_18 = arith.constant dense<0.000000e+00> : vector<5xf32>
    %49 = vector.multi_reduction <add>, %48, %cst_18 [1] : vector<5x5xf32> to vector<5xf32>
    %50 = vector.shape_cast %49 : vector<5xf32> to vector<5x1xf32>
    %51 = tpu.reciprocal %50 {approx = true} : vector<5x1xf32> -> vector<5x1xf32>
    %52 = vector.broadcast %51 : vector<5x1xf32> to vector<5x5xf32>
    %53 = arith.mulf %48, %52 : vector<5x5xf32>
    %54 = arith.truncf %53 : vector<5x5xf32> to vector<5x5xbf16>
    %cst_19 = arith.constant dense<0.000000e+00> : vector<5x64xf32>
    %55 = tpu.matmul %54, %40, %cst_19 {dimension_numbers = #tpu.dot_dimension_numbers<[1], [0], [0], [1], [0, 0, 1, 1], [], []>} : vector<5x5xbf16>, vector<5x64xbf16>, vector<5x64xf32> -> vector<5x64xf32>
    %56 = vector.extract_strided_slice %32 {offsets = [0, 64], sizes = [5, 64], strides = [1, 1]} : vector<5x128xf32> to vector<5x64xf32>
    %57 = arith.truncf %56 : vector<5x64xf32> to vector<5x64xbf16>
    %58 = vector.extract_strided_slice %33 {offsets = [0, 64], sizes = [5, 64], strides = [1, 1]} : vector<5x128xf32> to vector<5x64xf32>
    %59 = arith.truncf %58 : vector<5x64xf32> to vector<5x64xbf16>
    %60 = vector.extract_strided_slice %34 {offsets = [0, 64], sizes = [5, 64], strides = [1, 1]} : vector<5x128xf32> to vector<5x64xf32>
    %61 = arith.truncf %60 : vector<5x64xf32> to vector<5x64xbf16>
    %cst_20 = arith.constant dense<0.000000e+00> : vector<5x5xf32>
    %62 = tpu.matmul %57, %59, %cst_20 {dimension_numbers = #tpu.dot_dimension_numbers<[1], [1], [0], [0], [0, 0, 1, 0], [], []>} : vector<5x64xbf16>, vector<5x64xbf16>, vector<5x5xf32> -> vector<5x5xf32>
    %cst_21 = arith.constant 1.250000e-01 : f32
    %63 = vector.broadcast %cst_21 : f32 to vector<5x5xf32>
    %64 = arith.mulf %62, %63 : vector<5x5xf32>
    %cst_22 = arith.constant dense<0xFF800000> : vector<5xf32>
    %65 = vector.multi_reduction <maximumf>, %64, %cst_22 [1] : vector<5x5xf32> to vector<5xf32>
    %66 = vector.shape_cast %65 : vector<5xf32> to vector<5x1xf32>
    %67 = vector.broadcast %66 : vector<5x1xf32> to vector<5x5xf32>
    %68 = arith.subf %64, %67 : vector<5x5xf32>
    %69 = math.exp %68 : vector<5x5xf32>
    %cst_23 = arith.constant dense<0.000000e+00> : vector<5xf32>
    %70 = vector.multi_reduction <add>, %69, %cst_23 [1] : vector<5x5xf32> to vector<5xf32>
    %71 = vector.shape_cast %70 : vector<5xf32> to vector<5x1xf32>
    %72 = tpu.reciprocal %71 {approx = true} : vector<5x1xf32> -> vector<5x1xf32>
    %73 = vector.broadcast %72 : vector<5x1xf32> to vector<5x5xf32>
    %74 = arith.mulf %69, %73 : vector<5x5xf32>
    %75 = arith.truncf %74 : vector<5x5xf32> to vector<5x5xbf16>
    %cst_24 = arith.constant dense<0.000000e+00> : vector<5x64xf32>
    %76 = tpu.matmul %75, %61, %cst_24 {dimension_numbers = #tpu.dot_dimension_numbers<[1], [0], [0], [1], [0, 0, 1, 1], [], []>} : vector<5x5xbf16>, vector<5x64xbf16>, vector<5x64xf32> -> vector<5x64xf32>
    %77 = tpu.concatenate %55, %76 in 1 : vector<5x64xf32>, vector<5x64xf32> -> vector<5x128xf32>
    %c0_25 = arith.constant 0 : index
    %c0_26 = arith.constant 0 : index
    %78 = vector.load %arg6[%c0_25, %c0_26] : memref<128x128xbf16, #tpu.memory_space<vmem>>, vector<128x128xbf16>
    %c0_27 = arith.constant 0 : index
    %c0_28 = arith.constant 0 : index
    %79 = vector.load %arg7[%c0_27, %c0_28] : memref<1x128xf32, #tpu.memory_space<vmem>>, vector<1x128xf32>
    %80 = arith.truncf %77 : vector<5x128xf32> to vector<5x128xbf16>
    %cst_29 = arith.constant dense<0.000000e+00> : vector<5x128xf32>
    %81 = tpu.matmul %80, %78, %cst_29 {dimension_numbers = #tpu.dot_dimension_numbers<[1], [0], [0], [1], [0, 0, 1, 1], [], []>} : vector<5x128xbf16>, vector<128x128xbf16>, vector<5x128xf32> -> vector<5x128xf32>
    %82 = vector.broadcast %79 : vector<1x128xf32> to vector<5x128xf32>
    %83 = arith.addf %81, %82 : vector<5x128xf32>
    %84 = arith.addf %1, %83 : vector<5x128xf32>
    %c0_30 = arith.constant 0 : index
    %c0_31 = arith.constant 0 : index
    %85 = vector.load %arg8[%c0_30, %c0_31] : memref<1x128xf32, #tpu.memory_space<vmem>>, vector<1x128xf32>
    %c0_32 = arith.constant 0 : index
    %c0_33 = arith.constant 0 : index
    %86 = vector.load %arg9[%c0_32, %c0_33] : memref<1x128xf32, #tpu.memory_space<vmem>>, vector<1x128xf32>
    %cst_34 = arith.constant dense<0.000000e+00> : vector<5xf32>
    %87 = vector.multi_reduction <add>, %84, %cst_34 [1] : vector<5x128xf32> to vector<5xf32>
    %88 = vector.shape_cast %87 : vector<5xf32> to vector<5x1xf32>
    %cst_35 = arith.constant 1.280000e+02 : f32
    %89 = vector.broadcast %cst_35 : f32 to vector<5x1xf32>
    %90 = arith.divf %88, %89 : vector<5x1xf32>
    %91 = vector.broadcast %90 : vector<5x1xf32> to vector<5x128xf32>
    %92 = arith.subf %84, %91 : vector<5x128xf32>
    %93 = arith.mulf %92, %92 : vector<5x128xf32>
    %cst_36 = arith.constant dense<0.000000e+00> : vector<5xf32>
    %94 = vector.multi_reduction <add>, %93, %cst_36 [1] : vector<5x128xf32> to vector<5xf32>
    %95 = vector.shape_cast %94 : vector<5xf32> to vector<5x1xf32>
    %cst_37 = arith.constant 1.280000e+02 : f32
    %96 = vector.broadcast %cst_37 : f32 to vector<5x1xf32>
    %97 = arith.divf %95, %96 : vector<5x1xf32>
    %98 = vector.broadcast %90 : vector<5x1xf32> to vector<5x128xf32>
    %99 = arith.subf %84, %98 : vector<5x128xf32>
    %cst_38 = arith.constant 9.99999997E-7 : f32
    %100 = vector.broadcast %cst_38 : f32 to vector<5x1xf32>
    %101 = arith.addf %97, %100 : vector<5x1xf32>
    %102 = math.rsqrt %101 : vector<5x1xf32>
    %103 = vector.broadcast %102 : vector<5x1xf32> to vector<5x128xf32>
    %104 = arith.mulf %99, %103 : vector<5x128xf32>
    %105 = vector.broadcast %85 : vector<1x128xf32> to vector<5x128xf32>
    %106 = arith.mulf %104, %105 : vector<5x128xf32>
    %107 = vector.broadcast %86 : vector<1x128xf32> to vector<5x128xf32>
    %108 = arith.addf %106, %107 : vector<5x128xf32>
    %c0_39 = arith.constant 0 : index
    %c0_40 = arith.constant 0 : index
    %109 = vector.load %arg10[%c0_39, %c0_40] : memref<128x512xbf16, #tpu.memory_space<vmem>>, vector<128x512xbf16>
    %c0_41 = arith.constant 0 : index
    %c0_42 = arith.constant 0 : index
    %110 = vector.load %arg11[%c0_41, %c0_42] : memref<1x512xf32, #tpu.memory_space<vmem>>, vector<1x512xf32>
    %111 = arith.truncf %108 : vector<5x128xf32> to vector<5x128xbf16>
    %cst_43 = arith.constant dense<0.000000e+00> : vector<5x512xf32>
    %112 = tpu.matmul %111, %109, %cst_43 {dimension_numbers = #tpu.dot_dimension_numbers<[1], [0], [0], [1], [0, 0, 1, 1], [], []>} : vector<5x128xbf16>, vector<128x512xbf16>, vector<5x512xf32> -> vector<5x512xf32>
    %113 = vector.broadcast %110 : vector<1x512xf32> to vector<5x512xf32>
    %114 = arith.addf %112, %113 : vector<5x512xf32>
    %115 = arith.mulf %114, %114 : vector<5x512xf32>
    %116 = arith.mulf %114, %115 : vector<5x512xf32>
    %cst_44 = arith.constant 4.471500e-02 : f32
    %117 = vector.broadcast %cst_44 : f32 to vector<5x512xf32>
    %118 = arith.mulf %117, %116 : vector<5x512xf32>
    %119 = arith.addf %114, %118 : vector<5x512xf32>
    %cst_45 = arith.constant 0.797884583 : f32
    %120 = vector.broadcast %cst_45 : f32 to vector<5x512xf32>
    %121 = arith.mulf %120, %119 : vector<5x512xf32>
    %122 = math.tanh %121 : vector<5x512xf32>
    %cst_46 = arith.constant 1.000000e+00 : f32
    %123 = vector.broadcast %cst_46 : f32 to vector<5x512xf32>
    %124 = arith.addf %123, %122 : vector<5x512xf32>
    %cst_47 = arith.constant 5.000000e-01 : f32
    %125 = vector.broadcast %cst_47 : f32 to vector<5x512xf32>
    %126 = arith.mulf %125, %124 : vector<5x512xf32>
    %127 = arith.mulf %114, %126 : vector<5x512xf32>
    %c0_48 = arith.constant 0 : index
    %c0_49 = arith.constant 0 : index
    %128 = vector.load %arg12[%c0_48, %c0_49] : memref<512x128xbf16, #tpu.memory_space<vmem>>, vector<512x128xbf16>
    %c0_50 = arith.constant 0 : index
    %c0_51 = arith.constant 0 : index
    %129 = vector.load %arg13[%c0_50, %c0_51] : memref<1x128xf32, #tpu.memory_space<vmem>>, vector<1x128xf32>
    %130 = arith.truncf %127 : vector<5x512xf32> to vector<5x512xbf16>
    %cst_52 = arith.constant dense<0.000000e+00> : vector<5x128xf32>
    %131 = tpu.matmul %130, %128, %cst_52 {dimension_numbers = #tpu.dot_dimension_numbers<[1], [0], [0], [1], [0, 0, 1, 1], [], []>} : vector<5x512xbf16>, vector<512x128xbf16>, vector<5x128xf32> -> vector<5x128xf32>
    %132 = vector.broadcast %129 : vector<1x128xf32> to vector<5x128xf32>
    %133 = arith.addf %131, %132 : vector<5x128xf32>
    %134 = arith.addf %84, %133 : vector<5x128xf32>
    %c0_53 = arith.constant 0 : index
    %c0_54 = arith.constant 0 : index
    %c0_55 = arith.constant 0 : index
    %135 = vector.load %arg14[%c0_53, %c0_54, %c0_55] : memref<1x5x128xf32, #tpu.memory_space<vmem>>, vector<1x5x128xf32>
    %136 = vector.shape_cast %135 : vector<1x5x128xf32> to vector<5x128xf32>
    %137 = vector.shape_cast %134 : vector<5x128xf32> to vector<1x5x128xf32>
    tpu.vector_store %arg14[%c0_53, %c0_54, %c0_55], %137 {strides = array<i32>} : memref<1x5x128xf32, #tpu.memory_space<vmem>>, vector<1x5x128xf32>,
    return
  }
  func.func @transform_0(%arg0: i32) -> (i32, i32, i32) {
    %c0_i32 = arith.constant 0 : i32
    %c0_i32_0 = arith.constant 0 : i32
    %c0_i32_1 = arith.constant 0 : i32
    return %arg0, %c0_i32, %c0_i32_0 : i32, i32, i32
  }
  func.func @transform_1(%arg0: i32) -> (i32, i32) {
    %c0_i32 = arith.constant 0 : i32
    %c0_i32_0 = arith.constant 0 : i32
    %c0_i32_1 = arith.constant 0 : i32
    return %c0_i32, %c0_i32_0 : i32, i32
  }
  func.func @transform_2(%arg0: i32) -> (i32, i32) {
    %c0_i32 = arith.constant 0 : i32
    %c0_i32_0 = arith.constant 0 : i32
    %c0_i32_1 = arith.constant 0 : i32
    return %c0_i32, %c0_i32_0 : i32, i32
  }
  func.func @transform_3(%arg0: i32) -> (i32, i32) {
    %c0_i32 = arith.constant 0 : i32
    %c0_i32_0 = arith.constant 0 : i32
    %c0_i32_1 = arith.constant 0 : i32
    return %c0_i32, %c0_i32_0 : i32, i32
  }
  func.func @transform_4(%arg0: i32) -> (i32, i32) {
    %c0_i32 = arith.constant 0 : i32
    %c0_i32_0 = arith.constant 0 : i32
    %c0_i32_1 = arith.constant 0 : i32
    return %c0_i32, %c0_i32_0 : i32, i32
  }
  func.func @transform_5(%arg0: i32) -> (i32, i32) {
    %c0_i32 = arith.constant 0 : i32
    %c0_i32_0 = arith.constant 0 : i32
    %c0_i32_1 = arith.constant 0 : i32
    return %c0_i32, %c0_i32_0 : i32, i32
  }
  func.func @transform_6(%arg0: i32) -> (i32, i32) {
    %c0_i32 = arith.constant 0 : i32
    %c0_i32_0 = arith.constant 0 : i32
    %c0_i32_1 = arith.constant 0 : i32
    return %c0_i32, %c0_i32_0 : i32, i32
  }
  func.func @transform_7(%arg0: i32) -> (i32, i32) {
    %c0_i32 = arith.constant 0 : i32
    %c0_i32_0 = arith.constant 0 : i32
    %c0_i32_1 = arith.constant 0 : i32
    return %c0_i32, %c0_i32_0 : i32, i32
  }
  func.func @transform_8(%arg0: i32) -> (i32, i32) {
    %c0_i32 = arith.constant 0 : i32
    %c0_i32_0 = arith.constant 0 : i32
    %c0_i32_1 = arith.constant 0 : i32
    return %c0_i32, %c0_i32_0 : i32, i32
  }
  func.func @transform_9(%arg0: i32) -> (i32, i32) {
    %c0_i32 = arith.constant 0 : i32
    %c0_i32_0 = arith.constant 0 : i32
    %c0_i32_1 = arith.constant 0 : i32
    return %c0_i32, %c0_i32_0 : i32, i32
  }
  func.func @transform_10(%arg0: i32) -> (i32, i32) {
    %c0_i32 = arith.constant 0 : i32
    %c0_i32_0 = arith.constant 0 : i32
    %c0_i32_1 = arith.constant 0 : i32
    return %c0_i32, %c0_i32_0 : i32, i32
  }
  func.func @transform_11(%arg0: i32) -> (i32, i32) {
    %c0_i32 = arith.constant 0 : i32
    %c0_i32_0 = arith.constant 0 : i32
    %c0_i32_1 = arith.constant 0 : i32
    return %c0_i32, %c0_i32_0 : i32, i32
  }
  func.func @transform_12(%arg0: i32) -> (i32, i32) {
    %c0_i32 = arith.constant 0 : i32
    %c0_i32_0 = arith.constant 0 : i32
    %c0_i32_1 = arith.constant 0 : i32
    return %c0_i32, %c0_i32_0 : i32, i32
  }
  func.func @transform_13(%arg0: i32) -> (i32, i32, i32) {
    %c0_i32 = arith.constant 0 : i32
    %c0_i32_0 = arith.constant 0 : i32
    %c0_i32_1 = arith.constant 0 : i32
    return %arg0, %c0_i32, %c0_i32_0 : i32, i32, i32
  }
}

module attributes {stable_mosaic.version = 11 : i64} {
  func.func @_layernorm_kernel(%arg0: memref<10x128xf32, #tpu.memory_space<vmem>>, %arg1: memref<1x128xf32, #tpu.memory_space<vmem>>, %arg2: memref<1x128xf32, #tpu.memory_space<vmem>>, %arg3: memref<10x128xf32, #tpu.memory_space<vmem>>) attributes {dimension_semantics = [], scalar_prefetch = 0 : i64, scratch_operands = 0 : i64, tpu.core_type = #tpu.core_type<tc>} {
    %c0 = arith.constant 0 : index
    %c0_0 = arith.constant 0 : index
    %0 = vector.load %arg0[%c0, %c0_0] : memref<10x128xf32, #tpu.memory_space<vmem>>, vector<10x128xf32>
    %c0_1 = arith.constant 0 : index
    %c0_2 = arith.constant 0 : index
    %1 = vector.load %arg1[%c0_1, %c0_2] : memref<1x128xf32, #tpu.memory_space<vmem>>, vector<1x128xf32>
    %c0_3 = arith.constant 0 : index
    %c0_4 = arith.constant 0 : index
    %2 = vector.load %arg2[%c0_3, %c0_4] : memref<1x128xf32, #tpu.memory_space<vmem>>, vector<1x128xf32>
    %cst = arith.constant dense<0.000000e+00> : vector<10xf32>
    %3 = vector.multi_reduction <add>, %0, %cst [1] : vector<10x128xf32> to vector<10xf32>
    %4 = vector.shape_cast %3 : vector<10xf32> to vector<10x1xf32>
    %cst_5 = arith.constant 1.280000e+02 : f32
    %5 = vector.broadcast %cst_5 : f32 to vector<10x1xf32>
    %6 = arith.divf %4, %5 : vector<10x1xf32>
    %7 = vector.broadcast %6 : vector<10x1xf32> to vector<10x128xf32>
    %8 = arith.subf %0, %7 : vector<10x128xf32>
    %9 = arith.mulf %8, %8 : vector<10x128xf32>
    %cst_6 = arith.constant dense<0.000000e+00> : vector<10xf32>
    %10 = vector.multi_reduction <add>, %9, %cst_6 [1] : vector<10x128xf32> to vector<10xf32>
    %11 = vector.shape_cast %10 : vector<10xf32> to vector<10x1xf32>
    %cst_7 = arith.constant 1.280000e+02 : f32
    %12 = vector.broadcast %cst_7 : f32 to vector<10x1xf32>
    %13 = arith.divf %11, %12 : vector<10x1xf32>
    %14 = vector.broadcast %6 : vector<10x1xf32> to vector<10x128xf32>
    %15 = arith.subf %0, %14 : vector<10x128xf32>
    %cst_8 = arith.constant 9.99999997E-7 : f32
    %16 = vector.broadcast %cst_8 : f32 to vector<10x1xf32>
    %17 = arith.addf %13, %16 : vector<10x1xf32>
    %18 = math.rsqrt %17 : vector<10x1xf32>
    %19 = vector.broadcast %18 : vector<10x1xf32> to vector<10x128xf32>
    %20 = arith.mulf %15, %19 : vector<10x128xf32>
    %21 = vector.broadcast %1 : vector<1x128xf32> to vector<10x128xf32>
    %22 = arith.mulf %20, %21 : vector<10x128xf32>
    %23 = vector.broadcast %2 : vector<1x128xf32> to vector<10x128xf32>
    %24 = arith.addf %22, %23 : vector<10x128xf32>
    %c0_9 = arith.constant 0 : index
    %c0_10 = arith.constant 0 : index
    %25 = vector.load %arg3[%c0_9, %c0_10] : memref<10x128xf32, #tpu.memory_space<vmem>>, vector<10x128xf32>
    tpu.vector_store %arg3[%c0_9, %c0_10], %24 {strides = array<i32>} : memref<10x128xf32, #tpu.memory_space<vmem>>, vector<10x128xf32>,
    return
  }
}

module attributes {stable_mosaic.version = 11 : i64} {
  func.func @_layernorm_kernel(%arg0: memref<16x128xf32, #tpu.memory_space<vmem>>, %arg1: memref<1x128xf32, #tpu.memory_space<vmem>>, %arg2: memref<1x128xf32, #tpu.memory_space<vmem>>, %arg3: memref<16x128xf32, #tpu.memory_space<vmem>>) attributes {dimension_semantics = [], scalar_prefetch = 0 : i64, scratch_operands = 0 : i64, tpu.core_type = #tpu.core_type<tc>} {
    %c0 = arith.constant 0 : index
    %c0_0 = arith.constant 0 : index
    %0 = vector.load %arg0[%c0, %c0_0] : memref<16x128xf32, #tpu.memory_space<vmem>>, vector<16x128xf32>
    %c0_1 = arith.constant 0 : index
    %c0_2 = arith.constant 0 : index
    %1 = vector.load %arg1[%c0_1, %c0_2] : memref<1x128xf32, #tpu.memory_space<vmem>>, vector<1x128xf32>
    %c0_3 = arith.constant 0 : index
    %c0_4 = arith.constant 0 : index
    %2 = vector.load %arg2[%c0_3, %c0_4] : memref<1x128xf32, #tpu.memory_space<vmem>>, vector<1x128xf32>
    %cst = arith.constant dense<0.000000e+00> : vector<16xf32>
    %3 = vector.multi_reduction <add>, %0, %cst [1] : vector<16x128xf32> to vector<16xf32>
    %4 = vector.shape_cast %3 : vector<16xf32> to vector<16x1xf32>
    %cst_5 = arith.constant 1.280000e+02 : f32
    %5 = vector.broadcast %cst_5 : f32 to vector<16x1xf32>
    %6 = arith.divf %4, %5 : vector<16x1xf32>
    %7 = vector.broadcast %6 : vector<16x1xf32> to vector<16x128xf32>
    %8 = arith.subf %0, %7 : vector<16x128xf32>
    %9 = arith.mulf %8, %8 : vector<16x128xf32>
    %cst_6 = arith.constant dense<0.000000e+00> : vector<16xf32>
    %10 = vector.multi_reduction <add>, %9, %cst_6 [1] : vector<16x128xf32> to vector<16xf32>
    %11 = vector.shape_cast %10 : vector<16xf32> to vector<16x1xf32>
    %cst_7 = arith.constant 1.280000e+02 : f32
    %12 = vector.broadcast %cst_7 : f32 to vector<16x1xf32>
    %13 = arith.divf %11, %12 : vector<16x1xf32>
    %14 = vector.broadcast %6 : vector<16x1xf32> to vector<16x128xf32>
    %15 = arith.subf %0, %14 : vector<16x128xf32>
    %cst_8 = arith.constant 9.99999996E-13 : f32
    %16 = vector.broadcast %cst_8 : f32 to vector<16x1xf32>
    %17 = arith.addf %13, %16 : vector<16x1xf32>
    %18 = math.rsqrt %17 : vector<16x1xf32>
    %19 = vector.broadcast %18 : vector<16x1xf32> to vector<16x128xf32>
    %20 = arith.mulf %15, %19 : vector<16x128xf32>
    %21 = vector.broadcast %1 : vector<1x128xf32> to vector<16x128xf32>
    %22 = arith.mulf %20, %21 : vector<16x128xf32>
    %23 = vector.broadcast %2 : vector<1x128xf32> to vector<16x128xf32>
    %24 = arith.addf %22, %23 : vector<16x128xf32>
    %c0_9 = arith.constant 0 : index
    %c0_10 = arith.constant 0 : index
    %25 = vector.load %arg3[%c0_9, %c0_10] : memref<16x128xf32, #tpu.memory_space<vmem>>, vector<16x128xf32>
    tpu.vector_store %arg3[%c0_9, %c0_10], %24 {strides = array<i32>} : memref<16x128xf32, #tpu.memory_space<vmem>>, vector<16x128xf32>,
    return
  }
}

module attributes {stable_mosaic.version = 11 : i64} {
  func.func @_bert_layer_kernel(%arg0: i32, %arg1: memref<1x8x128xf32, #tpu.memory_space<vmem>>, %arg2: memref<1x5x128xf32, #tpu.memory_space<vmem>>, %arg3: memref<1x1x8xf32, #tpu.memory_space<vmem>>, %arg4: memref<128x384xbf16, #tpu.memory_space<vmem>>, %arg5: memref<1x384xf32, #tpu.memory_space<vmem>>, %arg6: memref<128x128xbf16, #tpu.memory_space<vmem>>, %arg7: memref<1x128xf32, #tpu.memory_space<vmem>>, %arg8: memref<1x128xf32, #tpu.memory_space<vmem>>, %arg9: memref<1x128xf32, #tpu.memory_space<vmem>>, %arg10: memref<128x128xbf16, #tpu.memory_space<vmem>>, %arg11: memref<1x128xf32, #tpu.memory_space<vmem>>, %arg12: memref<128x256xbf16, #tpu.memory_space<vmem>>, %arg13: memref<1x256xf32, #tpu.memory_space<vmem>>, %arg14: memref<128x128xbf16, #tpu.memory_space<vmem>>, %arg15: memref<1x128xf32, #tpu.memory_space<vmem>>, %arg16: memref<1x128xf32, #tpu.memory_space<vmem>>, %arg17: memref<1x128xf32, #tpu.memory_space<vmem>>, %arg18: memref<128x512xbf16, #tpu.memory_space<vmem>>, %arg19: memref<1x512xf32, #tpu.memory_space<vmem>>, %arg20: memref<512x128xbf16, #tpu.memory_space<vmem>>, %arg21: memref<1x128xf32, #tpu.memory_space<vmem>>, %arg22: memref<1x128xf32, #tpu.memory_space<vmem>>, %arg23: memref<1x128xf32, #tpu.memory_space<vmem>>, %arg24: memref<1x8x128xf32, #tpu.memory_space<vmem>>) attributes {dimension_semantics = [#tpu.dimension_semantics<parallel>], iteration_bounds = array<i64: 2>, scalar_prefetch = 0 : i64, scratch_operands = 0 : i64, tpu.core_type = #tpu.core_type<tc>, window_params = [{transform_indices = @transform_0, window_bounds = array<i64: 1, 8, 128>}, {transform_indices = @transform_1, window_bounds = array<i64: 1, 5, 128>}, {transform_indices = @transform_2, window_bounds = array<i64: 1, 1, 8>}, {pipeline_mode = #tpu.pipeline_mode<synchronous>, transform_indices = @transform_3, window_bounds = array<i64: 128, 384>}, {pipeline_mode = #tpu.pipeline_mode<synchronous>, transform_indices = @transform_4, window_bounds = array<i64: 1, 384>}, {pipeline_mode = #tpu.pipeline_mode<synchronous>, transform_indices = @transform_5, window_bounds = array<i64: 128, 128>}, {pipeline_mode = #tpu.pipeline_mode<synchronous>, transform_indices = @transform_6, window_bounds = array<i64: 1, 128>}, {pipeline_mode = #tpu.pipeline_mode<synchronous>, transform_indices = @transform_7, window_bounds = array<i64: 1, 128>}, {pipeline_mode = #tpu.pipeline_mode<synchronous>, transform_indices = @transform_8, window_bounds = array<i64: 1, 128>}, {pipeline_mode = #tpu.pipeline_mode<synchronous>, transform_indices = @transform_9, window_bounds = array<i64: 128, 128>}, {pipeline_mode = #tpu.pipeline_mode<synchronous>, transform_indices = @transform_10, window_bounds = array<i64: 1, 128>}, {pipeline_mode = #tpu.pipeline_mode<synchronous>, transform_indices = @transform_11, window_bounds = array<i64: 128, 256>}, {pipeline_mode = #tpu.pipeline_mode<synchronous>, transform_indices = @transform_12, window_bounds = array<i64: 1, 256>}, {pipeline_mode = #tpu.pipeline_mode<synchronous>, transform_indices = @transform_13, window_bounds = array<i64: 128, 128>}, {pipeline_mode = #tpu.pipeline_mode<synchronous>, transform_indices = @transform_14, window_bounds = array<i64: 1, 128>}, {pipeline_mode = #tpu.pipeline_mode<synchronous>, transform_indices = @transform_15, window_bounds = array<i64: 1, 128>}, {pipeline_mode = #tpu.pipeline_mode<synchronous>, transform_indices = @transform_16, window_bounds = array<i64: 1, 128>}, {pipeline_mode = #tpu.pipeline_mode<synchronous>, transform_indices = @transform_17, window_bounds = array<i64: 128, 512>}, {pipeline_mode = #tpu.pipeline_mode<synchronous>, transform_indices = @transform_18, window_bounds = array<i64: 1, 512>}, {pipeline_mode = #tpu.pipeline_mode<synchronous>, transform_indices = @transform_19, window_bounds = array<i64: 512, 128>}, {pipeline_mode = #tpu.pipeline_mode<synchronous>, transform_indices = @transform_20, window_bounds = array<i64: 1, 128>}, {pipeline_mode = #tpu.pipeline_mode<synchronous>, transform_indices = @transform_21, window_bounds = array<i64: 1, 128>}, {pipeline_mode = #tpu.pipeline_mode<synchronous>, transform_indices = @transform_22, window_bounds = array<i64: 1, 128>}, {transform_indices = @transform_23, window_bounds = array<i64: 1, 8, 128>}]} {
    %c0 = arith.constant 0 : index
    %c0_0 = arith.constant 0 : index
    %c0_1 = arith.constant 0 : index
    %0 = vector.load %arg1[%c0, %c0_0, %c0_1] : memref<1x8x128xf32, #tpu.memory_space<vmem>>, vector<1x8x128xf32>
    %1 = vector.shape_cast %0 : vector<1x8x128xf32> to vector<8x128xf32>
    %c0_2 = arith.constant 0 : index
    %c0_3 = arith.constant 0 : index
    %c0_4 = arith.constant 0 : index
    %2 = vector.load %arg2[%c0_2, %c0_3, %c0_4] : memref<1x5x128xf32, #tpu.memory_space<vmem>>, vector<1x5x128xf32>
    %3 = vector.shape_cast %2 : vector<1x5x128xf32> to vector<5x128xf32>
    %c0_5 = arith.constant 0 : index
    %c0_6 = arith.constant 0 : index
    %c0_7 = arith.constant 0 : index
    %4 = vector.load %arg3[%c0_5, %c0_6, %c0_7] : memref<1x1x8xf32, #tpu.memory_space<vmem>>, vector<1x1x8xf32>
    %5 = vector.shape_cast %4 : vector<1x1x8xf32> to vector<1x8xf32>
    %cst = arith.constant 1.000000e+00 : f32
    %6 = vector.broadcast %cst : f32 to vector<1x8xf32>
    %7 = arith.subf %6, %5 : vector<1x8xf32>
    %cst_8 = arith.constant -1.000000e+04 : f32
    %8 = vector.broadcast %cst_8 : f32 to vector<1x8xf32>
    %9 = arith.mulf %7, %8 : vector<1x8xf32>
    %c0_9 = arith.constant 0 : index
    %c0_10 = arith.constant 0 : index
    %10 = vector.load %arg4[%c0_9, %c0_10] : memref<128x384xbf16, #tpu.memory_space<vmem>>, vector<128x384xbf16>
    %c0_11 = arith.constant 0 : index
    %c0_12 = arith.constant 0 : index
    %11 = vector.load %arg5[%c0_11, %c0_12] : memref<1x384xf32, #tpu.memory_space<vmem>>, vector<1x384xf32>
    %12 = arith.truncf %1 : vector<8x128xf32> to vector<8x128xbf16>
    %cst_13 = arith.constant dense<0.000000e+00> : vector<8x384xf32>
    %13 = tpu.matmul %12, %10, %cst_13 {dimension_numbers = #tpu.dot_dimension_numbers<[1], [0], [0], [1], [0, 0, 1, 1], [], []>} : vector<8x128xbf16>, vector<128x384xbf16>, vector<8x384xf32> -> vector<8x384xf32>
    %14 = vector.broadcast %11 : vector<1x384xf32> to vector<8x384xf32>
    %15 = arith.addf %13, %14 : vector<8x384xf32>
    %16 = vector.extract_strided_slice %15 {offsets = [0, 0], sizes = [8, 128], strides = [1, 1]} : vector<8x384xf32> to vector<8x128xf32>
    %17 = vector.extract_strided_slice %15 {offsets = [0, 128], sizes = [8, 128], strides = [1, 1]} : vector<8x384xf32> to vector<8x128xf32>
    %18 = vector.extract_strided_slice %15 {offsets = [0, 256], sizes = [8, 128], strides = [1, 1]} : vector<8x384xf32> to vector<8x128xf32>
    %19 = vector.extract_strided_slice %16 {offsets = [0, 0], sizes = [8, 64], strides = [1, 1]} : vector<8x128xf32> to vector<8x64xf32>
    %20 = arith.truncf %19 : vector<8x64xf32> to vector<8x64xbf16>
    %21 = vector.extract_strided_slice %17 {offsets = [0, 0], sizes = [8, 64], strides = [1, 1]} : vector<8x128xf32> to vector<8x64xf32>
    %22 = arith.truncf %21 : vector<8x64xf32> to vector<8x64xbf16>
    %23 = vector.extract_strided_slice %18 {offsets = [0, 0], sizes = [8, 64], strides = [1, 1]} : vector<8x128xf32> to vector<8x64xf32>
    %24 = arith.truncf %23 : vector<8x64xf32> to vector<8x64xbf16>
    %cst_14 = arith.constant dense<0.000000e+00> : vector<8x8xf32>
    %25 = tpu.matmul %20, %22, %cst_14 {dimension_numbers = #tpu.dot_dimension_numbers<[1], [1], [0], [0], [0, 0, 1, 0], [], []>} : vector<8x64xbf16>, vector<8x64xbf16>, vector<8x8xf32> -> vector<8x8xf32>
    %cst_15 = arith.constant 1.250000e-01 : f32
    %26 = vector.broadcast %cst_15 : f32 to vector<8x8xf32>
    %27 = arith.mulf %25, %26 : vector<8x8xf32>
    %28 = vector.broadcast %9 : vector<1x8xf32> to vector<8x8xf32>
    %29 = arith.addf %27, %28 : vector<8x8xf32>
    %cst_16 = arith.constant dense<0xFF800000> : vector<8xf32>
    %30 = vector.multi_reduction <maximumf>, %29, %cst_16 [1] : vector<8x8xf32> to vector<8xf32>
    %31 = vector.shape_cast %30 : vector<8xf32> to vector<8x1xf32>
    %32 = vector.broadcast %31 : vector<8x1xf32> to vector<8x8xf32>
    %33 = arith.subf %29, %32 : vector<8x8xf32>
    %34 = math.exp %33 : vector<8x8xf32>
    %cst_17 = arith.constant dense<0.000000e+00> : vector<8xf32>
    %35 = vector.multi_reduction <add>, %34, %cst_17 [1] : vector<8x8xf32> to vector<8xf32>
    %36 = vector.shape_cast %35 : vector<8xf32> to vector<8x1xf32>
    %37 = tpu.reciprocal %36 {approx = true} : vector<8x1xf32> -> vector<8x1xf32>
    %38 = vector.broadcast %37 : vector<8x1xf32> to vector<8x8xf32>
    %39 = arith.mulf %34, %38 : vector<8x8xf32>
    %40 = arith.truncf %39 : vector<8x8xf32> to vector<8x8xbf16>
    %cst_18 = arith.constant dense<0.000000e+00> : vector<8x64xf32>
    %41 = tpu.matmul %40, %24, %cst_18 {dimension_numbers = #tpu.dot_dimension_numbers<[1], [0], [0], [1], [0, 0, 1, 1], [], []>} : vector<8x8xbf16>, vector<8x64xbf16>, vector<8x64xf32> -> vector<8x64xf32>
    %42 = vector.extract_strided_slice %16 {offsets = [0, 64], sizes = [8, 64], strides = [1, 1]} : vector<8x128xf32> to vector<8x64xf32>
    %43 = arith.truncf %42 : vector<8x64xf32> to vector<8x64xbf16>
    %44 = vector.extract_strided_slice %17 {offsets = [0, 64], sizes = [8, 64], strides = [1, 1]} : vector<8x128xf32> to vector<8x64xf32>
    %45 = arith.truncf %44 : vector<8x64xf32> to vector<8x64xbf16>
    %46 = vector.extract_strided_slice %18 {offsets = [0, 64], sizes = [8, 64], strides = [1, 1]} : vector<8x128xf32> to vector<8x64xf32>
    %47 = arith.truncf %46 : vector<8x64xf32> to vector<8x64xbf16>
    %cst_19 = arith.constant dense<0.000000e+00> : vector<8x8xf32>
    %48 = tpu.matmul %43, %45, %cst_19 {dimension_numbers = #tpu.dot_dimension_numbers<[1], [1], [0], [0], [0, 0, 1, 0], [], []>} : vector<8x64xbf16>, vector<8x64xbf16>, vector<8x8xf32> -> vector<8x8xf32>
    %cst_20 = arith.constant 1.250000e-01 : f32
    %49 = vector.broadcast %cst_20 : f32 to vector<8x8xf32>
    %50 = arith.mulf %48, %49 : vector<8x8xf32>
    %51 = vector.broadcast %9 : vector<1x8xf32> to vector<8x8xf32>
    %52 = arith.addf %50, %51 : vector<8x8xf32>
    %cst_21 = arith.constant dense<0xFF800000> : vector<8xf32>
    %53 = vector.multi_reduction <maximumf>, %52, %cst_21 [1] : vector<8x8xf32> to vector<8xf32>
    %54 = vector.shape_cast %53 : vector<8xf32> to vector<8x1xf32>
    %55 = vector.broadcast %54 : vector<8x1xf32> to vector<8x8xf32>
    %56 = arith.subf %52, %55 : vector<8x8xf32>
    %57 = math.exp %56 : vector<8x8xf32>
    %cst_22 = arith.constant dense<0.000000e+00> : vector<8xf32>
    %58 = vector.multi_reduction <add>, %57, %cst_22 [1] : vector<8x8xf32> to vector<8xf32>
    %59 = vector.shape_cast %58 : vector<8xf32> to vector<8x1xf32>
    %60 = tpu.reciprocal %59 {approx = true} : vector<8x1xf32> -> vector<8x1xf32>
    %61 = vector.broadcast %60 : vector<8x1xf32> to vector<8x8xf32>
    %62 = arith.mulf %57, %61 : vector<8x8xf32>
    %63 = arith.truncf %62 : vector<8x8xf32> to vector<8x8xbf16>
    %cst_23 = arith.constant dense<0.000000e+00> : vector<8x64xf32>
    %64 = tpu.matmul %63, %47, %cst_23 {dimension_numbers = #tpu.dot_dimension_numbers<[1], [0], [0], [1], [0, 0, 1, 1], [], []>} : vector<8x8xbf16>, vector<8x64xbf16>, vector<8x64xf32> -> vector<8x64xf32>
    %65 = tpu.concatenate %41, %64 in 1 : vector<8x64xf32>, vector<8x64xf32> -> vector<8x128xf32>
    %c0_24 = arith.constant 0 : index
    %c0_25 = arith.constant 0 : index
    %66 = vector.load %arg6[%c0_24, %c0_25] : memref<128x128xbf16, #tpu.memory_space<vmem>>, vector<128x128xbf16>
    %c0_26 = arith.constant 0 : index
    %c0_27 = arith.constant 0 : index
    %67 = vector.load %arg7[%c0_26, %c0_27] : memref<1x128xf32, #tpu.memory_space<vmem>>, vector<1x128xf32>
    %68 = arith.truncf %65 : vector<8x128xf32> to vector<8x128xbf16>
    %cst_28 = arith.constant dense<0.000000e+00> : vector<8x128xf32>
    %69 = tpu.matmul %68, %66, %cst_28 {dimension_numbers = #tpu.dot_dimension_numbers<[1], [0], [0], [1], [0, 0, 1, 1], [], []>} : vector<8x128xbf16>, vector<128x128xbf16>, vector<8x128xf32> -> vector<8x128xf32>
    %70 = vector.broadcast %67 : vector<1x128xf32> to vector<8x128xf32>
    %71 = arith.addf %69, %70 : vector<8x128xf32>
    %72 = arith.addf %1, %71 : vector<8x128xf32>
    %c0_29 = arith.constant 0 : index
    %c0_30 = arith.constant 0 : index
    %73 = vector.load %arg8[%c0_29, %c0_30] : memref<1x128xf32, #tpu.memory_space<vmem>>, vector<1x128xf32>
    %c0_31 = arith.constant 0 : index
    %c0_32 = arith.constant 0 : index
    %74 = vector.load %arg9[%c0_31, %c0_32] : memref<1x128xf32, #tpu.memory_space<vmem>>, vector<1x128xf32>
    %cst_33 = arith.constant dense<0.000000e+00> : vector<8xf32>
    %75 = vector.multi_reduction <add>, %72, %cst_33 [1] : vector<8x128xf32> to vector<8xf32>
    %76 = vector.shape_cast %75 : vector<8xf32> to vector<8x1xf32>
    %cst_34 = arith.constant 1.280000e+02 : f32
    %77 = vector.broadcast %cst_34 : f32 to vector<8x1xf32>
    %78 = arith.divf %76, %77 : vector<8x1xf32>
    %79 = vector.broadcast %78 : vector<8x1xf32> to vector<8x128xf32>
    %80 = arith.subf %72, %79 : vector<8x128xf32>
    %81 = arith.mulf %80, %80 : vector<8x128xf32>
    %cst_35 = arith.constant dense<0.000000e+00> : vector<8xf32>
    %82 = vector.multi_reduction <add>, %81, %cst_35 [1] : vector<8x128xf32> to vector<8xf32>
    %83 = vector.shape_cast %82 : vector<8xf32> to vector<8x1xf32>
    %cst_36 = arith.constant 1.280000e+02 : f32
    %84 = vector.broadcast %cst_36 : f32 to vector<8x1xf32>
    %85 = arith.divf %83, %84 : vector<8x1xf32>
    %86 = vector.broadcast %78 : vector<8x1xf32> to vector<8x128xf32>
    %87 = arith.subf %72, %86 : vector<8x128xf32>
    %cst_37 = arith.constant 9.99999996E-13 : f32
    %88 = vector.broadcast %cst_37 : f32 to vector<8x1xf32>
    %89 = arith.addf %85, %88 : vector<8x1xf32>
    %90 = math.rsqrt %89 : vector<8x1xf32>
    %91 = vector.broadcast %90 : vector<8x1xf32> to vector<8x128xf32>
    %92 = arith.mulf %87, %91 : vector<8x128xf32>
    %93 = vector.broadcast %73 : vector<1x128xf32> to vector<8x128xf32>
    %94 = arith.mulf %92, %93 : vector<8x128xf32>
    %95 = vector.broadcast %74 : vector<1x128xf32> to vector<8x128xf32>
    %96 = arith.addf %94, %95 : vector<8x128xf32>
    %c0_38 = arith.constant 0 : index
    %c0_39 = arith.constant 0 : index
    %97 = vector.load %arg10[%c0_38, %c0_39] : memref<128x128xbf16, #tpu.memory_space<vmem>>, vector<128x128xbf16>
    %c0_40 = arith.constant 0 : index
    %c0_41 = arith.constant 0 : index
    %98 = vector.load %arg11[%c0_40, %c0_41] : memref<1x128xf32, #tpu.memory_space<vmem>>, vector<1x128xf32>
    %99 = arith.truncf %96 : vector<8x128xf32> to vector<8x128xbf16>
    %cst_42 = arith.constant dense<0.000000e+00> : vector<8x128xf32>
    %100 = tpu.matmul %99, %97, %cst_42 {dimension_numbers = #tpu.dot_dimension_numbers<[1], [0], [0], [1], [0, 0, 1, 1], [], []>} : vector<8x128xbf16>, vector<128x128xbf16>, vector<8x128xf32> -> vector<8x128xf32>
    %101 = vector.broadcast %98 : vector<1x128xf32> to vector<8x128xf32>
    %102 = arith.addf %100, %101 : vector<8x128xf32>
    %c0_43 = arith.constant 0 : index
    %c0_44 = arith.constant 0 : index
    %103 = vector.load %arg12[%c0_43, %c0_44] : memref<128x256xbf16, #tpu.memory_space<vmem>>, vector<128x256xbf16>
    %c0_45 = arith.constant 0 : index
    %c0_46 = arith.constant 0 : index
    %104 = vector.load %arg13[%c0_45, %c0_46] : memref<1x256xf32, #tpu.memory_space<vmem>>, vector<1x256xf32>
    %105 = arith.truncf %3 : vector<5x128xf32> to vector<5x128xbf16>
    %cst_47 = arith.constant dense<0.000000e+00> : vector<5x256xf32>
    %106 = tpu.matmul %105, %103, %cst_47 {dimension_numbers = #tpu.dot_dimension_numbers<[1], [0], [0], [1], [0, 0, 1, 1], [], []>} : vector<5x128xbf16>, vector<128x256xbf16>, vector<5x256xf32> -> vector<5x256xf32>
    %107 = vector.broadcast %104 : vector<1x256xf32> to vector<5x256xf32>
    %108 = arith.addf %106, %107 : vector<5x256xf32>
    %109 = vector.extract_strided_slice %108 {offsets = [0, 0], sizes = [5, 128], strides = [1, 1]} : vector<5x256xf32> to vector<5x128xf32>
    %110 = vector.extract_strided_slice %108 {offsets = [0, 128], sizes = [5, 128], strides = [1, 1]} : vector<5x256xf32> to vector<5x128xf32>
    %111 = vector.extract_strided_slice %102 {offsets = [0, 0], sizes = [8, 64], strides = [1, 1]} : vector<8x128xf32> to vector<8x64xf32>
    %112 = arith.truncf %111 : vector<8x64xf32> to vector<8x64xbf16>
    %113 = vector.extract_strided_slice %109 {offsets = [0, 0], sizes = [5, 64], strides = [1, 1]} : vector<5x128xf32> to vector<5x64xf32>
    %114 = arith.truncf %113 : vector<5x64xf32> to vector<5x64xbf16>
    %115 = vector.extract_strided_slice %110 {offsets = [0, 0], sizes = [5, 64], strides = [1, 1]} : vector<5x128xf32> to vector<5x64xf32>
    %116 = arith.truncf %115 : vector<5x64xf32> to vector<5x64xbf16>
    %cst_48 = arith.constant dense<0.000000e+00> : vector<8x5xf32>
    %117 = tpu.matmul %112, %114, %cst_48 {dimension_numbers = #tpu.dot_dimension_numbers<[1], [1], [0], [0], [0, 0, 1, 0], [], []>} : vector<8x64xbf16>, vector<5x64xbf16>, vector<8x5xf32> -> vector<8x5xf32>
    %cst_49 = arith.constant 1.250000e-01 : f32
    %118 = vector.broadcast %cst_49 : f32 to vector<8x5xf32>
    %119 = arith.mulf %117, %118 : vector<8x5xf32>
    %cst_50 = arith.constant dense<0xFF800000> : vector<8xf32>
    %120 = vector.multi_reduction <maximumf>, %119, %cst_50 [1] : vector<8x5xf32> to vector<8xf32>
    %121 = vector.shape_cast %120 : vector<8xf32> to vector<8x1xf32>
    %122 = vector.broadcast %121 : vector<8x1xf32> to vector<8x5xf32>
    %123 = arith.subf %119, %122 : vector<8x5xf32>
    %124 = math.exp %123 : vector<8x5xf32>
    %cst_51 = arith.constant dense<0.000000e+00> : vector<8xf32>
    %125 = vector.multi_reduction <add>, %124, %cst_51 [1] : vector<8x5xf32> to vector<8xf32>
    %126 = vector.shape_cast %125 : vector<8xf32> to vector<8x1xf32>
    %127 = tpu.reciprocal %126 {approx = true} : vector<8x1xf32> -> vector<8x1xf32>
    %128 = vector.broadcast %127 : vector<8x1xf32> to vector<8x5xf32>
    %129 = arith.mulf %124, %128 : vector<8x5xf32>
    %130 = arith.truncf %129 : vector<8x5xf32> to vector<8x5xbf16>
    %cst_52 = arith.constant dense<0.000000e+00> : vector<8x64xf32>
    %131 = tpu.matmul %130, %116, %cst_52 {dimension_numbers = #tpu.dot_dimension_numbers<[1], [0], [0], [1], [0, 0, 1, 1], [], []>} : vector<8x5xbf16>, vector<5x64xbf16>, vector<8x64xf32> -> vector<8x64xf32>
    %132 = vector.extract_strided_slice %102 {offsets = [0, 64], sizes = [8, 64], strides = [1, 1]} : vector<8x128xf32> to vector<8x64xf32>
    %133 = arith.truncf %132 : vector<8x64xf32> to vector<8x64xbf16>
    %134 = vector.extract_strided_slice %109 {offsets = [0, 64], sizes = [5, 64], strides = [1, 1]} : vector<5x128xf32> to vector<5x64xf32>
    %135 = arith.truncf %134 : vector<5x64xf32> to vector<5x64xbf16>
    %136 = vector.extract_strided_slice %110 {offsets = [0, 64], sizes = [5, 64], strides = [1, 1]} : vector<5x128xf32> to vector<5x64xf32>
    %137 = arith.truncf %136 : vector<5x64xf32> to vector<5x64xbf16>
    %cst_53 = arith.constant dense<0.000000e+00> : vector<8x5xf32>
    %138 = tpu.matmul %133, %135, %cst_53 {dimension_numbers = #tpu.dot_dimension_numbers<[1], [1], [0], [0], [0, 0, 1, 0], [], []>} : vector<8x64xbf16>, vector<5x64xbf16>, vector<8x5xf32> -> vector<8x5xf32>
    %cst_54 = arith.constant 1.250000e-01 : f32
    %139 = vector.broadcast %cst_54 : f32 to vector<8x5xf32>
    %140 = arith.mulf %138, %139 : vector<8x5xf32>
    %cst_55 = arith.constant dense<0xFF800000> : vector<8xf32>
    %141 = vector.multi_reduction <maximumf>, %140, %cst_55 [1] : vector<8x5xf32> to vector<8xf32>
    %142 = vector.shape_cast %141 : vector<8xf32> to vector<8x1xf32>
    %143 = vector.broadcast %142 : vector<8x1xf32> to vector<8x5xf32>
    %144 = arith.subf %140, %143 : vector<8x5xf32>
    %145 = math.exp %144 : vector<8x5xf32>
    %cst_56 = arith.constant dense<0.000000e+00> : vector<8xf32>
    %146 = vector.multi_reduction <add>, %145, %cst_56 [1] : vector<8x5xf32> to vector<8xf32>
    %147 = vector.shape_cast %146 : vector<8xf32> to vector<8x1xf32>
    %148 = tpu.reciprocal %147 {approx = true} : vector<8x1xf32> -> vector<8x1xf32>
    %149 = vector.broadcast %148 : vector<8x1xf32> to vector<8x5xf32>
    %150 = arith.mulf %145, %149 : vector<8x5xf32>
    %151 = arith.truncf %150 : vector<8x5xf32> to vector<8x5xbf16>
    %cst_57 = arith.constant dense<0.000000e+00> : vector<8x64xf32>
    %152 = tpu.matmul %151, %137, %cst_57 {dimension_numbers = #tpu.dot_dimension_numbers<[1], [0], [0], [1], [0, 0, 1, 1], [], []>} : vector<8x5xbf16>, vector<5x64xbf16>, vector<8x64xf32> -> vector<8x64xf32>
    %153 = tpu.concatenate %131, %152 in 1 : vector<8x64xf32>, vector<8x64xf32> -> vector<8x128xf32>
    %c0_58 = arith.constant 0 : index
    %c0_59 = arith.constant 0 : index
    %154 = vector.load %arg14[%c0_58, %c0_59] : memref<128x128xbf16, #tpu.memory_space<vmem>>, vector<128x128xbf16>
    %c0_60 = arith.constant 0 : index
    %c0_61 = arith.constant 0 : index
    %155 = vector.load %arg15[%c0_60, %c0_61] : memref<1x128xf32, #tpu.memory_space<vmem>>, vector<1x128xf32>
    %156 = arith.truncf %153 : vector<8x128xf32> to vector<8x128xbf16>
    %cst_62 = arith.constant dense<0.000000e+00> : vector<8x128xf32>
    %157 = tpu.matmul %156, %154, %cst_62 {dimension_numbers = #tpu.dot_dimension_numbers<[1], [0], [0], [1], [0, 0, 1, 1], [], []>} : vector<8x128xbf16>, vector<128x128xbf16>, vector<8x128xf32> -> vector<8x128xf32>
    %158 = vector.broadcast %155 : vector<1x128xf32> to vector<8x128xf32>
    %159 = arith.addf %157, %158 : vector<8x128xf32>
    %160 = arith.addf %96, %159 : vector<8x128xf32>
    %c0_63 = arith.constant 0 : index
    %c0_64 = arith.constant 0 : index
    %161 = vector.load %arg16[%c0_63, %c0_64] : memref<1x128xf32, #tpu.memory_space<vmem>>, vector<1x128xf32>
    %c0_65 = arith.constant 0 : index
    %c0_66 = arith.constant 0 : index
    %162 = vector.load %arg17[%c0_65, %c0_66] : memref<1x128xf32, #tpu.memory_space<vmem>>, vector<1x128xf32>
    %cst_67 = arith.constant dense<0.000000e+00> : vector<8xf32>
    %163 = vector.multi_reduction <add>, %160, %cst_67 [1] : vector<8x128xf32> to vector<8xf32>
    %164 = vector.shape_cast %163 : vector<8xf32> to vector<8x1xf32>
    %cst_68 = arith.constant 1.280000e+02 : f32
    %165 = vector.broadcast %cst_68 : f32 to vector<8x1xf32>
    %166 = arith.divf %164, %165 : vector<8x1xf32>
    %167 = vector.broadcast %166 : vector<8x1xf32> to vector<8x128xf32>
    %168 = arith.subf %160, %167 : vector<8x128xf32>
    %169 = arith.mulf %168, %168 : vector<8x128xf32>
    %cst_69 = arith.constant dense<0.000000e+00> : vector<8xf32>
    %170 = vector.multi_reduction <add>, %169, %cst_69 [1] : vector<8x128xf32> to vector<8xf32>
    %171 = vector.shape_cast %170 : vector<8xf32> to vector<8x1xf32>
    %cst_70 = arith.constant 1.280000e+02 : f32
    %172 = vector.broadcast %cst_70 : f32 to vector<8x1xf32>
    %173 = arith.divf %171, %172 : vector<8x1xf32>
    %174 = vector.broadcast %166 : vector<8x1xf32> to vector<8x128xf32>
    %175 = arith.subf %160, %174 : vector<8x128xf32>
    %cst_71 = arith.constant 9.99999996E-13 : f32
    %176 = vector.broadcast %cst_71 : f32 to vector<8x1xf32>
    %177 = arith.addf %173, %176 : vector<8x1xf32>
    %178 = math.rsqrt %177 : vector<8x1xf32>
    %179 = vector.broadcast %178 : vector<8x1xf32> to vector<8x128xf32>
    %180 = arith.mulf %175, %179 : vector<8x128xf32>
    %181 = vector.broadcast %161 : vector<1x128xf32> to vector<8x128xf32>
    %182 = arith.mulf %180, %181 : vector<8x128xf32>
    %183 = vector.broadcast %162 : vector<1x128xf32> to vector<8x128xf32>
    %184 = arith.addf %182, %183 : vector<8x128xf32>
    %c0_72 = arith.constant 0 : index
    %c0_73 = arith.constant 0 : index
    %185 = vector.load %arg18[%c0_72, %c0_73] : memref<128x512xbf16, #tpu.memory_space<vmem>>, vector<128x512xbf16>
    %c0_74 = arith.constant 0 : index
    %c0_75 = arith.constant 0 : index
    %186 = vector.load %arg19[%c0_74, %c0_75] : memref<1x512xf32, #tpu.memory_space<vmem>>, vector<1x512xf32>
    %187 = arith.truncf %184 : vector<8x128xf32> to vector<8x128xbf16>
    %cst_76 = arith.constant dense<0.000000e+00> : vector<8x512xf32>
    %188 = tpu.matmul %187, %185, %cst_76 {dimension_numbers = #tpu.dot_dimension_numbers<[1], [0], [0], [1], [0, 0, 1, 1], [], []>} : vector<8x128xbf16>, vector<128x512xbf16>, vector<8x512xf32> -> vector<8x512xf32>
    %189 = vector.broadcast %186 : vector<1x512xf32> to vector<8x512xf32>
    %190 = arith.addf %188, %189 : vector<8x512xf32>
    %191 = arith.mulf %190, %190 : vector<8x512xf32>
    %192 = arith.mulf %190, %191 : vector<8x512xf32>
    %cst_77 = arith.constant 4.471500e-02 : f32
    %193 = vector.broadcast %cst_77 : f32 to vector<8x512xf32>
    %194 = arith.mulf %193, %192 : vector<8x512xf32>
    %195 = arith.addf %190, %194 : vector<8x512xf32>
    %cst_78 = arith.constant 0.797884583 : f32
    %196 = vector.broadcast %cst_78 : f32 to vector<8x512xf32>
    %197 = arith.mulf %196, %195 : vector<8x512xf32>
    %198 = math.tanh %197 : vector<8x512xf32>
    %cst_79 = arith.constant 1.000000e+00 : f32
    %199 = vector.broadcast %cst_79 : f32 to vector<8x512xf32>
    %200 = arith.addf %199, %198 : vector<8x512xf32>
    %cst_80 = arith.constant 5.000000e-01 : f32
    %201 = vector.broadcast %cst_80 : f32 to vector<8x512xf32>
    %202 = arith.mulf %201, %200 : vector<8x512xf32>
    %203 = arith.mulf %190, %202 : vector<8x512xf32>
    %c0_81 = arith.constant 0 : index
    %c0_82 = arith.constant 0 : index
    %204 = vector.load %arg20[%c0_81, %c0_82] : memref<512x128xbf16, #tpu.memory_space<vmem>>, vector<512x128xbf16>
    %c0_83 = arith.constant 0 : index
    %c0_84 = arith.constant 0 : index
    %205 = vector.load %arg21[%c0_83, %c0_84] : memref<1x128xf32, #tpu.memory_space<vmem>>, vector<1x128xf32>
    %206 = arith.truncf %203 : vector<8x512xf32> to vector<8x512xbf16>
    %cst_85 = arith.constant dense<0.000000e+00> : vector<8x128xf32>
    %207 = tpu.matmul %206, %204, %cst_85 {dimension_numbers = #tpu.dot_dimension_numbers<[1], [0], [0], [1], [0, 0, 1, 1], [], []>} : vector<8x512xbf16>, vector<512x128xbf16>, vector<8x128xf32> -> vector<8x128xf32>
    %208 = vector.broadcast %205 : vector<1x128xf32> to vector<8x128xf32>
    %209 = arith.addf %207, %208 : vector<8x128xf32>
    %210 = arith.addf %184, %209 : vector<8x128xf32>
    %c0_86 = arith.constant 0 : index
    %c0_87 = arith.constant 0 : index
    %211 = vector.load %arg22[%c0_86, %c0_87] : memref<1x128xf32, #tpu.memory_space<vmem>>, vector<1x128xf32>
    %c0_88 = arith.constant 0 : index
    %c0_89 = arith.constant 0 : index
    %212 = vector.load %arg23[%c0_88, %c0_89] : memref<1x128xf32, #tpu.memory_space<vmem>>, vector<1x128xf32>
    %cst_90 = arith.constant dense<0.000000e+00> : vector<8xf32>
    %213 = vector.multi_reduction <add>, %210, %cst_90 [1] : vector<8x128xf32> to vector<8xf32>
    %214 = vector.shape_cast %213 : vector<8xf32> to vector<8x1xf32>
    %cst_91 = arith.constant 1.280000e+02 : f32
    %215 = vector.broadcast %cst_91 : f32 to vector<8x1xf32>
    %216 = arith.divf %214, %215 : vector<8x1xf32>
    %217 = vector.broadcast %216 : vector<8x1xf32> to vector<8x128xf32>
    %218 = arith.subf %210, %217 : vector<8x128xf32>
    %219 = arith.mulf %218, %218 : vector<8x128xf32>
    %cst_92 = arith.constant dense<0.000000e+00> : vector<8xf32>
    %220 = vector.multi_reduction <add>, %219, %cst_92 [1] : vector<8x128xf32> to vector<8xf32>
    %221 = vector.shape_cast %220 : vector<8xf32> to vector<8x1xf32>
    %cst_93 = arith.constant 1.280000e+02 : f32
    %222 = vector.broadcast %cst_93 : f32 to vector<8x1xf32>
    %223 = arith.divf %221, %222 : vector<8x1xf32>
    %224 = vector.broadcast %216 : vector<8x1xf32> to vector<8x128xf32>
    %225 = arith.subf %210, %224 : vector<8x128xf32>
    %cst_94 = arith.constant 9.99999996E-13 : f32
    %226 = vector.broadcast %cst_94 : f32 to vector<8x1xf32>
    %227 = arith.addf %223, %226 : vector<8x1xf32>
    %228 = math.rsqrt %227 : vector<8x1xf32>
    %229 = vector.broadcast %228 : vector<8x1xf32> to vector<8x128xf32>
    %230 = arith.mulf %225, %229 : vector<8x128xf32>
    %231 = vector.broadcast %211 : vector<1x128xf32> to vector<8x128xf32>
    %232 = arith.mulf %230, %231 : vector<8x128xf32>
    %233 = vector.broadcast %212 : vector<1x128xf32> to vector<8x128xf32>
    %234 = arith.addf %232, %233 : vector<8x128xf32>
    %c0_95 = arith.constant 0 : index
    %c0_96 = arith.constant 0 : index
    %c0_97 = arith.constant 0 : index
    %235 = vector.load %arg24[%c0_95, %c0_96, %c0_97] : memref<1x8x128xf32, #tpu.memory_space<vmem>>, vector<1x8x128xf32>
    %236 = vector.shape_cast %235 : vector<1x8x128xf32> to vector<8x128xf32>
    %237 = vector.shape_cast %234 : vector<8x128xf32> to vector<1x8x128xf32>
    tpu.vector_store %arg24[%c0_95, %c0_96, %c0_97], %237 {strides = array<i32>} : memref<1x8x128xf32, #tpu.memory_space<vmem>>, vector<1x8x128xf32>,
    return
  }
  func.func @transform_0(%arg0: i32) -> (i32, i32, i32) {
    %c0_i32 = arith.constant 0 : i32
    %c0_i32_0 = arith.constant 0 : i32
    %c0_i32_1 = arith.constant 0 : i32
    return %arg0, %c0_i32, %c0_i32_0 : i32, i32, i32
  }
  func.func @transform_1(%arg0: i32) -> (i32, i32, i32) {
    %c0_i32 = arith.constant 0 : i32
    %c0_i32_0 = arith.constant 0 : i32
    %c0_i32_1 = arith.constant 0 : i32
    return %arg0, %c0_i32, %c0_i32_0 : i32, i32, i32
  }
  func.func @transform_2(%arg0: i32) -> (i32, i32, i32) {
    %c0_i32 = arith.constant 0 : i32
    %c0_i32_0 = arith.constant 0 : i32
    %c0_i32_1 = arith.constant 0 : i32
    return %arg0, %c0_i32, %c0_i32_0 : i32, i32, i32
  }
  func.func @transform_3(%arg0: i32) -> (i32, i32) {
    %c0_i32 = arith.constant 0 : i32
    %c0_i32_0 = arith.constant 0 : i32
    %c0_i32_1 = arith.constant 0 : i32
    return %c0_i32, %c0_i32_0 : i32, i32
  }
  func.func @transform_4(%arg0: i32) -> (i32, i32) {
    %c0_i32 = arith.constant 0 : i32
    %c0_i32_0 = arith.constant 0 : i32
    %c0_i32_1 = arith.constant 0 : i32
    return %c0_i32, %c0_i32_0 : i32, i32
  }
  func.func @transform_5(%arg0: i32) -> (i32, i32) {
    %c0_i32 = arith.constant 0 : i32
    %c0_i32_0 = arith.constant 0 : i32
    %c0_i32_1 = arith.constant 0 : i32
    return %c0_i32, %c0_i32_0 : i32, i32
  }
  func.func @transform_6(%arg0: i32) -> (i32, i32) {
    %c0_i32 = arith.constant 0 : i32
    %c0_i32_0 = arith.constant 0 : i32
    %c0_i32_1 = arith.constant 0 : i32
    return %c0_i32, %c0_i32_0 : i32, i32
  }
  func.func @transform_7(%arg0: i32) -> (i32, i32) {
    %c0_i32 = arith.constant 0 : i32
    %c0_i32_0 = arith.constant 0 : i32
    %c0_i32_1 = arith.constant 0 : i32
    return %c0_i32, %c0_i32_0 : i32, i32
  }
  func.func @transform_8(%arg0: i32) -> (i32, i32) {
    %c0_i32 = arith.constant 0 : i32
    %c0_i32_0 = arith.constant 0 : i32
    %c0_i32_1 = arith.constant 0 : i32
    return %c0_i32, %c0_i32_0 : i32, i32
  }
  func.func @transform_9(%arg0: i32) -> (i32, i32) {
    %c0_i32 = arith.constant 0 : i32
    %c0_i32_0 = arith.constant 0 : i32
    %c0_i32_1 = arith.constant 0 : i32
    return %c0_i32, %c0_i32_0 : i32, i32
  }
  func.func @transform_10(%arg0: i32) -> (i32, i32) {
    %c0_i32 = arith.constant 0 : i32
    %c0_i32_0 = arith.constant 0 : i32
    %c0_i32_1 = arith.constant 0 : i32
    return %c0_i32, %c0_i32_0 : i32, i32
  }
  func.func @transform_11(%arg0: i32) -> (i32, i32) {
    %c0_i32 = arith.constant 0 : i32
    %c0_i32_0 = arith.constant 0 : i32
    %c0_i32_1 = arith.constant 0 : i32
    return %c0_i32, %c0_i32_0 : i32, i32
  }
  func.func @transform_12(%arg0: i32) -> (i32, i32) {
    %c0_i32 = arith.constant 0 : i32
    %c0_i32_0 = arith.constant 0 : i32
    %c0_i32_1 = arith.constant 0 : i32
    return %c0_i32, %c0_i32_0 : i32, i32
  }
  func.func @transform_13(%arg0: i32) -> (i32, i32) {
    %c0_i32 = arith.constant 0 : i32
    %c0_i32_0 = arith.constant 0 : i32
    %c0_i32_1 = arith.constant 0 : i32
    return %c0_i32, %c0_i32_0 : i32, i32
  }
  func.func @transform_14(%arg0: i32) -> (i32, i32) {
    %c0_i32 = arith.constant 0 : i32
    %c0_i32_0 = arith.constant 0 : i32
    %c0_i32_1 = arith.constant 0 : i32
    return %c0_i32, %c0_i32_0 : i32, i32
  }
  func.func @transform_15(%arg0: i32) -> (i32, i32) {
    %c0_i32 = arith.constant 0 : i32
    %c0_i32_0 = arith.constant 0 : i32
    %c0_i32_1 = arith.constant 0 : i32
    return %c0_i32, %c0_i32_0 : i32, i32
  }
  func.func @transform_16(%arg0: i32) -> (i32, i32) {
    %c0_i32 = arith.constant 0 : i32
    %c0_i32_0 = arith.constant 0 : i32
    %c0_i32_1 = arith.constant 0 : i32
    return %c0_i32, %c0_i32_0 : i32, i32
  }
  func.func @transform_17(%arg0: i32) -> (i32, i32) {
    %c0_i32 = arith.constant 0 : i32
    %c0_i32_0 = arith.constant 0 : i32
    %c0_i32_1 = arith.constant 0 : i32
    return %c0_i32, %c0_i32_0 : i32, i32
  }
  func.func @transform_18(%arg0: i32) -> (i32, i32) {
    %c0_i32 = arith.constant 0 : i32
    %c0_i32_0 = arith.constant 0 : i32
    %c0_i32_1 = arith.constant 0 : i32
    return %c0_i32, %c0_i32_0 : i32, i32
  }
  func.func @transform_19(%arg0: i32) -> (i32, i32) {
    %c0_i32 = arith.constant 0 : i32
    %c0_i32_0 = arith.constant 0 : i32
    %c0_i32_1 = arith.constant 0 : i32
    return %c0_i32, %c0_i32_0 : i32, i32
  }
  func.func @transform_20(%arg0: i32) -> (i32, i32) {
    %c0_i32 = arith.constant 0 : i32
    %c0_i32_0 = arith.constant 0 : i32
    %c0_i32_1 = arith.constant 0 : i32
    return %c0_i32, %c0_i32_0 : i32, i32
  }
  func.func @transform_21(%arg0: i32) -> (i32, i32) {
    %c0_i32 = arith.constant 0 : i32
    %c0_i32_0 = arith.constant 0 : i32
    %c0_i32_1 = arith.constant 0 : i32
    return %c0_i32, %c0_i32_0 : i32, i32
  }
  func.func @transform_22(%arg0: i32) -> (i32, i32) {
    %c0_i32 = arith.constant 0 : i32
    %c0_i32_0 = arith.constant 0 : i32
    %c0_i32_1 = arith.constant 0 : i32
    return %c0_i32, %c0_i32_0 : i32, i32
  }
  func.func @transform_23(%arg0: i32) -> (i32, i32, i32) {
    %c0_i32 = arith.constant 0 : i32
    %c0_i32_0 = arith.constant 0 : i32
    %c0_i32_1 = arith.constant 0 : i32
    return %arg0, %c0_i32, %c0_i32_0 : i32, i32, i32
  }
}

module attributes {stable_mosaic.version = 11 : i64} {
  func.func @_classifier_kernel(%arg0: memref<2x128xf32, #tpu.memory_space<vmem>>, %arg1: memref<128x256xbf16, #tpu.memory_space<vmem>>, %arg2: memref<1x256xf32, #tpu.memory_space<vmem>>, %arg3: memref<256x256xbf16, #tpu.memory_space<vmem>>, %arg4: memref<1x256xf32, #tpu.memory_space<vmem>>, %arg5: memref<2x256xf32, #tpu.memory_space<vmem>>) attributes {dimension_semantics = [], scalar_prefetch = 0 : i64, scratch_operands = 0 : i64, tpu.core_type = #tpu.core_type<tc>} {
    %c0 = arith.constant 0 : index
    %c0_0 = arith.constant 0 : index
    %0 = vector.load %arg0[%c0, %c0_0] : memref<2x128xf32, #tpu.memory_space<vmem>>, vector<2x128xf32>
    %c0_1 = arith.constant 0 : index
    %c0_2 = arith.constant 0 : index
    %1 = vector.load %arg1[%c0_1, %c0_2] : memref<128x256xbf16, #tpu.memory_space<vmem>>, vector<128x256xbf16>
    %c0_3 = arith.constant 0 : index
    %c0_4 = arith.constant 0 : index
    %2 = vector.load %arg2[%c0_3, %c0_4] : memref<1x256xf32, #tpu.memory_space<vmem>>, vector<1x256xf32>
    %3 = arith.truncf %0 : vector<2x128xf32> to vector<2x128xbf16>
    %cst = arith.constant dense<0.000000e+00> : vector<2x256xf32>
    %4 = tpu.matmul %3, %1, %cst {dimension_numbers = #tpu.dot_dimension_numbers<[1], [0], [0], [1], [0, 0, 1, 1], [], []>} : vector<2x128xbf16>, vector<128x256xbf16>, vector<2x256xf32> -> vector<2x256xf32>
    %5 = vector.broadcast %2 : vector<1x256xf32> to vector<2x256xf32>
    %6 = arith.addf %4, %5 : vector<2x256xf32>
    %c0_5 = arith.constant 0 : index
    %c0_6 = arith.constant 0 : index
    %7 = vector.load %arg3[%c0_5, %c0_6] : memref<256x256xbf16, #tpu.memory_space<vmem>>, vector<256x256xbf16>
    %c0_7 = arith.constant 0 : index
    %c0_8 = arith.constant 0 : index
    %8 = vector.load %arg4[%c0_7, %c0_8] : memref<1x256xf32, #tpu.memory_space<vmem>>, vector<1x256xf32>
    %9 = arith.truncf %6 : vector<2x256xf32> to vector<2x256xbf16>
    %cst_9 = arith.constant dense<0.000000e+00> : vector<2x256xf32>
    %10 = tpu.matmul %9, %7, %cst_9 {dimension_numbers = #tpu.dot_dimension_numbers<[1], [0], [0], [1], [0, 0, 1, 1], [], []>} : vector<2x256xbf16>, vector<256x256xbf16>, vector<2x256xf32> -> vector<2x256xf32>
    %11 = vector.broadcast %8 : vector<1x256xf32> to vector<2x256xf32>
    %12 = arith.addf %10, %11 : vector<2x256xf32>
    %c0_10 = arith.constant 0 : index
    %c0_11 = arith.constant 0 : index
    %13 = vector.load %arg5[%c0_10, %c0_11] : memref<2x256xf32, #tpu.memory_space<vmem>>, vector<2x256xf32>
    tpu.vector_store %arg5[%c0_10, %c0_11], %12 {strides = array<i32>} : memref<2x256xf32, #tpu.memory_space<vmem>>, vector<2x256xf32>,
    return
  }
}

module attributes {stable_mosaic.version = 11 : i64} {
  func.func @_bert_layer_kernel(%arg0: i32, %arg1: memref<1x8x128xf32, #tpu.memory_space<vmem>>, %arg2: memref<1x5x128xf32, #tpu.memory_space<vmem>>, %arg3: memref<1x1x8xf32, #tpu.memory_space<vmem>>, %arg4: memref<128x384xbf16, #tpu.memory_space<vmem>>, %arg5: memref<1x384xf32, #tpu.memory_space<vmem>>, %arg6: memref<128x128xbf16, #tpu.memory_space<vmem>>, %arg7: memref<1x128xf32, #tpu.memory_space<vmem>>, %arg8: memref<1x128xf32, #tpu.memory_space<vmem>>, %arg9: memref<1x128xf32, #tpu.memory_space<vmem>>, %arg10: memref<128x128xbf16, #tpu.memory_space<vmem>>, %arg11: memref<1x128xf32, #tpu.memory_space<vmem>>, %arg12: memref<128x256xbf16, #tpu.memory_space<vmem>>, %arg13: memref<1x256xf32, #tpu.memory_space<vmem>>, %arg14: memref<128x128xbf16, #tpu.memory_space<vmem>>, %arg15: memref<1x128xf32, #tpu.memory_space<vmem>>, %arg16: memref<1x128xf32, #tpu.memory_space<vmem>>, %arg17: memref<1x128xf32, #tpu.memory_space<vmem>>, %arg18: memref<128x512xbf16, #tpu.memory_space<vmem>>, %arg19: memref<1x512xf32, #tpu.memory_space<vmem>>, %arg20: memref<512x128xbf16, #tpu.memory_space<vmem>>, %arg21: memref<1x128xf32, #tpu.memory_space<vmem>>, %arg22: memref<1x128xf32, #tpu.memory_space<vmem>>, %arg23: memref<1x128xf32, #tpu.memory_space<vmem>>, %arg24: memref<1x8x128xf32, #tpu.memory_space<vmem>>) attributes {dimension_semantics = [#tpu.dimension_semantics<parallel>], iteration_bounds = array<i64: 2>, scalar_prefetch = 0 : i64, scratch_operands = 0 : i64, tpu.core_type = #tpu.core_type<tc>, window_params = [{transform_indices = @transform_0, window_bounds = array<i64: 1, 8, 128>}, {transform_indices = @transform_1, window_bounds = array<i64: 1, 5, 128>}, {transform_indices = @transform_2, window_bounds = array<i64: 1, 1, 8>}, {pipeline_mode = #tpu.pipeline_mode<synchronous>, transform_indices = @transform_3, window_bounds = array<i64: 128, 384>}, {pipeline_mode = #tpu.pipeline_mode<synchronous>, transform_indices = @transform_4, window_bounds = array<i64: 1, 384>}, {pipeline_mode = #tpu.pipeline_mode<synchronous>, transform_indices = @transform_5, window_bounds = array<i64: 128, 128>}, {pipeline_mode = #tpu.pipeline_mode<synchronous>, transform_indices = @transform_6, window_bounds = array<i64: 1, 128>}, {pipeline_mode = #tpu.pipeline_mode<synchronous>, transform_indices = @transform_7, window_bounds = array<i64: 1, 128>}, {pipeline_mode = #tpu.pipeline_mode<synchronous>, transform_indices = @transform_8, window_bounds = array<i64: 1, 128>}, {pipeline_mode = #tpu.pipeline_mode<synchronous>, transform_indices = @transform_9, window_bounds = array<i64: 128, 128>}, {pipeline_mode = #tpu.pipeline_mode<synchronous>, transform_indices = @transform_10, window_bounds = array<i64: 1, 128>}, {pipeline_mode = #tpu.pipeline_mode<synchronous>, transform_indices = @transform_11, window_bounds = array<i64: 128, 256>}, {pipeline_mode = #tpu.pipeline_mode<synchronous>, transform_indices = @transform_12, window_bounds = array<i64: 1, 256>}, {pipeline_mode = #tpu.pipeline_mode<synchronous>, transform_indices = @transform_13, window_bounds = array<i64: 128, 128>}, {pipeline_mode = #tpu.pipeline_mode<synchronous>, transform_indices = @transform_14, window_bounds = array<i64: 1, 128>}, {pipeline_mode = #tpu.pipeline_mode<synchronous>, transform_indices = @transform_15, window_bounds = array<i64: 1, 128>}, {pipeline_mode = #tpu.pipeline_mode<synchronous>, transform_indices = @transform_16, window_bounds = array<i64: 1, 128>}, {pipeline_mode = #tpu.pipeline_mode<synchronous>, transform_indices = @transform_17, window_bounds = array<i64: 128, 512>}, {pipeline_mode = #tpu.pipeline_mode<synchronous>, transform_indices = @transform_18, window_bounds = array<i64: 1, 512>}, {pipeline_mode = #tpu.pipeline_mode<synchronous>, transform_indices = @transform_19, window_bounds = array<i64: 512, 128>}, {pipeline_mode = #tpu.pipeline_mode<synchronous>, transform_indices = @transform_20, window_bounds = array<i64: 1, 128>}, {pipeline_mode = #tpu.pipeline_mode<synchronous>, transform_indices = @transform_21, window_bounds = array<i64: 1, 128>}, {pipeline_mode = #tpu.pipeline_mode<synchronous>, transform_indices = @transform_22, window_bounds = array<i64: 1, 128>}, {transform_indices = @transform_23, window_bounds = array<i64: 1, 8, 128>}]} {
    %c0 = arith.constant 0 : index
    %c0_0 = arith.constant 0 : index
    %c0_1 = arith.constant 0 : index
    %0 = vector.load %arg1[%c0, %c0_0, %c0_1] : memref<1x8x128xf32, #tpu.memory_space<vmem>>, vector<1x8x128xf32>
    %1 = vector.shape_cast %0 : vector<1x8x128xf32> to vector<8x128xf32>
    %c0_2 = arith.constant 0 : index
    %c0_3 = arith.constant 0 : index
    %c0_4 = arith.constant 0 : index
    %2 = vector.load %arg2[%c0_2, %c0_3, %c0_4] : memref<1x5x128xf32, #tpu.memory_space<vmem>>, vector<1x5x128xf32>
    %3 = vector.shape_cast %2 : vector<1x5x128xf32> to vector<5x128xf32>
    %c0_5 = arith.constant 0 : index
    %c0_6 = arith.constant 0 : index
    %c0_7 = arith.constant 0 : index
    %4 = vector.load %arg3[%c0_5, %c0_6, %c0_7] : memref<1x1x8xf32, #tpu.memory_space<vmem>>, vector<1x1x8xf32>
    %5 = vector.shape_cast %4 : vector<1x1x8xf32> to vector<1x8xf32>
    %cst = arith.constant 1.000000e+00 : f32
    %6 = vector.broadcast %cst : f32 to vector<1x8xf32>
    %7 = arith.subf %6, %5 : vector<1x8xf32>
    %cst_8 = arith.constant -1.000000e+04 : f32
    %8 = vector.broadcast %cst_8 : f32 to vector<1x8xf32>
    %9 = arith.mulf %7, %8 : vector<1x8xf32>
    %c0_9 = arith.constant 0 : index
    %c0_10 = arith.constant 0 : index
    %10 = vector.load %arg4[%c0_9, %c0_10] : memref<128x384xbf16, #tpu.memory_space<vmem>>, vector<128x384xbf16>
    %c0_11 = arith.constant 0 : index
    %c0_12 = arith.constant 0 : index
    %11 = vector.load %arg5[%c0_11, %c0_12] : memref<1x384xf32, #tpu.memory_space<vmem>>, vector<1x384xf32>
    %12 = arith.truncf %1 : vector<8x128xf32> to vector<8x128xbf16>
    %cst_13 = arith.constant dense<0.000000e+00> : vector<8x384xf32>
    %13 = tpu.matmul %12, %10, %cst_13 {dimension_numbers = #tpu.dot_dimension_numbers<[1], [0], [0], [1], [0, 0, 1, 1], [], []>} : vector<8x128xbf16>, vector<128x384xbf16>, vector<8x384xf32> -> vector<8x384xf32>
    %14 = vector.broadcast %11 : vector<1x384xf32> to vector<8x384xf32>
    %15 = arith.addf %13, %14 : vector<8x384xf32>
    %16 = vector.extract_strided_slice %15 {offsets = [0, 0], sizes = [8, 128], strides = [1, 1]} : vector<8x384xf32> to vector<8x128xf32>
    %17 = vector.extract_strided_slice %15 {offsets = [0, 128], sizes = [8, 128], strides = [1, 1]} : vector<8x384xf32> to vector<8x128xf32>
    %18 = vector.extract_strided_slice %15 {offsets = [0, 256], sizes = [8, 128], strides = [1, 1]} : vector<8x384xf32> to vector<8x128xf32>
    %19 = vector.extract_strided_slice %16 {offsets = [0, 0], sizes = [8, 64], strides = [1, 1]} : vector<8x128xf32> to vector<8x64xf32>
    %20 = arith.truncf %19 : vector<8x64xf32> to vector<8x64xbf16>
    %21 = vector.extract_strided_slice %17 {offsets = [0, 0], sizes = [8, 64], strides = [1, 1]} : vector<8x128xf32> to vector<8x64xf32>
    %22 = arith.truncf %21 : vector<8x64xf32> to vector<8x64xbf16>
    %23 = vector.extract_strided_slice %18 {offsets = [0, 0], sizes = [8, 64], strides = [1, 1]} : vector<8x128xf32> to vector<8x64xf32>
    %24 = arith.truncf %23 : vector<8x64xf32> to vector<8x64xbf16>
    %cst_14 = arith.constant dense<0.000000e+00> : vector<8x8xf32>
    %25 = tpu.matmul %20, %22, %cst_14 {dimension_numbers = #tpu.dot_dimension_numbers<[1], [1], [0], [0], [0, 0, 1, 0], [], []>} : vector<8x64xbf16>, vector<8x64xbf16>, vector<8x8xf32> -> vector<8x8xf32>
    %cst_15 = arith.constant 1.250000e-01 : f32
    %26 = vector.broadcast %cst_15 : f32 to vector<8x8xf32>
    %27 = arith.mulf %25, %26 : vector<8x8xf32>
    %28 = vector.broadcast %9 : vector<1x8xf32> to vector<8x8xf32>
    %29 = arith.addf %27, %28 : vector<8x8xf32>
    %cst_16 = arith.constant dense<0xFF800000> : vector<8xf32>
    %30 = vector.multi_reduction <maximumf>, %29, %cst_16 [1] : vector<8x8xf32> to vector<8xf32>
    %31 = vector.shape_cast %30 : vector<8xf32> to vector<8x1xf32>
    %32 = vector.broadcast %31 : vector<8x1xf32> to vector<8x8xf32>
    %33 = arith.subf %29, %32 : vector<8x8xf32>
    %34 = math.exp %33 : vector<8x8xf32>
    %cst_17 = arith.constant dense<0.000000e+00> : vector<8xf32>
    %35 = vector.multi_reduction <add>, %34, %cst_17 [1] : vector<8x8xf32> to vector<8xf32>
    %36 = vector.shape_cast %35 : vector<8xf32> to vector<8x1xf32>
    %37 = tpu.reciprocal %36 {approx = true} : vector<8x1xf32> -> vector<8x1xf32>
    %38 = vector.broadcast %37 : vector<8x1xf32> to vector<8x8xf32>
    %39 = arith.mulf %34, %38 : vector<8x8xf32>
    %40 = arith.truncf %39 : vector<8x8xf32> to vector<8x8xbf16>
    %cst_18 = arith.constant dense<0.000000e+00> : vector<8x64xf32>
    %41 = tpu.matmul %40, %24, %cst_18 {dimension_numbers = #tpu.dot_dimension_numbers<[1], [0], [0], [1], [0, 0, 1, 1], [], []>} : vector<8x8xbf16>, vector<8x64xbf16>, vector<8x64xf32> -> vector<8x64xf32>
    %42 = vector.extract_strided_slice %16 {offsets = [0, 64], sizes = [8, 64], strides = [1, 1]} : vector<8x128xf32> to vector<8x64xf32>
    %43 = arith.truncf %42 : vector<8x64xf32> to vector<8x64xbf16>
    %44 = vector.extract_strided_slice %17 {offsets = [0, 64], sizes = [8, 64], strides = [1, 1]} : vector<8x128xf32> to vector<8x64xf32>
    %45 = arith.truncf %44 : vector<8x64xf32> to vector<8x64xbf16>
    %46 = vector.extract_strided_slice %18 {offsets = [0, 64], sizes = [8, 64], strides = [1, 1]} : vector<8x128xf32> to vector<8x64xf32>
    %47 = arith.truncf %46 : vector<8x64xf32> to vector<8x64xbf16>
    %cst_19 = arith.constant dense<0.000000e+00> : vector<8x8xf32>
    %48 = tpu.matmul %43, %45, %cst_19 {dimension_numbers = #tpu.dot_dimension_numbers<[1], [1], [0], [0], [0, 0, 1, 0], [], []>} : vector<8x64xbf16>, vector<8x64xbf16>, vector<8x8xf32> -> vector<8x8xf32>
    %cst_20 = arith.constant 1.250000e-01 : f32
    %49 = vector.broadcast %cst_20 : f32 to vector<8x8xf32>
    %50 = arith.mulf %48, %49 : vector<8x8xf32>
    %51 = vector.broadcast %9 : vector<1x8xf32> to vector<8x8xf32>
    %52 = arith.addf %50, %51 : vector<8x8xf32>
    %cst_21 = arith.constant dense<0xFF800000> : vector<8xf32>
    %53 = vector.multi_reduction <maximumf>, %52, %cst_21 [1] : vector<8x8xf32> to vector<8xf32>
    %54 = vector.shape_cast %53 : vector<8xf32> to vector<8x1xf32>
    %55 = vector.broadcast %54 : vector<8x1xf32> to vector<8x8xf32>
    %56 = arith.subf %52, %55 : vector<8x8xf32>
    %57 = math.exp %56 : vector<8x8xf32>
    %cst_22 = arith.constant dense<0.000000e+00> : vector<8xf32>
    %58 = vector.multi_reduction <add>, %57, %cst_22 [1] : vector<8x8xf32> to vector<8xf32>
    %59 = vector.shape_cast %58 : vector<8xf32> to vector<8x1xf32>
    %60 = tpu.reciprocal %59 {approx = true} : vector<8x1xf32> -> vector<8x1xf32>
    %61 = vector.broadcast %60 : vector<8x1xf32> to vector<8x8xf32>
    %62 = arith.mulf %57, %61 : vector<8x8xf32>
    %63 = arith.truncf %62 : vector<8x8xf32> to vector<8x8xbf16>
    %cst_23 = arith.constant dense<0.000000e+00> : vector<8x64xf32>
    %64 = tpu.matmul %63, %47, %cst_23 {dimension_numbers = #tpu.dot_dimension_numbers<[1], [0], [0], [1], [0, 0, 1, 1], [], []>} : vector<8x8xbf16>, vector<8x64xbf16>, vector<8x64xf32> -> vector<8x64xf32>
    %65 = tpu.concatenate %41, %64 in 1 : vector<8x64xf32>, vector<8x64xf32> -> vector<8x128xf32>
    %c0_24 = arith.constant 0 : index
    %c0_25 = arith.constant 0 : index
    %66 = vector.load %arg6[%c0_24, %c0_25] : memref<128x128xbf16, #tpu.memory_space<vmem>>, vector<128x128xbf16>
    %c0_26 = arith.constant 0 : index
    %c0_27 = arith.constant 0 : index
    %67 = vector.load %arg7[%c0_26, %c0_27] : memref<1x128xf32, #tpu.memory_space<vmem>>, vector<1x128xf32>
    %68 = arith.truncf %65 : vector<8x128xf32> to vector<8x128xbf16>
    %cst_28 = arith.constant dense<0.000000e+00> : vector<8x128xf32>
    %69 = tpu.matmul %68, %66, %cst_28 {dimension_numbers = #tpu.dot_dimension_numbers<[1], [0], [0], [1], [0, 0, 1, 1], [], []>} : vector<8x128xbf16>, vector<128x128xbf16>, vector<8x128xf32> -> vector<8x128xf32>
    %70 = vector.broadcast %67 : vector<1x128xf32> to vector<8x128xf32>
    %71 = arith.addf %69, %70 : vector<8x128xf32>
    %72 = arith.addf %1, %71 : vector<8x128xf32>
    %c0_29 = arith.constant 0 : index
    %c0_30 = arith.constant 0 : index
    %73 = vector.load %arg8[%c0_29, %c0_30] : memref<1x128xf32, #tpu.memory_space<vmem>>, vector<1x128xf32>
    %c0_31 = arith.constant 0 : index
    %c0_32 = arith.constant 0 : index
    %74 = vector.load %arg9[%c0_31, %c0_32] : memref<1x128xf32, #tpu.memory_space<vmem>>, vector<1x128xf32>
    %cst_33 = arith.constant dense<0.000000e+00> : vector<8xf32>
    %75 = vector.multi_reduction <add>, %72, %cst_33 [1] : vector<8x128xf32> to vector<8xf32>
    %76 = vector.shape_cast %75 : vector<8xf32> to vector<8x1xf32>
    %cst_34 = arith.constant 1.280000e+02 : f32
    %77 = vector.broadcast %cst_34 : f32 to vector<8x1xf32>
    %78 = arith.divf %76, %77 : vector<8x1xf32>
    %79 = vector.broadcast %78 : vector<8x1xf32> to vector<8x128xf32>
    %80 = arith.subf %72, %79 : vector<8x128xf32>
    %81 = arith.mulf %80, %80 : vector<8x128xf32>
    %cst_35 = arith.constant dense<0.000000e+00> : vector<8xf32>
    %82 = vector.multi_reduction <add>, %81, %cst_35 [1] : vector<8x128xf32> to vector<8xf32>
    %83 = vector.shape_cast %82 : vector<8xf32> to vector<8x1xf32>
    %cst_36 = arith.constant 1.280000e+02 : f32
    %84 = vector.broadcast %cst_36 : f32 to vector<8x1xf32>
    %85 = arith.divf %83, %84 : vector<8x1xf32>
    %86 = vector.broadcast %78 : vector<8x1xf32> to vector<8x128xf32>
    %87 = arith.subf %72, %86 : vector<8x128xf32>
    %cst_37 = arith.constant 9.99999996E-13 : f32
    %88 = vector.broadcast %cst_37 : f32 to vector<8x1xf32>
    %89 = arith.addf %85, %88 : vector<8x1xf32>
    %90 = math.rsqrt %89 : vector<8x1xf32>
    %91 = vector.broadcast %90 : vector<8x1xf32> to vector<8x128xf32>
    %92 = arith.mulf %87, %91 : vector<8x128xf32>
    %93 = vector.broadcast %73 : vector<1x128xf32> to vector<8x128xf32>
    %94 = arith.mulf %92, %93 : vector<8x128xf32>
    %95 = vector.broadcast %74 : vector<1x128xf32> to vector<8x128xf32>
    %96 = arith.addf %94, %95 : vector<8x128xf32>
    %c0_38 = arith.constant 0 : index
    %c0_39 = arith.constant 0 : index
    %97 = vector.load %arg10[%c0_38, %c0_39] : memref<128x128xbf16, #tpu.memory_space<vmem>>, vector<128x128xbf16>
    %c0_40 = arith.constant 0 : index
    %c0_41 = arith.constant 0 : index
    %98 = vector.load %arg11[%c0_40, %c0_41] : memref<1x128xf32, #tpu.memory_space<vmem>>, vector<1x128xf32>
    %99 = arith.truncf %96 : vector<8x128xf32> to vector<8x128xbf16>
    %cst_42 = arith.constant dense<0.000000e+00> : vector<8x128xf32>
    %100 = tpu.matmul %99, %97, %cst_42 {dimension_numbers = #tpu.dot_dimension_numbers<[1], [0], [0], [1], [0, 0, 1, 1], [], []>} : vector<8x128xbf16>, vector<128x128xbf16>, vector<8x128xf32> -> vector<8x128xf32>
    %101 = vector.broadcast %98 : vector<1x128xf32> to vector<8x128xf32>
    %102 = arith.addf %100, %101 : vector<8x128xf32>
    %c0_43 = arith.constant 0 : index
    %c0_44 = arith.constant 0 : index
    %103 = vector.load %arg12[%c0_43, %c0_44] : memref<128x256xbf16, #tpu.memory_space<vmem>>, vector<128x256xbf16>
    %c0_45 = arith.constant 0 : index
    %c0_46 = arith.constant 0 : index
    %104 = vector.load %arg13[%c0_45, %c0_46] : memref<1x256xf32, #tpu.memory_space<vmem>>, vector<1x256xf32>
    %105 = arith.truncf %3 : vector<5x128xf32> to vector<5x128xbf16>
    %cst_47 = arith.constant dense<0.000000e+00> : vector<5x256xf32>
    %106 = tpu.matmul %105, %103, %cst_47 {dimension_numbers = #tpu.dot_dimension_numbers<[1], [0], [0], [1], [0, 0, 1, 1], [], []>} : vector<5x128xbf16>, vector<128x256xbf16>, vector<5x256xf32> -> vector<5x256xf32>
    %107 = vector.broadcast %104 : vector<1x256xf32> to vector<5x256xf32>
    %108 = arith.addf %106, %107 : vector<5x256xf32>
    %109 = vector.extract_strided_slice %108 {offsets = [0, 0], sizes = [5, 128], strides = [1, 1]} : vector<5x256xf32> to vector<5x128xf32>
    %110 = vector.extract_strided_slice %108 {offsets = [0, 128], sizes = [5, 128], strides = [1, 1]} : vector<5x256xf32> to vector<5x128xf32>
    %111 = vector.extract_strided_slice %102 {offsets = [0, 0], sizes = [8, 64], strides = [1, 1]} : vector<8x128xf32> to vector<8x64xf32>
    %112 = arith.truncf %111 : vector<8x64xf32> to vector<8x64xbf16>
    %113 = vector.extract_strided_slice %109 {offsets = [0, 0], sizes = [5, 64], strides = [1, 1]} : vector<5x128xf32> to vector<5x64xf32>
    %114 = arith.truncf %113 : vector<5x64xf32> to vector<5x64xbf16>
    %115 = vector.extract_strided_slice %110 {offsets = [0, 0], sizes = [5, 64], strides = [1, 1]} : vector<5x128xf32> to vector<5x64xf32>
    %116 = arith.truncf %115 : vector<5x64xf32> to vector<5x64xbf16>
    %cst_48 = arith.constant dense<0.000000e+00> : vector<8x5xf32>
    %117 = tpu.matmul %112, %114, %cst_48 {dimension_numbers = #tpu.dot_dimension_numbers<[1], [1], [0], [0], [0, 0, 1, 0], [], []>} : vector<8x64xbf16>, vector<5x64xbf16>, vector<8x5xf32> -> vector<8x5xf32>
    %cst_49 = arith.constant 1.250000e-01 : f32
    %118 = vector.broadcast %cst_49 : f32 to vector<8x5xf32>
    %119 = arith.mulf %117, %118 : vector<8x5xf32>
    %cst_50 = arith.constant dense<0xFF800000> : vector<8xf32>
    %120 = vector.multi_reduction <maximumf>, %119, %cst_50 [1] : vector<8x5xf32> to vector<8xf32>
    %121 = vector.shape_cast %120 : vector<8xf32> to vector<8x1xf32>
    %122 = vector.broadcast %121 : vector<8x1xf32> to vector<8x5xf32>
    %123 = arith.subf %119, %122 : vector<8x5xf32>
    %124 = math.exp %123 : vector<8x5xf32>
    %cst_51 = arith.constant dense<0.000000e+00> : vector<8xf32>
    %125 = vector.multi_reduction <add>, %124, %cst_51 [1] : vector<8x5xf32> to vector<8xf32>
    %126 = vector.shape_cast %125 : vector<8xf32> to vector<8x1xf32>
    %127 = tpu.reciprocal %126 {approx = true} : vector<8x1xf32> -> vector<8x1xf32>
    %128 = vector.broadcast %127 : vector<8x1xf32> to vector<8x5xf32>
    %129 = arith.mulf %124, %128 : vector<8x5xf32>
    %130 = arith.truncf %129 : vector<8x5xf32> to vector<8x5xbf16>
    %cst_52 = arith.constant dense<0.000000e+00> : vector<8x64xf32>
    %131 = tpu.matmul %130, %116, %cst_52 {dimension_numbers = #tpu.dot_dimension_numbers<[1], [0], [0], [1], [0, 0, 1, 1], [], []>} : vector<8x5xbf16>, vector<5x64xbf16>, vector<8x64xf32> -> vector<8x64xf32>
    %132 = vector.extract_strided_slice %102 {offsets = [0, 64], sizes = [8, 64], strides = [1, 1]} : vector<8x128xf32> to vector<8x64xf32>
    %133 = arith.truncf %132 : vector<8x64xf32> to vector<8x64xbf16>
    %134 = vector.extract_strided_slice %109 {offsets = [0, 64], sizes = [5, 64], strides = [1, 1]} : vector<5x128xf32> to vector<5x64xf32>
    %135 = arith.truncf %134 : vector<5x64xf32> to vector<5x64xbf16>
    %136 = vector.extract_strided_slice %110 {offsets = [0, 64], sizes = [5, 64], strides = [1, 1]} : vector<5x128xf32> to vector<5x64xf32>
    %137 = arith.truncf %136 : vector<5x64xf32> to vector<5x64xbf16>
    %cst_53 = arith.constant dense<0.000000e+00> : vector<8x5xf32>
    %138 = tpu.matmul %133, %135, %cst_53 {dimension_numbers = #tpu.dot_dimension_numbers<[1], [1], [0], [0], [0, 0, 1, 0], [], []>} : vector<8x64xbf16>, vector<5x64xbf16>, vector<8x5xf32> -> vector<8x5xf32>
    %cst_54 = arith.constant 1.250000e-01 : f32
    %139 = vector.broadcast %cst_54 : f32 to vector<8x5xf32>
    %140 = arith.mulf %138, %139 : vector<8x5xf32>
    %cst_55 = arith.constant dense<0xFF800000> : vector<8xf32>
    %141 = vector.multi_reduction <maximumf>, %140, %cst_55 [1] : vector<8x5xf32> to vector<8xf32>
    %142 = vector.shape_cast %141 : vector<8xf32> to vector<8x1xf32>
    %143 = vector.broadcast %142 : vector<8x1xf32> to vector<8x5xf32>
    %144 = arith.subf %140, %143 : vector<8x5xf32>
    %145 = math.exp %144 : vector<8x5xf32>
    %cst_56 = arith.constant dense<0.000000e+00> : vector<8xf32>
    %146 = vector.multi_reduction <add>, %145, %cst_56 [1] : vector<8x5xf32> to vector<8xf32>
    %147 = vector.shape_cast %146 : vector<8xf32> to vector<8x1xf32>
    %148 = tpu.reciprocal %147 {approx = true} : vector<8x1xf32> -> vector<8x1xf32>
    %149 = vector.broadcast %148 : vector<8x1xf32> to vector<8x5xf32>
    %150 = arith.mulf %145, %149 : vector<8x5xf32>
    %151 = arith.truncf %150 : vector<8x5xf32> to vector<8x5xbf16>
    %cst_57 = arith.constant dense<0.000000e+00> : vector<8x64xf32>
    %152 = tpu.matmul %151, %137, %cst_57 {dimension_numbers = #tpu.dot_dimension_numbers<[1], [0], [0], [1], [0, 0, 1, 1], [], []>} : vector<8x5xbf16>, vector<5x64xbf16>, vector<8x64xf32> -> vector<8x64xf32>
    %153 = tpu.concatenate %131, %152 in 1 : vector<8x64xf32>, vector<8x64xf32> -> vector<8x128xf32>
    %c0_58 = arith.constant 0 : index
    %c0_59 = arith.constant 0 : index
    %154 = vector.load %arg14[%c0_58, %c0_59] : memref<128x128xbf16, #tpu.memory_space<vmem>>, vector<128x128xbf16>
    %c0_60 = arith.constant 0 : index
    %c0_61 = arith.constant 0 : index
    %155 = vector.load %arg15[%c0_60, %c0_61] : memref<1x128xf32, #tpu.memory_space<vmem>>, vector<1x128xf32>
    %156 = arith.truncf %153 : vector<8x128xf32> to vector<8x128xbf16>
    %cst_62 = arith.constant dense<0.000000e+00> : vector<8x128xf32>
    %157 = tpu.matmul %156, %154, %cst_62 {dimension_numbers = #tpu.dot_dimension_numbers<[1], [0], [0], [1], [0, 0, 1, 1], [], []>} : vector<8x128xbf16>, vector<128x128xbf16>, vector<8x128xf32> -> vector<8x128xf32>
    %158 = vector.broadcast %155 : vector<1x128xf32> to vector<8x128xf32>
    %159 = arith.addf %157, %158 : vector<8x128xf32>
    %160 = arith.addf %96, %159 : vector<8x128xf32>
    %c0_63 = arith.constant 0 : index
    %c0_64 = arith.constant 0 : index
    %161 = vector.load %arg16[%c0_63, %c0_64] : memref<1x128xf32, #tpu.memory_space<vmem>>, vector<1x128xf32>
    %c0_65 = arith.constant 0 : index
    %c0_66 = arith.constant 0 : index
    %162 = vector.load %arg17[%c0_65, %c0_66] : memref<1x128xf32, #tpu.memory_space<vmem>>, vector<1x128xf32>
    %cst_67 = arith.constant dense<0.000000e+00> : vector<8xf32>
    %163 = vector.multi_reduction <add>, %160, %cst_67 [1] : vector<8x128xf32> to vector<8xf32>
    %164 = vector.shape_cast %163 : vector<8xf32> to vector<8x1xf32>
    %cst_68 = arith.constant 1.280000e+02 : f32
    %165 = vector.broadcast %cst_68 : f32 to vector<8x1xf32>
    %166 = arith.divf %164, %165 : vector<8x1xf32>
    %167 = vector.broadcast %166 : vector<8x1xf32> to vector<8x128xf32>
    %168 = arith.subf %160, %167 : vector<8x128xf32>
    %169 = arith.mulf %168, %168 : vector<8x128xf32>
    %cst_69 = arith.constant dense<0.000000e+00> : vector<8xf32>
    %170 = vector.multi_reduction <add>, %169, %cst_69 [1] : vector<8x128xf32> to vector<8xf32>
    %171 = vector.shape_cast %170 : vector<8xf32> to vector<8x1xf32>
    %cst_70 = arith.constant 1.280000e+02 : f32
    %172 = vector.broadcast %cst_70 : f32 to vector<8x1xf32>
    %173 = arith.divf %171, %172 : vector<8x1xf32>
    %174 = vector.broadcast %166 : vector<8x1xf32> to vector<8x128xf32>
    %175 = arith.subf %160, %174 : vector<8x128xf32>
    %cst_71 = arith.constant 9.99999996E-13 : f32
    %176 = vector.broadcast %cst_71 : f32 to vector<8x1xf32>
    %177 = arith.addf %173, %176 : vector<8x1xf32>
    %178 = math.rsqrt %177 : vector<8x1xf32>
    %179 = vector.broadcast %178 : vector<8x1xf32> to vector<8x128xf32>
    %180 = arith.mulf %175, %179 : vector<8x128xf32>
    %181 = vector.broadcast %161 : vector<1x128xf32> to vector<8x128xf32>
    %182 = arith.mulf %180, %181 : vector<8x128xf32>
    %183 = vector.broadcast %162 : vector<1x128xf32> to vector<8x128xf32>
    %184 = arith.addf %182, %183 : vector<8x128xf32>
    %c0_72 = arith.constant 0 : index
    %c0_73 = arith.constant 0 : index
    %185 = vector.load %arg18[%c0_72, %c0_73] : memref<128x512xbf16, #tpu.memory_space<vmem>>, vector<128x512xbf16>
    %c0_74 = arith.constant 0 : index
    %c0_75 = arith.constant 0 : index
    %186 = vector.load %arg19[%c0_74, %c0_75] : memref<1x512xf32, #tpu.memory_space<vmem>>, vector<1x512xf32>
    %187 = arith.truncf %184 : vector<8x128xf32> to vector<8x128xbf16>
    %cst_76 = arith.constant dense<0.000000e+00> : vector<8x512xf32>
    %188 = tpu.matmul %187, %185, %cst_76 {dimension_numbers = #tpu.dot_dimension_numbers<[1], [0], [0], [1], [0, 0, 1, 1], [], []>} : vector<8x128xbf16>, vector<128x512xbf16>, vector<8x512xf32> -> vector<8x512xf32>
    %189 = vector.broadcast %186 : vector<1x512xf32> to vector<8x512xf32>
    %190 = arith.addf %188, %189 : vector<8x512xf32>
    %191 = arith.mulf %190, %190 : vector<8x512xf32>
    %192 = arith.mulf %190, %191 : vector<8x512xf32>
    %cst_77 = arith.constant 4.471500e-02 : f32
    %193 = vector.broadcast %cst_77 : f32 to vector<8x512xf32>
    %194 = arith.mulf %193, %192 : vector<8x512xf32>
    %195 = arith.addf %190, %194 : vector<8x512xf32>
    %cst_78 = arith.constant 0.797884583 : f32
    %196 = vector.broadcast %cst_78 : f32 to vector<8x512xf32>
    %197 = arith.mulf %196, %195 : vector<8x512xf32>
    %198 = math.tanh %197 : vector<8x512xf32>
    %cst_79 = arith.constant 1.000000e+00 : f32
    %199 = vector.broadcast %cst_79 : f32 to vector<8x512xf32>
    %200 = arith.addf %199, %198 : vector<8x512xf32>
    %cst_80 = arith.constant 5.000000e-01 : f32
    %201 = vector.broadcast %cst_80 : f32 to vector<8x512xf32>
    %202 = arith.mulf %201, %200 : vector<8x512xf32>
    %203 = arith.mulf %190, %202 : vector<8x512xf32>
    %c0_81 = arith.constant 0 : index
    %c0_82 = arith.constant 0 : index
    %204 = vector.load %arg20[%c0_81, %c0_82] : memref<512x128xbf16, #tpu.memory_space<vmem>>, vector<512x128xbf16>
    %c0_83 = arith.constant 0 : index
    %c0_84 = arith.constant 0 : index
    %205 = vector.load %arg21[%c0_83, %c0_84] : memref<1x128xf32, #tpu.memory_space<vmem>>, vector<1x128xf32>
    %206 = arith.truncf %203 : vector<8x512xf32> to vector<8x512xbf16>
    %cst_85 = arith.constant dense<0.000000e+00> : vector<8x128xf32>
    %207 = tpu.matmul %206, %204, %cst_85 {dimension_numbers = #tpu.dot_dimension_numbers<[1], [0], [0], [1], [0, 0, 1, 1], [], []>} : vector<8x512xbf16>, vector<512x128xbf16>, vector<8x128xf32> -> vector<8x128xf32>
    %208 = vector.broadcast %205 : vector<1x128xf32> to vector<8x128xf32>
    %209 = arith.addf %207, %208 : vector<8x128xf32>
    %210 = arith.addf %184, %209 : vector<8x128xf32>
    %c0_86 = arith.constant 0 : index
    %c0_87 = arith.constant 0 : index
    %211 = vector.load %arg22[%c0_86, %c0_87] : memref<1x128xf32, #tpu.memory_space<vmem>>, vector<1x128xf32>
    %c0_88 = arith.constant 0 : index
    %c0_89 = arith.constant 0 : index
    %212 = vector.load %arg23[%c0_88, %c0_89] : memref<1x128xf32, #tpu.memory_space<vmem>>, vector<1x128xf32>
    %cst_90 = arith.constant dense<0.000000e+00> : vector<8xf32>
    %213 = vector.multi_reduction <add>, %210, %cst_90 [1] : vector<8x128xf32> to vector<8xf32>
    %214 = vector.shape_cast %213 : vector<8xf32> to vector<8x1xf32>
    %cst_91 = arith.constant 1.280000e+02 : f32
    %215 = vector.broadcast %cst_91 : f32 to vector<8x1xf32>
    %216 = arith.divf %214, %215 : vector<8x1xf32>
    %217 = vector.broadcast %216 : vector<8x1xf32> to vector<8x128xf32>
    %218 = arith.subf %210, %217 : vector<8x128xf32>
    %219 = arith.mulf %218, %218 : vector<8x128xf32>
    %cst_92 = arith.constant dense<0.000000e+00> : vector<8xf32>
    %220 = vector.multi_reduction <add>, %219, %cst_92 [1] : vector<8x128xf32> to vector<8xf32>
    %221 = vector.shape_cast %220 : vector<8xf32> to vector<8x1xf32>
    %cst_93 = arith.constant 1.280000e+02 : f32
    %222 = vector.broadcast %cst_93 : f32 to vector<8x1xf32>
    %223 = arith.divf %221, %222 : vector<8x1xf32>
    %224 = vector.broadcast %216 : vector<8x1xf32> to vector<8x128xf32>
    %225 = arith.subf %210, %224 : vector<8x128xf32>
    %cst_94 = arith.constant 9.99999996E-13 : f32
    %226 = vector.broadcast %cst_94 : f32 to vector<8x1xf32>
    %227 = arith.addf %223, %226 : vector<8x1xf32>
    %228 = math.rsqrt %227 : vector<8x1xf32>
    %229 = vector.broadcast %228 : vector<8x1xf32> to vector<8x128xf32>
    %230 = arith.mulf %225, %229 : vector<8x128xf32>
    %231 = vector.broadcast %211 : vector<1x128xf32> to vector<8x128xf32>
    %232 = arith.mulf %230, %231 : vector<8x128xf32>
    %233 = vector.broadcast %212 : vector<1x128xf32> to vector<8x128xf32>
    %234 = arith.addf %232, %233 : vector<8x128xf32>
    %c0_95 = arith.constant 0 : index
    %c0_96 = arith.constant 0 : index
    %c0_97 = arith.constant 0 : index
    %235 = vector.load %arg24[%c0_95, %c0_96, %c0_97] : memref<1x8x128xf32, #tpu.memory_space<vmem>>, vector<1x8x128xf32>
    %236 = vector.shape_cast %235 : vector<1x8x128xf32> to vector<8x128xf32>
    %237 = vector.shape_cast %234 : vector<8x128xf32> to vector<1x8x128xf32>
    tpu.vector_store %arg24[%c0_95, %c0_96, %c0_97], %237 {strides = array<i32>} : memref<1x8x128xf32, #tpu.memory_space<vmem>>, vector<1x8x128xf32>,
    return
  }
  func.func @transform_0(%arg0: i32) -> (i32, i32, i32) {
    %c0_i32 = arith.constant 0 : i32
    %c0_i32_0 = arith.constant 0 : i32
    %c0_i32_1 = arith.constant 0 : i32
    return %arg0, %c0_i32, %c0_i32_0 : i32, i32, i32
  }
  func.func @transform_1(%arg0: i32) -> (i32, i32, i32) {
    %c0_i32 = arith.constant 0 : i32
    %c0_i32_0 = arith.constant 0 : i32
    %c0_i32_1 = arith.constant 0 : i32
    return %arg0, %c0_i32, %c0_i32_0 : i32, i32, i32
  }
  func.func @transform_2(%arg0: i32) -> (i32, i32, i32) {
    %c0_i32 = arith.constant 0 : i32
    %c0_i32_0 = arith.constant 0 : i32
    %c0_i32_1 = arith.constant 0 : i32
    return %arg0, %c0_i32, %c0_i32_0 : i32, i32, i32
  }
  func.func @transform_3(%arg0: i32) -> (i32, i32) {
    %c0_i32 = arith.constant 0 : i32
    %c0_i32_0 = arith.constant 0 : i32
    %c0_i32_1 = arith.constant 0 : i32
    return %c0_i32, %c0_i32_0 : i32, i32
  }
  func.func @transform_4(%arg0: i32) -> (i32, i32) {
    %c0_i32 = arith.constant 0 : i32
    %c0_i32_0 = arith.constant 0 : i32
    %c0_i32_1 = arith.constant 0 : i32
    return %c0_i32, %c0_i32_0 : i32, i32
  }
  func.func @transform_5(%arg0: i32) -> (i32, i32) {
    %c0_i32 = arith.constant 0 : i32
    %c0_i32_0 = arith.constant 0 : i32
    %c0_i32_1 = arith.constant 0 : i32
    return %c0_i32, %c0_i32_0 : i32, i32
  }
  func.func @transform_6(%arg0: i32) -> (i32, i32) {
    %c0_i32 = arith.constant 0 : i32
    %c0_i32_0 = arith.constant 0 : i32
    %c0_i32_1 = arith.constant 0 : i32
    return %c0_i32, %c0_i32_0 : i32, i32
  }
  func.func @transform_7(%arg0: i32) -> (i32, i32) {
    %c0_i32 = arith.constant 0 : i32
    %c0_i32_0 = arith.constant 0 : i32
    %c0_i32_1 = arith.constant 0 : i32
    return %c0_i32, %c0_i32_0 : i32, i32
  }
  func.func @transform_8(%arg0: i32) -> (i32, i32) {
    %c0_i32 = arith.constant 0 : i32
    %c0_i32_0 = arith.constant 0 : i32
    %c0_i32_1 = arith.constant 0 : i32
    return %c0_i32, %c0_i32_0 : i32, i32
  }
  func.func @transform_9(%arg0: i32) -> (i32, i32) {
    %c0_i32 = arith.constant 0 : i32
    %c0_i32_0 = arith.constant 0 : i32
    %c0_i32_1 = arith.constant 0 : i32
    return %c0_i32, %c0_i32_0 : i32, i32
  }
  func.func @transform_10(%arg0: i32) -> (i32, i32) {
    %c0_i32 = arith.constant 0 : i32
    %c0_i32_0 = arith.constant 0 : i32
    %c0_i32_1 = arith.constant 0 : i32
    return %c0_i32, %c0_i32_0 : i32, i32
  }
  func.func @transform_11(%arg0: i32) -> (i32, i32) {
    %c0_i32 = arith.constant 0 : i32
    %c0_i32_0 = arith.constant 0 : i32
    %c0_i32_1 = arith.constant 0 : i32
    return %c0_i32, %c0_i32_0 : i32, i32
  }
  func.func @transform_12(%arg0: i32) -> (i32, i32) {
    %c0_i32 = arith.constant 0 : i32
    %c0_i32_0 = arith.constant 0 : i32
    %c0_i32_1 = arith.constant 0 : i32
    return %c0_i32, %c0_i32_0 : i32, i32
  }
  func.func @transform_13(%arg0: i32) -> (i32, i32) {
    %c0_i32 = arith.constant 0 : i32
    %c0_i32_0 = arith.constant 0 : i32
    %c0_i32_1 = arith.constant 0 : i32
    return %c0_i32, %c0_i32_0 : i32, i32
  }
  func.func @transform_14(%arg0: i32) -> (i32, i32) {
    %c0_i32 = arith.constant 0 : i32
    %c0_i32_0 = arith.constant 0 : i32
    %c0_i32_1 = arith.constant 0 : i32
    return %c0_i32, %c0_i32_0 : i32, i32
  }
  func.func @transform_15(%arg0: i32) -> (i32, i32) {
    %c0_i32 = arith.constant 0 : i32
    %c0_i32_0 = arith.constant 0 : i32
    %c0_i32_1 = arith.constant 0 : i32
    return %c0_i32, %c0_i32_0 : i32, i32
  }
  func.func @transform_16(%arg0: i32) -> (i32, i32) {
    %c0_i32 = arith.constant 0 : i32
    %c0_i32_0 = arith.constant 0 : i32
    %c0_i32_1 = arith.constant 0 : i32
    return %c0_i32, %c0_i32_0 : i32, i32
  }
  func.func @transform_17(%arg0: i32) -> (i32, i32) {
    %c0_i32 = arith.constant 0 : i32
    %c0_i32_0 = arith.constant 0 : i32
    %c0_i32_1 = arith.constant 0 : i32
    return %c0_i32, %c0_i32_0 : i32, i32
  }
  func.func @transform_18(%arg0: i32) -> (i32, i32) {
    %c0_i32 = arith.constant 0 : i32
    %c0_i32_0 = arith.constant 0 : i32
    %c0_i32_1 = arith.constant 0 : i32
    return %c0_i32, %c0_i32_0 : i32, i32
  }
  func.func @transform_19(%arg0: i32) -> (i32, i32) {
    %c0_i32 = arith.constant 0 : i32
    %c0_i32_0 = arith.constant 0 : i32
    %c0_i32_1 = arith.constant 0 : i32
    return %c0_i32, %c0_i32_0 : i32, i32
  }
  func.func @transform_20(%arg0: i32) -> (i32, i32) {
    %c0_i32 = arith.constant 0 : i32
    %c0_i32_0 = arith.constant 0 : i32
    %c0_i32_1 = arith.constant 0 : i32
    return %c0_i32, %c0_i32_0 : i32, i32
  }
  func.func @transform_21(%arg0: i32) -> (i32, i32) {
    %c0_i32 = arith.constant 0 : i32
    %c0_i32_0 = arith.constant 0 : i32
    %c0_i32_1 = arith.constant 0 : i32
    return %c0_i32, %c0_i32_0 : i32, i32
  }
  func.func @transform_22(%arg0: i32) -> (i32, i32) {
    %c0_i32 = arith.constant 0 : i32
    %c0_i32_0 = arith.constant 0 : i32
    %c0_i32_1 = arith.constant 0 : i32
    return %c0_i32, %c0_i32_0 : i32, i32
  }
  func.func @transform_23(%arg0: i32) -> (i32, i32, i32) {
    %c0_i32 = arith.constant 0 : i32
    %c0_i32_0 = arith.constant 0 : i32
    %c0_i32_1 = arith.constant 0 : i32
    return %arg0, %c0_i32, %c0_i32_0 : i32, i32, i32
  }
}

</mosaic_0001>

<bundles_post_ra>
// kernel: question_answer_classifier.10
= control target key start
LH: loop header
LB: loop body
LE: loop exit
PB: predicated region body
PF: predicated region fallthrough
CT: control target
= control target key end

     0   :  { %s894_s1 = inlined_call_operand.vmem [shape: bf16[768,128], index: 1, kind: input, shape index: {}]   ;;  %s895_s0 = inlined_call_operand.vmem [shape: f32[8,768], index: 0, kind: input, shape index: {}]   ;;  %s896_s2 = inlined_call_operand.vmem [shape: f32[1,128], index: 2, kind: input, shape index: {}]   ;;  %s897_s3 = inlined_call_operand.vmem [shape: f32[8,128], index: 3, kind: output, shape index: {}]  }
   0x1   :  { %v658_v0 = vld [vmem:[%s894_s1 + $0x40] sm:$0xff]   ;;  %v662_v4 = vld [vmem:[%s894_s1 + $0x48] sm:$0xff]   ;;  %v666_v8 = vld [vmem:[%s894_s1 + $0x50] sm:$0xff]  }
   0x2   :  { %v659_v1 = vld [vmem:[%s894_s1] sm:$0xff]   ;;  %592 = vmatprep.subr.bf16.mxu0 %v658_v0  ;;  %v663_v5 = vld [vmem:[%s894_s1 + $0x8] sm:$0xff]   ;;  %v667_v9 = vld [vmem:[%s894_s1 + $0x10] sm:$0xff]  }
   0x3   :  { %v660_v2 = vld [vmem:[%s894_s1 + $0xc0] sm:$0xff]   ;;  %593 = vmatpush3.bf16.msra.mxu0 %v659_v1  ;;  %v664_v6 = vld [vmem:[%s894_s1 + $0xc8] sm:$0xff]   ;;  %v668_v10 = vld [vmem:[%s894_s1 + $0xd0] sm:$0xff]  }
   0x4   :  { %v661_v3 = vld [vmem:[%s894_s1 + $0x80] sm:$0xff]   ;;  %614 = vmatprep.subr.bf16.mxu1 %v660_v2  ;;  %594 = vmatprep.subr.bf16.mxu0 %v662_v4  ;;  %v665_v7 = vld [vmem:[%s894_s1 + $0x88] sm:$0xff]   ;;  %v669_v11 = vld [vmem:[%s894_s1 + $0x90] sm:$0xff]  }
   0x5   :  { %615 = vmatpush3.bf16.msra.mxu1 %v661_v3  ;;  %v670_v12 = vld [vmem:[%s894_s1 + $0x58] sm:$0xff]   ;;  %v674_v16 = vld [vmem:[%s894_s1 + $0x60] sm:$0xff]   ;;  %v678_v20 = vld [vmem:[%s894_s1 + $0x68] sm:$0xff]  }
   0x6   :  { %616 = vmatprep.subr.bf16.mxu1 %v664_v6  ;;  %v671_v13 = vld [vmem:[%s894_s1 + $0x18] sm:$0xff]   ;;  %v675_v17 = vld [vmem:[%s894_s1 + $0x20] sm:$0xff]   ;;  %v679_v21 = vld [vmem:[%s894_s1 + $0x28] sm:$0xff]  }
   0x7   :  { %595 = vmatpush3.bf16.msra.mxu0 %v663_v5  ;;  %v672_v14 = vld [vmem:[%s894_s1 + $0xd8] sm:$0xff]   ;;  %v676_v18 = vld [vmem:[%s894_s1 + $0xe0] sm:$0xff]   ;;  %v680_v22 = vld [vmem:[%s894_s1 + $0xe8] sm:$0xff]  }
   0x8   :  { %596 = vmatprep.subr.bf16.mxu0 %v666_v8  ;;  %v673_v15 = vld [vmem:[%s894_s1 + $0x98] sm:$0xff]   ;;  %v677_v19 = vld [vmem:[%s894_s1 + $0xa0] sm:$0xff]   ;;  %v681_v23 = vld [vmem:[%s894_s1 + $0xa8] sm:$0xff]  }
   0x9   :  { %617 = vmatpush3.bf16.msra.mxu1 %v665_v7  ;;  %v682_v24 = vld [vmem:[%s894_s1 + $0x70] sm:$0xff]   ;;  %v686_v28 = vld [vmem:[%s894_s1 + $0x78] sm:$0xff]   ;;  %v16_v31 = vld [vmem:[%s895_s0 + $0x8] sm:$0xff] }
   0xa   :  { %618 = vmatprep.subr.bf16.mxu1 %v668_v10  ;;  %v683_v25 = vld [vmem:[%s894_s1 + $0x30] sm:$0xff]   ;;  %v687_v29 = vld [vmem:[%s894_s1 + $0x38] sm:$0xff]   ;;  %v119_v32 = vpack.c.bf16 %v16_v31, %v16_v31  ;;  %v15_v34 = vld [vmem:[%s895_s0] sm:$0xff] }
   0xb   :  { %597 = vmatpush3.bf16.msra.mxu0 %v667_v9  ;;  %v684_v26 = vld [vmem:[%s894_s1 + $0xf0] sm:$0xff]   ;;  %v688_v30 = vld [vmem:[%s894_s1 + $0xf8] sm:$0xff]   ;;  %v118_v35 = vpack.c.bf16 %v15_v34, %v15_v34  ;;  %v690_v36 = vld [vmem:[%s894_s1 + $0x140] sm:$0xff]  }
   0xc   :  { %598 = vmatprep.subr.bf16.mxu0 %v670_v12  ;;  %v685_v27 = vld [vmem:[%s894_s1 + $0xb0] sm:$0xff]   ;;  %v689_v33 = vld [vmem:[%s894_s1 + $0xb8] sm:$0xff]   ;;  %450 = vmatprep.mubr.bf16.mxu0 %v119_v32  ;;  %v691_v39 = vld [vmem:[%s894_s1 + $0x100] sm:$0xff]  }
   0xd   :  { %619 = vmatpush3.bf16.msra.mxu1 %v669_v11  ;;  %v18_v37 = vld [vmem:[%s895_s0 + $0x18] sm:$0xff]  ;;  %v17_v40 = vld [vmem:[%s895_s0 + $0x10] sm:$0xff]  ;;  %v692_v42 = vld [vmem:[%s894_s1 + $0x148] sm:$0xff]  }
   0xe   :  { %620 = vmatprep.subr.bf16.mxu1 %v672_v14  ;;  %v121_v38 = vpack.c.bf16 %v18_v37, %v18_v37  ;;  %v120_v41 = vpack.c.bf16 %v17_v40, %v17_v40  ;;  %v693_v43 = vld [vmem:[%s894_s1 + $0x108] sm:$0xff]   ;;  %v694_v44 = vld [vmem:[%s894_s1 + $0x150] sm:$0xff]   ;;  %v696_v46 = vld [vmem:[%s894_s1 + $0x158] sm:$0xff]  }
   0xf   :  { %599 = vmatpush3.bf16.msra.mxu0 %v671_v13  ;;  %v695_v45 = vld [vmem:[%s894_s1 + $0x110] sm:$0xff]   ;;  %v697_v47 = vld [vmem:[%s894_s1 + $0x118] sm:$0xff]   ;;  %v698_v48 = vld [vmem:[%s894_s1 + $0x160] sm:$0xff]  }
  0x10   :  { %600 = vmatprep.subr.bf16.mxu0 %v674_v16  ;;  %490 = vmatprep.mubr.bf16.mxu1 %v121_v38  ;;  %v699_v49 = vld [vmem:[%s894_s1 + $0x120] sm:$0xff]   ;;  %v700_v50 = vld [vmem:[%s894_s1 + $0x168] sm:$0xff]   ;;  %v702_v54 = vld [vmem:[%s894_s1 + $0x170] sm:$0xff]  }
  0x11   :  { %621 = vmatpush3.bf16.msra.mxu1 %v673_v15  ;;  %v20_v51 = vld [vmem:[%s895_s0 + $0x28] sm:$0xff]  ;;  %v703_v55 = vld [vmem:[%s894_s1 + $0x130] sm:$0xff]   ;;  %v704_v56 = vld [vmem:[%s894_s1 + $0x178] sm:$0xff]  }
  0x12   :  { %622 = vmatprep.subr.bf16.mxu1 %v676_v18  ;;  %v123_v52 = vpack.c.bf16 %v20_v51, %v20_v51  ;;  %v701_v53 = vld [vmem:[%s894_s1 + $0x128] sm:$0xff]   ;;  %v705_v57 = vld [vmem:[%s894_s1 + $0x138] sm:$0xff]   ;;  %v19_v58 = vld [vmem:[%s895_s0 + $0x20] sm:$0xff] }
  0x13   :  { %601 = vmatpush3.bf16.msra.mxu0 %v675_v17  ;;  %v122_v59 = vpack.c.bf16 %v19_v58, %v19_v58  ;;  %v543_v61 = vld [vmem:[%s896_s2] ss:$0 sm:$0xff] }
  0x14   :  { %602 = vmatprep.subr.bf16.mxu0 %v678_v20 }
  0x15   :  { %623 = vmatpush3.bf16.msra.mxu1 %v677_v19 }
  0x16   :  { %624 = vmatprep.subr.bf16.mxu1 %v680_v22 }
  0x17   :  { %603 = vmatpush3.bf16.msra.mxu0 %v679_v21 }
  0x18   :  { %604 = vmatprep.subr.bf16.mxu0 %v682_v24 }
  0x19   :  { %625 = vmatpush3.bf16.msra.mxu1 %v681_v23 }
  0x1a   :  { %626 = vmatprep.subr.bf16.mxu1 %v684_v26 }
  0x1b   :  { %605 = vmatpush3.bf16.msra.mxu0 %v683_v25 }
  0x1c   :  { %606 = vmatprep.subr.bf16.mxu0 %v686_v28 }
  0x1d   :  { %627 = vmatpush3.bf16.msra.mxu1 %v685_v27 }
  0x1e   :  { %628 = vmatprep.subr.bf16.mxu1 %v688_v30 }
  0x1f   :  { %607 = vmatpush3.bf16.msra.mxu0 %v687_v29 }
  0x20   :  { %636 = vmatprep.subr.bf16.mxu0 %v690_v36 }
  0x21   :  { %629 = vmatpush3.bf16.msra.mxu1 %v689_v33 }
  0x22   :  { %451 = vmatmul.mubr.bf16.vlgmr.msra.gmra.mrb[0].mxu0 %v118_v35 }
  0x23   :  { %637 = vmatpush3.bf16.msra.mxu0 %v691_v39  ;;  %530 = vmatprep.mubr.bf16.mxu0 %v123_v52 }
  0x24   :  { %491 = vmatmul.mubr.bf16.vlgmr.msra.gmra.mrb[0].mxu1 %v120_v41  ;;  %638 = vmatprep.subr.bf16.mxu0 %v692_v42 }
  0x27   :  { %639 = vmatpush3.bf16.msra.mxu0 %v693_v43 }
  0x28   :  { %640 = vmatprep.subr.bf16.mxu0 %v694_v44 }
  0x2b   :  { %641 = vmatpush3.bf16.msra.mxu0 %v695_v45 }
  0x2c   :  { %642 = vmatprep.subr.bf16.mxu0 %v696_v46 }
  0x2f   :  { %643 = vmatpush3.bf16.msra.mxu0 %v697_v47 }
  0x30   :  { %644 = vmatprep.subr.bf16.mxu0 %v698_v48 }
  0x33   :  { %645 = vmatpush3.bf16.msra.mxu0 %v699_v49 }
  0x34   :  { %646 = vmatprep.subr.bf16.mxu0 %v700_v50 }
  0x37   :  { %647 = vmatpush3.bf16.msra.mxu0 %v701_v53 }
  0x38   :  { %648 = vmatprep.subr.bf16.mxu0 %v702_v54 }
  0x3b   :  { %649 = vmatpush3.bf16.msra.mxu0 %v703_v55 }
  0x3c   :  { %650 = vmatprep.subr.bf16.mxu0 %v704_v56 }
  0x3f   :  { %651 = vmatpush3.bf16.msra.mxu0 %v705_v57 }
  0x42   :  { %531 = vmatmul.mubr.bf16.vlgmr.msra.gmra.mrb[4].mxu0 %v122_v59 }
  0xf5   :  { %v608_v60 = vpop.f32.mrb[0].mxu0 }
  0xf6   :  { %v609_v62 = vpop.f32.mrb[1].mxu0 }
  0xf7   :  { %v610_v63 = vadd.f32 %v609_v62, %v608_v60  ;;  %v611_v0 = vpop.f32.mrb[2].mxu0  ;;  %v630_v1 = vpop.f32.mrb[0].mxu1 }
  0xf8   :  { %v612_v2 = vpop.f32.mrb[3].mxu0  ;;  %v631_v4 = vpop.f32.mrb[1].mxu1 }
  0xf9   :  { %v453_v3 = vadd.f32 %v610_v63, %v543_v61  ;;  %v632_v5 = vadd.f32 %v631_v4, %v630_v1  ;;  %v633_v6 = vpop.f32.mrb[2].mxu1 }
  0xfa   :  { %v634_v7 = vpop.f32.mrb[3].mxu1 }
  0xfb   :  { %v493_v8 = vadd.f32 %v632_v5, %v453_v3 }
 0x115   :  { %v652_v9 = vpop.f32.mrb[4].mxu0 }
 0x116   :  { %v653_v10 = vpop.f32.mrb[5].mxu0 }
 0x117   :  { %v654_v11 = vadd.f32 %v653_v10, %v652_v9  ;;  %v655_v12 = vpop.f32.mrb[6].mxu0 }
 0x118   :  { %v656_v13 = vpop.f32.mrb[7].mxu0 }
 0x119   :  { %v533_v14 = vadd.f32 %v654_v11, %v493_v8 }
 0x11b   :  { %538 = vst [vmem:[%s897_s3] sm:$0xff] %v533_v14 }

// kernel: question_answer_classifier.15
= control target key start
LH: loop header
LB: loop body
LE: loop exit
PB: predicated region body
PF: predicated region fallthrough
CT: control target
= control target key end

     0   :  { %vm20_vm0 = vcmask 1041408   ;;  %s110_s0 = inlined_call_operand.vmem [shape: f32[10,128], index: 0, kind: input, shape index: {}]   ;;  %s111_s1 = inlined_call_operand.vmem [shape: f32[1,128], index: 1, kind: input, shape index: {}]   ;;  %s112_s2 = inlined_call_operand.vmem [shape: f32[1,128], index: 2, kind: input, shape index: {}]   ;;  %s113_s3 = inlined_call_operand.vmem [shape: f32[10,128], index: 3, kind: output, shape index: {}]  }
   0x1   :  { %v15_v0 = vld [vmem:[%s110_s0 + $0x8] sm:$0x3]  ;;  %v14_v2 = vld [vmem:[%s110_s0] sm:$0xff] }
   0x2   :  { %v21_v1 = vsel %vm20_vm0, %v15_v0, 0.0  ;;  %v66_v19 = vld [vmem:[%s111_s1] ss:$0 sm:$0xff] }
   0x3   :  { %22 = vadd.xlane.f32.xlu0 %v21_v1  ;;  %v67_v21 = vld [vmem:[%s112_s2] ss:$0 sm:$0xff] }
   0x7   :  { %18 = vadd.xlane.f32.xlu0 %v14_v2 }
  0x90   :  { %v23_v3 = vpop.xlane.xlu0 %22 }
  0x91   :  { %v26_v4 = vmul.f32 0.0078125, %v23_v3 }
  0x93   :  { %v28_v7 = vsub.f32 %v15_v0, %v26_v4 }
  0x94   :  { %v19_v5 = vpop.xlane.xlu0 %18 }
  0x95   :  { %v25_v6 = vmul.f32 0.0078125, %v19_v5  ;;  %v30_v10 = vmul.f32 %v28_v7, %v28_v7 }
  0x97   :  { %v27_v8 = vsub.f32 %v14_v2, %v25_v6  ;;  %v33_v11 = vsel %vm20_vm0, %v30_v10, 0.0 }
  0x99   :  { %v29_v9 = vmul.f32 %v27_v8, %v27_v8 }
  0x9b   :  { %31 = vadd.xlane.f32.xlu1 %v29_v9 }
  0x9f   :  { %34 = vadd.xlane.f32.xlu1 %v33_v11 }
 0x128   :  { %v32_v12 = vpop.xlane.xlu1 %31 }
 0x129   :  { %v36_v13 = vmul.f32 0.0078125, %v32_v12 }
 0x12b   :  { %v38_v14 = vadd.f32 1e-06, %v36_v13 }
 0x12c   :  { %v35_v15 = vpop.xlane.xlu1 %34 }
 0x12d   :  { %68 = vrsqrt.f32 %v38_v14  ;;  %v37_v16 = vmul.f32 0.0078125, %v35_v15 }
 0x12f   :  { %v39_v17 = vadd.f32 1e-06, %v37_v16 }
 0x131   :  { %70 = vrsqrt.f32 %v39_v17 }
 0x137   :  { %v69_v18 = vpop.eup %68 }
 0x138   :  { %v42_v20 = vmul.f32 %v69_v18, %v27_v8 }
 0x13a   :  { %v50_v22 = vmul.f32 %v66_v19, %v42_v20 }
 0x13b   :  { %v71_v23 = vpop.eup %70 }
 0x13c   :  { %v58_v24 = vadd.f32 %v67_v21, %v50_v22  ;;  %v43_v25 = vmul.f32 %v71_v23, %v28_v7 }
 0x13e   :  { %60 = vst [vmem:[%s113_s3] sm:$0xff] %v58_v24  ;;  %v51_v26 = vmul.f32 %v66_v19, %v43_v25 }
 0x140   :  { %v59_v27 = vadd.f32 %v67_v21, %v51_v26 }
 0x142   :  { %61 = vst [vmem:[%s113_s3 + $0x8] sm:$0x3] %v59_v27 }

// kernel: question_answer_classifier.11
= control target key start
LH: loop header
LB: loop body
LE: loop exit
PB: predicated region body
PF: predicated region fallthrough
CT: control target
= control target key end

     0   :  { %s2324_s25 = smov 0   ;;  %s2742_s0 = inlined_call_operand.vmem [shape: f32[2,5,128], index: 0, kind: input, shape index: {}]   ;;  %s2743_s1 = inlined_call_operand.vmem [shape: f32[1,128], index: 1, kind: input, shape index: {}]   ;;  %s2744_s2 = inlined_call_operand.vmem [shape: f32[1,128], index: 2, kind: input, shape index: {}]   ;;  %s2745_s3 = inlined_call_operand.vmem [shape: bf16[128,384], index: 3, kind: input, shape index: {}]   ;;  %s2746_s4 = inlined_call_operand.vmem [shape: f32[1,384], index: 4, kind: input, shape index: {}]   ;;  %s2747_s5 = inlined_call_operand.vmem [shape: bf16[128,128], index: 5, kind: input, shape index: {}]   ;;  %s2748_s6 = inlined_call_operand.vmem [shape: f32[1,128], index: 6, kind: input, shape index: {}]   ;;  %s2749_s7 = inlined_call_operand.vmem [shape: f32[1,128], index: 7, kind: input, shape index: {}]   ;;  %s2750_s8 = inlined_call_operand.vmem [shape: f32[1,128], index: 8, kind: input, shape index: {}]   ;;  %s2751_s9 = inlined_call_operand.vmem [shape: bf16[128,512], index: 9, kind: input, shape index: {}]   ;;  %s2752_s10 = inlined_call_operand.vmem [shape: f32[1,512], index: 10, kind: input, shape index: {}]   ;;  %s2753_s11 = inlined_call_operand.vmem [shape: bf16[512,128], index: 11, kind: input, shape index: {}]   ;;  %s2754_s12 = inlined_call_operand.vmem [shape: f32[1,128], index: 12, kind: input, shape index: {}]   ;;  %s2755_s13 = inlined_call_operand.vmem [shape: f32[2,5,128], index: 13, kind: output, shape index: {}]  }
   0x1 LB: > { %s1839_s26 = sadd.s32 4294967295, %s2247_s25   ;;  %p1843_p0 = scmp.ge.s32.totalorder %s2247_s25, 1  ;;  %s2247_s25 = sphi %s2324_s25, %s23_s25  }
   0x2   : > { %p386_p1 = scmp.lt.s32.totalorder %s2247_s25, 3 }
   0x4   : > { %p387_p2 = pnand %p1843_p0, %p386_p1 }
   0x5   : > { %p428_p3 = scmp.lt.s32.totalorder (!%p387_p2), %s1839_s26, 1  ;;  %vm440_vm0 = vcmask (!%p387_p2), 1044480   ;;  %v2101_v2 = vld [vmem:[%s2745_s3 + $0x4] ss:$12 sps:$4 sm:$0xff] (!%p387_p2)   ;;  %v2103_v3 = vld [vmem:[%s2745_s3] ss:$12 sps:$4 sm:$0xff] (!%p387_p2)   ;;  %v504_v43 = vlaneseq (!%p387_p2) }
   0x6   : > { %390 = sbr.rel (%p387_p2) target bundleno = 2954 (0xb8a), region = 72  ;;  %v2249_v4 = vmov (!%p387_p2), 0.0   ;;  %v2104_v5 = vld [vmem:[%s2745_s3 + $0x8] ss:$12 sps:$4 sm:$0xff] (!%p387_p2)   ;;  %v2107_v7 = vld [vmem:[%s2745_s3 + $0x18] ss:$12 sps:$4 sm:$0xff] (!%p387_p2)   ;;  %647 = vmatprep.subr.bf16.mxu0 (!%p387_p2), %v2101_v2 }
   0x7   : > { %2024 = vmatprep.subr.bf16.mxu1 (!%p387_p2), %v2249_v4  ;;  %v2105_v6 = vld [vmem:[%s2745_s3 + $0x1c] ss:$12 sps:$4 sm:$0xff] (!%p387_p2)   ;;  %v2108_v8 = vld [vmem:[%s2745_s3 + $0x20] ss:$12 sps:$4 sm:$0xff] (!%p387_p2)   ;;  %648 = vmatpush1.bf16.msra.mxu0 (!%p387_p2), %v2103_v3  ;;  %v2112_v16 = vld [vmem:[%s2745_s3 + $0x38] ss:$12 sps:$4 sm:$0xff] (!%p387_p2)  }
   0x8   : > { %v2109_v9 = vld [vmem:[%s2745_s3 + $0x34] ss:$12 sps:$4 sm:$0xff] (!%p387_p2)   ;;  %2025 = vmatpush3.bf16.msra.mxu1 (!%p387_p2), %v2104_v5  ;;  %649 = vmatprep.subr.bf16.mxu0 (!%p387_p2), %v2105_v6  ;;  %v2111_v15 = vld [vmem:[%s2745_s3 + $0x30] ss:$12 sps:$4 sm:$0xff] (!%p387_p2)   ;;  %v2113_v17 = vld [vmem:[%s2745_s3 + $0x4c] ss:$12 sps:$4 sm:$0xff] (!%p387_p2)  }
   0x9   : > { %2026 = vmatprep.subr.bf16.mxu1 (!%p387_p2), %v2249_v4  ;;  %v2115_v18 = vld [vmem:[%s2745_s3 + $0x48] ss:$12 sps:$4 sm:$0xff] (!%p387_p2)   ;;  %v2116_v19 = vld [vmem:[%s2745_s3 + $0x50] ss:$12 sps:$4 sm:$0xff] (!%p387_p2)   ;;  %v2119_v21 = vld [vmem:[%s2745_s3 + $0x60] ss:$12 sps:$4 sm:$0xff] (!%p387_p2)  }
   0xa   : > { %v2117_v20 = vld [vmem:[%s2745_s3 + $0x64] ss:$12 sps:$4 sm:$0xff] (!%p387_p2)   ;;  %v2120_v22 = vld [vmem:[%s2745_s3 + $0x68] ss:$12 sps:$4 sm:$0xff] (!%p387_p2)   ;;  %v2124_v25 = vld [vmem:[%s2745_s3 + $0x80] ss:$12 sps:$4 sm:$0xff] (!%p387_p2)  }
   0xb   : > { %650 = vmatpush1.bf16.msra.mxu0 (!%p387_p2), %v2107_v7  ;;  %v2121_v23 = vld [vmem:[%s2745_s3 + $0x7c] ss:$12 sps:$4 sm:$0xff] (!%p387_p2)   ;;  %v2123_v24 = vld [vmem:[%s2745_s3 + $0x78] ss:$12 sps:$4 sm:$0xff] (!%p387_p2)   ;;  %v2125_v26 = vld [vmem:[%s2745_s3 + $0x94] ss:$12 sps:$4 sm:$0xff] (!%p387_p2)  }
   0xc   : > { %2027 = vmatpush3.bf16.msra.mxu1 (!%p387_p2), %v2108_v8  ;;  %651 = vmatprep.subr.bf16.mxu0 (!%p387_p2), %v2109_v9  ;;  %v2250_v27 = vmov (!%p387_p2), 0   ;;  %vm2251_vm1 = vmmov (!%p387_p2), 0   ;;  %v2127_v28 = vld [vmem:[%s2745_s3 + $0x90] ss:$12 sps:$4 sm:$0xff] (!%p387_p2)   ;;  %v2128_v29 = vld [vmem:[%s2745_s3 + $0x98] ss:$12 sps:$4 sm:$0xff] (!%p387_p2)  }
   0xd   : > { %s2757_s26 = smov (!%p428_p3, %s1839_s26), 1  ;;  %2028 = vmatprep.subr.bf16.mxu1 %v2249_v4  ;;  %679 = vmatprep.mubr.bf16.mxu0 %v2250_v27  ;;  %v2129_v30 = vld [vmem:[%s2745_s3 + $0xac] ss:$12 sps:$4 sm:$0xff]   ;;  %v2131_v31 = vld [vmem:[%s2745_s3 + $0xa8] ss:$12 sps:$4 sm:$0xff]   ;;  %v2441_v44 = vshrl.u32 %v504_v43, 7 }
   0xe   : > { %s1844_s27 = sshll.u32 %s2757_s26, 3  ;;  %2040 = vmatprep.mubr.msk.bf16.mxu1 %vm2251_vm1, %v2249_v4  ;;  %v2132_v32 = vld [vmem:[%s2745_s3 + $0xb0] ss:$12 sps:$4 sm:$0xff]   ;;  %v1846_v37 = vld [vmem:[%s2743_s1] ss:$0 sm:$0xff]  ;;  %vm731_vm2 = vcmask 523264  }
   0xf   : > { %s431_s30 = scalar_lea.vmem %s2742_s0, %s1844_s27  ;;  %652 = vmatpush1.bf16.msra.mxu0 %v2111_v15  ;;  %v1847_v39 = vld [vmem:[%s2744_s2] ss:$0 sm:$0xff]  ;;  %v510_v45 = vsub.s32 1, %v2441_v44  ;;  %v514_v47 = vsub.s32 2, %v2441_v44  ;;  %v506_v49 = vsub.s32 0, %v2441_v44  ;;  %vm796_vm3 = vcmask 1041408   ;;  %s435_s16 = scalar_lea.vmem %s2755_s13, %s1844_s27 }
  0x10   : > { %v2340_v0 = vld [vmem:[%s431_s30] sm:$0x1f]  ;;  %2029 = vmatpush3.bf16.msra.mxu1 %v2112_v16  ;;  %653 = vmatprep.subr.bf16.mxu0 %v2113_v17  ;;  %s2252_s29 = smov 64   ;;  %vm797_vm4 = vcmask 1042432   ;;  %vm779_vm5 = vcmask 36864   ;;  %vm792_vm6 = vcmask 39936  }
  0x11   : > { %v441_v1 = vsel %vm440_vm0, %v2340_v0, 0.0  ;;  %2030 = vmatprep.subr.bf16.mxu1 %v2249_v4  ;;  %v501_v46 = vld [vmem:[%s2746_s4] sm:$0x7] }
  0x12   : > { %442 = vadd.xlane.f32.xlu0 %v441_v1  ;;  %v511_v48 = vrot.slane %v501_v46, %v510_v45  ;;  %v515_v52 = vrot.slane %v501_v46, %v514_v47  ;;  %v507_v60 = vrot.slane %v501_v46, %v506_v49  ;;  %v2253_v1 = vmov 65535  }
  0x13   : > { %654 = vmatpush1.bf16.msra.mxu0 %v2115_v18  ;;  %v798_v2 = vsel %vm796_vm3, 4294967295, %v2253_v1 }
  0x14   : > { %2031 = vmatpush3.bf16.msra.mxu1 %v2116_v19  ;;  %655 = vmatprep.subr.bf16.mxu0 %v2117_v20  ;;  %v799_v6 = vsel %vm797_vm4, %v798_v2, 0 }
  0x15   : > { %2032 = vmatprep.subr.bf16.mxu1 %v2249_v4 }
  0x17   : > { %656 = vmatpush1.bf16.msra.mxu0 %v2119_v21 }
  0x18   : > { %2033 = vmatpush3.bf16.msra.mxu1 %v2120_v22  ;;  %657 = vmatprep.subr.bf16.mxu0 %v2121_v23 }
  0x19   : > { %2034 = vmatprep.subr.bf16.mxu1 %v2249_v4 }
  0x1b   : > { %658 = vmatpush1.bf16.msra.mxu0 %v2123_v24 }
  0x1c   : > { %2035 = vmatpush3.bf16.msra.mxu1 %v2124_v25  ;;  %659 = vmatprep.subr.bf16.mxu0 %v2125_v26 }
  0x1d   : > { %2036 = vmatprep.subr.bf16.mxu1 %v2249_v4 }
  0x1f   : > { %660 = vmatpush1.bf16.msra.mxu0 %v2127_v28 }
  0x20   : > { %2037 = vmatpush3.bf16.msra.mxu1 %v2128_v29  ;;  %661 = vmatprep.subr.bf16.mxu0 %v2129_v30 }
  0x21   : > { %2038 = vmatprep.subr.bf16.mxu1 %v2249_v4 }
  0x23   : > { %662 = vmatpush1.bf16.msra.mxu0 %v2131_v31 }
  0x24   : > { %2039 = vmatpush3.bf16.msra.mxu1 %v2132_v32  ;;  %2068 = vmatprep.subr.bf16.mxu0 %v2249_v4 }
  0x25   : > { %2044 = vmatprep.subr.bf16.mxu1 %v2249_v4 }
  0x9f   : > { %v443_v10 = vpop.xlane.xlu0 %442 }
  0xa0   : > { %v445_v11 = vmul.f32 0.0078125, %v443_v10 }
  0xa2   : > { %v446_v12 = vsub.f32 %v2340_v0, %v445_v11 }
  0xa4   : > { %v447_v13 = vmul.f32 %v446_v12, %v446_v12 }
  0xa6   : > { %v448_v14 = vsel %vm440_vm0, %v447_v13, 0.0 }
  0xa7   : > { %449 = vadd.xlane.f32.xlu0 %v448_v14 }
 0x134   : > { %v450_v33 = vpop.xlane.xlu0 %449 }
 0x135   : > { %v451_v34 = vmul.f32 0.0078125, %v450_v33 }
 0x137   : > { %v452_v35 = vadd.f32 1e-06, %v451_v34 }
 0x139   : > { %2221 = vrsqrt.f32 %v452_v35 }
 0x143   : > { %v2222_v36 = vpop.eup %2221 }
 0x144   : > { %v454_v38 = vmul.f32 %v2222_v36, %v446_v12 }
 0x146   : > { %v461_v40 = vmul.f32 %v1846_v37, %v454_v38 }
 0x148   : > { %v468_v41 = vadd.f32 %v1847_v39, %v461_v40 }
 0x14a   : > { %v502_v42 = vpack.c.bf16 %v468_v41, %v468_v41 }
 0x14c   : > { %680 = vmatmul.mubr.bf16.vlgmr.msra.gmra.mrb[0].mxu0 %v502_v42  ;;  %2041 = vmatmul.mubr.bf16.vlgmr.msra.gmra.mrb[0].mxu1 %v502_v42 }
 0x14d   : > { %2046 = vmatprep.mubr.msk.bf16.mxu1 %vm2251_vm1, %v2249_v4  ;;  %2084 = vmatprep.mubr.msk.bf16.mxu0 %vm2251_vm1, %v2249_v4 }
 0x21f   : > { %v681_v50 = vpop.f32.mrb[0].mxu0  ;;  %v722_v51 = vpop.f32.mrb[0].mxu1 }
 0x220   : > { %v683_v53 = vpop.f32.mrb[1].mxu0  ;;  %v2042_v54 = vpop.f32.mrb[1].mxu1  ;;  %v723_v62 = vadd.f32 %v722_v51, %v515_v52  ;;  %v682_v3 = vadd.f32 %v681_v50, %v507_v60  ;;  %v2140_v60 = vld [vmem:[%s2747_s5 + $0x38] sm:$0xff]  }
 0x221   : > { %v684_v55 = vadd.f32 %v683_v53, %v511_v48  ;;  %v685_v56 = vpop.f32.mrb[2].mxu0  ;;  %v725_v57 = vpop.f32.mrb[2].mxu1  ;;  %v2133_v53 = vld [vmem:[%s2747_s5] sm:$0xff]   ;;  %v2134_v54 = vld [vmem:[%s2747_s5 + $0x8] sm:$0xff]  }
 0x222   : > { %v686_v58 = vpop.f32.mrb[3].mxu0  ;;  %v2043_v59 = vpop.f32.mrb[3].mxu1  ;;  %v730_v5 = vpack.c.bf16 %v723_v62, %v723_v62  ;;  %v728_v7 = vpack.c.bf16 %v682_v3, %v682_v3  ;;  %2069 = vmatpush3.bf16.msra.mxu0 %v2133_v53  ;;  %v2136_v56 = vld [vmem:[%s2747_s5 + $0x18] sm:$0xff]   ;;  %v2137_v57 = vld [vmem:[%s2747_s5 + $0x20] sm:$0xff]  }
 0x223   : > { %v729_v61 = vpack.c.bf16 %v684_v55, %v684_v55  ;;  %2070 = vmatprep.subr.bf16.mxu0 %v2249_v4  ;;  %v2135_v55 = vld [vmem:[%s2747_s5 + $0x10] sm:$0xff]   ;;  %v2138_v58 = vld [vmem:[%s2747_s5 + $0x28] sm:$0xff]  }
 0x224   : > { %v801_v8 = vand.u32 %v799_v6, %v730_v5  ;;  %v2139_v59 = vld [vmem:[%s2747_s5 + $0x30] sm:$0xff]  }
 0x225   : > { %v736_v63 = vsel %vm731_vm2, %v729_v61, 0  ;;  %847 = vrot.lane.b32.xlu0 %v729_v61, %s2252_s29 }
 0x226   : > { %2045 = vmatpush3.bf16.xpose.msra.mxu1 %v736_v63  ;;  %2071 = vmatpush3.bf16.msra.mxu0 %v2134_v54 }
 0x227   : > { %2050 = vmatprep.subr.bf16.mxu1 %v2249_v4  ;;  %2072 = vmatprep.subr.bf16.mxu0 %v2249_v4 }
 0x22a   : > { %2073 = vmatpush3.bf16.msra.mxu0 %v2135_v55 }
 0x22b   : > { %2074 = vmatprep.subr.bf16.mxu0 %v2249_v4 }
 0x22d   : > { %2047 = vmatmul.mubr.msk.bf16.vlgmr.msra.gmra.mrb[4].mxu1 %vm731_vm2, %v728_v7 }
 0x22e   : > { %2051 = vmatpush3.bf16.msra.mxu1 %v801_v8  ;;  %2052 = vmatprep.mubr.msk.bf16.mxu1 %vm2251_vm1, %v2249_v4 }
 0x22f   : > { %2056 = vmatprep.subr.bf16.mxu1 %v2249_v4  ;;  %2075 = vmatpush3.bf16.msra.mxu0 %v2136_v56 }
 0x230   : > { %2076 = vmatprep.subr.bf16.mxu0 %v2249_v4 }
 0x233   : > { %2077 = vmatpush3.bf16.msra.mxu0 %v2137_v57  ;;  %v1885_v57 = vld [vmem:[%s2749_s7] ss:$0 sm:$0xff] }
 0x234   : > { %2078 = vmatprep.subr.bf16.mxu0 %v2249_v4 }
 0x237   : > { %2079 = vmatpush3.bf16.msra.mxu0 %v2138_v58 }
 0x238   : > { %2080 = vmatprep.subr.bf16.mxu0 %v2249_v4 }
 0x23b   : > { %2081 = vmatpush3.bf16.msra.mxu0 %v2139_v59  ;;  %v1886_v59 = vld [vmem:[%s2750_s8] ss:$0 sm:$0xff] }
 0x23c   : > { %2082 = vmatprep.subr.bf16.mxu0 %v2249_v4 }
 0x23f   : > { %2083 = vmatpush3.bf16.msra.mxu0 %v2140_v60 }
 0x297   : > { %v848_v23 = vpop.permute.xlu0 %847 }
 0x298   : > { %v853_v25 = vsel %vm731_vm2, %v848_v23, 0 }
 0x300   : > { %v772_v9 = vpop.f32.mrb[4].mxu1 }
 0x301   : > { %v778_v10 = vmul.f32 0.125, %v772_v9  ;;  %v2048_v11 = vpop.f32.mrb[5].mxu1 }
 0x302   : > { %v775_v12 = vpop.f32.mrb[6].mxu1 }
 0x303   : > { %v2049_v13 = vpop.f32.mrb[7].mxu1  ;;  %v780_v14 = vsel %vm779_vm5, %v778_v10, -inf }
 0x304   : > { %781 = vmax.xlane.f32.xlu1 %v780_v14  ;;  %v2143_v13 = vld [vmem:[%s2751_s9 + $0x4] ss:$16 sps:$4 sm:$0xff]   ;;  %v2144_v14 = vld [vmem:[%s2751_s9 + $0x8] ss:$16 sps:$4 sm:$0xff]  }
 0x391   : > { %v782_v15 = vpop.xlane.xlu1 %781 }
 0x392   : > { %v783_v16 = vsub.f32 %v778_v10, %v782_v15  ;;  %v2149_v15 = vld [vmem:[%s2751_s9 + $0x24] ss:$16 sps:$4 sm:$0xff]  }
 0x394   : > { %v784_v17 = vmul.f32 1.442695, %v783_v16  ;;  %v2152_v16 = vld [vmem:[%s2751_s9 + $0x2c] ss:$16 sps:$4 sm:$0xff]  }
 0x396   : > { %2223 = vpow2.f32 %v784_v17  ;;  %v2147_v17 = vld [vmem:[%s2751_s9 + $0x20] ss:$16 sps:$4 sm:$0xff]  }
 0x3a0   : > { %v2224_v18 = vpop.eup %2223 }
 0x3a1   : > { %v786_v19 = vsel %vm779_vm5, %v2224_v18, 0.0 }
 0x3a2   : > { %787 = vadd.xlane.f32.xlu1 %v786_v19  ;;  %v2155_v19 = vld [vmem:[%s2751_s9 + $0x44] ss:$16 sps:$4 sm:$0xff]  }
 0x3b3   : > { %844 = vrot.lane.b32.xlu1 %v728_v7, %s2252_s29 }
 0x42f   : > { %v788_v20 = vpop.xlane.xlu1 %787 }
 0x430   : > { %2225 = vrcp.f32 %v788_v20  ;;  %v2158_v20 = vld [vmem:[%s2751_s9 + $0x4c] ss:$16 sps:$4 sm:$0xff]  }
 0x433   : > { %v845_v26 = vpop.permute.xlu1 %844 }
 0x43a   : > { %v2226_v21 = vpop.eup %2225 }
 0x43b   : > { %v790_v22 = vmul.f32 %v2226_v21, %v2224_v18  ;;  %v2150_v18 = vld [vmem:[%s2751_s9 + $0x28] ss:$16 sps:$4 sm:$0xff]   ;;  %v2153_v21 = vld [vmem:[%s2751_s9 + $0x40] ss:$16 sps:$4 sm:$0xff]  }
 0x43d   : > { %v791_v24 = vpack.c.bf16 %v790_v22, %v790_v22  ;;  %v2156_v22 = vld [vmem:[%s2751_s9 + $0x48] ss:$16 sps:$4 sm:$0xff]  }
 0x43f   : > { %2053 = vmatmul.mubr.msk.bf16.vlgmr.msra.gmra.mrb[8].mxu1 %vm792_vm6, %v791_v24 }
 0x440   : > { %2057 = vmatpush3.bf16.xpose.msra.mxu1 %v853_v25  ;;  %2058 = vmatprep.mubr.msk.bf16.mxu1 %vm2251_vm1, %v2249_v4 }
 0x441   : > { %2062 = vmatprep.subr.bf16.mxu1 %v2249_v4 }
 0x447   : > { %2059 = vmatmul.mubr.msk.bf16.vlgmr.msra.gmra.mrb[12].mxu1 %vm731_vm2, %v845_v26 }
 0x448   : > { %2064 = vmatprep.mubr.msk.bf16.mxu1 %vm2251_vm1, %v2249_v4  ;;  %v1876_v4 = vld [vmem:[%s2748_s6] ss:$0 sm:$0xff] }
 0x512   : > { %v837_v28 = vpop.f32.mrb[8].mxu1 }
 0x513   : > { %v2054_v29 = vpop.f32.mrb[9].mxu1 }
 0x514   : > { %v840_v30 = vpop.f32.mrb[10].mxu1  ;;  %v2161_v29 = vld [vmem:[%s2751_s9 + $0x64] ss:$16 sps:$4 sm:$0xff]  }
 0x515   : > { %v2055_v31 = vpop.f32.mrb[11].mxu1  ;;  %v2164_v30 = vld [vmem:[%s2751_s9 + $0x6c] ss:$16 sps:$4 sm:$0xff]  }
 0x516   : > { %v2159_v31 = vld [vmem:[%s2751_s9 + $0x60] ss:$16 sps:$4 sm:$0xff]  }
 0x51a   : > { %v889_v32 = vpop.f32.mrb[12].mxu1 }
 0x51b   : > { %v895_v33 = vmul.f32 0.125, %v889_v32  ;;  %v2060_v34 = vpop.f32.mrb[13].mxu1  ;;  %v2162_v32 = vld [vmem:[%s2751_s9 + $0x68] ss:$16 sps:$4 sm:$0xff]  }
 0x51c   : > { %v892_v35 = vpop.f32.mrb[14].mxu1  ;;  %v2170_v34 = vld [vmem:[%s2751_s9 + $0x8c] ss:$16 sps:$4 sm:$0xff]  }
 0x51d   : > { %v2061_v36 = vpop.f32.mrb[15].mxu1  ;;  %v896_v37 = vsel %vm779_vm5, %v895_v33, -inf  ;;  %v2165_v35 = vld [vmem:[%s2751_s9 + $0x80] ss:$16 sps:$4 sm:$0xff]  }
 0x51e   : > { %897 = vmax.xlane.f32.xlu1 %v896_v37  ;;  %v2168_v36 = vld [vmem:[%s2751_s9 + $0x88] ss:$16 sps:$4 sm:$0xff]   ;;  %v2173_v37 = vld [vmem:[%s2751_s9 + $0xa4] ss:$16 sps:$4 sm:$0xff]  }
 0x5ab   : > { %v898_v38 = vpop.xlane.xlu1 %897 }
 0x5ac   : > { %v899_v39 = vsub.f32 %v895_v33, %v898_v38  ;;  %v2167_v33 = vld [vmem:[%s2751_s9 + $0x84] ss:$16 sps:$4 sm:$0xff]   ;;  %v2176_v38 = vld [vmem:[%s2751_s9 + $0xac] ss:$16 sps:$4 sm:$0xff]  }
 0x5ae   : > { %v900_v40 = vmul.f32 1.442695, %v899_v39  ;;  %v2171_v39 = vld [vmem:[%s2751_s9 + $0xa0] ss:$16 sps:$4 sm:$0xff]  }
 0x5b0   : > { %2227 = vpow2.f32 %v900_v40  ;;  %v2174_v40 = vld [vmem:[%s2751_s9 + $0xa8] ss:$16 sps:$4 sm:$0xff]  }
 0x5ba   : > { %v2228_v41 = vpop.eup %2227 }
 0x5bb   : > { %v902_v42 = vsel %vm779_vm5, %v2228_v41, 0.0 }
 0x5bc   : > { %903 = vadd.xlane.f32.xlu0 %v902_v42  ;;  %v2182_v42 = vld [vmem:[%s2751_s9 + $0xcc] ss:$16 sps:$4 sm:$0xff]  }
 0x5d2   : > { %909 = vrot.lane.b32.xlu0 %v730_v5, %s2252_s29 }
 0x649   : > { %v904_v43 = vpop.xlane.xlu0 %903 }
 0x64a   : > { %2229 = vrcp.f32 %v904_v43  ;;  %v2177_v43 = vld [vmem:[%s2751_s9 + $0xc0] ss:$16 sps:$4 sm:$0xff]  }
 0x64d   : > { %v910_v46 = vpop.permute.xlu0 %909 }
 0x64e   : > { %v915_v48 = vand.u32 %v910_v46, %v799_v6  ;;  %v2180_v46 = vld [vmem:[%s2751_s9 + $0xc8] ss:$16 sps:$4 sm:$0xff]  }
 0x650   : > { %2063 = vmatpush3.bf16.msra.mxu1 %v915_v48  ;;  %v2185_v48 = vld [vmem:[%s2751_s9 + $0xe4] ss:$16 sps:$4 sm:$0xff]  }
 0x651   : > { %1319 = vmatprep.subr.bf16.mxu1 %v2143_v13  ;;  %v2202_v13 = vld [vmem:[%s2753_s11 + $0xd8] sm:$0xff]  }
 0x654   : > { %v2230_v50 = vpop.eup %2229 }
 0x655   : > { %v906_v51 = vmul.f32 %v2230_v50, %v2228_v41  ;;  %v2179_v41 = vld [vmem:[%s2751_s9 + $0xc4] ss:$16 sps:$4 sm:$0xff]   ;;  %v2188_v50 = vld [vmem:[%s2751_s9 + $0xec] ss:$16 sps:$4 sm:$0xff]  }
 0x657   : > { %v907_v52 = vpack.c.bf16 %v906_v51, %v906_v51  ;;  %v2183_v51 = vld [vmem:[%s2751_s9 + $0xe0] ss:$16 sps:$4 sm:$0xff]  }
 0x659   : > { %2065 = vmatmul.mubr.msk.bf16.vlgmr.msra.gmra.mrb[16].mxu1 %vm792_vm6, %v907_v52  ;;  %v2186_v52 = vld [vmem:[%s2751_s9 + $0xe8] ss:$16 sps:$4 sm:$0xff]  }
 0x65a   : > { %1351 = vmatprep.mubr.bf16.mxu1 %v2250_v27 }
 0x72c   : > { %v951_v61 = vpop.f32.mrb[16].mxu1 }
 0x72d   : > { %958 = vrot.lane.b32.xlu1 %v951_v61, %s2252_s29  ;;  %v2066_v62 = vpop.f32.mrb[17].mxu1 }
 0x72e   : > { %v954_v63 = vpop.f32.mrb[18].mxu1 }
 0x72f   : > { %v2067_v1 = vpop.f32.mrb[19].mxu1  ;;  %v2189_v63 = vld [vmem:[%s2753_s11 + $0x40] sm:$0xff]  }
 0x730   : > { %v2190_v1 = vld [vmem:[%s2753_s11 + $0xc0] sm:$0xff]  }
 0x79f   : > { %v959_v2 = vpop.permute.xlu1 %958 }
 0x7a0   : > { %v961_v3 = vsel %vm731_vm2, %v837_v28, %v959_v2  ;;  %v2191_v2 = vld [vmem:[%s2753_s11] sm:$0xff]  }
 0x7a1   : > { %v979_v5 = vpack.c.bf16 %v961_v3, %v961_v3  ;;  %v2192_v3 = vld [vmem:[%s2753_s11 + $0x80] sm:$0xff]  }
 0x7a3   : > { %2085 = vmatmul.mubr.bf16.vlgmr.msra.gmra.mrb[4].mxu0 %v979_v5  ;;  %v2193_v5 = vld [vmem:[%s2753_s11 + $0x48] sm:$0xff]  }
 0x7a4   : > { %1392 = vmatprep.mubr.bf16.mxu0 %v2250_v27  ;;  %v2141_v27 = vld [vmem:[%s2751_s9] ss:$16 sps:$4 sm:$0xff]  }
 0x7a5   : > { %1320 = vmatpush1.bf16.msra.mxu1 %v2141_v27  ;;  %v2201_v27 = vld [vmem:[%s2753_s11 + $0x58] sm:$0xff]  }
 0x7a6   : > { %1321 = vmatprep.subr.bf16.mxu1 %v2149_v15  ;;  %v2205_v15 = vld [vmem:[%s2753_s11 + $0x60] sm:$0xff]  }
 0x7a9   : > { %1322 = vmatpush1.bf16.msra.mxu1 %v2147_v17  ;;  %v2207_v17 = vld [vmem:[%s2753_s11 + $0x20] sm:$0xff]  }
 0x7aa   : > { %1323 = vmatprep.subr.bf16.mxu1 %v2155_v19  ;;  %v2209_v19 = vld [vmem:[%s2753_s11 + $0x68] sm:$0xff]  }
 0x7ad   : > { %1324 = vmatpush1.bf16.msra.mxu1 %v2153_v21  ;;  %v2211_v21 = vld [vmem:[%s2753_s11 + $0x28] sm:$0xff]  }
 0x7ae   : > { %1325 = vmatprep.subr.bf16.mxu1 %v2161_v29  ;;  %v2218_v29 = vld [vmem:[%s2753_s11 + $0xf8] sm:$0xff]  }
 0x7b1   : > { %1326 = vmatpush1.bf16.msra.mxu1 %v2159_v31  ;;  %v2220_v31 = vld [vmem:[%s2753_s11 + $0xb8] sm:$0xff]  }
 0x7b2   : > { %1327 = vmatprep.subr.bf16.mxu1 %v2167_v33  ;;  %v1153_v33 = vsub.s32 3, %v2441_v44 }
 0x7b5   : > { %1328 = vmatpush1.bf16.msra.mxu1 %v2165_v35 }
 0x7b6   : > { %1329 = vmatprep.subr.bf16.mxu1 %v2173_v37 }
 0x7b9   : > { %1330 = vmatpush1.bf16.msra.mxu1 %v2171_v39 }
 0x7ba   : > { %1331 = vmatprep.subr.bf16.mxu1 %v2179_v41 }
 0x7bd   : > { %1332 = vmatpush1.bf16.msra.mxu1 %v2177_v43 }
 0x7be   : > { %1333 = vmatprep.subr.bf16.mxu1 %v2185_v48 }
 0x7c1   : > { %1334 = vmatpush1.bf16.msra.mxu1 %v2183_v51 }
 0x7c2   : > { %1980 = vmatprep.subr.bf16.mxu1 %v2189_v63 }
 0x876   : > { %v1068_v6 = vpop.f32.mrb[4].mxu0 }
 0x877   : > { %v1069_v7 = vadd.f32 %v1876_v4, %v1068_v6  ;;  %v2086_v8 = vpop.f32.mrb[5].mxu0  ;;  %v2194_v4 = vld [vmem:[%s2753_s11 + $0xc8] sm:$0xff]  }
 0x878   : > { %v1071_v9 = vpop.f32.mrb[6].mxu0  ;;  %v2195_v6 = vld [vmem:[%s2753_s11 + $0x8] sm:$0xff]   ;;  %v2197_v8 = vld [vmem:[%s2753_s11 + $0x50] sm:$0xff]  }
 0x879   : > { %v2516_v10 = vadd.f32 %v1069_v7, %v2340_v0  ;;  %v2087_v11 = vpop.f32.mrb[7].mxu0  ;;  %v2146_v0 = vld [vmem:[%s2751_s9 + $0xc] ss:$16 sps:$4 sm:$0xff]   ;;  %v2198_v9 = vld [vmem:[%s2753_s11 + $0xd0] sm:$0xff]  }
 0x87a   : > { %1360 = vmatprep.subr.bf16.mxu0 %v2146_v0  ;;  %v2196_v7 = vld [vmem:[%s2753_s11 + $0x88] sm:$0xff]   ;;  %v2199_v11 = vld [vmem:[%s2753_s11 + $0x10] sm:$0xff]   ;;  %v2204_v0 = vld [vmem:[%s2753_s11 + $0x98] sm:$0xff]  }
 0x87b   : > { %v1077_v12 = vsel %vm440_vm0, %v2516_v10, 0.0  ;;  %1361 = vmatpush1.bf16.msra.mxu0 %v2144_v14  ;;  %v2203_v14 = vld [vmem:[%s2753_s11 + $0x18] sm:$0xff]  }
 0x87c   : > { %1078 = vadd.xlane.f32.xlu1 %v1077_v12  ;;  %1362 = vmatprep.subr.bf16.mxu0 %v2152_v16  ;;  %v2200_v12 = vld [vmem:[%s2753_s11 + $0x90] sm:$0xff]   ;;  %v2206_v16 = vld [vmem:[%s2753_s11 + $0xe0] sm:$0xff]  }
 0x87f   : > { %1363 = vmatpush1.bf16.msra.mxu0 %v2150_v18  ;;  %v2208_v18 = vld [vmem:[%s2753_s11 + $0xa0] sm:$0xff]  }
 0x880   : > { %1364 = vmatprep.subr.bf16.mxu0 %v2158_v20  ;;  %v2210_v20 = vld [vmem:[%s2753_s11 + $0xe8] sm:$0xff]  }
 0x883   : > { %1365 = vmatpush1.bf16.msra.mxu0 %v2156_v22  ;;  %v2212_v22 = vld [vmem:[%s2753_s11 + $0xa8] sm:$0xff]  }
 0x884   : > { %1366 = vmatprep.subr.bf16.mxu0 %v2164_v30  ;;  %v2219_v30 = vld [vmem:[%s2753_s11 + $0x38] sm:$0xff]  }
 0x887   : > { %1367 = vmatpush1.bf16.msra.mxu0 %v2162_v32  ;;  %v1136_v32 = vld [vmem:[%s2752_s10] sm:$0xf] }
 0x888   : > { %1368 = vmatprep.subr.bf16.mxu0 %v2170_v34  ;;  %v1142_v34 = vrot.slane %v1136_v32, %v506_v49  ;;  %v1150_v35 = vrot.slane %v1136_v32, %v514_v47  ;;  %v1154_v37 = vrot.slane %v1136_v32, %v1153_v33 }
 0x88b   : > { %1369 = vmatpush1.bf16.msra.mxu0 %v2168_v36  ;;  %v1146_v36 = vrot.slane %v1136_v32, %v510_v45 }
 0x88c   : > { %1370 = vmatprep.subr.bf16.mxu0 %v2176_v38 }
 0x88f   : > { %1371 = vmatpush1.bf16.msra.mxu0 %v2174_v40 }
 0x890   : > { %1372 = vmatprep.subr.bf16.mxu0 %v2182_v42 }
 0x893   : > { %1373 = vmatpush1.bf16.msra.mxu0 %v2180_v46 }
 0x894   : > { %1374 = vmatprep.subr.bf16.mxu0 %v2188_v50 }
 0x897   : > { %1375 = vmatpush1.bf16.msra.mxu0 %v2186_v52 }
 0x898   : > { %2002 = vmatprep.subr.bf16.mxu0 %v2190_v1 }
 0x909   : > { %v1079_v23 = vpop.xlane.xlu1 %1078 }
 0x90a   : > { %v1080_v24 = vmul.f32 0.0078125, %v1079_v23  ;;  %v2213_v23 = vld [vmem:[%s2753_s11 + $0x70] sm:$0xff]  }
 0x90c   : > { %v1081_v25 = vsub.f32 %v2516_v10, %v1080_v24  ;;  %v2214_v24 = vld [vmem:[%s2753_s11 + $0xf0] sm:$0xff]  }
 0x90e   : > { %v1082_v26 = vmul.f32 %v1081_v25, %v1081_v25 }
 0x910   : > { %v1083_v28 = vsel %vm440_vm0, %v1082_v26, 0.0  ;;  %v2216_v26 = vld [vmem:[%s2753_s11 + $0xb0] sm:$0xff]  }
 0x911   : > { %1084 = vadd.xlane.f32.xlu0 %v1083_v28  ;;  %v2217_v28 = vld [vmem:[%s2753_s11 + $0x78] sm:$0xff]  }
 0x99e   : > { %v1085_v53 = vpop.xlane.xlu0 %1084 }
 0x99f   : > { %v1086_v54 = vmul.f32 0.0078125, %v1085_v53 }
 0x9a1   : > { %v1087_v55 = vadd.f32 1e-06, %v1086_v54 }
 0x9a3   : > { %2231 = vrsqrt.f32 %v1087_v55 }
 0x9ad   : > { %v2232_v56 = vpop.eup %2231 }
 0x9ae   : > { %v1089_v58 = vmul.f32 %v2232_v56, %v1081_v25  ;;  %v2215_v25 = vld [vmem:[%s2753_s11 + $0x30] sm:$0xff]  }
 0x9b0   : > { %v1096_v60 = vmul.f32 %v1885_v57, %v1089_v58 }
 0x9b2   : > { %v1103_v61 = vadd.f32 %v1886_v59, %v1096_v60 }
 0x9b4   : > { %v1137_v62 = vpack.c.bf16 %v1103_v61, %v1103_v61 }
 0x9b6   : > { %1352 = vmatmul.mubr.bf16.vlgmr.msra.gmra.mrb[20].mxu1 %v1137_v62  ;;  %1393 = vmatmul.mubr.bf16.vlgmr.msra.gmra.mrb[8].mxu0 %v1137_v62 }
 0x9b7   : > { %1981 = vmatpush3.bf16.msra.mxu1 %v2191_v2  ;;  %2003 = vmatpush3.bf16.msra.mxu0 %v2192_v3 }
 0x9b8   : > { %1982 = vmatprep.subr.bf16.mxu1 %v2193_v5  ;;  %2004 = vmatprep.subr.bf16.mxu0 %v2194_v4 }
 0x9bb   : > { %1983 = vmatpush3.bf16.msra.mxu1 %v2195_v6  ;;  %2005 = vmatpush3.bf16.msra.mxu0 %v2196_v7 }
 0x9bc   : > { %1984 = vmatprep.subr.bf16.mxu1 %v2197_v8  ;;  %2006 = vmatprep.subr.bf16.mxu0 %v2198_v9 }
 0x9bf   : > { %1985 = vmatpush3.bf16.msra.mxu1 %v2199_v11  ;;  %2007 = vmatpush3.bf16.msra.mxu0 %v2200_v12 }
 0x9c0   : > { %1986 = vmatprep.subr.bf16.mxu1 %v2201_v27  ;;  %2008 = vmatprep.subr.bf16.mxu0 %v2202_v13 }
 0x9c3   : > { %1987 = vmatpush3.bf16.msra.mxu1 %v2203_v14  ;;  %2009 = vmatpush3.bf16.msra.mxu0 %v2204_v0 }
 0x9c4   : > { %1988 = vmatprep.subr.bf16.mxu1 %v2205_v15  ;;  %2010 = vmatprep.subr.bf16.mxu0 %v2206_v16 }
 0x9c7   : > { %1989 = vmatpush3.bf16.msra.mxu1 %v2207_v17  ;;  %2011 = vmatpush3.bf16.msra.mxu0 %v2208_v18 }
 0x9c8   : > { %1990 = vmatprep.subr.bf16.mxu1 %v2209_v19  ;;  %2012 = vmatprep.subr.bf16.mxu0 %v2210_v20 }
 0x9cb   : > { %1991 = vmatpush3.bf16.msra.mxu1 %v2211_v21  ;;  %2013 = vmatpush3.bf16.msra.mxu0 %v2212_v22 }
 0x9cc   : > { %1992 = vmatprep.subr.bf16.mxu1 %v2213_v23  ;;  %2014 = vmatprep.subr.bf16.mxu0 %v2214_v24 }
 0x9cf   : > { %1993 = vmatpush3.bf16.msra.mxu1 %v2215_v25  ;;  %2015 = vmatpush3.bf16.msra.mxu0 %v2216_v26 }
 0x9d0   : > { %1994 = vmatprep.subr.bf16.mxu1 %v2217_v28  ;;  %2016 = vmatprep.subr.bf16.mxu0 %v2218_v29  ;;  %v1919_v29 = vld [vmem:[%s2754_s12] ss:$0 sm:$0xff] }
 0x9d3   : > { %1995 = vmatpush3.bf16.msra.mxu1 %v2219_v30  ;;  %2017 = vmatpush3.bf16.msra.mxu0 %v2220_v31 }
 0xa89   : > { %v1353_v38 = vpop.f32.mrb[20].mxu1  ;;  %v1394_v39 = vpop.f32.mrb[8].mxu0 }
 0xa8a   : > { %v1354_v40 = vadd.f32 %v1353_v38, %v1142_v34  ;;  %v1395_v41 = vadd.f32 %v1394_v39, %v1150_v35  ;;  %v1355_v42 = vpop.f32.mrb[21].mxu1  ;;  %v1396_v43 = vpop.f32.mrb[9].mxu0 }
 0xa8b   : > { %v1356_v46 = vadd.f32 %v1355_v42, %v1146_v36  ;;  %v1397_v48 = vadd.f32 %v1396_v43, %v1154_v37  ;;  %v1357_v50 = vpop.f32.mrb[22].mxu1  ;;  %v1398_v51 = vpop.f32.mrb[10].mxu0 }
 0xa8c   : > { %v1401_v52 = vmul.f32 %v1354_v40, %v1354_v40  ;;  %v1403_v53 = vmul.f32 %v1395_v41, %v1395_v41  ;;  %v1358_v49 = vpop.f32.mrb[23].mxu1  ;;  %v1399_v54 = vpop.f32.mrb[11].mxu0 }
 0xa8d   : > { %v1402_v55 = vmul.f32 %v1356_v46, %v1356_v46  ;;  %v1404_v47 = vmul.f32 %v1397_v48, %v1397_v48 }
 0xa8e   : > { %v1405_v56 = vmul.f32 %v1401_v52, %v1354_v40  ;;  %v1407_v44 = vmul.f32 %v1403_v53, %v1395_v41 }
 0xa8f   : > { %v1406_v45 = vmul.f32 %v1402_v55, %v1356_v46  ;;  %v1408_v57 = vmul.f32 %v1404_v47, %v1397_v48 }
 0xa90   : > { %v1409_v58 = vmul.f32 0.044715, %v1405_v56  ;;  %v1411_v59 = vmul.f32 0.044715, %v1407_v44 }
 0xa91   : > { %v1410_v60 = vmul.f32 0.044715, %v1406_v45  ;;  %v1412_v61 = vmul.f32 0.044715, %v1408_v57 }
 0xa92   : > { %v1413_v62 = vadd.f32 %v1409_v58, %v1354_v40  ;;  %v1415_v63 = vadd.f32 %v1411_v59, %v1395_v41 }
 0xa93   : > { %v1414_v1 = vadd.f32 %v1410_v60, %v1356_v46  ;;  %v1416_v2 = vadd.f32 %v1412_v61, %v1397_v48 }
 0xa94   : > { %v1417_v3 = vmul.f32 0.7978846, %v1413_v62  ;;  %v1419_v5 = vmul.f32 0.7978846, %v1415_v63 }
 0xa95   : > { %v1418_v4 = vmul.f32 0.7978846, %v1414_v1  ;;  %v1420_v6 = vmul.f32 0.7978846, %v1416_v2 }
 0xa96   : > { %2233 = vtanh.f32 %v1417_v3 }
 0xa97   : > { %2235 = vtanh.f32 %v1419_v5 }
 0xa98   : > { %2237 = vtanh.f32 %v1418_v4 }
 0xa99   : > { %2239 = vtanh.f32 %v1420_v6 }
 0xaa0   : > { %v2234_v7 = vpop.eup %2233 }
 0xaa1   : > { %v2236_v8 = vpop.eup %2235  ;;  %v1425_v9 = vadd.f32 1.0, %v2234_v7 }
 0xaa2   : > { %v2238_v11 = vpop.eup %2237  ;;  %v1427_v12 = vadd.f32 1.0, %v2236_v8 }
 0xaa3   : > { %v2240_v27 = vpop.eup %2239  ;;  %v1426_v13 = vadd.f32 1.0, %v2238_v11  ;;  %v1429_v14 = vmul.f32 0.5, %v1425_v9 }
 0xaa4   : > { %v1428_v0 = vadd.f32 1.0, %v2240_v27  ;;  %v1431_v15 = vmul.f32 0.5, %v1427_v12 }
 0xaa5   : > { %v1430_v16 = vmul.f32 0.5, %v1426_v13  ;;  %v1433_v18 = vmul.f32 %v1429_v14, %v1354_v40 }
 0xaa6   : > { %v1432_v17 = vmul.f32 0.5, %v1428_v0  ;;  %v1435_v20 = vmul.f32 %v1431_v15, %v1395_v41 }
 0xaa7   : > { %v1434_v19 = vmul.f32 %v1430_v16, %v1356_v46  ;;  %v1502_v24 = vpack.c.bf16 %v1433_v18, %v1433_v18 }
 0xaa8   : > { %v1436_v21 = vmul.f32 %v1432_v17, %v1397_v48  ;;  %v1504_v25 = vpack.c.bf16 %v1435_v20, %v1435_v20 }
 0xaa9   : > { %v1503_v22 = vpack.c.bf16 %v1434_v19, %v1434_v19 }
 0xaaa   : > { %v1505_v23 = vpack.c.bf16 %v1436_v21, %v1436_v21 }
 0xaab   : > { %1736 = vmatprep.mubr.bf16.mxu1 %v1503_v22 }
 0xaac   : > { %1776 = vmatprep.mubr.bf16.mxu0 %v1505_v23  ;;  %1737 = vmatmul.mubr.bf16.vlgmr.msra.gmra.mrb[24].mxu1 %v1502_v24 }
 0xaad   : > { %1777 = vmatmul.mubr.bf16.vlgmr.msra.gmra.mrb[12].mxu0 %v1504_v25 }
 0xb7f   : > { %v1996_v26 = vpop.f32.mrb[24].mxu1 }
 0xb80   : > { %v2018_v28 = vpop.f32.mrb[12].mxu0  ;;  %v1997_v30 = vpop.f32.mrb[25].mxu1 }
 0xb81   : > { %v1998_v31 = vadd.f32 %v1997_v30, %v1996_v26  ;;  %v2019_v32 = vpop.f32.mrb[13].mxu0  ;;  %v1999_v33 = vpop.f32.mrb[26].mxu1 }
 0xb82   : > { %v2020_v34 = vadd.f32 %v2019_v32, %v2018_v28  ;;  %v2021_v35 = vpop.f32.mrb[14].mxu0  ;;  %v2000_v36 = vpop.f32.mrb[27].mxu1 }
 0xb83   : > { %v1739_v37 = vadd.f32 %v1998_v31, %v1919_v29  ;;  %v2022_v38 = vpop.f32.mrb[15].mxu0 }
 0xb85   : > { %v1779_v39 = vadd.f32 %v2020_v34, %v1739_v37 }
 0xb87   : > { %v1784_v40 = vadd.f32 %v1779_v39, %v2516_v10 }
 0xb89   : > { %1785 = vst [vmem:[%s435_s16] sm:$0x1f] %v1784_v40 }
 0xb8a PF: > { %s23_s25 = sadd.s32 1, %s2247_s25  }
 0xb8b   : > { %p20_p4 = scmp.ge.s32.totalorder %s23_s25, 4  }
 0xb8d   :  { %22 = sbr.rel (!%p20_p4) target bundleno = 1 (0x1), region = 102 }

// kernel: question_answer_classifier.13
= control target key start
LH: loop header
LB: loop body
LE: loop exit
PB: predicated region body
PF: predicated region fallthrough
CT: control target
= control target key end

     0   :  { %18 = vsyncpa [#allocation3], 0  ;;  %s3037_s0 = inlined_call_operand.vmem [shape: f32[2,5,128], index: 0, kind: input, shape index: {}]   ;;  %s3038_s1 = inlined_call_operand.vmem [shape: f32[1,128], index: 1, kind: input, shape index: {}]   ;;  %s3039_s2 = inlined_call_operand.vmem [shape: f32[1,128], index: 2, kind: input, shape index: {}]   ;;  %s3040_s3 = inlined_call_operand.vmem [shape: bf16[128,384], index: 3, kind: input, shape index: {}]   ;;  %s3041_s4 = inlined_call_operand.vmem [shape: f32[1,384], index: 4, kind: input, shape index: {}]   ;;  %s3042_s5 = inlined_call_operand.vmem [shape: bf16[128,128], index: 5, kind: input, shape index: {}]   ;;  %s3043_s6 = inlined_call_operand.vmem [shape: f32[1,128], index: 6, kind: input, shape index: {}]   ;;  %s3044_s7 = inlined_call_operand.hbm [shape: f32[1,128], index: 7, kind: input, shape index: {}]   ;;  %s3045_s8 = inlined_call_operand.hbm [shape: f32[1,128], index: 8, kind: input, shape index: {}]   ;;  %s3046_s9 = inlined_call_operand.vmem [shape: bf16[128,512], index: 9, kind: input, shape index: {}]   ;;  %s3047_s10 = inlined_call_operand.vmem [shape: f32[1,512], index: 10, kind: input, shape index: {}]   ;;  %s3048_s11 = inlined_call_operand.vmem [shape: bf16[512,128], index: 11, kind: input, shape index: {}]   ;;  %s3049_s12 = inlined_call_operand.hbm [shape: f32[1,128], index: 12, kind: input, shape index: {}]   ;;  %s3050_s13 = inlined_call_operand.vmem [shape: f32[2,5,128], index: 13, kind: output, shape index: {}]  }
   0x1   :  { %19 = vsyncpa [#allocation5], 0  ;;  %s2525_s25 = smov 0  }
   0x2 LB: > { %s2531_s26 = sadd.s32 4294967295, %s2445_s25   ;;  %p1910_p0 = scmp.ge.s32.totalorder %s2445_s25, 1  ;;  %s2445_s25 = sphi %s2525_s25, %s25_s25  }
   0x3   : > { %p334_p1 = scmp.lt.s32.totalorder %s2445_s25, 3  ;;  %p3051_p2 = scmp.eq.s32.totalorder %s2531_s26, 0 }
   0x4   : > { %s2447_s28 = smov [#allocation4]   ;;  %s2448_s30 = smov [#allocation2]  }
   0x5   : > { %p2536_p3 = pnand %p1910_p0, %p334_p1  ;;  %s376_s29 = sshll.u32 %s2447_s28, 4  ;;  %s377_s29 = int_to_ptr.vmem [resolvable:$true] %s376_s29 }
   0x6   : > { %s365_s14 = sshll.u32 %s2448_s30, 4  ;;  %s2449_s15 = smov [#allocation6]   ;;  %s2548_s14 = int_to_ptr.vmem [resolvable:$true] %s365_s14 }
   0x7   : > { %s3053_s27 = scalar_select %p2536_p3, 1, 0 }
   0x8   : > { %p2175_p4 = pneg %p2536_p3  ;;  %s396_s16 = sshll.u32 %s2449_s15, 4  ;;  %s2550_s16 = int_to_ptr.vmem [resolvable:$true] %s396_s16 }
   0x9   : > { %s2347_s20 = scalar_lea.hbm %s3045_s8, 16 }
   0xa   : > { %p2544_p5 = pnand %p3051_p2, %p2175_p4  ;;  %p2348_p6 = scmp.ne.s32.totalorder %s3045_s8, %s2347_s20 }
   0xb   : > { %p2354_p10 = scmp.lt.u32.totalorder %s2347_s20, %s3045_s8 }
   0xc   : > { %p2560_p7 = pneg %p2544_p5 }
   0xe   : > { %p2350_p8 = pnand %p2560_p7, %p2348_p6 }
  0x10   : > { %p2351_p9 = pneg %p2350_p8 }
  0x12   : > { %p2356_p11 = pnand %p2354_p10, %p2351_p9 }
  0x14   : > { %2359 = shalt.err (!%p2356_p11)
}
  0x15   : > { %s2360_s30 = scalar_lea.vmem %s377_s29, 16  ;;  %s2367_s15 = scalar_lea.vmem %s377_s29, 32 }
  0x16   : > { %p2361_p12 = scmp.ne.s32.totalorder %s377_s29, %s2360_s30  ;;  %p2368_p1 = scmp.lt.s32.totalorder %s377_s29, %s377_s29 }
  0x17   : > { %p2369_p4 = scmp.lt.s32.totalorder %s2367_s15, %s2360_s30 }
  0x18   : > { %p2363_p13 = pnand %p2361_p12, %p2560_p7 }
  0x19   : > { %p2370_p2 = por %p2369_p4, %p2368_p1 }
  0x1a   : > { %p2364_p0 = pneg %p2363_p13 }
  0x1c   : > { %p2371_p3 = pnand %p2370_p2, %p2364_p0 }
  0x1e   : > { %2374 = shalt.err (!%p2371_p3)
}
  0x1f   : > { %2181 = dma.hbm_to_vmem [thread:$0]  (!%p2544_p5), %s3045_s8, 16, %s377_s29, [#allocation5]  }
  0x20   : > { %s2375_s22 = scalar_lea.hbm %s3044_s7, 16 }
  0x21   : > { %p2376_p6 = scmp.ne.s32.totalorder %s3044_s7, %s2375_s22  ;;  %p2382_p2 = scmp.lt.u32.totalorder %s2375_s22, %s3044_s7 }
  0x23   : > { %p2378_p8 = pnand %p2376_p6, %p2560_p7 }
  0x25   : > { %p2379_p9 = pneg %p2378_p8 }
  0x27   : > { %p2384_p3 = pnand %p2382_p2, %p2379_p9 }
  0x29   : > { %2387 = shalt.err (!%p2384_p3)
}
  0x2a   : > { %s2388_s29 = scalar_lea.vmem %s2548_s14, 16  ;;  %s2395_s18 = scalar_lea.vmem %s2548_s14, 32 }
  0x2b   : > { %p2389_p10 = scmp.ne.s32.totalorder %s2548_s14, %s2388_s29  ;;  %p2396_p13 = scmp.lt.s32.totalorder %s2548_s14, %s2548_s14 }
  0x2c   : > { %p2397_p0 = scmp.lt.s32.totalorder %s2395_s18, %s2388_s29 }
  0x2d   : > { %p2391_p11 = pnand %p2389_p10, %p2560_p7 }
  0x2e   : > { %p2398_p1 = por %p2397_p0, %p2396_p13 }
  0x2f   : > { %p2392_p12 = pneg %p2391_p11 }
  0x31   : > { %p2399_p4 = pnand %p2398_p1, %p2392_p12 }
  0x33   : > { %2402 = shalt.err (!%p2399_p4)
}
  0x34   : > { %2178 = dma.hbm_to_vmem [thread:$0]  (!%p2544_p5), %s3044_s7, 16, %s2548_s14, [#allocation3]  }
  0x35   : > { %s2403_s24 = scalar_lea.hbm %s3049_s12, 16 }
  0x36   : > { %p2404_p6 = scmp.ne.s32.totalorder %s3049_s12, %s2403_s24  ;;  %p2410_p2 = scmp.lt.u32.totalorder %s2403_s24, %s3049_s12 }
  0x38   : > { %p2406_p8 = pnand %p2404_p6, %p2560_p7 }
  0x3a   : > { %p2407_p9 = pneg %p2406_p8 }
  0x3c   : > { %p2412_p3 = pnand %p2410_p2, %p2407_p9 }
  0x3e   : > { %2415 = shalt.err (!%p2412_p3)
}
  0x3f   : > { %s2416_s14 = scalar_lea.vmem %s2550_s16, 16  ;;  %s2423_s18 = scalar_lea.vmem %s2550_s16, 32 }
  0x40   : > { %p2417_p10 = scmp.ne.s32.totalorder %s2550_s16, %s2416_s14  ;;  %p2424_p13 = scmp.lt.s32.totalorder %s2550_s16, %s2550_s16 }
  0x41   : > { %p2425_p0 = scmp.lt.s32.totalorder %s2423_s18, %s2416_s14 }
  0x42   : > { %p2419_p11 = pnand %p2417_p10, %p2560_p7 }
  0x43   : > { %p2426_p1 = por %p2425_p0, %p2424_p13 }
  0x44   : > { %p2420_p12 = pneg %p2419_p11 }
  0x46   : > { %p2427_p4 = pnand %p2426_p1, %p2420_p12 }
  0x48   : > { %2430 = shalt.err (!%p2427_p4)
}
  0x49   : > { %2184 = dma.hbm_to_vmem [thread:$0]  (!%p2544_p5), %s3049_s12, 16, %s2550_s16, [#allocation5]  }
  0x4a   : > { %p3056_p6 = scmp.ne.s32.totalorder %s3053_s27, 0 }
  0x4b   : > { %p3057_p7 = scmp.eq.s32.totalorder (!%p3056_p6), %s2531_s26, 0 }
  0x4c   : > { %416 = sbr.rel (%p3056_p6) target bundleno = 3030 (0xbd6), region = 72 }
  0x53   : > { %2436 = dma.done.wait (%p3057_p7), [#allocation3], 16   ;;  %p3058_p8 = pmov %p3057_p7 }
  0x54   : > { %p3059_p9 = pmov %p3057_p7 }
  0x55   : > { %2438 = vsyncadd (%p3058_p8), [#allocation3], 4294967280 }
  0x56   : > { %2440 = dma.done.wait (%p3059_p9), [#allocation5], 32   ;;  %p3060_p2 = pmov %p3057_p7 }
  0x57   : > { %p466_p3 = scmp.lt.s32.totalorder %s2531_s26, 1  ;;  %vm478_vm0 = vcmask 1044480   ;;  %v2207_v2 = vld [vmem:[%s3040_s3 + $0x4] ss:$12 sps:$4 sm:$0xff]   ;;  %v2209_v3 = vld [vmem:[%s3040_s3] ss:$12 sps:$4 sm:$0xff]   ;;  %v542_v43 = vlaneseq }
  0x58   : > { %2442 = vsyncadd (%p3060_p2), [#allocation5], 4294967264  ;;  %v2450_v4 = vmov 0.0   ;;  %v2210_v5 = vld [vmem:[%s3040_s3 + $0x8] ss:$12 sps:$4 sm:$0xff]   ;;  %685 = vmatprep.subr.bf16.mxu0 %v2207_v2  ;;  %v2451_v27 = vmov 0  }
  0x59   : > { %s3062_s26 = smov (!%p466_p3, %s2531_s26), 1  ;;  %2099 = vmatprep.subr.bf16.mxu1 %v2450_v4  ;;  %v2211_v6 = vld [vmem:[%s3040_s3 + $0x1c] ss:$12 sps:$4 sm:$0xff]   ;;  %v2213_v7 = vld [vmem:[%s3040_s3 + $0x18] ss:$12 sps:$4 sm:$0xff]   ;;  %686 = vmatpush1.bf16.msra.mxu0 %v2209_v3  ;;  %vm2452_vm1 = vmmov 0  }
  0x5a   : > { %s1919_s27 = sshll.u32 %s3062_s26, 3  ;;  %v2214_v8 = vld [vmem:[%s3040_s3 + $0x20] ss:$12 sps:$4 sm:$0xff]   ;;  %2100 = vmatpush3.bf16.msra.mxu1 %v2210_v5  ;;  %687 = vmatprep.subr.bf16.mxu0 %v2211_v6  ;;  %v2217_v15 = vld [vmem:[%s3040_s3 + $0x30] ss:$12 sps:$4 sm:$0xff]   ;;  %v2745_v44 = vshrl.u32 %v542_v43, 7 }
  0x5b   : > { %s469_s23 = scalar_lea.vmem %s3037_s0, %s1919_s27  ;;  %v2215_v9 = vld [vmem:[%s3040_s3 + $0x34] ss:$12 sps:$4 sm:$0xff]   ;;  %2101 = vmatprep.subr.bf16.mxu1 %v2450_v4  ;;  %v2218_v16 = vld [vmem:[%s3040_s3 + $0x38] ss:$12 sps:$4 sm:$0xff]   ;;  %v2222_v19 = vld [vmem:[%s3040_s3 + $0x50] ss:$12 sps:$4 sm:$0xff]   ;;  %717 = vmatprep.mubr.bf16.mxu0 %v2451_v27  ;;  %s473_s19 = scalar_lea.vmem %s3050_s13, %s1919_s27 }
  0x5c   : > { %v2644_v0 = vld [vmem:[%s469_s23] sm:$0x1f]  ;;  %v2219_v17 = vld [vmem:[%s3040_s3 + $0x4c] ss:$12 sps:$4 sm:$0xff]   ;;  %v2221_v18 = vld [vmem:[%s3040_s3 + $0x48] ss:$12 sps:$4 sm:$0xff]   ;;  %2115 = vmatprep.mubr.msk.bf16.mxu1 %vm2452_vm1, %v2450_v4 }
  0x5d   : > { %v479_v1 = vsel %vm478_vm0, %v2644_v0, 0.0  ;;  %688 = vmatpush1.bf16.msra.mxu0 %v2213_v7  ;;  %v2223_v20 = vld [vmem:[%s3040_s3 + $0x64] ss:$12 sps:$4 sm:$0xff]   ;;  %v2225_v21 = vld [vmem:[%s3040_s3 + $0x60] ss:$12 sps:$4 sm:$0xff]   ;;  %v548_v45 = vsub.s32 1, %v2745_v44 }
  0x5e   : > { %480 = vadd.xlane.f32.xlu0 %v479_v1  ;;  %2102 = vmatpush3.bf16.msra.mxu1 %v2214_v8  ;;  %v2226_v22 = vld [vmem:[%s3040_s3 + $0x68] ss:$12 sps:$4 sm:$0xff]   ;;  %v2229_v24 = vld [vmem:[%s3040_s3 + $0x78] ss:$12 sps:$4 sm:$0xff]   ;;  %v2230_v25 = vld [vmem:[%s3040_s3 + $0x80] ss:$12 sps:$4 sm:$0xff]  }
  0x5f   : > { %689 = vmatprep.subr.bf16.mxu0 %v2215_v9  ;;  %2103 = vmatprep.subr.bf16.mxu1 %v2450_v4  ;;  %v2227_v23 = vld [vmem:[%s3040_s3 + $0x7c] ss:$12 sps:$4 sm:$0xff]   ;;  %v2231_v26 = vld [vmem:[%s3040_s3 + $0x94] ss:$12 sps:$4 sm:$0xff]   ;;  %v2234_v29 = vld [vmem:[%s3040_s3 + $0x98] ss:$12 sps:$4 sm:$0xff]  }
  0x60   : > { %v2233_v28 = vld [vmem:[%s3040_s3 + $0x90] ss:$12 sps:$4 sm:$0xff]   ;;  %v2235_v30 = vld [vmem:[%s3040_s3 + $0xac] ss:$12 sps:$4 sm:$0xff]   ;;  %v2237_v31 = vld [vmem:[%s3040_s3 + $0xa8] ss:$12 sps:$4 sm:$0xff]  }
  0x61   : > { %690 = vmatpush1.bf16.msra.mxu0 %v2217_v15  ;;  %v2238_v32 = vld [vmem:[%s3040_s3 + $0xb0] ss:$12 sps:$4 sm:$0xff]   ;;  %v1921_v37 = vld [vmem:[%s3038_s1] ss:$0 sm:$0xff]  ;;  %v552_v47 = vsub.s32 2, %v2745_v44  ;;  %v544_v49 = vsub.s32 0, %v2745_v44 }
  0x62   : > { %2104 = vmatpush3.bf16.msra.mxu1 %v2218_v16  ;;  %691 = vmatprep.subr.bf16.mxu0 %v2219_v17  ;;  %v1922_v39 = vld [vmem:[%s3039_s2] ss:$0 sm:$0xff]  ;;  %vm769_vm2 = vcmask 523264   ;;  %vm834_vm3 = vcmask 1041408   ;;  %s2453_s17 = smov 64   ;;  %vm835_vm4 = vcmask 1042432  }
  0x63   : > { %2105 = vmatprep.subr.bf16.mxu1 %v2450_v4  ;;  %v539_v46 = vld [vmem:[%s3041_s4] sm:$0x7]  ;;  %v2454_v1 = vmov 65535   ;;  %vm817_vm5 = vcmask 36864   ;;  %vm830_vm6 = vcmask 39936  }
  0x64   : > { %v549_v48 = vrot.slane %v539_v46, %v548_v45  ;;  %v553_v52 = vrot.slane %v539_v46, %v552_v47  ;;  %v545_v60 = vrot.slane %v539_v46, %v544_v49  ;;  %v836_v2 = vsel %vm834_vm3, 4294967295, %v2454_v1 }
  0x65   : > { %692 = vmatpush1.bf16.msra.mxu0 %v2221_v18  ;;  %v837_v6 = vsel %vm835_vm4, %v836_v2, 0 }
  0x66   : > { %2106 = vmatpush3.bf16.msra.mxu1 %v2222_v19  ;;  %693 = vmatprep.subr.bf16.mxu0 %v2223_v20 }
  0x67   : > { %2107 = vmatprep.subr.bf16.mxu1 %v2450_v4 }
  0x69   : > { %694 = vmatpush1.bf16.msra.mxu0 %v2225_v21 }
  0x6a   : > { %2108 = vmatpush3.bf16.msra.mxu1 %v2226_v22  ;;  %695 = vmatprep.subr.bf16.mxu0 %v2227_v23 }
  0x6b   : > { %2109 = vmatprep.subr.bf16.mxu1 %v2450_v4 }
  0x6d   : > { %696 = vmatpush1.bf16.msra.mxu0 %v2229_v24 }
  0x6e   : > { %2110 = vmatpush3.bf16.msra.mxu1 %v2230_v25  ;;  %697 = vmatprep.subr.bf16.mxu0 %v2231_v26 }
  0x6f   : > { %2111 = vmatprep.subr.bf16.mxu1 %v2450_v4 }
  0x71   : > { %698 = vmatpush1.bf16.msra.mxu0 %v2233_v28 }
  0x72   : > { %2112 = vmatpush3.bf16.msra.mxu1 %v2234_v29  ;;  %699 = vmatprep.subr.bf16.mxu0 %v2235_v30 }
  0x73   : > { %2113 = vmatprep.subr.bf16.mxu1 %v2450_v4 }
  0x75   : > { %700 = vmatpush1.bf16.msra.mxu0 %v2237_v31 }
  0x76   : > { %2114 = vmatpush3.bf16.msra.mxu1 %v2238_v32  ;;  %2143 = vmatprep.subr.bf16.mxu0 %v2450_v4 }
  0x77   : > { %2119 = vmatprep.subr.bf16.mxu1 %v2450_v4 }
  0xeb   : > { %v481_v10 = vpop.xlane.xlu0 %480 }
  0xec   : > { %v483_v11 = vmul.f32 0.0078125, %v481_v10 }
  0xee   : > { %v484_v12 = vsub.f32 %v2644_v0, %v483_v11 }
  0xf0   : > { %v485_v13 = vmul.f32 %v484_v12, %v484_v12 }
  0xf2   : > { %v486_v14 = vsel %vm478_vm0, %v485_v13, 0.0 }
  0xf3   : > { %487 = vadd.xlane.f32.xlu0 %v486_v14 }
 0x180   : > { %v488_v33 = vpop.xlane.xlu0 %487 }
 0x181   : > { %v489_v34 = vmul.f32 0.0078125, %v488_v33 }
 0x183   : > { %v490_v35 = vadd.f32 1e-06, %v489_v34 }
 0x185   : > { %2327 = vrsqrt.f32 %v490_v35 }
 0x18f   : > { %v2328_v36 = vpop.eup %2327 }
 0x190   : > { %v492_v38 = vmul.f32 %v2328_v36, %v484_v12 }
 0x192   : > { %v499_v40 = vmul.f32 %v1921_v37, %v492_v38 }
 0x194   : > { %v506_v41 = vadd.f32 %v1922_v39, %v499_v40 }
 0x196   : > { %v540_v42 = vpack.c.bf16 %v506_v41, %v506_v41 }
 0x198   : > { %718 = vmatmul.mubr.bf16.vlgmr.msra.gmra.mrb[0].mxu0 %v540_v42  ;;  %2116 = vmatmul.mubr.bf16.vlgmr.msra.gmra.mrb[0].mxu1 %v540_v42 }
 0x199   : > { %2121 = vmatprep.mubr.msk.bf16.mxu1 %vm2452_vm1, %v2450_v4  ;;  %2159 = vmatprep.mubr.msk.bf16.mxu0 %vm2452_vm1, %v2450_v4 }
 0x26b   : > { %v719_v50 = vpop.f32.mrb[0].mxu0  ;;  %v760_v51 = vpop.f32.mrb[0].mxu1 }
 0x26c   : > { %v721_v53 = vpop.f32.mrb[1].mxu0  ;;  %v2117_v54 = vpop.f32.mrb[1].mxu1  ;;  %v761_v62 = vadd.f32 %v760_v51, %v553_v52  ;;  %v720_v3 = vadd.f32 %v719_v50, %v545_v60  ;;  %v2246_v60 = vld [vmem:[%s3042_s5 + $0x38] sm:$0xff]  }
 0x26d   : > { %v722_v55 = vadd.f32 %v721_v53, %v549_v48  ;;  %v723_v56 = vpop.f32.mrb[2].mxu0  ;;  %v763_v57 = vpop.f32.mrb[2].mxu1  ;;  %v2239_v53 = vld [vmem:[%s3042_s5] sm:$0xff]   ;;  %v2240_v54 = vld [vmem:[%s3042_s5 + $0x8] sm:$0xff]  }
 0x26e   : > { %v724_v58 = vpop.f32.mrb[3].mxu0  ;;  %v2118_v59 = vpop.f32.mrb[3].mxu1  ;;  %v768_v5 = vpack.c.bf16 %v761_v62, %v761_v62  ;;  %v766_v7 = vpack.c.bf16 %v720_v3, %v720_v3  ;;  %2144 = vmatpush3.bf16.msra.mxu0 %v2239_v53  ;;  %v2242_v56 = vld [vmem:[%s3042_s5 + $0x18] sm:$0xff]   ;;  %v2243_v57 = vld [vmem:[%s3042_s5 + $0x20] sm:$0xff]  }
 0x26f   : > { %v767_v61 = vpack.c.bf16 %v722_v55, %v722_v55  ;;  %2145 = vmatprep.subr.bf16.mxu0 %v2450_v4  ;;  %v2241_v55 = vld [vmem:[%s3042_s5 + $0x10] sm:$0xff]   ;;  %v2244_v58 = vld [vmem:[%s3042_s5 + $0x28] sm:$0xff]  }
 0x270   : > { %v839_v8 = vand.u32 %v837_v6, %v768_v5  ;;  %v2245_v59 = vld [vmem:[%s3042_s5 + $0x30] sm:$0xff]  }
 0x271   : > { %v774_v63 = vsel %vm769_vm2, %v767_v61, 0  ;;  %885 = vrot.lane.b32.xlu0 %v767_v61, %s2453_s17 }
 0x272   : > { %2120 = vmatpush3.bf16.xpose.msra.mxu1 %v774_v63  ;;  %2146 = vmatpush3.bf16.msra.mxu0 %v2240_v54 }
 0x273   : > { %2125 = vmatprep.subr.bf16.mxu1 %v2450_v4  ;;  %2147 = vmatprep.subr.bf16.mxu0 %v2450_v4 }
 0x276   : > { %2148 = vmatpush3.bf16.msra.mxu0 %v2241_v55 }
 0x277   : > { %2149 = vmatprep.subr.bf16.mxu0 %v2450_v4 }
 0x279   : > { %2122 = vmatmul.mubr.msk.bf16.vlgmr.msra.gmra.mrb[4].mxu1 %vm769_vm2, %v766_v7 }
 0x27a   : > { %2126 = vmatpush3.bf16.msra.mxu1 %v839_v8  ;;  %2127 = vmatprep.mubr.msk.bf16.mxu1 %vm2452_vm1, %v2450_v4 }
 0x27b   : > { %2131 = vmatprep.subr.bf16.mxu1 %v2450_v4  ;;  %2150 = vmatpush3.bf16.msra.mxu0 %v2242_v56 }
 0x27c   : > { %2151 = vmatprep.subr.bf16.mxu0 %v2450_v4 }
 0x27f   : > { %2152 = vmatpush3.bf16.msra.mxu0 %v2243_v57  ;;  %v1960_v57 = vld [vmem:[#allocation2] ss:$0 sm:$0xff] }
 0x280   : > { %2153 = vmatprep.subr.bf16.mxu0 %v2450_v4 }
 0x283   : > { %2154 = vmatpush3.bf16.msra.mxu0 %v2244_v58 }
 0x284   : > { %2155 = vmatprep.subr.bf16.mxu0 %v2450_v4 }
 0x287   : > { %2156 = vmatpush3.bf16.msra.mxu0 %v2245_v59  ;;  %v1961_v59 = vld [vmem:[#allocation4] ss:$0 sm:$0xff] }
 0x288   : > { %2157 = vmatprep.subr.bf16.mxu0 %v2450_v4 }
 0x28b   : > { %2158 = vmatpush3.bf16.msra.mxu0 %v2246_v60 }
 0x2e3   : > { %v886_v23 = vpop.permute.xlu0 %885 }
 0x2e4   : > { %v891_v25 = vsel %vm769_vm2, %v886_v23, 0 }
 0x34c   : > { %v810_v9 = vpop.f32.mrb[4].mxu1 }
 0x34d   : > { %v816_v10 = vmul.f32 0.125, %v810_v9  ;;  %v2123_v11 = vpop.f32.mrb[5].mxu1 }
 0x34e   : > { %v813_v12 = vpop.f32.mrb[6].mxu1 }
 0x34f   : > { %v2124_v13 = vpop.f32.mrb[7].mxu1  ;;  %v818_v14 = vsel %vm817_vm5, %v816_v10, -inf }
 0x350   : > { %819 = vmax.xlane.f32.xlu1 %v818_v14  ;;  %v2249_v13 = vld [vmem:[%s3046_s9 + $0x4] ss:$16 sps:$4 sm:$0xff]   ;;  %v2250_v14 = vld [vmem:[%s3046_s9 + $0x8] ss:$16 sps:$4 sm:$0xff]  }
 0x3dd   : > { %v820_v15 = vpop.xlane.xlu1 %819 }
 0x3de   : > { %v821_v16 = vsub.f32 %v816_v10, %v820_v15  ;;  %v2255_v15 = vld [vmem:[%s3046_s9 + $0x24] ss:$16 sps:$4 sm:$0xff]  }
 0x3e0   : > { %v822_v17 = vmul.f32 1.442695, %v821_v16  ;;  %v2258_v16 = vld [vmem:[%s3046_s9 + $0x2c] ss:$16 sps:$4 sm:$0xff]  }
 0x3e2   : > { %2329 = vpow2.f32 %v822_v17  ;;  %v2253_v17 = vld [vmem:[%s3046_s9 + $0x20] ss:$16 sps:$4 sm:$0xff]  }
 0x3ec   : > { %v2330_v18 = vpop.eup %2329 }
 0x3ed   : > { %v824_v19 = vsel %vm817_vm5, %v2330_v18, 0.0 }
 0x3ee   : > { %825 = vadd.xlane.f32.xlu1 %v824_v19  ;;  %v2261_v19 = vld [vmem:[%s3046_s9 + $0x44] ss:$16 sps:$4 sm:$0xff]  }
 0x3ff   : > { %882 = vrot.lane.b32.xlu1 %v766_v7, %s2453_s17 }
 0x47b   : > { %v826_v20 = vpop.xlane.xlu1 %825 }
 0x47c   : > { %2331 = vrcp.f32 %v826_v20  ;;  %v2264_v20 = vld [vmem:[%s3046_s9 + $0x4c] ss:$16 sps:$4 sm:$0xff]  }
 0x47f   : > { %v883_v26 = vpop.permute.xlu1 %882 }
 0x486   : > { %v2332_v21 = vpop.eup %2331 }
 0x487   : > { %v828_v22 = vmul.f32 %v2332_v21, %v2330_v18  ;;  %v2256_v18 = vld [vmem:[%s3046_s9 + $0x28] ss:$16 sps:$4 sm:$0xff]   ;;  %v2259_v21 = vld [vmem:[%s3046_s9 + $0x40] ss:$16 sps:$4 sm:$0xff]  }
 0x489   : > { %v829_v24 = vpack.c.bf16 %v828_v22, %v828_v22  ;;  %v2262_v22 = vld [vmem:[%s3046_s9 + $0x48] ss:$16 sps:$4 sm:$0xff]  }
 0x48b   : > { %2128 = vmatmul.mubr.msk.bf16.vlgmr.msra.gmra.mrb[8].mxu1 %vm830_vm6, %v829_v24 }
 0x48c   : > { %2132 = vmatpush3.bf16.xpose.msra.mxu1 %v891_v25  ;;  %2133 = vmatprep.mubr.msk.bf16.mxu1 %vm2452_vm1, %v2450_v4 }
 0x48d   : > { %2137 = vmatprep.subr.bf16.mxu1 %v2450_v4 }
 0x493   : > { %2134 = vmatmul.mubr.msk.bf16.vlgmr.msra.gmra.mrb[12].mxu1 %vm769_vm2, %v883_v26 }
 0x494   : > { %2139 = vmatprep.mubr.msk.bf16.mxu1 %vm2452_vm1, %v2450_v4  ;;  %v1951_v4 = vld [vmem:[%s3043_s6] ss:$0 sm:$0xff] }
 0x55e   : > { %v875_v28 = vpop.f32.mrb[8].mxu1 }
 0x55f   : > { %v2129_v29 = vpop.f32.mrb[9].mxu1 }
 0x560   : > { %v878_v30 = vpop.f32.mrb[10].mxu1  ;;  %v2267_v29 = vld [vmem:[%s3046_s9 + $0x64] ss:$16 sps:$4 sm:$0xff]  }
 0x561   : > { %v2130_v31 = vpop.f32.mrb[11].mxu1  ;;  %v2270_v30 = vld [vmem:[%s3046_s9 + $0x6c] ss:$16 sps:$4 sm:$0xff]  }
 0x562   : > { %v2265_v31 = vld [vmem:[%s3046_s9 + $0x60] ss:$16 sps:$4 sm:$0xff]  }
 0x566   : > { %v927_v32 = vpop.f32.mrb[12].mxu1 }
 0x567   : > { %v933_v33 = vmul.f32 0.125, %v927_v32  ;;  %v2135_v34 = vpop.f32.mrb[13].mxu1  ;;  %v2268_v32 = vld [vmem:[%s3046_s9 + $0x68] ss:$16 sps:$4 sm:$0xff]  }
 0x568   : > { %v930_v35 = vpop.f32.mrb[14].mxu1  ;;  %v2276_v34 = vld [vmem:[%s3046_s9 + $0x8c] ss:$16 sps:$4 sm:$0xff]  }
 0x569   : > { %v2136_v36 = vpop.f32.mrb[15].mxu1  ;;  %v934_v37 = vsel %vm817_vm5, %v933_v33, -inf  ;;  %v2271_v35 = vld [vmem:[%s3046_s9 + $0x80] ss:$16 sps:$4 sm:$0xff]  }
 0x56a   : > { %935 = vmax.xlane.f32.xlu1 %v934_v37  ;;  %v2274_v36 = vld [vmem:[%s3046_s9 + $0x88] ss:$16 sps:$4 sm:$0xff]   ;;  %v2279_v37 = vld [vmem:[%s3046_s9 + $0xa4] ss:$16 sps:$4 sm:$0xff]  }
 0x5f7   : > { %v936_v38 = vpop.xlane.xlu1 %935 }
 0x5f8   : > { %v937_v39 = vsub.f32 %v933_v33, %v936_v38  ;;  %v2273_v33 = vld [vmem:[%s3046_s9 + $0x84] ss:$16 sps:$4 sm:$0xff]   ;;  %v2282_v38 = vld [vmem:[%s3046_s9 + $0xac] ss:$16 sps:$4 sm:$0xff]  }
 0x5fa   : > { %v938_v40 = vmul.f32 1.442695, %v937_v39  ;;  %v2277_v39 = vld [vmem:[%s3046_s9 + $0xa0] ss:$16 sps:$4 sm:$0xff]  }
 0x5fc   : > { %2333 = vpow2.f32 %v938_v40  ;;  %v2280_v40 = vld [vmem:[%s3046_s9 + $0xa8] ss:$16 sps:$4 sm:$0xff]  }
 0x606   : > { %v2334_v41 = vpop.eup %2333 }
 0x607   : > { %v940_v42 = vsel %vm817_vm5, %v2334_v41, 0.0 }
 0x608   : > { %941 = vadd.xlane.f32.xlu0 %v940_v42  ;;  %v2288_v42 = vld [vmem:[%s3046_s9 + $0xcc] ss:$16 sps:$4 sm:$0xff]  }
 0x61e   : > { %947 = vrot.lane.b32.xlu0 %v768_v5, %s2453_s17 }
 0x695   : > { %v942_v43 = vpop.xlane.xlu0 %941 }
 0x696   : > { %2335 = vrcp.f32 %v942_v43  ;;  %v2283_v43 = vld [vmem:[%s3046_s9 + $0xc0] ss:$16 sps:$4 sm:$0xff]  }
 0x699   : > { %v948_v46 = vpop.permute.xlu0 %947 }
 0x69a   : > { %v953_v48 = vand.u32 %v948_v46, %v837_v6  ;;  %v2286_v46 = vld [vmem:[%s3046_s9 + $0xc8] ss:$16 sps:$4 sm:$0xff]  }
 0x69c   : > { %2138 = vmatpush3.bf16.msra.mxu1 %v953_v48  ;;  %v2291_v48 = vld [vmem:[%s3046_s9 + $0xe4] ss:$16 sps:$4 sm:$0xff]  }
 0x69d   : > { %1357 = vmatprep.subr.bf16.mxu1 %v2249_v13  ;;  %v2308_v13 = vld [vmem:[%s3048_s11 + $0xd8] sm:$0xff]  }
 0x6a0   : > { %v2336_v50 = vpop.eup %2335 }
 0x6a1   : > { %v944_v51 = vmul.f32 %v2336_v50, %v2334_v41  ;;  %v2285_v41 = vld [vmem:[%s3046_s9 + $0xc4] ss:$16 sps:$4 sm:$0xff]   ;;  %v2294_v50 = vld [vmem:[%s3046_s9 + $0xec] ss:$16 sps:$4 sm:$0xff]  }
 0x6a3   : > { %v945_v52 = vpack.c.bf16 %v944_v51, %v944_v51  ;;  %v2289_v51 = vld [vmem:[%s3046_s9 + $0xe0] ss:$16 sps:$4 sm:$0xff]  }
 0x6a5   : > { %2140 = vmatmul.mubr.msk.bf16.vlgmr.msra.gmra.mrb[16].mxu1 %vm830_vm6, %v945_v52  ;;  %v2292_v52 = vld [vmem:[%s3046_s9 + $0xe8] ss:$16 sps:$4 sm:$0xff]  }
 0x6a6   : > { %1389 = vmatprep.mubr.bf16.mxu1 %v2451_v27 }
 0x778   : > { %v989_v61 = vpop.f32.mrb[16].mxu1 }
 0x779   : > { %996 = vrot.lane.b32.xlu1 %v989_v61, %s2453_s17  ;;  %v2141_v62 = vpop.f32.mrb[17].mxu1 }
 0x77a   : > { %v992_v63 = vpop.f32.mrb[18].mxu1 }
 0x77b   : > { %v2142_v1 = vpop.f32.mrb[19].mxu1  ;;  %v2295_v63 = vld [vmem:[%s3048_s11 + $0x40] sm:$0xff]  }
 0x77c   : > { %v2296_v1 = vld [vmem:[%s3048_s11 + $0xc0] sm:$0xff]  }
 0x7eb   : > { %v997_v2 = vpop.permute.xlu1 %996 }
 0x7ec   : > { %v999_v3 = vsel %vm769_vm2, %v875_v28, %v997_v2  ;;  %v2297_v2 = vld [vmem:[%s3048_s11] sm:$0xff]  }
 0x7ed   : > { %v1017_v5 = vpack.c.bf16 %v999_v3, %v999_v3  ;;  %v2298_v3 = vld [vmem:[%s3048_s11 + $0x80] sm:$0xff]  }
 0x7ef   : > { %2160 = vmatmul.mubr.bf16.vlgmr.msra.gmra.mrb[4].mxu0 %v1017_v5  ;;  %v2299_v5 = vld [vmem:[%s3048_s11 + $0x48] sm:$0xff]  }
 0x7f0   : > { %1430 = vmatprep.mubr.bf16.mxu0 %v2451_v27  ;;  %v2247_v27 = vld [vmem:[%s3046_s9] ss:$16 sps:$4 sm:$0xff]  }
 0x7f1   : > { %1358 = vmatpush1.bf16.msra.mxu1 %v2247_v27  ;;  %v2307_v27 = vld [vmem:[%s3048_s11 + $0x58] sm:$0xff]  }
 0x7f2   : > { %1359 = vmatprep.subr.bf16.mxu1 %v2255_v15  ;;  %v2311_v15 = vld [vmem:[%s3048_s11 + $0x60] sm:$0xff]  }
 0x7f5   : > { %1360 = vmatpush1.bf16.msra.mxu1 %v2253_v17  ;;  %v2313_v17 = vld [vmem:[%s3048_s11 + $0x20] sm:$0xff]  }
 0x7f6   : > { %1361 = vmatprep.subr.bf16.mxu1 %v2261_v19  ;;  %v2315_v19 = vld [vmem:[%s3048_s11 + $0x68] sm:$0xff]  }
 0x7f9   : > { %1362 = vmatpush1.bf16.msra.mxu1 %v2259_v21  ;;  %v2317_v21 = vld [vmem:[%s3048_s11 + $0x28] sm:$0xff]  }
 0x7fa   : > { %1363 = vmatprep.subr.bf16.mxu1 %v2267_v29  ;;  %v2324_v29 = vld [vmem:[%s3048_s11 + $0xf8] sm:$0xff]  }
 0x7fd   : > { %1364 = vmatpush1.bf16.msra.mxu1 %v2265_v31  ;;  %v2326_v31 = vld [vmem:[%s3048_s11 + $0xb8] sm:$0xff]  }
 0x7fe   : > { %1365 = vmatprep.subr.bf16.mxu1 %v2273_v33  ;;  %v1191_v33 = vsub.s32 3, %v2745_v44 }
 0x801   : > { %1366 = vmatpush1.bf16.msra.mxu1 %v2271_v35 }
 0x802   : > { %1367 = vmatprep.subr.bf16.mxu1 %v2279_v37 }
 0x805   : > { %1368 = vmatpush1.bf16.msra.mxu1 %v2277_v39 }
 0x806   : > { %1369 = vmatprep.subr.bf16.mxu1 %v2285_v41 }
 0x809   : > { %1370 = vmatpush1.bf16.msra.mxu1 %v2283_v43 }
 0x80a   : > { %1371 = vmatprep.subr.bf16.mxu1 %v2291_v48 }
 0x80d   : > { %1372 = vmatpush1.bf16.msra.mxu1 %v2289_v51 }
 0x80e   : > { %2055 = vmatprep.subr.bf16.mxu1 %v2295_v63 }
 0x8c2   : > { %v1106_v6 = vpop.f32.mrb[4].mxu0 }
 0x8c3   : > { %v1107_v7 = vadd.f32 %v1951_v4, %v1106_v6  ;;  %v2161_v8 = vpop.f32.mrb[5].mxu0  ;;  %v2300_v4 = vld [vmem:[%s3048_s11 + $0xc8] sm:$0xff]  }
 0x8c4   : > { %v1109_v9 = vpop.f32.mrb[6].mxu0  ;;  %v2301_v6 = vld [vmem:[%s3048_s11 + $0x8] sm:$0xff]   ;;  %v2303_v8 = vld [vmem:[%s3048_s11 + $0x50] sm:$0xff]  }
 0x8c5   : > { %v2820_v10 = vadd.f32 %v1107_v7, %v2644_v0  ;;  %v2162_v11 = vpop.f32.mrb[7].mxu0  ;;  %v2252_v0 = vld [vmem:[%s3046_s9 + $0xc] ss:$16 sps:$4 sm:$0xff]   ;;  %v2304_v9 = vld [vmem:[%s3048_s11 + $0xd0] sm:$0xff]  }
 0x8c6   : > { %1398 = vmatprep.subr.bf16.mxu0 %v2252_v0  ;;  %v2302_v7 = vld [vmem:[%s3048_s11 + $0x88] sm:$0xff]   ;;  %v2305_v11 = vld [vmem:[%s3048_s11 + $0x10] sm:$0xff]   ;;  %v2310_v0 = vld [vmem:[%s3048_s11 + $0x98] sm:$0xff]  }
 0x8c7   : > { %v1115_v12 = vsel %vm478_vm0, %v2820_v10, 0.0  ;;  %1399 = vmatpush1.bf16.msra.mxu0 %v2250_v14  ;;  %v2309_v14 = vld [vmem:[%s3048_s11 + $0x18] sm:$0xff]  }
 0x8c8   : > { %1116 = vadd.xlane.f32.xlu1 %v1115_v12  ;;  %1400 = vmatprep.subr.bf16.mxu0 %v2258_v16  ;;  %v2306_v12 = vld [vmem:[%s3048_s11 + $0x90] sm:$0xff]   ;;  %v2312_v16 = vld [vmem:[%s3048_s11 + $0xe0] sm:$0xff]  }
 0x8cb   : > { %1401 = vmatpush1.bf16.msra.mxu0 %v2256_v18  ;;  %v2314_v18 = vld [vmem:[%s3048_s11 + $0xa0] sm:$0xff]  }
 0x8cc   : > { %1402 = vmatprep.subr.bf16.mxu0 %v2264_v20  ;;  %v2316_v20 = vld [vmem:[%s3048_s11 + $0xe8] sm:$0xff]  }
 0x8cf   : > { %1403 = vmatpush1.bf16.msra.mxu0 %v2262_v22  ;;  %v2318_v22 = vld [vmem:[%s3048_s11 + $0xa8] sm:$0xff]  }
 0x8d0   : > { %1404 = vmatprep.subr.bf16.mxu0 %v2270_v30  ;;  %v2325_v30 = vld [vmem:[%s3048_s11 + $0x38] sm:$0xff]  }
 0x8d3   : > { %1405 = vmatpush1.bf16.msra.mxu0 %v2268_v32  ;;  %v1174_v32 = vld [vmem:[%s3047_s10] sm:$0xf] }
 0x8d4   : > { %1406 = vmatprep.subr.bf16.mxu0 %v2276_v34  ;;  %v1180_v34 = vrot.slane %v1174_v32, %v544_v49  ;;  %v1188_v35 = vrot.slane %v1174_v32, %v552_v47  ;;  %v1192_v37 = vrot.slane %v1174_v32, %v1191_v33 }
 0x8d7   : > { %1407 = vmatpush1.bf16.msra.mxu0 %v2274_v36  ;;  %v1184_v36 = vrot.slane %v1174_v32, %v548_v45 }
 0x8d8   : > { %1408 = vmatprep.subr.bf16.mxu0 %v2282_v38 }
 0x8db   : > { %1409 = vmatpush1.bf16.msra.mxu0 %v2280_v40 }
 0x8dc   : > { %1410 = vmatprep.subr.bf16.mxu0 %v2288_v42 }
 0x8df   : > { %1411 = vmatpush1.bf16.msra.mxu0 %v2286_v46 }
 0x8e0   : > { %1412 = vmatprep.subr.bf16.mxu0 %v2294_v50 }
 0x8e3   : > { %1413 = vmatpush1.bf16.msra.mxu0 %v2292_v52 }
 0x8e4   : > { %2077 = vmatprep.subr.bf16.mxu0 %v2296_v1 }
 0x955   : > { %v1117_v23 = vpop.xlane.xlu1 %1116 }
 0x956   : > { %v1118_v24 = vmul.f32 0.0078125, %v1117_v23  ;;  %v2319_v23 = vld [vmem:[%s3048_s11 + $0x70] sm:$0xff]  }
 0x958   : > { %v1119_v25 = vsub.f32 %v2820_v10, %v1118_v24  ;;  %v2320_v24 = vld [vmem:[%s3048_s11 + $0xf0] sm:$0xff]  }
 0x95a   : > { %v1120_v26 = vmul.f32 %v1119_v25, %v1119_v25 }
 0x95c   : > { %v1121_v28 = vsel %vm478_vm0, %v1120_v26, 0.0  ;;  %v2322_v26 = vld [vmem:[%s3048_s11 + $0xb0] sm:$0xff]  }
 0x95d   : > { %1122 = vadd.xlane.f32.xlu0 %v1121_v28  ;;  %v2323_v28 = vld [vmem:[%s3048_s11 + $0x78] sm:$0xff]  }
 0x9ea   : > { %v1123_v53 = vpop.xlane.xlu0 %1122 }
 0x9eb   : > { %v1124_v54 = vmul.f32 0.0078125, %v1123_v53 }
 0x9ed   : > { %v1125_v55 = vadd.f32 1e-06, %v1124_v54 }
 0x9ef   : > { %2337 = vrsqrt.f32 %v1125_v55 }
 0x9f9   : > { %v2338_v56 = vpop.eup %2337 }
 0x9fa   : > { %v1127_v58 = vmul.f32 %v2338_v56, %v1119_v25  ;;  %v2321_v25 = vld [vmem:[%s3048_s11 + $0x30] sm:$0xff]  }
 0x9fc   : > { %v1134_v60 = vmul.f32 %v1960_v57, %v1127_v58 }
 0x9fe   : > { %v1141_v61 = vadd.f32 %v1961_v59, %v1134_v60 }
 0xa00   : > { %v1175_v62 = vpack.c.bf16 %v1141_v61, %v1141_v61 }
 0xa02   : > { %1390 = vmatmul.mubr.bf16.vlgmr.msra.gmra.mrb[20].mxu1 %v1175_v62  ;;  %1431 = vmatmul.mubr.bf16.vlgmr.msra.gmra.mrb[8].mxu0 %v1175_v62 }
 0xa03   : > { %2056 = vmatpush3.bf16.msra.mxu1 %v2297_v2  ;;  %2078 = vmatpush3.bf16.msra.mxu0 %v2298_v3 }
 0xa04   : > { %2057 = vmatprep.subr.bf16.mxu1 %v2299_v5  ;;  %2079 = vmatprep.subr.bf16.mxu0 %v2300_v4 }
 0xa07   : > { %2058 = vmatpush3.bf16.msra.mxu1 %v2301_v6  ;;  %2080 = vmatpush3.bf16.msra.mxu0 %v2302_v7 }
 0xa08   : > { %2059 = vmatprep.subr.bf16.mxu1 %v2303_v8  ;;  %2081 = vmatprep.subr.bf16.mxu0 %v2304_v9 }
 0xa0b   : > { %2060 = vmatpush3.bf16.msra.mxu1 %v2305_v11  ;;  %2082 = vmatpush3.bf16.msra.mxu0 %v2306_v12 }
 0xa0c   : > { %2061 = vmatprep.subr.bf16.mxu1 %v2307_v27  ;;  %2083 = vmatprep.subr.bf16.mxu0 %v2308_v13 }
 0xa0f   : > { %2062 = vmatpush3.bf16.msra.mxu1 %v2309_v14  ;;  %2084 = vmatpush3.bf16.msra.mxu0 %v2310_v0 }
 0xa10   : > { %2063 = vmatprep.subr.bf16.mxu1 %v2311_v15  ;;  %2085 = vmatprep.subr.bf16.mxu0 %v2312_v16 }
 0xa13   : > { %2064 = vmatpush3.bf16.msra.mxu1 %v2313_v17  ;;  %2086 = vmatpush3.bf16.msra.mxu0 %v2314_v18 }
 0xa14   : > { %2065 = vmatprep.subr.bf16.mxu1 %v2315_v19  ;;  %2087 = vmatprep.subr.bf16.mxu0 %v2316_v20 }
 0xa17   : > { %2066 = vmatpush3.bf16.msra.mxu1 %v2317_v21  ;;  %2088 = vmatpush3.bf16.msra.mxu0 %v2318_v22 }
 0xa18   : > { %2067 = vmatprep.subr.bf16.mxu1 %v2319_v23  ;;  %2089 = vmatprep.subr.bf16.mxu0 %v2320_v24 }
 0xa1b   : > { %2068 = vmatpush3.bf16.msra.mxu1 %v2321_v25  ;;  %2090 = vmatpush3.bf16.msra.mxu0 %v2322_v26 }
 0xa1c   : > { %2069 = vmatprep.subr.bf16.mxu1 %v2323_v28  ;;  %2091 = vmatprep.subr.bf16.mxu0 %v2324_v29  ;;  %v1994_v29 = vld [vmem:[#allocation6] ss:$0 sm:$0xff] }
 0xa1f   : > { %2070 = vmatpush3.bf16.msra.mxu1 %v2325_v30  ;;  %2092 = vmatpush3.bf16.msra.mxu0 %v2326_v31 }
 0xad5   : > { %v1391_v38 = vpop.f32.mrb[20].mxu1  ;;  %v1432_v39 = vpop.f32.mrb[8].mxu0 }
 0xad6   : > { %v1392_v40 = vadd.f32 %v1391_v38, %v1180_v34  ;;  %v1433_v41 = vadd.f32 %v1432_v39, %v1188_v35  ;;  %v1393_v42 = vpop.f32.mrb[21].mxu1  ;;  %v1434_v43 = vpop.f32.mrb[9].mxu0 }
 0xad7   : > { %v1394_v46 = vadd.f32 %v1393_v42, %v1184_v36  ;;  %v1435_v48 = vadd.f32 %v1434_v43, %v1192_v37  ;;  %v1395_v50 = vpop.f32.mrb[22].mxu1  ;;  %v1436_v51 = vpop.f32.mrb[10].mxu0 }
 0xad8   : > { %v1439_v52 = vmul.f32 %v1392_v40, %v1392_v40  ;;  %v1441_v53 = vmul.f32 %v1433_v41, %v1433_v41  ;;  %v1396_v49 = vpop.f32.mrb[23].mxu1  ;;  %v1437_v54 = vpop.f32.mrb[11].mxu0 }
 0xad9   : > { %v1440_v55 = vmul.f32 %v1394_v46, %v1394_v46  ;;  %v1442_v47 = vmul.f32 %v1435_v48, %v1435_v48 }
 0xada   : > { %v1443_v56 = vmul.f32 %v1439_v52, %v1392_v40  ;;  %v1445_v44 = vmul.f32 %v1441_v53, %v1433_v41 }
 0xadb   : > { %v1444_v45 = vmul.f32 %v1440_v55, %v1394_v46  ;;  %v1446_v57 = vmul.f32 %v1442_v47, %v1435_v48 }
 0xadc   : > { %v1447_v58 = vmul.f32 0.044715, %v1443_v56  ;;  %v1449_v59 = vmul.f32 0.044715, %v1445_v44 }
 0xadd   : > { %v1448_v60 = vmul.f32 0.044715, %v1444_v45  ;;  %v1450_v61 = vmul.f32 0.044715, %v1446_v57 }
 0xade   : > { %v1451_v62 = vadd.f32 %v1447_v58, %v1392_v40  ;;  %v1453_v63 = vadd.f32 %v1449_v59, %v1433_v41 }
 0xadf   : > { %v1452_v1 = vadd.f32 %v1448_v60, %v1394_v46  ;;  %v1454_v2 = vadd.f32 %v1450_v61, %v1435_v48 }
 0xae0   : > { %v1455_v3 = vmul.f32 0.7978846, %v1451_v62  ;;  %v1457_v5 = vmul.f32 0.7978846, %v1453_v63 }
 0xae1   : > { %v1456_v4 = vmul.f32 0.7978846, %v1452_v1  ;;  %v1458_v6 = vmul.f32 0.7978846, %v1454_v2 }
 0xae2   : > { %2339 = vtanh.f32 %v1455_v3 }
 0xae3   : > { %2341 = vtanh.f32 %v1457_v5 }
 0xae4   : > { %2343 = vtanh.f32 %v1456_v4 }
 0xae5   : > { %2345 = vtanh.f32 %v1458_v6 }
 0xaec   : > { %v2340_v7 = vpop.eup %2339 }
 0xaed   : > { %v2342_v8 = vpop.eup %2341  ;;  %v1463_v9 = vadd.f32 1.0, %v2340_v7 }
 0xaee   : > { %v2344_v11 = vpop.eup %2343  ;;  %v1465_v12 = vadd.f32 1.0, %v2342_v8 }
 0xaef   : > { %v2346_v27 = vpop.eup %2345  ;;  %v1464_v13 = vadd.f32 1.0, %v2344_v11  ;;  %v1467_v14 = vmul.f32 0.5, %v1463_v9 }
 0xaf0   : > { %v1466_v0 = vadd.f32 1.0, %v2346_v27  ;;  %v1469_v15 = vmul.f32 0.5, %v1465_v12 }
 0xaf1   : > { %v1468_v16 = vmul.f32 0.5, %v1464_v13  ;;  %v1471_v18 = vmul.f32 %v1467_v14, %v1392_v40 }
 0xaf2   : > { %v1470_v17 = vmul.f32 0.5, %v1466_v0  ;;  %v1473_v20 = vmul.f32 %v1469_v15, %v1433_v41 }
 0xaf3   : > { %v1472_v19 = vmul.f32 %v1468_v16, %v1394_v46  ;;  %v1540_v24 = vpack.c.bf16 %v1471_v18, %v1471_v18 }
 0xaf4   : > { %v1474_v21 = vmul.f32 %v1470_v17, %v1435_v48  ;;  %v1542_v25 = vpack.c.bf16 %v1473_v20, %v1473_v20 }
 0xaf5   : > { %v1541_v22 = vpack.c.bf16 %v1472_v19, %v1472_v19 }
 0xaf6   : > { %v1543_v23 = vpack.c.bf16 %v1474_v21, %v1474_v21 }
 0xaf7   : > { %1774 = vmatprep.mubr.bf16.mxu1 %v1541_v22 }
 0xaf8   : > { %1814 = vmatprep.mubr.bf16.mxu0 %v1543_v23  ;;  %1775 = vmatmul.mubr.bf16.vlgmr.msra.gmra.mrb[24].mxu1 %v1540_v24 }
 0xaf9   : > { %1815 = vmatmul.mubr.bf16.vlgmr.msra.gmra.mrb[12].mxu0 %v1542_v25 }
 0xbcb   : > { %v2071_v26 = vpop.f32.mrb[24].mxu1 }
 0xbcc   : > { %v2093_v28 = vpop.f32.mrb[12].mxu0  ;;  %v2072_v30 = vpop.f32.mrb[25].mxu1 }
 0xbcd   : > { %v2073_v31 = vadd.f32 %v2072_v30, %v2071_v26  ;;  %v2094_v32 = vpop.f32.mrb[13].mxu0  ;;  %v2074_v33 = vpop.f32.mrb[26].mxu1 }
 0xbce   : > { %v2095_v34 = vadd.f32 %v2094_v32, %v2093_v28  ;;  %v2096_v35 = vpop.f32.mrb[14].mxu0  ;;  %v2075_v36 = vpop.f32.mrb[27].mxu1 }
 0xbcf   : > { %v1777_v37 = vadd.f32 %v2073_v31, %v1994_v29  ;;  %v2097_v38 = vpop.f32.mrb[15].mxu0 }
 0xbd1   : > { %v1817_v39 = vadd.f32 %v2095_v34, %v1777_v37 }
 0xbd3   : > { %v1822_v40 = vadd.f32 %v1817_v39, %v2820_v10 }
 0xbd5   : > { %1823 = vst [vmem:[%s473_s19] sm:$0x1f] %v1822_v40 }
 0xbd6 PF: > { %s25_s25 = sadd.s32 1, %s2445_s25  }
 0xbd7   : > { %p22_p5 = scmp.ge.s32.totalorder %s25_s25, 4  }
 0xbd9   :  { %24 = sbr.rel (!%p22_p5) target bundleno = 2 (0x2), region = 115 }
 0xbe0   :  { %1843 = vsyncpa [#allocation3], 1 }
 0xbe1   :  { %1845 = vsyncpa [#allocation3 + $0x1], 1 }
 0xbe2   :  { %1846 = vsyncpa [#allocation5], 1 }

// kernel: question_answer_classifier.14
= control target key start
LH: loop header
LB: loop body
LE: loop exit
PB: predicated region body
PF: predicated region fallthrough
CT: control target
= control target key end

     0   :  { %18 = vsyncpa [#allocation3], 0  ;;  %s2395_s25 = smov 0   ;;  %s2849_s0 = inlined_call_operand.vmem [shape: f32[2,5,128], index: 0, kind: input, shape index: {}]   ;;  %s2850_s1 = inlined_call_operand.vmem [shape: f32[1,128], index: 1, kind: input, shape index: {}]   ;;  %s2851_s2 = inlined_call_operand.vmem [shape: f32[1,128], index: 2, kind: input, shape index: {}]   ;;  %s2852_s3 = inlined_call_operand.vmem [shape: bf16[128,384], index: 3, kind: input, shape index: {}]   ;;  %s2853_s4 = inlined_call_operand.vmem [shape: f32[1,384], index: 4, kind: input, shape index: {}]   ;;  %s2854_s5 = inlined_call_operand.vmem [shape: bf16[128,128], index: 5, kind: input, shape index: {}]   ;;  %s2855_s6 = inlined_call_operand.vmem [shape: f32[1,128], index: 6, kind: input, shape index: {}]   ;;  %s2856_s7 = inlined_call_operand.vmem [shape: f32[1,128], index: 7, kind: input, shape index: {}]   ;;  %s2857_s8 = inlined_call_operand.vmem [shape: f32[1,128], index: 8, kind: input, shape index: {}]   ;;  %s2858_s9 = inlined_call_operand.vmem [shape: bf16[128,512], index: 9, kind: input, shape index: {}]   ;;  %s2859_s10 = inlined_call_operand.vmem [shape: f32[1,512], index: 10, kind: input, shape index: {}]   ;;  %s2860_s11 = inlined_call_operand.vmem [shape: bf16[512,128], index: 11, kind: input, shape index: {}]   ;;  %s2861_s12 = inlined_call_operand.hbm [shape: f32[1,128], index: 12, kind: input, shape index: {}]   ;;  %s2862_s13 = inlined_call_operand.vmem [shape: f32[2,5,128], index: 13, kind: output, shape index: {}]  }
   0x1 LB: > { %s2401_s26 = sadd.s32 4294967295, %s2317_s25   ;;  %p1866_p0 = scmp.ge.s32.totalorder %s2317_s25, 1  ;;  %s2317_s25 = sphi %s2395_s25, %s24_s25  }
   0x2   : > { %p333_p1 = scmp.lt.s32.totalorder %s2317_s25, 3  ;;  %p2863_p3 = scmp.eq.s32.totalorder %s2401_s26, 0 }
   0x3   : > { %s2319_s28 = smov [#allocation2]   ;;  %s2279_s16 = scalar_lea.hbm %s2861_s12, 16 }
   0x4   : > { %p2405_p2 = pnand %p1866_p0, %p333_p1  ;;  %s379_s29 = sshll.u32 %s2319_s28, 4  ;;  %s380_s29 = int_to_ptr.vmem [resolvable:$true] %s379_s29 }
   0x5   : > { %p2280_p6 = scmp.ne.s32.totalorder %s2861_s12, %s2279_s16  ;;  %p2286_p10 = scmp.lt.u32.totalorder %s2279_s16, %s2861_s12 }
   0x6   : > { %s2865_s27 = scalar_select %p2405_p2, 1, 0 }
   0x7   : > { %p2119_p4 = pneg %p2405_p2 }
   0x9   : > { %p2414_p5 = pnand %p2863_p3, %p2119_p4 }
   0xb   : > { %p2281_p7 = pneg %p2414_p5 }
   0xd   : > { %p2282_p8 = pnand %p2281_p7, %p2280_p6 }
   0xf   : > { %p2283_p9 = pneg %p2282_p8 }
  0x11   : > { %p2288_p11 = pnand %p2286_p10, %p2283_p9 }
  0x13   : > { %2291 = shalt.err (!%p2288_p11)
}
  0x14   : > { %s2292_s21 = scalar_lea.vmem %s380_s29, 16  ;;  %s2299_s22 = scalar_lea.vmem %s380_s29, 32 }
  0x15   : > { %p2293_p12 = scmp.ne.s32.totalorder %s380_s29, %s2292_s21  ;;  %p2300_p1 = scmp.lt.s32.totalorder %s380_s29, %s380_s29 }
  0x16   : > { %p2301_p4 = scmp.lt.s32.totalorder %s2299_s22, %s2292_s21 }
  0x17   : > { %p2295_p13 = pnand %p2293_p12, %p2281_p7 }
  0x18   : > { %p2302_p3 = por %p2301_p4, %p2300_p1 }
  0x19   : > { %p2296_p0 = pneg %p2295_p13 }
  0x1b   : > { %p2303_p2 = pnand %p2302_p3, %p2296_p0 }
  0x1d   : > { %2306 = shalt.err (!%p2303_p2)
}
  0x1e   : > { %2122 = dma.hbm_to_vmem [thread:$0]  (!%p2414_p5), %s2861_s12, 16, %s380_s29, [#allocation3]  }
  0x1f   : > { %p2867_p6 = scmp.ne.s32.totalorder %s2865_s27, 0 }
  0x20   : > { %p2868_p8 = scmp.eq.s32.totalorder (!%p2867_p6), %s2401_s26, 0 }
  0x21   : > { %399 = sbr.rel (%p2867_p6) target bundleno = 2984 (0xba8), region = 72 }
  0x28   : > { %2312 = dma.done.wait (%p2868_p8), [#allocation3], 16   ;;  %p2869_p7 = pmov %p2868_p8 }
  0x29   : > { %p441_p9 = scmp.lt.s32.totalorder %s2401_s26, 1  ;;  %vm453_vm0 = vcmask 1044480   ;;  %v2139_v2 = vld [vmem:[%s2852_s3 + $0x4] ss:$12 sps:$4 sm:$0xff]   ;;  %v2141_v3 = vld [vmem:[%s2852_s3] ss:$12 sps:$4 sm:$0xff]   ;;  %v517_v43 = vlaneseq }
  0x2a   : > { %2314 = vsyncadd (%p2869_p7), [#allocation3], 4294967280  ;;  %v2320_v4 = vmov 0.0   ;;  %v2142_v5 = vld [vmem:[%s2852_s3 + $0x8] ss:$12 sps:$4 sm:$0xff]   ;;  %660 = vmatprep.subr.bf16.mxu0 %v2139_v2  ;;  %v2321_v27 = vmov 0  }
  0x2b   : > { %s2871_s26 = smov (!%p441_p9, %s2401_s26), 1  ;;  %2051 = vmatprep.subr.bf16.mxu1 %v2320_v4  ;;  %v2143_v6 = vld [vmem:[%s2852_s3 + $0x1c] ss:$12 sps:$4 sm:$0xff]   ;;  %v2145_v7 = vld [vmem:[%s2852_s3 + $0x18] ss:$12 sps:$4 sm:$0xff]   ;;  %661 = vmatpush1.bf16.msra.mxu0 %v2141_v3  ;;  %vm2322_vm1 = vmmov 0  }
  0x2c   : > { %s1871_s28 = sshll.u32 %s2871_s26, 3  ;;  %v2146_v8 = vld [vmem:[%s2852_s3 + $0x20] ss:$12 sps:$4 sm:$0xff]   ;;  %2052 = vmatpush3.bf16.msra.mxu1 %v2142_v5  ;;  %662 = vmatprep.subr.bf16.mxu0 %v2143_v6  ;;  %v2149_v15 = vld [vmem:[%s2852_s3 + $0x30] ss:$12 sps:$4 sm:$0xff]   ;;  %v2551_v44 = vshrl.u32 %v517_v43, 7 }
  0x2d   : > { %s444_s27 = scalar_lea.vmem %s2849_s0, %s1871_s28  ;;  %v2147_v9 = vld [vmem:[%s2852_s3 + $0x34] ss:$12 sps:$4 sm:$0xff]   ;;  %2053 = vmatprep.subr.bf16.mxu1 %v2320_v4  ;;  %v2150_v16 = vld [vmem:[%s2852_s3 + $0x38] ss:$12 sps:$4 sm:$0xff]   ;;  %v2154_v19 = vld [vmem:[%s2852_s3 + $0x50] ss:$12 sps:$4 sm:$0xff]   ;;  %692 = vmatprep.mubr.bf16.mxu0 %v2321_v27  ;;  %s448_s14 = scalar_lea.vmem %s2862_s13, %s1871_s28 }
  0x2e   : > { %v2450_v0 = vld [vmem:[%s444_s27] sm:$0x1f]  ;;  %v2151_v17 = vld [vmem:[%s2852_s3 + $0x4c] ss:$12 sps:$4 sm:$0xff]   ;;  %v2153_v18 = vld [vmem:[%s2852_s3 + $0x48] ss:$12 sps:$4 sm:$0xff]   ;;  %2067 = vmatprep.mubr.msk.bf16.mxu1 %vm2322_vm1, %v2320_v4 }
  0x2f   : > { %v454_v1 = vsel %vm453_vm0, %v2450_v0, 0.0  ;;  %663 = vmatpush1.bf16.msra.mxu0 %v2145_v7  ;;  %v2155_v20 = vld [vmem:[%s2852_s3 + $0x64] ss:$12 sps:$4 sm:$0xff]   ;;  %v2157_v21 = vld [vmem:[%s2852_s3 + $0x60] ss:$12 sps:$4 sm:$0xff]   ;;  %v523_v45 = vsub.s32 1, %v2551_v44 }
  0x30   : > { %455 = vadd.xlane.f32.xlu0 %v454_v1  ;;  %2054 = vmatpush3.bf16.msra.mxu1 %v2146_v8  ;;  %v2158_v22 = vld [vmem:[%s2852_s3 + $0x68] ss:$12 sps:$4 sm:$0xff]   ;;  %v2161_v24 = vld [vmem:[%s2852_s3 + $0x78] ss:$12 sps:$4 sm:$0xff]   ;;  %v2162_v25 = vld [vmem:[%s2852_s3 + $0x80] ss:$12 sps:$4 sm:$0xff]  }
  0x31   : > { %664 = vmatprep.subr.bf16.mxu0 %v2147_v9  ;;  %2055 = vmatprep.subr.bf16.mxu1 %v2320_v4  ;;  %v2159_v23 = vld [vmem:[%s2852_s3 + $0x7c] ss:$12 sps:$4 sm:$0xff]   ;;  %v2163_v26 = vld [vmem:[%s2852_s3 + $0x94] ss:$12 sps:$4 sm:$0xff]   ;;  %v2166_v29 = vld [vmem:[%s2852_s3 + $0x98] ss:$12 sps:$4 sm:$0xff]  }
  0x32   : > { %v2165_v28 = vld [vmem:[%s2852_s3 + $0x90] ss:$12 sps:$4 sm:$0xff]   ;;  %v2167_v30 = vld [vmem:[%s2852_s3 + $0xac] ss:$12 sps:$4 sm:$0xff]   ;;  %v2169_v31 = vld [vmem:[%s2852_s3 + $0xa8] ss:$12 sps:$4 sm:$0xff]  }
  0x33   : > { %665 = vmatpush1.bf16.msra.mxu0 %v2149_v15  ;;  %v2170_v32 = vld [vmem:[%s2852_s3 + $0xb0] ss:$12 sps:$4 sm:$0xff]   ;;  %v1873_v37 = vld [vmem:[%s2850_s1] ss:$0 sm:$0xff]  ;;  %v527_v47 = vsub.s32 2, %v2551_v44  ;;  %v519_v49 = vsub.s32 0, %v2551_v44 }
  0x34   : > { %2056 = vmatpush3.bf16.msra.mxu1 %v2150_v16  ;;  %666 = vmatprep.subr.bf16.mxu0 %v2151_v17  ;;  %v1874_v39 = vld [vmem:[%s2851_s2] ss:$0 sm:$0xff]  ;;  %vm744_vm2 = vcmask 523264   ;;  %vm809_vm3 = vcmask 1041408   ;;  %s2323_s29 = smov 64   ;;  %vm810_vm4 = vcmask 1042432  }
  0x35   : > { %2057 = vmatprep.subr.bf16.mxu1 %v2320_v4  ;;  %v514_v46 = vld [vmem:[%s2853_s4] sm:$0x7]  ;;  %v2324_v1 = vmov 65535   ;;  %vm792_vm5 = vcmask 36864   ;;  %vm805_vm6 = vcmask 39936  }
  0x36   : > { %v524_v48 = vrot.slane %v514_v46, %v523_v45  ;;  %v528_v52 = vrot.slane %v514_v46, %v527_v47  ;;  %v520_v60 = vrot.slane %v514_v46, %v519_v49  ;;  %v811_v2 = vsel %vm809_vm3, 4294967295, %v2324_v1 }
  0x37   : > { %667 = vmatpush1.bf16.msra.mxu0 %v2153_v18  ;;  %v812_v6 = vsel %vm810_vm4, %v811_v2, 0 }
  0x38   : > { %2058 = vmatpush3.bf16.msra.mxu1 %v2154_v19  ;;  %668 = vmatprep.subr.bf16.mxu0 %v2155_v20 }
  0x39   : > { %2059 = vmatprep.subr.bf16.mxu1 %v2320_v4 }
  0x3b   : > { %669 = vmatpush1.bf16.msra.mxu0 %v2157_v21 }
  0x3c   : > { %2060 = vmatpush3.bf16.msra.mxu1 %v2158_v22  ;;  %670 = vmatprep.subr.bf16.mxu0 %v2159_v23 }
  0x3d   : > { %2061 = vmatprep.subr.bf16.mxu1 %v2320_v4 }
  0x3f   : > { %671 = vmatpush1.bf16.msra.mxu0 %v2161_v24 }
  0x40   : > { %2062 = vmatpush3.bf16.msra.mxu1 %v2162_v25  ;;  %672 = vmatprep.subr.bf16.mxu0 %v2163_v26 }
  0x41   : > { %2063 = vmatprep.subr.bf16.mxu1 %v2320_v4 }
  0x43   : > { %673 = vmatpush1.bf16.msra.mxu0 %v2165_v28 }
  0x44   : > { %2064 = vmatpush3.bf16.msra.mxu1 %v2166_v29  ;;  %674 = vmatprep.subr.bf16.mxu0 %v2167_v30 }
  0x45   : > { %2065 = vmatprep.subr.bf16.mxu1 %v2320_v4 }
  0x47   : > { %675 = vmatpush1.bf16.msra.mxu0 %v2169_v31 }
  0x48   : > { %2066 = vmatpush3.bf16.msra.mxu1 %v2170_v32  ;;  %2095 = vmatprep.subr.bf16.mxu0 %v2320_v4 }
  0x49   : > { %2071 = vmatprep.subr.bf16.mxu1 %v2320_v4 }
  0xbd   : > { %v456_v10 = vpop.xlane.xlu0 %455 }
  0xbe   : > { %v458_v11 = vmul.f32 0.0078125, %v456_v10 }
  0xc0   : > { %v459_v12 = vsub.f32 %v2450_v0, %v458_v11 }
  0xc2   : > { %v460_v13 = vmul.f32 %v459_v12, %v459_v12 }
  0xc4   : > { %v461_v14 = vsel %vm453_vm0, %v460_v13, 0.0 }
  0xc5   : > { %462 = vadd.xlane.f32.xlu0 %v461_v14 }
 0x152   : > { %v463_v33 = vpop.xlane.xlu0 %462 }
 0x153   : > { %v464_v34 = vmul.f32 0.0078125, %v463_v33 }
 0x155   : > { %v465_v35 = vadd.f32 1e-06, %v464_v34 }
 0x157   : > { %2259 = vrsqrt.f32 %v465_v35 }
 0x161   : > { %v2260_v36 = vpop.eup %2259 }
 0x162   : > { %v467_v38 = vmul.f32 %v2260_v36, %v459_v12 }
 0x164   : > { %v474_v40 = vmul.f32 %v1873_v37, %v467_v38 }
 0x166   : > { %v481_v41 = vadd.f32 %v1874_v39, %v474_v40 }
 0x168   : > { %v515_v42 = vpack.c.bf16 %v481_v41, %v481_v41 }
 0x16a   : > { %693 = vmatmul.mubr.bf16.vlgmr.msra.gmra.mrb[0].mxu0 %v515_v42  ;;  %2068 = vmatmul.mubr.bf16.vlgmr.msra.gmra.mrb[0].mxu1 %v515_v42 }
 0x16b   : > { %2073 = vmatprep.mubr.msk.bf16.mxu1 %vm2322_vm1, %v2320_v4  ;;  %2111 = vmatprep.mubr.msk.bf16.mxu0 %vm2322_vm1, %v2320_v4 }
 0x23d   : > { %v694_v50 = vpop.f32.mrb[0].mxu0  ;;  %v735_v51 = vpop.f32.mrb[0].mxu1 }
 0x23e   : > { %v696_v53 = vpop.f32.mrb[1].mxu0  ;;  %v2069_v54 = vpop.f32.mrb[1].mxu1  ;;  %v736_v62 = vadd.f32 %v735_v51, %v528_v52  ;;  %v695_v3 = vadd.f32 %v694_v50, %v520_v60  ;;  %v2178_v60 = vld [vmem:[%s2854_s5 + $0x38] sm:$0xff]  }
 0x23f   : > { %v697_v55 = vadd.f32 %v696_v53, %v524_v48  ;;  %v698_v56 = vpop.f32.mrb[2].mxu0  ;;  %v738_v57 = vpop.f32.mrb[2].mxu1  ;;  %v2171_v53 = vld [vmem:[%s2854_s5] sm:$0xff]   ;;  %v2172_v54 = vld [vmem:[%s2854_s5 + $0x8] sm:$0xff]  }
 0x240   : > { %v699_v58 = vpop.f32.mrb[3].mxu0  ;;  %v2070_v59 = vpop.f32.mrb[3].mxu1  ;;  %v743_v5 = vpack.c.bf16 %v736_v62, %v736_v62  ;;  %v741_v7 = vpack.c.bf16 %v695_v3, %v695_v3  ;;  %2096 = vmatpush3.bf16.msra.mxu0 %v2171_v53  ;;  %v2174_v56 = vld [vmem:[%s2854_s5 + $0x18] sm:$0xff]   ;;  %v2175_v57 = vld [vmem:[%s2854_s5 + $0x20] sm:$0xff]  }
 0x241   : > { %v742_v61 = vpack.c.bf16 %v697_v55, %v697_v55  ;;  %2097 = vmatprep.subr.bf16.mxu0 %v2320_v4  ;;  %v2173_v55 = vld [vmem:[%s2854_s5 + $0x10] sm:$0xff]   ;;  %v2176_v58 = vld [vmem:[%s2854_s5 + $0x28] sm:$0xff]  }
 0x242   : > { %v814_v8 = vand.u32 %v812_v6, %v743_v5  ;;  %v2177_v59 = vld [vmem:[%s2854_s5 + $0x30] sm:$0xff]  }
 0x243   : > { %v749_v63 = vsel %vm744_vm2, %v742_v61, 0  ;;  %860 = vrot.lane.b32.xlu0 %v742_v61, %s2323_s29 }
 0x244   : > { %2072 = vmatpush3.bf16.xpose.msra.mxu1 %v749_v63  ;;  %2098 = vmatpush3.bf16.msra.mxu0 %v2172_v54 }
 0x245   : > { %2077 = vmatprep.subr.bf16.mxu1 %v2320_v4  ;;  %2099 = vmatprep.subr.bf16.mxu0 %v2320_v4 }
 0x248   : > { %2100 = vmatpush3.bf16.msra.mxu0 %v2173_v55 }
 0x249   : > { %2101 = vmatprep.subr.bf16.mxu0 %v2320_v4 }
 0x24b   : > { %2074 = vmatmul.mubr.msk.bf16.vlgmr.msra.gmra.mrb[4].mxu1 %vm744_vm2, %v741_v7 }
 0x24c   : > { %2078 = vmatpush3.bf16.msra.mxu1 %v814_v8  ;;  %2079 = vmatprep.mubr.msk.bf16.mxu1 %vm2322_vm1, %v2320_v4 }
 0x24d   : > { %2083 = vmatprep.subr.bf16.mxu1 %v2320_v4  ;;  %2102 = vmatpush3.bf16.msra.mxu0 %v2174_v56 }
 0x24e   : > { %2103 = vmatprep.subr.bf16.mxu0 %v2320_v4 }
 0x251   : > { %2104 = vmatpush3.bf16.msra.mxu0 %v2175_v57  ;;  %v1912_v57 = vld [vmem:[%s2856_s7] ss:$0 sm:$0xff] }
 0x252   : > { %2105 = vmatprep.subr.bf16.mxu0 %v2320_v4 }
 0x255   : > { %2106 = vmatpush3.bf16.msra.mxu0 %v2176_v58 }
 0x256   : > { %2107 = vmatprep.subr.bf16.mxu0 %v2320_v4 }
 0x259   : > { %2108 = vmatpush3.bf16.msra.mxu0 %v2177_v59  ;;  %v1913_v59 = vld [vmem:[%s2857_s8] ss:$0 sm:$0xff] }
 0x25a   : > { %2109 = vmatprep.subr.bf16.mxu0 %v2320_v4 }
 0x25d   : > { %2110 = vmatpush3.bf16.msra.mxu0 %v2178_v60 }
 0x2b5   : > { %v861_v23 = vpop.permute.xlu0 %860 }
 0x2b6   : > { %v866_v25 = vsel %vm744_vm2, %v861_v23, 0 }
 0x31e   : > { %v785_v9 = vpop.f32.mrb[4].mxu1 }
 0x31f   : > { %v791_v10 = vmul.f32 0.125, %v785_v9  ;;  %v2075_v11 = vpop.f32.mrb[5].mxu1 }
 0x320   : > { %v788_v12 = vpop.f32.mrb[6].mxu1 }
 0x321   : > { %v2076_v13 = vpop.f32.mrb[7].mxu1  ;;  %v793_v14 = vsel %vm792_vm5, %v791_v10, -inf }
 0x322   : > { %794 = vmax.xlane.f32.xlu1 %v793_v14  ;;  %v2181_v13 = vld [vmem:[%s2858_s9 + $0x4] ss:$16 sps:$4 sm:$0xff]   ;;  %v2182_v14 = vld [vmem:[%s2858_s9 + $0x8] ss:$16 sps:$4 sm:$0xff]  }
 0x3af   : > { %v795_v15 = vpop.xlane.xlu1 %794 }
 0x3b0   : > { %v796_v16 = vsub.f32 %v791_v10, %v795_v15  ;;  %v2187_v15 = vld [vmem:[%s2858_s9 + $0x24] ss:$16 sps:$4 sm:$0xff]  }
 0x3b2   : > { %v797_v17 = vmul.f32 1.442695, %v796_v16  ;;  %v2190_v16 = vld [vmem:[%s2858_s9 + $0x2c] ss:$16 sps:$4 sm:$0xff]  }
 0x3b4   : > { %2261 = vpow2.f32 %v797_v17  ;;  %v2185_v17 = vld [vmem:[%s2858_s9 + $0x20] ss:$16 sps:$4 sm:$0xff]  }
 0x3be   : > { %v2262_v18 = vpop.eup %2261 }
 0x3bf   : > { %v799_v19 = vsel %vm792_vm5, %v2262_v18, 0.0 }
 0x3c0   : > { %800 = vadd.xlane.f32.xlu1 %v799_v19  ;;  %v2193_v19 = vld [vmem:[%s2858_s9 + $0x44] ss:$16 sps:$4 sm:$0xff]  }
 0x3d1   : > { %857 = vrot.lane.b32.xlu1 %v741_v7, %s2323_s29 }
 0x44d   : > { %v801_v20 = vpop.xlane.xlu1 %800 }
 0x44e   : > { %2263 = vrcp.f32 %v801_v20  ;;  %v2196_v20 = vld [vmem:[%s2858_s9 + $0x4c] ss:$16 sps:$4 sm:$0xff]  }
 0x451   : > { %v858_v26 = vpop.permute.xlu1 %857 }
 0x458   : > { %v2264_v21 = vpop.eup %2263 }
 0x459   : > { %v803_v22 = vmul.f32 %v2264_v21, %v2262_v18  ;;  %v2188_v18 = vld [vmem:[%s2858_s9 + $0x28] ss:$16 sps:$4 sm:$0xff]   ;;  %v2191_v21 = vld [vmem:[%s2858_s9 + $0x40] ss:$16 sps:$4 sm:$0xff]  }
 0x45b   : > { %v804_v24 = vpack.c.bf16 %v803_v22, %v803_v22  ;;  %v2194_v22 = vld [vmem:[%s2858_s9 + $0x48] ss:$16 sps:$4 sm:$0xff]  }
 0x45d   : > { %2080 = vmatmul.mubr.msk.bf16.vlgmr.msra.gmra.mrb[8].mxu1 %vm805_vm6, %v804_v24 }
 0x45e   : > { %2084 = vmatpush3.bf16.xpose.msra.mxu1 %v866_v25  ;;  %2085 = vmatprep.mubr.msk.bf16.mxu1 %vm2322_vm1, %v2320_v4 }
 0x45f   : > { %2089 = vmatprep.subr.bf16.mxu1 %v2320_v4 }
 0x465   : > { %2086 = vmatmul.mubr.msk.bf16.vlgmr.msra.gmra.mrb[12].mxu1 %vm744_vm2, %v858_v26 }
 0x466   : > { %2091 = vmatprep.mubr.msk.bf16.mxu1 %vm2322_vm1, %v2320_v4  ;;  %v1903_v4 = vld [vmem:[%s2855_s6] ss:$0 sm:$0xff] }
 0x530   : > { %v850_v28 = vpop.f32.mrb[8].mxu1 }
 0x531   : > { %v2081_v29 = vpop.f32.mrb[9].mxu1 }
 0x532   : > { %v853_v30 = vpop.f32.mrb[10].mxu1  ;;  %v2199_v29 = vld [vmem:[%s2858_s9 + $0x64] ss:$16 sps:$4 sm:$0xff]  }
 0x533   : > { %v2082_v31 = vpop.f32.mrb[11].mxu1  ;;  %v2202_v30 = vld [vmem:[%s2858_s9 + $0x6c] ss:$16 sps:$4 sm:$0xff]  }
 0x534   : > { %v2197_v31 = vld [vmem:[%s2858_s9 + $0x60] ss:$16 sps:$4 sm:$0xff]  }
 0x538   : > { %v902_v32 = vpop.f32.mrb[12].mxu1 }
 0x539   : > { %v908_v33 = vmul.f32 0.125, %v902_v32  ;;  %v2087_v34 = vpop.f32.mrb[13].mxu1  ;;  %v2200_v32 = vld [vmem:[%s2858_s9 + $0x68] ss:$16 sps:$4 sm:$0xff]  }
 0x53a   : > { %v905_v35 = vpop.f32.mrb[14].mxu1  ;;  %v2208_v34 = vld [vmem:[%s2858_s9 + $0x8c] ss:$16 sps:$4 sm:$0xff]  }
 0x53b   : > { %v2088_v36 = vpop.f32.mrb[15].mxu1  ;;  %v909_v37 = vsel %vm792_vm5, %v908_v33, -inf  ;;  %v2203_v35 = vld [vmem:[%s2858_s9 + $0x80] ss:$16 sps:$4 sm:$0xff]  }
 0x53c   : > { %910 = vmax.xlane.f32.xlu1 %v909_v37  ;;  %v2206_v36 = vld [vmem:[%s2858_s9 + $0x88] ss:$16 sps:$4 sm:$0xff]   ;;  %v2211_v37 = vld [vmem:[%s2858_s9 + $0xa4] ss:$16 sps:$4 sm:$0xff]  }
 0x5c9   : > { %v911_v38 = vpop.xlane.xlu1 %910 }
 0x5ca   : > { %v912_v39 = vsub.f32 %v908_v33, %v911_v38  ;;  %v2205_v33 = vld [vmem:[%s2858_s9 + $0x84] ss:$16 sps:$4 sm:$0xff]   ;;  %v2214_v38 = vld [vmem:[%s2858_s9 + $0xac] ss:$16 sps:$4 sm:$0xff]  }
 0x5cc   : > { %v913_v40 = vmul.f32 1.442695, %v912_v39  ;;  %v2209_v39 = vld [vmem:[%s2858_s9 + $0xa0] ss:$16 sps:$4 sm:$0xff]  }
 0x5ce   : > { %2265 = vpow2.f32 %v913_v40  ;;  %v2212_v40 = vld [vmem:[%s2858_s9 + $0xa8] ss:$16 sps:$4 sm:$0xff]  }
 0x5d8   : > { %v2266_v41 = vpop.eup %2265 }
 0x5d9   : > { %v915_v42 = vsel %vm792_vm5, %v2266_v41, 0.0 }
 0x5da   : > { %916 = vadd.xlane.f32.xlu0 %v915_v42  ;;  %v2220_v42 = vld [vmem:[%s2858_s9 + $0xcc] ss:$16 sps:$4 sm:$0xff]  }
 0x5f0   : > { %922 = vrot.lane.b32.xlu0 %v743_v5, %s2323_s29 }
 0x667   : > { %v917_v43 = vpop.xlane.xlu0 %916 }
 0x668   : > { %2267 = vrcp.f32 %v917_v43  ;;  %v2215_v43 = vld [vmem:[%s2858_s9 + $0xc0] ss:$16 sps:$4 sm:$0xff]  }
 0x66b   : > { %v923_v46 = vpop.permute.xlu0 %922 }
 0x66c   : > { %v928_v48 = vand.u32 %v923_v46, %v812_v6  ;;  %v2218_v46 = vld [vmem:[%s2858_s9 + $0xc8] ss:$16 sps:$4 sm:$0xff]  }
 0x66e   : > { %2090 = vmatpush3.bf16.msra.mxu1 %v928_v48  ;;  %v2223_v48 = vld [vmem:[%s2858_s9 + $0xe4] ss:$16 sps:$4 sm:$0xff]  }
 0x66f   : > { %1332 = vmatprep.subr.bf16.mxu1 %v2181_v13  ;;  %v2240_v13 = vld [vmem:[%s2860_s11 + $0xd8] sm:$0xff]  }
 0x672   : > { %v2268_v50 = vpop.eup %2267 }
 0x673   : > { %v919_v51 = vmul.f32 %v2268_v50, %v2266_v41  ;;  %v2217_v41 = vld [vmem:[%s2858_s9 + $0xc4] ss:$16 sps:$4 sm:$0xff]   ;;  %v2226_v50 = vld [vmem:[%s2858_s9 + $0xec] ss:$16 sps:$4 sm:$0xff]  }
 0x675   : > { %v920_v52 = vpack.c.bf16 %v919_v51, %v919_v51  ;;  %v2221_v51 = vld [vmem:[%s2858_s9 + $0xe0] ss:$16 sps:$4 sm:$0xff]  }
 0x677   : > { %2092 = vmatmul.mubr.msk.bf16.vlgmr.msra.gmra.mrb[16].mxu1 %vm805_vm6, %v920_v52  ;;  %v2224_v52 = vld [vmem:[%s2858_s9 + $0xe8] ss:$16 sps:$4 sm:$0xff]  }
 0x678   : > { %1364 = vmatprep.mubr.bf16.mxu1 %v2321_v27 }
 0x74a   : > { %v964_v61 = vpop.f32.mrb[16].mxu1 }
 0x74b   : > { %971 = vrot.lane.b32.xlu1 %v964_v61, %s2323_s29  ;;  %v2093_v62 = vpop.f32.mrb[17].mxu1 }
 0x74c   : > { %v967_v63 = vpop.f32.mrb[18].mxu1 }
 0x74d   : > { %v2094_v1 = vpop.f32.mrb[19].mxu1  ;;  %v2227_v63 = vld [vmem:[%s2860_s11 + $0x40] sm:$0xff]  }
 0x74e   : > { %v2228_v1 = vld [vmem:[%s2860_s11 + $0xc0] sm:$0xff]  }
 0x7bd   : > { %v972_v2 = vpop.permute.xlu1 %971 }
 0x7be   : > { %v974_v3 = vsel %vm744_vm2, %v850_v28, %v972_v2  ;;  %v2229_v2 = vld [vmem:[%s2860_s11] sm:$0xff]  }
 0x7bf   : > { %v992_v5 = vpack.c.bf16 %v974_v3, %v974_v3  ;;  %v2230_v3 = vld [vmem:[%s2860_s11 + $0x80] sm:$0xff]  }
 0x7c1   : > { %2112 = vmatmul.mubr.bf16.vlgmr.msra.gmra.mrb[4].mxu0 %v992_v5  ;;  %v2231_v5 = vld [vmem:[%s2860_s11 + $0x48] sm:$0xff]  }
 0x7c2   : > { %1405 = vmatprep.mubr.bf16.mxu0 %v2321_v27  ;;  %v2179_v27 = vld [vmem:[%s2858_s9] ss:$16 sps:$4 sm:$0xff]  }
 0x7c3   : > { %1333 = vmatpush1.bf16.msra.mxu1 %v2179_v27  ;;  %v2239_v27 = vld [vmem:[%s2860_s11 + $0x58] sm:$0xff]  }
 0x7c4   : > { %1334 = vmatprep.subr.bf16.mxu1 %v2187_v15  ;;  %v2243_v15 = vld [vmem:[%s2860_s11 + $0x60] sm:$0xff]  }
 0x7c7   : > { %1335 = vmatpush1.bf16.msra.mxu1 %v2185_v17  ;;  %v2245_v17 = vld [vmem:[%s2860_s11 + $0x20] sm:$0xff]  }
 0x7c8   : > { %1336 = vmatprep.subr.bf16.mxu1 %v2193_v19  ;;  %v2247_v19 = vld [vmem:[%s2860_s11 + $0x68] sm:$0xff]  }
 0x7cb   : > { %1337 = vmatpush1.bf16.msra.mxu1 %v2191_v21  ;;  %v2249_v21 = vld [vmem:[%s2860_s11 + $0x28] sm:$0xff]  }
 0x7cc   : > { %1338 = vmatprep.subr.bf16.mxu1 %v2199_v29  ;;  %v2256_v29 = vld [vmem:[%s2860_s11 + $0xf8] sm:$0xff]  }
 0x7cf   : > { %1339 = vmatpush1.bf16.msra.mxu1 %v2197_v31  ;;  %v2258_v31 = vld [vmem:[%s2860_s11 + $0xb8] sm:$0xff]  }
 0x7d0   : > { %1340 = vmatprep.subr.bf16.mxu1 %v2205_v33  ;;  %v1166_v33 = vsub.s32 3, %v2551_v44 }
 0x7d3   : > { %1341 = vmatpush1.bf16.msra.mxu1 %v2203_v35 }
 0x7d4   : > { %1342 = vmatprep.subr.bf16.mxu1 %v2211_v37 }
 0x7d7   : > { %1343 = vmatpush1.bf16.msra.mxu1 %v2209_v39 }
 0x7d8   : > { %1344 = vmatprep.subr.bf16.mxu1 %v2217_v41 }
 0x7db   : > { %1345 = vmatpush1.bf16.msra.mxu1 %v2215_v43 }
 0x7dc   : > { %1346 = vmatprep.subr.bf16.mxu1 %v2223_v48 }
 0x7df   : > { %1347 = vmatpush1.bf16.msra.mxu1 %v2221_v51 }
 0x7e0   : > { %2007 = vmatprep.subr.bf16.mxu1 %v2227_v63 }
 0x894   : > { %v1081_v6 = vpop.f32.mrb[4].mxu0 }
 0x895   : > { %v1082_v7 = vadd.f32 %v1903_v4, %v1081_v6  ;;  %v2113_v8 = vpop.f32.mrb[5].mxu0  ;;  %v2232_v4 = vld [vmem:[%s2860_s11 + $0xc8] sm:$0xff]  }
 0x896   : > { %v1084_v9 = vpop.f32.mrb[6].mxu0  ;;  %v2233_v6 = vld [vmem:[%s2860_s11 + $0x8] sm:$0xff]   ;;  %v2235_v8 = vld [vmem:[%s2860_s11 + $0x50] sm:$0xff]  }
 0x897   : > { %v2626_v10 = vadd.f32 %v1082_v7, %v2450_v0  ;;  %v2114_v11 = vpop.f32.mrb[7].mxu0  ;;  %v2184_v0 = vld [vmem:[%s2858_s9 + $0xc] ss:$16 sps:$4 sm:$0xff]   ;;  %v2236_v9 = vld [vmem:[%s2860_s11 + $0xd0] sm:$0xff]  }
 0x898   : > { %1373 = vmatprep.subr.bf16.mxu0 %v2184_v0  ;;  %v2234_v7 = vld [vmem:[%s2860_s11 + $0x88] sm:$0xff]   ;;  %v2237_v11 = vld [vmem:[%s2860_s11 + $0x10] sm:$0xff]   ;;  %v2242_v0 = vld [vmem:[%s2860_s11 + $0x98] sm:$0xff]  }
 0x899   : > { %v1090_v12 = vsel %vm453_vm0, %v2626_v10, 0.0  ;;  %1374 = vmatpush1.bf16.msra.mxu0 %v2182_v14  ;;  %v2241_v14 = vld [vmem:[%s2860_s11 + $0x18] sm:$0xff]  }
 0x89a   : > { %1091 = vadd.xlane.f32.xlu1 %v1090_v12  ;;  %1375 = vmatprep.subr.bf16.mxu0 %v2190_v16  ;;  %v2238_v12 = vld [vmem:[%s2860_s11 + $0x90] sm:$0xff]   ;;  %v2244_v16 = vld [vmem:[%s2860_s11 + $0xe0] sm:$0xff]  }
 0x89d   : > { %1376 = vmatpush1.bf16.msra.mxu0 %v2188_v18  ;;  %v2246_v18 = vld [vmem:[%s2860_s11 + $0xa0] sm:$0xff]  }
 0x89e   : > { %1377 = vmatprep.subr.bf16.mxu0 %v2196_v20  ;;  %v2248_v20 = vld [vmem:[%s2860_s11 + $0xe8] sm:$0xff]  }
 0x8a1   : > { %1378 = vmatpush1.bf16.msra.mxu0 %v2194_v22  ;;  %v2250_v22 = vld [vmem:[%s2860_s11 + $0xa8] sm:$0xff]  }
 0x8a2   : > { %1379 = vmatprep.subr.bf16.mxu0 %v2202_v30  ;;  %v2257_v30 = vld [vmem:[%s2860_s11 + $0x38] sm:$0xff]  }
 0x8a5   : > { %1380 = vmatpush1.bf16.msra.mxu0 %v2200_v32  ;;  %v1149_v32 = vld [vmem:[%s2859_s10] sm:$0xf] }
 0x8a6   : > { %1381 = vmatprep.subr.bf16.mxu0 %v2208_v34  ;;  %v1155_v34 = vrot.slane %v1149_v32, %v519_v49  ;;  %v1163_v35 = vrot.slane %v1149_v32, %v527_v47  ;;  %v1167_v37 = vrot.slane %v1149_v32, %v1166_v33 }
 0x8a9   : > { %1382 = vmatpush1.bf16.msra.mxu0 %v2206_v36  ;;  %v1159_v36 = vrot.slane %v1149_v32, %v523_v45 }
 0x8aa   : > { %1383 = vmatprep.subr.bf16.mxu0 %v2214_v38 }
 0x8ad   : > { %1384 = vmatpush1.bf16.msra.mxu0 %v2212_v40 }
 0x8ae   : > { %1385 = vmatprep.subr.bf16.mxu0 %v2220_v42 }
 0x8b1   : > { %1386 = vmatpush1.bf16.msra.mxu0 %v2218_v46 }
 0x8b2   : > { %1387 = vmatprep.subr.bf16.mxu0 %v2226_v50 }
 0x8b5   : > { %1388 = vmatpush1.bf16.msra.mxu0 %v2224_v52 }
 0x8b6   : > { %2029 = vmatprep.subr.bf16.mxu0 %v2228_v1 }
 0x927   : > { %v1092_v23 = vpop.xlane.xlu1 %1091 }
 0x928   : > { %v1093_v24 = vmul.f32 0.0078125, %v1092_v23  ;;  %v2251_v23 = vld [vmem:[%s2860_s11 + $0x70] sm:$0xff]  }
 0x92a   : > { %v1094_v25 = vsub.f32 %v2626_v10, %v1093_v24  ;;  %v2252_v24 = vld [vmem:[%s2860_s11 + $0xf0] sm:$0xff]  }
 0x92c   : > { %v1095_v26 = vmul.f32 %v1094_v25, %v1094_v25 }
 0x92e   : > { %v1096_v28 = vsel %vm453_vm0, %v1095_v26, 0.0  ;;  %v2254_v26 = vld [vmem:[%s2860_s11 + $0xb0] sm:$0xff]  }
 0x92f   : > { %1097 = vadd.xlane.f32.xlu0 %v1096_v28  ;;  %v2255_v28 = vld [vmem:[%s2860_s11 + $0x78] sm:$0xff]  }
 0x9bc   : > { %v1098_v53 = vpop.xlane.xlu0 %1097 }
 0x9bd   : > { %v1099_v54 = vmul.f32 0.0078125, %v1098_v53 }
 0x9bf   : > { %v1100_v55 = vadd.f32 1e-06, %v1099_v54 }
 0x9c1   : > { %2269 = vrsqrt.f32 %v1100_v55 }
 0x9cb   : > { %v2270_v56 = vpop.eup %2269 }
 0x9cc   : > { %v1102_v58 = vmul.f32 %v2270_v56, %v1094_v25  ;;  %v2253_v25 = vld [vmem:[%s2860_s11 + $0x30] sm:$0xff]  }
 0x9ce   : > { %v1109_v60 = vmul.f32 %v1912_v57, %v1102_v58 }
 0x9d0   : > { %v1116_v61 = vadd.f32 %v1913_v59, %v1109_v60 }
 0x9d2   : > { %v1150_v62 = vpack.c.bf16 %v1116_v61, %v1116_v61 }
 0x9d4   : > { %1365 = vmatmul.mubr.bf16.vlgmr.msra.gmra.mrb[20].mxu1 %v1150_v62  ;;  %1406 = vmatmul.mubr.bf16.vlgmr.msra.gmra.mrb[8].mxu0 %v1150_v62 }
 0x9d5   : > { %2008 = vmatpush3.bf16.msra.mxu1 %v2229_v2  ;;  %2030 = vmatpush3.bf16.msra.mxu0 %v2230_v3 }
 0x9d6   : > { %2009 = vmatprep.subr.bf16.mxu1 %v2231_v5  ;;  %2031 = vmatprep.subr.bf16.mxu0 %v2232_v4 }
 0x9d9   : > { %2010 = vmatpush3.bf16.msra.mxu1 %v2233_v6  ;;  %2032 = vmatpush3.bf16.msra.mxu0 %v2234_v7 }
 0x9da   : > { %2011 = vmatprep.subr.bf16.mxu1 %v2235_v8  ;;  %2033 = vmatprep.subr.bf16.mxu0 %v2236_v9 }
 0x9dd   : > { %2012 = vmatpush3.bf16.msra.mxu1 %v2237_v11  ;;  %2034 = vmatpush3.bf16.msra.mxu0 %v2238_v12 }
 0x9de   : > { %2013 = vmatprep.subr.bf16.mxu1 %v2239_v27  ;;  %2035 = vmatprep.subr.bf16.mxu0 %v2240_v13 }
 0x9e1   : > { %2014 = vmatpush3.bf16.msra.mxu1 %v2241_v14  ;;  %2036 = vmatpush3.bf16.msra.mxu0 %v2242_v0 }
 0x9e2   : > { %2015 = vmatprep.subr.bf16.mxu1 %v2243_v15  ;;  %2037 = vmatprep.subr.bf16.mxu0 %v2244_v16 }
 0x9e5   : > { %2016 = vmatpush3.bf16.msra.mxu1 %v2245_v17  ;;  %2038 = vmatpush3.bf16.msra.mxu0 %v2246_v18 }
 0x9e6   : > { %2017 = vmatprep.subr.bf16.mxu1 %v2247_v19  ;;  %2039 = vmatprep.subr.bf16.mxu0 %v2248_v20 }
 0x9e9   : > { %2018 = vmatpush3.bf16.msra.mxu1 %v2249_v21  ;;  %2040 = vmatpush3.bf16.msra.mxu0 %v2250_v22 }
 0x9ea   : > { %2019 = vmatprep.subr.bf16.mxu1 %v2251_v23  ;;  %2041 = vmatprep.subr.bf16.mxu0 %v2252_v24 }
 0x9ed   : > { %2020 = vmatpush3.bf16.msra.mxu1 %v2253_v25  ;;  %2042 = vmatpush3.bf16.msra.mxu0 %v2254_v26 }
 0x9ee   : > { %2021 = vmatprep.subr.bf16.mxu1 %v2255_v28  ;;  %2043 = vmatprep.subr.bf16.mxu0 %v2256_v29  ;;  %v1946_v29 = vld [vmem:[#allocation2] ss:$0 sm:$0xff] }
 0x9f1   : > { %2022 = vmatpush3.bf16.msra.mxu1 %v2257_v30  ;;  %2044 = vmatpush3.bf16.msra.mxu0 %v2258_v31 }
 0xaa7   : > { %v1366_v38 = vpop.f32.mrb[20].mxu1  ;;  %v1407_v39 = vpop.f32.mrb[8].mxu0 }
 0xaa8   : > { %v1367_v40 = vadd.f32 %v1366_v38, %v1155_v34  ;;  %v1408_v41 = vadd.f32 %v1407_v39, %v1163_v35  ;;  %v1368_v42 = vpop.f32.mrb[21].mxu1  ;;  %v1409_v43 = vpop.f32.mrb[9].mxu0 }
 0xaa9   : > { %v1369_v46 = vadd.f32 %v1368_v42, %v1159_v36  ;;  %v1410_v48 = vadd.f32 %v1409_v43, %v1167_v37  ;;  %v1370_v50 = vpop.f32.mrb[22].mxu1  ;;  %v1411_v51 = vpop.f32.mrb[10].mxu0 }
 0xaaa   : > { %v1414_v52 = vmul.f32 %v1367_v40, %v1367_v40  ;;  %v1416_v53 = vmul.f32 %v1408_v41, %v1408_v41  ;;  %v1371_v49 = vpop.f32.mrb[23].mxu1  ;;  %v1412_v54 = vpop.f32.mrb[11].mxu0 }
 0xaab   : > { %v1415_v55 = vmul.f32 %v1369_v46, %v1369_v46  ;;  %v1417_v47 = vmul.f32 %v1410_v48, %v1410_v48 }
 0xaac   : > { %v1418_v56 = vmul.f32 %v1414_v52, %v1367_v40  ;;  %v1420_v44 = vmul.f32 %v1416_v53, %v1408_v41 }
 0xaad   : > { %v1419_v45 = vmul.f32 %v1415_v55, %v1369_v46  ;;  %v1421_v57 = vmul.f32 %v1417_v47, %v1410_v48 }
 0xaae   : > { %v1422_v58 = vmul.f32 0.044715, %v1418_v56  ;;  %v1424_v59 = vmul.f32 0.044715, %v1420_v44 }
 0xaaf   : > { %v1423_v60 = vmul.f32 0.044715, %v1419_v45  ;;  %v1425_v61 = vmul.f32 0.044715, %v1421_v57 }
 0xab0   : > { %v1426_v62 = vadd.f32 %v1422_v58, %v1367_v40  ;;  %v1428_v63 = vadd.f32 %v1424_v59, %v1408_v41 }
 0xab1   : > { %v1427_v1 = vadd.f32 %v1423_v60, %v1369_v46  ;;  %v1429_v2 = vadd.f32 %v1425_v61, %v1410_v48 }
 0xab2   : > { %v1430_v3 = vmul.f32 0.7978846, %v1426_v62  ;;  %v1432_v5 = vmul.f32 0.7978846, %v1428_v63 }
 0xab3   : > { %v1431_v4 = vmul.f32 0.7978846, %v1427_v1  ;;  %v1433_v6 = vmul.f32 0.7978846, %v1429_v2 }
 0xab4   : > { %2271 = vtanh.f32 %v1430_v3 }
 0xab5   : > { %2273 = vtanh.f32 %v1432_v5 }
 0xab6   : > { %2275 = vtanh.f32 %v1431_v4 }
 0xab7   : > { %2277 = vtanh.f32 %v1433_v6 }
 0xabe   : > { %v2272_v7 = vpop.eup %2271 }
 0xabf   : > { %v2274_v8 = vpop.eup %2273  ;;  %v1438_v9 = vadd.f32 1.0, %v2272_v7 }
 0xac0   : > { %v2276_v11 = vpop.eup %2275  ;;  %v1440_v12 = vadd.f32 1.0, %v2274_v8 }
 0xac1   : > { %v2278_v27 = vpop.eup %2277  ;;  %v1439_v13 = vadd.f32 1.0, %v2276_v11  ;;  %v1442_v14 = vmul.f32 0.5, %v1438_v9 }
 0xac2   : > { %v1441_v0 = vadd.f32 1.0, %v2278_v27  ;;  %v1444_v15 = vmul.f32 0.5, %v1440_v12 }
 0xac3   : > { %v1443_v16 = vmul.f32 0.5, %v1439_v13  ;;  %v1446_v18 = vmul.f32 %v1442_v14, %v1367_v40 }
 0xac4   : > { %v1445_v17 = vmul.f32 0.5, %v1441_v0  ;;  %v1448_v20 = vmul.f32 %v1444_v15, %v1408_v41 }
 0xac5   : > { %v1447_v19 = vmul.f32 %v1443_v16, %v1369_v46  ;;  %v1515_v24 = vpack.c.bf16 %v1446_v18, %v1446_v18 }
 0xac6   : > { %v1449_v21 = vmul.f32 %v1445_v17, %v1410_v48  ;;  %v1517_v25 = vpack.c.bf16 %v1448_v20, %v1448_v20 }
 0xac7   : > { %v1516_v22 = vpack.c.bf16 %v1447_v19, %v1447_v19 }
 0xac8   : > { %v1518_v23 = vpack.c.bf16 %v1449_v21, %v1449_v21 }
 0xac9   : > { %1749 = vmatprep.mubr.bf16.mxu1 %v1516_v22 }
 0xaca   : > { %1789 = vmatprep.mubr.bf16.mxu0 %v1518_v23  ;;  %1750 = vmatmul.mubr.bf16.vlgmr.msra.gmra.mrb[24].mxu1 %v1515_v24 }
 0xacb   : > { %1790 = vmatmul.mubr.bf16.vlgmr.msra.gmra.mrb[12].mxu0 %v1517_v25 }
 0xb9d   : > { %v2023_v26 = vpop.f32.mrb[24].mxu1 }
 0xb9e   : > { %v2045_v28 = vpop.f32.mrb[12].mxu0  ;;  %v2024_v30 = vpop.f32.mrb[25].mxu1 }
 0xb9f   : > { %v2025_v31 = vadd.f32 %v2024_v30, %v2023_v26  ;;  %v2046_v32 = vpop.f32.mrb[13].mxu0  ;;  %v2026_v33 = vpop.f32.mrb[26].mxu1 }
 0xba0   : > { %v2047_v34 = vadd.f32 %v2046_v32, %v2045_v28  ;;  %v2048_v35 = vpop.f32.mrb[14].mxu0  ;;  %v2027_v36 = vpop.f32.mrb[27].mxu1 }
 0xba1   : > { %v1752_v37 = vadd.f32 %v2025_v31, %v1946_v29  ;;  %v2049_v38 = vpop.f32.mrb[15].mxu0 }
 0xba3   : > { %v1792_v39 = vadd.f32 %v2047_v34, %v1752_v37 }
 0xba5   : > { %v1797_v40 = vadd.f32 %v1792_v39, %v2626_v10 }
 0xba7   : > { %1798 = vst [vmem:[%s448_s14] sm:$0x1f] %v1797_v40 }
 0xba8 PF: > { %s24_s25 = sadd.s32 1, %s2317_s25  }
 0xba9   : > { %p21_p2 = scmp.ge.s32.totalorder %s24_s25, 4  }
 0xbab   :  { %23 = sbr.rel (!%p21_p2) target bundleno = 1 (0x1), region = 107 }
 0xbb2   :  { %1818 = vsyncpa [#allocation3], 1 }
 0xbb3   :  { %1820 = vsyncpa [#allocation3 + $0x1], 1 }

// kernel: question_answer_classifier.16
= control target key start
LH: loop header
LB: loop body
LE: loop exit
PB: predicated region body
PF: predicated region fallthrough
CT: control target
= control target key end

     0   :  { %s107_s0 = inlined_call_operand.vmem [shape: f32[16,128], index: 0, kind: input, shape index: {}]   ;;  %s108_s1 = inlined_call_operand.vmem [shape: f32[1,128], index: 1, kind: input, shape index: {}]   ;;  %s109_s2 = inlined_call_operand.vmem [shape: f32[1,128], index: 2, kind: input, shape index: {}]   ;;  %s110_s3 = inlined_call_operand.vmem [shape: f32[16,128], index: 3, kind: output, shape index: {}]  }
   0x1   :  { %v14_v0 = vld [vmem:[%s107_s0] sm:$0xff]  ;;  %v15_v1 = vld [vmem:[%s107_s0 + $0x8] sm:$0xff] }
   0x2   :  { %18 = vadd.xlane.f32.xlu0 %v14_v0  ;;  %v63_v17 = vld [vmem:[%s108_s1] ss:$0 sm:$0xff] }
   0x3   :  { %v64_v19 = vld [vmem:[%s109_s2] ss:$0 sm:$0xff] }
   0x6   :  { %20 = vadd.xlane.f32.xlu0 %v15_v1 }
  0x8f   :  { %v19_v2 = vpop.xlane.xlu0 %18 }
  0x90   :  { %v23_v3 = vmul.f32 0.0078125, %v19_v2 }
  0x92   :  { %v25_v4 = vsub.f32 %v14_v0, %v23_v3 }
  0x93   :  { %v21_v5 = vpop.xlane.xlu0 %20 }
  0x94   :  { %v24_v6 = vmul.f32 0.0078125, %v21_v5  ;;  %v27_v7 = vmul.f32 %v25_v4, %v25_v4 }
  0x96   :  { %v26_v8 = vsub.f32 %v15_v1, %v24_v6  ;;  %29 = vadd.xlane.f32.xlu1 %v27_v7 }
  0x98   :  { %v28_v9 = vmul.f32 %v26_v8, %v26_v8 }
  0x9a   :  { %31 = vadd.xlane.f32.xlu1 %v28_v9 }
 0x123   :  { %v30_v10 = vpop.xlane.xlu1 %29 }
 0x124   :  { %v33_v11 = vmul.f32 0.0078125, %v30_v10 }
 0x126   :  { %v35_v12 = vadd.f32 1e-12, %v33_v11 }
 0x127   :  { %v32_v13 = vpop.xlane.xlu1 %31 }
 0x128   :  { %65 = vrsqrt.f32 %v35_v12  ;;  %v34_v14 = vmul.f32 0.0078125, %v32_v13 }
 0x12a   :  { %v36_v15 = vadd.f32 1e-12, %v34_v14 }
 0x12c   :  { %67 = vrsqrt.f32 %v36_v15 }
 0x132   :  { %v66_v16 = vpop.eup %65 }
 0x133   :  { %v39_v18 = vmul.f32 %v66_v16, %v25_v4 }
 0x135   :  { %v47_v20 = vmul.f32 %v63_v17, %v39_v18 }
 0x136   :  { %v68_v21 = vpop.eup %67 }
 0x137   :  { %v55_v22 = vadd.f32 %v64_v19, %v47_v20  ;;  %v40_v23 = vmul.f32 %v68_v21, %v26_v8 }
 0x139   :  { %57 = vst [vmem:[%s110_s3] sm:$0xff] %v55_v22  ;;  %v48_v24 = vmul.f32 %v63_v17, %v40_v23 }
 0x13b   :  { %v56_v25 = vadd.f32 %v64_v19, %v48_v24 }
 0x13d   :  { %58 = vst [vmem:[%s110_s3 + $0x8] sm:$0xff] %v56_v25 }

// kernel: question_answer_classifier.19
= control target key start
LH: loop header
LB: loop body
LE: loop exit
PB: predicated region body
PF: predicated region fallthrough
CT: control target
= control target key end

     0   :  { %v593_v2 = vmov 0   ;;  %s790_s0 = inlined_call_operand.vmem [shape: f32[2,128], index: 0, kind: input, shape index: {}]   ;;  %s791_s1 = inlined_call_operand.vmem [shape: bf16[128,256], index: 1, kind: input, shape index: {}]   ;;  %s792_s2 = inlined_call_operand.vmem [shape: f32[1,256], index: 2, kind: input, shape index: {}]   ;;  %s793_s3 = inlined_call_operand.vmem [shape: bf16[256,256], index: 3, kind: input, shape index: {}]   ;;  %s794_s4 = inlined_call_operand.vmem [shape: f32[1,256], index: 4, kind: input, shape index: {}]   ;;  %s795_s5 = inlined_call_operand.hbm [shape: f32[2,256], index: 5, kind: output, shape index: {}]  }
   0x1   :  { %v497_v0 = vld [vmem:[%s791_s1 + $0x4] ss:$8 sps:$4 sm:$0xff]   ;;  %v499_v1 = vld [vmem:[%s791_s1] ss:$8 sps:$4 sm:$0xff]   ;;  %164 = vmatprep.mubr.bf16.mxu0 %v593_v2  ;;  %v500_v3 = vld [vmem:[%s791_s1 + $0x14] ss:$8 sps:$4 sm:$0xff]  }
   0x2   :  { %132 = vmatprep.subr.bf16.mxu0 %v497_v0  ;;  %v502_v4 = vld [vmem:[%s791_s1 + $0x10] ss:$8 sps:$4 sm:$0xff]   ;;  %v503_v5 = vld [vmem:[%s791_s1 + $0x24] ss:$8 sps:$4 sm:$0xff]   ;;  %v505_v6 = vld [vmem:[%s791_s1 + $0x20] ss:$8 sps:$4 sm:$0xff]  }
   0x3   :  { %133 = vmatpush1.bf16.msra.mxu0 %v499_v1  ;;  %v506_v7 = vld [vmem:[%s791_s1 + $0x34] ss:$8 sps:$4 sm:$0xff]   ;;  %v508_v8 = vld [vmem:[%s791_s1 + $0x30] ss:$8 sps:$4 sm:$0xff]   ;;  %v509_v9 = vld [vmem:[%s791_s1 + $0x44] ss:$8 sps:$4 sm:$0xff]  }
   0x4   :  { %134 = vmatprep.subr.bf16.mxu0 %v500_v3  ;;  %v521_v10 = vld [vmem:[%s793_s3 + $0x4] ss:$8 sps:$4 sm:$0xff]   ;;  %v523_v11 = vld [vmem:[%s793_s3] ss:$8 sps:$4 sm:$0xff]   ;;  %v524_v12 = vld [vmem:[%s793_s3 + $0x14] ss:$8 sps:$4 sm:$0xff]  }
   0x5   :  { %379 = vmatprep.subr.bf16.mxu1 %v521_v10  ;;  %v511_v13 = vld [vmem:[%s791_s1 + $0x40] ss:$8 sps:$4 sm:$0xff]   ;;  %v526_v14 = vld [vmem:[%s793_s3 + $0x10] ss:$8 sps:$4 sm:$0xff]   ;;  %v527_v15 = vld [vmem:[%s793_s3 + $0x24] ss:$8 sps:$4 sm:$0xff]  }
   0x6   :  { %380 = vmatpush1.bf16.msra.mxu1 %v523_v11  ;;  %v512_v16 = vld [vmem:[%s791_s1 + $0x54] ss:$8 sps:$4 sm:$0xff]   ;;  %v514_v17 = vld [vmem:[%s791_s1 + $0x50] ss:$8 sps:$4 sm:$0xff]   ;;  %v529_v18 = vld [vmem:[%s793_s3 + $0x20] ss:$8 sps:$4 sm:$0xff]  }
   0x7   :  { %135 = vmatpush1.bf16.msra.mxu0 %v502_v4  ;;  %381 = vmatprep.subr.bf16.mxu1 %v524_v12  ;;  %v530_v19 = vld [vmem:[%s793_s3 + $0x34] ss:$8 sps:$4 sm:$0xff]   ;;  %v515_v20 = vld [vmem:[%s791_s1 + $0x64] ss:$8 sps:$4 sm:$0xff]   ;;  %v517_v21 = vld [vmem:[%s791_s1 + $0x60] ss:$8 sps:$4 sm:$0xff]  }
   0x8   :  { %136 = vmatprep.subr.bf16.mxu0 %v503_v5  ;;  %v532_v22 = vld [vmem:[%s793_s3 + $0x30] ss:$8 sps:$4 sm:$0xff]   ;;  %v533_v23 = vld [vmem:[%s793_s3 + $0x44] ss:$8 sps:$4 sm:$0xff]   ;;  %v518_v24 = vld [vmem:[%s791_s1 + $0x74] ss:$8 sps:$4 sm:$0xff]  }
   0x9   :  { %v520_v25 = vld [vmem:[%s791_s1 + $0x70] ss:$8 sps:$4 sm:$0xff]   ;;  %v22_v26 = vld [vmem:[%s790_s0] sm:$0x3]  ;;  %v536_v28 = vld [vmem:[%s793_s3 + $0x54] ss:$8 sps:$4 sm:$0xff]  }
   0xa   :  { %382 = vmatpush1.bf16.msra.mxu1 %v526_v14  ;;  %v535_v27 = vld [vmem:[%s793_s3 + $0x40] ss:$8 sps:$4 sm:$0xff]   ;;  %v40_v29 = vpack.c.bf16 %v22_v26, %v22_v26  ;;  %v538_v30 = vld [vmem:[%s793_s3 + $0x50] ss:$8 sps:$4 sm:$0xff]   ;;  %v539_v31 = vld [vmem:[%s793_s3 + $0x64] ss:$8 sps:$4 sm:$0xff]  }
   0xb   :  { %137 = vmatpush1.bf16.msra.mxu0 %v505_v6  ;;  %383 = vmatprep.subr.bf16.mxu1 %v527_v15 }
   0xc   :  { %138 = vmatprep.subr.bf16.mxu0 %v506_v7 }
   0xe   :  { %384 = vmatpush1.bf16.msra.mxu1 %v529_v18 }
   0xf   :  { %139 = vmatpush1.bf16.msra.mxu0 %v508_v8  ;;  %385 = vmatprep.subr.bf16.mxu1 %v530_v19 }
  0x10   :  { %140 = vmatprep.subr.bf16.mxu0 %v509_v9 }
  0x12   :  { %386 = vmatpush1.bf16.msra.mxu1 %v532_v22 }
  0x13   :  { %141 = vmatpush1.bf16.msra.mxu0 %v511_v13  ;;  %387 = vmatprep.subr.bf16.mxu1 %v533_v23 }
  0x14   :  { %142 = vmatprep.subr.bf16.mxu0 %v512_v16 }
  0x16   :  { %388 = vmatpush1.bf16.msra.mxu1 %v535_v27 }
  0x17   :  { %143 = vmatpush1.bf16.msra.mxu0 %v514_v17  ;;  %389 = vmatprep.subr.bf16.mxu1 %v536_v28 }
  0x18   :  { %144 = vmatprep.subr.bf16.mxu0 %v515_v20 }
  0x1b   :  { %145 = vmatpush1.bf16.msra.mxu0 %v517_v21 }
  0x1c   :  { %146 = vmatprep.subr.bf16.mxu0 %v518_v24 }
  0x1f   :  { %147 = vmatpush1.bf16.msra.mxu0 %v520_v25 }
  0x20   :  { %10 = vsyncpa [#allocation3], 0  ;;  %390 = vmatpush1.bf16.msra.mxu1 %v538_v30  ;;  %v541_v32 = vld [vmem:[%s793_s3 + $0x60] ss:$8 sps:$4 sm:$0xff]   ;;  %v542_v33 = vld [vmem:[%s793_s3 + $0x74] ss:$8 sps:$4 sm:$0xff]   ;;  %v42_v51 = vlaneseq }
  0x21   :  { %391 = vmatprep.subr.bf16.mxu1 %v539_v31  ;;  %v544_v34 = vld [vmem:[%s793_s3 + $0x70] ss:$8 sps:$4 sm:$0xff]   ;;  %v545_v35 = vld [vmem:[%s793_s3 + $0x84] ss:$8 sps:$4 sm:$0xff]   ;;  %v547_v36 = vld [vmem:[%s793_s3 + $0x80] ss:$8 sps:$4 sm:$0xff]  }
  0x22   :  { %165 = vmatmul.mubr.bf16.vlgmr.msra.gmra.mrb[0].mxu0 %v40_v29  ;;  %v548_v37 = vld [vmem:[%s793_s3 + $0x94] ss:$8 sps:$4 sm:$0xff]   ;;  %v550_v38 = vld [vmem:[%s793_s3 + $0x90] ss:$8 sps:$4 sm:$0xff]   ;;  %v551_v39 = vld [vmem:[%s793_s3 + $0xa4] ss:$8 sps:$4 sm:$0xff]  }
  0x23   :  { %v553_v40 = vld [vmem:[%s793_s3 + $0xa0] ss:$8 sps:$4 sm:$0xff]   ;;  %v554_v41 = vld [vmem:[%s793_s3 + $0xb4] ss:$8 sps:$4 sm:$0xff]   ;;  %v556_v42 = vld [vmem:[%s793_s3 + $0xb0] ss:$8 sps:$4 sm:$0xff]  }
  0x24   :  { %392 = vmatpush1.bf16.msra.mxu1 %v541_v32  ;;  %v557_v43 = vld [vmem:[%s793_s3 + $0xc4] ss:$8 sps:$4 sm:$0xff]   ;;  %v559_v44 = vld [vmem:[%s793_s3 + $0xc0] ss:$8 sps:$4 sm:$0xff]   ;;  %v560_v45 = vld [vmem:[%s793_s3 + $0xd4] ss:$8 sps:$4 sm:$0xff]  }
  0x25   :  { %393 = vmatprep.subr.bf16.mxu1 %v542_v33  ;;  %v562_v46 = vld [vmem:[%s793_s3 + $0xd0] ss:$8 sps:$4 sm:$0xff]   ;;  %v563_v47 = vld [vmem:[%s793_s3 + $0xe4] ss:$8 sps:$4 sm:$0xff]   ;;  %v565_v48 = vld [vmem:[%s793_s3 + $0xe0] ss:$8 sps:$4 sm:$0xff]  }
  0x26   :  { %v566_v49 = vld [vmem:[%s793_s3 + $0xf4] ss:$8 sps:$4 sm:$0xff]   ;;  %v568_v50 = vld [vmem:[%s793_s3 + $0xf0] ss:$8 sps:$4 sm:$0xff]   ;;  %v43_v52 = vshrl.u32 %v42_v51, 7 }
  0x27   :  { %v39_v54 = vld [vmem:[%s792_s2] sm:$0x3]  ;;  %s594_s2 = smov [#allocation2]  }
  0x28   :  { %394 = vmatpush1.bf16.msra.mxu1 %v544_v34  ;;  %v44_v53 = vsub.s32 0, %v43_v52  ;;  %v48_v55 = vsub.s32 1, %v43_v52  ;;  %v205_v2 = vld [vmem:[%s794_s4] sm:$0x3]  ;;  %s438_s15 = sshll.u32 %s594_s2, 4  ;;  %s439_s15 = int_to_ptr.vmem [resolvable:$true] %s438_s15 }
  0x29   :  { %395 = vmatprep.subr.bf16.mxu1 %v545_v35  ;;  %s569_s16 = scalar_lea.vmem %s439_s15, 64  ;;  %p574_p1 = scmp.lt.s32.totalorder %s439_s15, %s439_s15 }
  0x2a   :  { %v45_v56 = vrot.slane %v39_v54, %v44_v53  ;;  %v49_v57 = vrot.slane %v39_v54, %v48_v55  ;;  %v212_v3 = vrot.slane %v205_v2, %v44_v53  ;;  %v216_v4 = vrot.slane %v205_v2, %v48_v55  ;;  %p570_p0 = scmp.ne.s32.totalorder %s439_s15, %s569_s16  ;;  %p575_p2 = scmp.lt.s32.totalorder %s569_s16, %s569_s16 }
  0x2c   :  { %396 = vmatpush1.bf16.msra.mxu1 %v547_v36  ;;  %p576_p3 = por %p575_p2, %p574_p1 }
  0x2d   :  { %397 = vmatprep.subr.bf16.mxu1 %v548_v37 }
  0x2e   :  { %p577_p4 = pnand %p576_p3, %p570_p0 }
  0x30   :  { %398 = vmatpush1.bf16.msra.mxu1 %v550_v38 }
  0x31   :  { %399 = vmatprep.subr.bf16.mxu1 %v551_v39 }
  0x34   :  { %400 = vmatpush1.bf16.msra.mxu1 %v553_v40 }
  0x35   :  { %401 = vmatprep.subr.bf16.mxu1 %v554_v41 }
  0x38   :  { %402 = vmatpush1.bf16.msra.mxu1 %v556_v42 }
  0x39   :  { %403 = vmatprep.subr.bf16.mxu1 %v557_v43 }
  0x3c   :  { %404 = vmatpush1.bf16.msra.mxu1 %v559_v44 }
  0x3d   :  { %405 = vmatprep.subr.bf16.mxu1 %v560_v45 }
  0x40   :  { %406 = vmatpush1.bf16.msra.mxu1 %v562_v46 }
  0x41   :  { %407 = vmatprep.subr.bf16.mxu1 %v563_v47 }
  0x44   :  { %408 = vmatpush1.bf16.msra.mxu1 %v565_v48 }
  0x45   :  { %409 = vmatprep.subr.bf16.mxu1 %v566_v49 }
  0x48   :  { %410 = vmatpush1.bf16.msra.mxu1 %v568_v50 }
  0xf5   :  { %v166_v58 = vpop.f32.mrb[0].mxu0 }
  0xf6   :  { %v167_v59 = vadd.f32 %v166_v58, %v45_v56  ;;  %v168_v60 = vpop.f32.mrb[1].mxu0 }
  0xf7   :  { %v170_v61 = vpop.f32.mrb[2].mxu0  ;;  %v169_v62 = vadd.f32 %v168_v60, %v49_v57 }
  0xf8   :  { %v171_v63 = vpop.f32.mrb[3].mxu0  ;;  %v206_v1 = vpack.c.bf16 %v167_v59, %v167_v59 }
  0xf9   :  { %v207_v0 = vpack.c.bf16 %v169_v62, %v169_v62 }
  0xfb   :  { %411 = vmatprep.mubr.bf16.mxu1 %v207_v0 }
  0xfc   :  { %412 = vmatmul.mubr.bf16.vlgmr.msra.gmra.mrb[0].mxu1 %v206_v1 }
 0x1cf   :  { %v413_v5 = vpop.f32.mrb[0].mxu1 }
 0x1d0   :  { %v414_v6 = vadd.f32 %v413_v5, %v212_v3  ;;  %v415_v7 = vpop.f32.mrb[1].mxu1 }
 0x1d1   :  { %v416_v8 = vadd.f32 %v415_v7, %v216_v4  ;;  %v417_v9 = vpop.f32.mrb[2].mxu1 }
 0x1d2   :  { %v418_v10 = vpop.f32.mrb[3].mxu1 }
 0x1d3   :  { %v422_v11 = vcombine.low %v414_v6, %v416_v8 }
 0x1d5   :  { %494 = vst.sshfl [vmem:[#allocation2] sm:$0x33 pattern:$0x76325410] %v422_v11 }
 0x1d6   :  { %580 = shalt.err (!%p577_p4)
}
 0x1d7   :  { %s581_s18 = scalar_lea.hbm %s795_s5, 64 }
 0x1d8   :  { %p582_p5 = scmp.ne.s32.totalorder %s795_s5, %s581_s18  ;;  %p585_p6 = scmp.lt.u32.totalorder %s581_s18, %s795_s5 }
 0x1da   :  { %p587_p7 = pnand %p585_p6, %p582_p5 }
 0x1dc   :  { %590 = shalt.err (!%p587_p7)
}
 0x1dd   :  { %441 = dma.vmem_to_hbm [thread:$0]  %s439_s15, 64, %s795_s5, [#allocation3]  }
 0x1de   :  { %591 = dma.done.wait [#allocation3], 64  }
 0x1df   :  { %592 = vsyncadd [#allocation3], 4294967232 }
 0x1e0   :  { %445 = vsyncpa [#allocation3], 1 }

// kernel: question_answer_classifier.17
= control target key start
LH: loop header
LB: loop body
LE: loop exit
PB: predicated region body
PF: predicated region fallthrough
CT: control target
= control target key end

     0   :  { %s4105_s0 = inlined_call_operand.vmem [shape: f32[2,8,128], index: 0, kind: input, shape index: {}]   ;;  %s4106_s1 = inlined_call_operand.vmem [shape: f32[2,5,128], index: 1, kind: input, shape index: {}]   ;;  %s4107_s2 = inlined_call_operand.vmem [shape: f32[2,1,8], index: 2, kind: input, shape index: {}]   ;;  %s4108_s3 = inlined_call_operand.vmem [shape: bf16[128,384], index: 3, kind: input, shape index: {}]   ;;  %s4109_s4 = inlined_call_operand.vmem [shape: f32[1,384], index: 4, kind: input, shape index: {}]   ;;  %s4110_s5 = inlined_call_operand.vmem [shape: bf16[128,128], index: 5, kind: input, shape index: {}]   ;;  %s4111_s6 = inlined_call_operand.vmem [shape: f32[1,128], index: 6, kind: input, shape index: {}]   ;;  %s4112_s7 = inlined_call_operand.vmem [shape: f32[1,128], index: 7, kind: input, shape index: {}]   ;;  %s4113_s8 = inlined_call_operand.vmem [shape: f32[1,128], index: 8, kind: input, shape index: {}]   ;;  %s4114_s9 = inlined_call_operand.vmem [shape: bf16[128,128], index: 9, kind: input, shape index: {}]   ;;  %s4115_s10 = inlined_call_operand.vmem [shape: f32[1,128], index: 10, kind: input, shape index: {}]   ;;  %s4116_s11 = inlined_call_operand.vmem [shape: bf16[128,256], index: 11, kind: input, shape index: {}]   ;;  %s4117_s12 = inlined_call_operand.vmem [shape: f32[1,256], index: 12, kind: input, shape index: {}]   ;;  %s4118_s13 = inlined_call_operand.vmem [shape: bf16[128,128], index: 13, kind: input, shape index: {}]   ;;  %s4119_s14 = inlined_call_operand.vmem [shape: f32[1,128], index: 14, kind: input, shape index: {}]   ;;  %s4120_s15 = inlined_call_operand.vmem [shape: f32[1,128], index: 15, kind: input, shape index: {}]   ;;  %s4121_s16 = inlined_call_operand.vmem [shape: f32[1,128], index: 16, kind: input, shape index: {}]   ;;  %s4122_s17 = inlined_call_operand.vmem [shape: bf16[128,512], index: 17, kind: input, shape index: {}]   ;;  %s4123_s18 = inlined_call_operand.vmem [shape: f32[1,512], index: 18, kind: input, shape index: {}]   ;;  %s4124_s19 = inlined_call_operand.vmem [shape: bf16[512,128], index: 19, kind: input, shape index: {}]   ;;  %s4125_s20 = inlined_call_operand.vmem [shape: f32[1,128], index: 20, kind: input, shape index: {}]   ;;  %s4126_s21 = inlined_call_operand.vmem [shape: f32[1,128], index: 21, kind: input, shape index: {}]   ;;  %s4127_s22 = inlined_call_operand.vmem [shape: f32[1,128], index: 22, kind: input, shape index: {}]   ;;  %s4128_s23 = inlined_call_operand.vmem [shape: f32[2,8,128], index: 23, kind: output, shape index: {}]  }
   0x1   :  { %4131 = sst [smem:[#allocation2_spill]] %s4105_s0 }
   0x2   :  { %4132 = sst [smem:[#allocation3_spill]] %s4106_s1 }
   0x3   :  { %4133 = sst [smem:[#allocation4_spill]] %s4107_s2 }
   0x4   :  { %4134 = sst [smem:[#allocation5_spill]] %s4108_s3 }
   0x5   :  { %4135 = sst [smem:[#allocation6_spill]] %s4109_s4  ;;  %s3514_s4 = smov 0  }
   0x6   :  { %4136 = sst [smem:[#allocation7_spill]] %s4110_s5 }
   0x7   :  { %4137 = sst [smem:[#allocation8_spill]] %s4111_s6 }
   0x8   :  { %4138 = sst [smem:[#allocation9_spill]] %s4112_s7 }
   0x9 LB: > { %s2798_s30 = sadd.s32 4294967295, %s3387_s4   ;;  %p2802_p0 = scmp.ge.s32.totalorder %s3387_s4, 1  ;;  %s3387_s4 = sphi %s3514_s4, %s33_s4  }
   0xa   : > { %p653_p1 = scmp.lt.s32.totalorder %s3387_s4, 3 }
   0xc   : > { %p654_p2 = pnand %p2802_p0, %p653_p1 }
   0xd   : > { %s4139_s5 = sld [smem:[#allocation5_spill]] (!%p654_p2)  ;;  %v3389_v2 = vmov (!%p654_p2), 0   ;;  %v3390_v4 = vmov (!%p654_p2), 0.0   ;;  %p722_p3 = scmp.lt.s32.totalorder (!%p654_p2), %s2798_s30, 1  ;;  %vm3391_vm0 = vmmov (!%p654_p2), 0   ;;  %v778_v28 = vlaneseq (!%p654_p2) }
   0xe   : > { %657 = sbr.rel (%p654_p2) target bundleno = 5130 (0x140a), region = 112  ;;  %953 = vmatprep.mubr.bf16.mxu0 (!%p654_p2), %v3389_v2  ;;  %3050 = vmatprep.subr.bf16.mxu1 (!%p654_p2), %v3390_v4  ;;  %s4140_s27 = sld [smem:[#allocation2_spill]] (!%p654_p2)  ;;  %vm1005_vm1 = vcmask (!%p654_p2), 523264   ;;  %vm1076_vm2 = vcmask (!%p654_p2), 1043456   ;;  %vm1060_vm3 = vcmask (!%p654_p2), 64512   ;;  %vm1709_vm4 = vcmask (!%p654_p2), 1041408  }
   0xf   : > { %3066 = vmatprep.mubr.msk.bf16.mxu1 (!%p654_p2), %vm3391_vm0, %v3390_v4  ;;  %v3624_v29 = vshrl.u32 (!%p654_p2), %v778_v28, 7  ;;  %s4141_s29 = sld [smem:[#allocation6_spill]] (!%p654_p2)  ;;  %s3392_s0 = smov (!%p654_p2), 64   ;;  %vm1710_vm5 = vcmask (!%p654_p2), 1042432   ;;  %vm1693_vm6 = vcmask (!%p654_p2), 39936  }
  0x10   : > { %s4142_s1 = sld [smem:[#allocation4_spill]] (!%p654_p2)  ;;  %s4143_s6 = sld [smem:[#allocation7_spill]] (!%p654_p2) }
  0x11   : > { %v3627_v30 = vsub.s32 (!%p654_p2), 1, %v3624_v29  ;;  %v3633_v32 = vsub.s32 (!%p654_p2), 0, %v3624_v29  ;;  %v788_v44 = vsub.s32 (!%p654_p2), 2, %v3624_v29 }
  0x13   : > { %v3191_v0 = vld [vmem:[%s4139_s5 + $0x4] ss:$12 sps:$4 sm:$0xff] (!%p654_p2)   ;;  %v3193_v1 = vld [vmem:[%s4139_s5] ss:$12 sps:$4 sm:$0xff] (!%p654_p2)   ;;  %v3194_v3 = vld [vmem:[%s4139_s5 + $0x1c] ss:$12 sps:$4 sm:$0xff] (!%p654_p2)  }
  0x14   : > { %921 = vmatprep.subr.bf16.mxu0 (!%p654_p2), %v3191_v0  ;;  %v3196_v5 = vld [vmem:[%s4139_s5 + $0x18] ss:$12 sps:$4 sm:$0xff] (!%p654_p2)   ;;  %v3197_v6 = vld [vmem:[%s4139_s5 + $0x34] ss:$12 sps:$4 sm:$0xff] (!%p654_p2)   ;;  %v3199_v7 = vld [vmem:[%s4139_s5 + $0x30] ss:$12 sps:$4 sm:$0xff] (!%p654_p2)  }
  0x15   : > { %922 = vmatpush1.bf16.msra.mxu0 %v3193_v1  ;;  %v3200_v8 = vld [vmem:[%s4139_s5 + $0x4c] ss:$12 sps:$4 sm:$0xff]   ;;  %v3202_v9 = vld [vmem:[%s4139_s5 + $0x48] ss:$12 sps:$4 sm:$0xff]   ;;  %s4148_s30 = smov (!%p722_p3, %s2798_s30), 1 }
  0x16   : > { %923 = vmatprep.subr.bf16.mxu0 %v3194_v3  ;;  %v3215_v10 = vld [vmem:[%s4139_s5 + $0x8] ss:$12 sps:$4 sm:$0xff]   ;;  %v3203_v11 = vld [vmem:[%s4139_s5 + $0x64] ss:$12 sps:$4 sm:$0xff]   ;;  %v3216_v12 = vld [vmem:[%s4139_s5 + $0x20] ss:$12 sps:$4 sm:$0xff]   ;;  %s732_s26 = scalar_lea.vmem %s4142_s1, %s4148_s30 }
  0x17   : > { %3051 = vmatpush3.bf16.msra.mxu1 %v3215_v10  ;;  %s3560_s3 = sshll.u32 %s4148_s30, 3  ;;  %v3205_v13 = vld [vmem:[%s4139_s5 + $0x60] ss:$12 sps:$4 sm:$0xff]   ;;  %v3206_v14 = vld [vmem:[%s4139_s5 + $0x7c] ss:$12 sps:$4 sm:$0xff]   ;;  %s4144_s1 = sld [smem:[#allocation8_spill]] }
  0x18   : > { %3052 = vmatprep.subr.bf16.mxu1 %v3390_v4  ;;  %v3208_v15 = vld [vmem:[%s4139_s5 + $0x78] ss:$12 sps:$4 sm:$0xff]   ;;  %v3209_v17 = vld [vmem:[%s4139_s5 + $0x94] ss:$12 sps:$4 sm:$0xff]   ;;  %v3218_v18 = vld [vmem:[%s4139_s5 + $0x50] ss:$12 sps:$4 sm:$0xff]   ;;  %s725_s7 = scalar_lea.vmem %s4140_s27, %s3560_s3  ;;  %s736_s25 = scalar_lea.vmem %s4128_s23, %s3560_s3 }
  0x19   : > { %924 = vmatpush1.bf16.msra.mxu0 %v3196_v5  ;;  %v3217_v16 = vld [vmem:[%s4139_s5 + $0x38] ss:$12 sps:$4 sm:$0xff]   ;;  %v3211_v19 = vld [vmem:[%s4139_s5 + $0x90] ss:$12 sps:$4 sm:$0xff]   ;;  %v3219_v21 = vld [vmem:[%s4139_s5 + $0x68] ss:$12 sps:$4 sm:$0xff]  }
  0x1a   : > { %925 = vmatprep.subr.bf16.mxu0 %v3197_v6  ;;  %v3212_v20 = vld [vmem:[%s4139_s5 + $0xac] ss:$12 sps:$4 sm:$0xff]   ;;  %v3214_v22 = vld [vmem:[%s4139_s5 + $0xa8] ss:$12 sps:$4 sm:$0xff]   ;;  %v3599_v23 = vld [vmem:[%s725_s7] sm:$0xff]  ;;  %s4145_s7 = sld [smem:[#allocation3_spill]] }
  0x1b   : > { %3053 = vmatpush3.bf16.msra.mxu1 %v3216_v12  ;;  %v3220_v24 = vld [vmem:[%s4139_s5 + $0x80] ss:$12 sps:$4 sm:$0xff]   ;;  %v776_v25 = vpack.c.bf16 %v3599_v23, %v3599_v23  ;;  %v3221_v26 = vld [vmem:[%s4139_s5 + $0x98] ss:$12 sps:$4 sm:$0xff]   ;;  %v3222_v27 = vld [vmem:[%s4139_s5 + $0xb0] ss:$12 sps:$4 sm:$0xff]  }
  0x1c   : > { %3054 = vmatprep.subr.bf16.mxu1 %v3390_v4  ;;  %v775_v31 = vld [vmem:[%s4141_s29] sm:$0x7] }
  0x1d   : > { %926 = vmatpush1.bf16.msra.mxu0 %v3199_v7  ;;  %v785_v33 = vrot.slane %v775_v31, %v3627_v30  ;;  %v781_v34 = vrot.slane %v775_v31, %v3633_v32  ;;  %v789_v45 = vrot.slane %v775_v31, %v788_v44  ;;  %v740_v53 = vld [vmem:[%s732_s26] sm:$0x1] }
  0x1e   : > { %927 = vmatprep.subr.bf16.mxu0 %v3200_v8  ;;  %v741_v54 = vsub.f32 1.0, %v740_v53 }
  0x1f   : > { %3055 = vmatpush3.bf16.msra.mxu1 %v3217_v16 }
  0x20   : > { %3056 = vmatprep.subr.bf16.mxu1 %v3390_v4  ;;  %v742_v55 = vmul.f32 -10000.0, %v741_v54  ;;  %s729_s28 = scalar_lea.vmem %s4145_s7, %s3560_s3  ;;  %s4146_s7 = sld [smem:[#allocation9_spill]] }
  0x21   : > { %928 = vmatpush1.bf16.msra.mxu0 %v3202_v9 }
  0x22   : > { %929 = vmatprep.subr.bf16.mxu0 %v3203_v11  ;;  %v1057_v56 = vrot.slane %v742_v55, %v3633_v32 }
  0x23   : > { %3057 = vmatpush3.bf16.msra.mxu1 %v3218_v18 }
  0x24   : > { %3058 = vmatprep.subr.bf16.mxu1 %v3390_v4 }
  0x25   : > { %930 = vmatpush1.bf16.msra.mxu0 %v3205_v13 }
  0x26   : > { %931 = vmatprep.subr.bf16.mxu0 %v3206_v14 }
  0x27   : > { %3059 = vmatpush3.bf16.msra.mxu1 %v3219_v21 }
  0x28   : > { %3060 = vmatprep.subr.bf16.mxu1 %v3390_v4 }
  0x29   : > { %932 = vmatpush1.bf16.msra.mxu0 %v3208_v15 }
  0x2a   : > { %933 = vmatprep.subr.bf16.mxu0 %v3209_v17 }
  0x2b   : > { %3061 = vmatpush3.bf16.msra.mxu1 %v3220_v24 }
  0x2c   : > { %3062 = vmatprep.subr.bf16.mxu1 %v3390_v4 }
  0x2d   : > { %934 = vmatpush1.bf16.msra.mxu0 %v3211_v19 }
  0x2e   : > { %935 = vmatprep.subr.bf16.mxu0 %v3212_v20 }
  0x2f   : > { %3063 = vmatpush3.bf16.msra.mxu1 %v3221_v26 }
  0x30   : > { %3064 = vmatprep.subr.bf16.mxu1 %v3390_v4 }
  0x31   : > { %936 = vmatpush1.bf16.msra.mxu0 %v3214_v22 }
  0x32   : > { %3094 = vmatprep.subr.bf16.mxu0 %v3390_v4 }
  0x33   : > { %3065 = vmatpush3.bf16.msra.mxu1 %v3222_v27 }
  0x34   : > { %954 = vmatmul.mubr.bf16.vlgmr.msra.gmra.mrb[0].mxu0 %v776_v25  ;;  %3070 = vmatprep.subr.bf16.mxu1 %v3390_v4 }
  0x35   : > { %3110 = vmatprep.mubr.msk.bf16.mxu0 %vm3391_vm0, %v3390_v4 }
  0x36   : > { %3067 = vmatmul.mubr.bf16.vlgmr.msra.gmra.mrb[0].mxu1 %v776_v25 }
  0x37   : > { %3072 = vmatprep.mubr.msk.bf16.mxu1 %vm3391_vm0, %v3390_v4 }
 0x107   : > { %v955_v35 = vpop.f32.mrb[0].mxu0 }
 0x108   : > { %v957_v36 = vpop.f32.mrb[1].mxu0  ;;  %v956_v40 = vadd.f32 %v955_v35, %v781_v34 }
 0x109   : > { %v958_v37 = vadd.f32 %v957_v36, %v785_v33  ;;  %v959_v38 = vpop.f32.mrb[2].mxu0  ;;  %v996_v46 = vpop.f32.mrb[0].mxu1 }
 0x10a   : > { %v960_v39 = vpop.f32.mrb[3].mxu0  ;;  %v1002_v43 = vpack.c.bf16 %v956_v40, %v956_v40  ;;  %v997_v47 = vadd.f32 %v996_v46, %v789_v45  ;;  %v3068_v48 = vpop.f32.mrb[1].mxu1  ;;  %v3223_v40 = vld [vmem:[%s4143_s6] sm:$0xff]   ;;  %v3228_v46 = vld [vmem:[%s4143_s6 + $0x28] sm:$0xff]  }
 0x10b   : > { %v1003_v41 = vpack.c.bf16 %v958_v37, %v958_v37  ;;  %v999_v49 = vpop.f32.mrb[2].mxu1  ;;  %3095 = vmatpush3.bf16.msra.mxu0 %v3223_v40  ;;  %v3227_v45 = vld [vmem:[%s4143_s6 + $0x20] sm:$0xff]   ;;  %v3230_v48 = vld [vmem:[%s4143_s6 + $0x38] sm:$0xff]  }
 0x10c   : > { %v1004_v50 = vpack.c.bf16 %v997_v47, %v997_v47  ;;  %v3069_v51 = vpop.f32.mrb[3].mxu1  ;;  %3096 = vmatprep.subr.bf16.mxu0 %v3390_v4  ;;  %v3229_v47 = vld [vmem:[%s4143_s6 + $0x30] sm:$0xff]   ;;  %v2844_v40 = vld [vmem:[%s4113_s8] ss:$0 sm:$0xff] }
 0x10d   : > { %v1010_v42 = vsel %vm1005_vm1, %v1003_v41, 0  ;;  %1124 = vrot.lane.b32.xlu1 %v1003_v41, %s3392_s0  ;;  %v3224_v41 = vld [vmem:[%s4143_s6 + $0x8] sm:$0xff]  }
 0x10e   : > { %3071 = vmatpush3.bf16.xpose.msra.mxu1 %v1010_v42  ;;  %v1078_v52 = vsel %vm1076_vm2, %v1004_v50, 0  ;;  %v3225_v42 = vld [vmem:[%s4143_s6 + $0x10] sm:$0xff]  }
 0x10f   : > { %3076 = vmatprep.subr.bf16.mxu1 %v3390_v4  ;;  %3097 = vmatpush3.bf16.msra.mxu0 %v3224_v41 }
 0x110   : > { %3098 = vmatprep.subr.bf16.mxu0 %v3390_v4 }
 0x111   : > { %1121 = vrot.lane.b32.xlu1 %v1002_v43, %s3392_s0 }
 0x113   : > { %3099 = vmatpush3.bf16.msra.mxu0 %v3225_v42 }
 0x114   : > { %3100 = vmatprep.subr.bf16.mxu0 %v3390_v4 }
 0x115   : > { %3073 = vmatmul.mubr.msk.bf16.vlgmr.msra.gmra.mrb[4].mxu1 %vm1005_vm1, %v1002_v43  ;;  %v3226_v43 = vld [vmem:[%s4143_s6 + $0x18] sm:$0xff]  }
 0x116   : > { %3078 = vmatprep.mubr.msk.bf16.mxu1 %vm3391_vm0, %v3390_v4  ;;  %3077 = vmatpush3.bf16.msra.mxu1 %v1078_v52 }
 0x117   : > { %3082 = vmatprep.subr.bf16.mxu1 %v3390_v4  ;;  %3101 = vmatpush3.bf16.msra.mxu0 %v3226_v43 }
 0x118   : > { %3102 = vmatprep.subr.bf16.mxu0 %v3390_v4 }
 0x11b   : > { %3103 = vmatpush3.bf16.msra.mxu0 %v3227_v45  ;;  %v1509_v45 = vld [vmem:[%s4117_s12] sm:$0x3] }
 0x11c   : > { %3104 = vmatprep.subr.bf16.mxu0 %v3390_v4 }
 0x11f   : > { %3105 = vmatpush3.bf16.msra.mxu0 %v3228_v46  ;;  %v1515_v46 = vrot.slane %v1509_v45, %v3633_v32 }
 0x120   : > { %3106 = vmatprep.subr.bf16.mxu0 %v3390_v4 }
 0x123   : > { %3107 = vmatpush3.bf16.msra.mxu0 %v3229_v47 }
 0x124   : > { %3108 = vmatprep.subr.bf16.mxu0 %v3390_v4 }
 0x127   : > { %3109 = vmatpush3.bf16.msra.mxu0 %v3230_v48 }
 0x17f   : > { %v1125_v10 = vpop.permute.xlu1 %1124 }
 0x180   : > { %v1130_v12 = vsel %vm1005_vm1, %v1125_v10, 0  ;;  %v3247_v10 = vld [vmem:[%s4116_s11 + $0x44] ss:$8 sps:$4 sm:$0xff]  }
 0x183   : > { %v1122_v13 = vpop.permute.xlu1 %1121 }
 0x1e8   : > { %v1046_v57 = vpop.f32.mrb[4].mxu1 }
 0x1e9   : > { %v1052_v58 = vmul.f32 0.125, %v1046_v57  ;;  %v3074_v59 = vpop.f32.mrb[5].mxu1 }
 0x1ea   : > { %v1049_v60 = vpop.f32.mrb[6].mxu1 }
 0x1eb   : > { %v3075_v61 = vpop.f32.mrb[7].mxu1  ;;  %v1059_v62 = vadd.f32 %v1057_v56, %v1052_v58 }
 0x1ed   : > { %v1061_v63 = vsel %vm1060_vm3, %v1059_v62, -inf }
 0x1ee   : > { %1062 = vmax.xlane.f32.xlu0 %v1061_v63  ;;  %v3231_v63 = vld [vmem:[%s4116_s11] ss:$8 sps:$4 sm:$0xff]  }
 0x27b   : > { %v1063_v0 = vpop.xlane.xlu0 %1062 }
 0x27c   : > { %v1064_v1 = vsub.f32 %v1059_v62, %v1063_v0  ;;  %v3233_v0 = vld [vmem:[%s4116_s11 + $0x4] ss:$8 sps:$4 sm:$0xff]  }
 0x27d   : > { %1602 = vmatprep.subr.bf16.mxu0 %v3233_v0 }
 0x27e   : > { %v1065_v3 = vmul.f32 1.442695, %v1064_v1  ;;  %v3236_v1 = vld [vmem:[%s4116_s11 + $0x14] ss:$8 sps:$4 sm:$0xff]  }
 0x280   : > { %3351 = vpow2.f32 %v1065_v3  ;;  %v3240_v3 = vld [vmem:[%s4114_s9] sm:$0xff]  }
 0x28a   : > { %v3352_v5 = vpop.eup %3351 }
 0x28b   : > { %v1067_v6 = vsel %vm1060_vm3, %v3352_v5, 0.0 }
 0x28c   : > { %1068 = vadd.xlane.f32.xlu0 %v1067_v6  ;;  %v3244_v6 = vld [vmem:[%s4114_s9 + $0x8] sm:$0xff]  }
 0x319   : > { %v1069_v7 = vpop.xlane.xlu0 %1068 }
 0x31a   : > { %3353 = vrcp.f32 %v1069_v7  ;;  %v3237_v7 = vld [vmem:[%s4116_s11 + $0x20] ss:$8 sps:$4 sm:$0xff]  }
 0x324   : > { %v3354_v8 = vpop.eup %3353 }
 0x325   : > { %v1071_v9 = vmul.f32 %v3354_v8, %v3352_v5  ;;  %v3239_v5 = vld [vmem:[%s4116_s11 + $0x24] ss:$8 sps:$4 sm:$0xff]   ;;  %v3243_v8 = vld [vmem:[%s4116_s11 + $0x34] ss:$8 sps:$4 sm:$0xff]  }
 0x327   : > { %v1072_v11 = vpack.c.bf16 %v1071_v9, %v1071_v9  ;;  %v3241_v9 = vld [vmem:[%s4116_s11 + $0x30] ss:$8 sps:$4 sm:$0xff]  }
 0x329   : > { %3079 = vmatmul.mubr.msk.bf16.vlgmr.msra.gmra.mrb[8].mxu1 %vm1060_vm3, %v1072_v11  ;;  %v3245_v11 = vld [vmem:[%s4116_s11 + $0x40] ss:$8 sps:$4 sm:$0xff]  }
 0x32a   : > { %3083 = vmatpush3.bf16.xpose.msra.mxu1 %v1130_v12  ;;  %3084 = vmatprep.mubr.msk.bf16.mxu1 %vm3391_vm0, %v3390_v4 }
 0x32b   : > { %3088 = vmatprep.subr.bf16.mxu1 %v3390_v4 }
 0x331   : > { %3085 = vmatmul.mubr.msk.bf16.vlgmr.msra.gmra.mrb[12].mxu1 %vm1005_vm1, %v1122_v13 }
 0x332   : > { %3090 = vmatprep.mubr.msk.bf16.mxu1 %vm3391_vm0, %v3390_v4 }
 0x3fc   : > { %v1114_v14 = vpop.f32.mrb[8].mxu1 }
 0x3fd   : > { %v3080_v15 = vpop.f32.mrb[9].mxu1 }
 0x3fe   : > { %v1117_v16 = vpop.f32.mrb[10].mxu1 }
 0x3ff   : > { %v3081_v17 = vpop.f32.mrb[11].mxu1  ;;  %v3248_v16 = vld [vmem:[%s4114_s9 + $0x10] sm:$0xff]  }
 0x400   : > { %v3251_v17 = vld [vmem:[%s4116_s11 + $0x54] ss:$8 sps:$4 sm:$0xff]  }
 0x404   : > { %v1166_v18 = vpop.f32.mrb[12].mxu1 }
 0x405   : > { %v1172_v19 = vmul.f32 0.125, %v1166_v18  ;;  %v3086_v20 = vpop.f32.mrb[13].mxu1  ;;  %v3249_v18 = vld [vmem:[%s4116_s11 + $0x50] ss:$8 sps:$4 sm:$0xff]  }
 0x406   : > { %v1169_v21 = vpop.f32.mrb[14].mxu1  ;;  %v3255_v20 = vld [vmem:[%s4116_s11 + $0x64] ss:$8 sps:$4 sm:$0xff]  }
 0x407   : > { %v3087_v22 = vpop.f32.mrb[15].mxu1  ;;  %v1173_v24 = vadd.f32 %v1172_v19, %v1057_v56  ;;  %v2834_v56 = vld [vmem:[%s4144_s1] ss:$0 sm:$0xff]  ;;  %v3252_v19 = vld [vmem:[%s4114_s9 + $0x18] sm:$0xff]  }
 0x408   : > { %v3253_v21 = vld [vmem:[%s4116_s11 + $0x60] ss:$8 sps:$4 sm:$0xff]  }
 0x409   : > { %v1174_v25 = vsel %vm1060_vm3, %v1173_v24, -inf  ;;  %v3256_v22 = vld [vmem:[%s4114_s9 + $0x20] sm:$0xff]  }
 0x40a   : > { %1175 = vmax.xlane.f32.xlu0 %v1174_v25  ;;  %v3257_v25 = vld [vmem:[%s4116_s11 + $0x70] ss:$8 sps:$4 sm:$0xff]  }
 0x420   : > { %1187 = vrot.lane.b32.xlu0 %v1004_v50, %s3392_s0 }
 0x497   : > { %v1176_v26 = vpop.xlane.xlu0 %1175 }
 0x498   : > { %v1177_v27 = vsub.f32 %v1173_v24, %v1176_v26  ;;  %v3259_v24 = vld [vmem:[%s4116_s11 + $0x74] ss:$8 sps:$4 sm:$0xff]   ;;  %v739_v26 = vld [vmem:[%s729_s28] sm:$0x1f] }
 0x49a   : > { %v1178_v28 = vmul.f32 1.442695, %v1177_v27  ;;  %v3260_v27 = vld [vmem:[%s4114_s9 + $0x28] sm:$0xff]  }
 0x49b   : > { %v1188_v31 = vpop.permute.xlu0 %1187 }
 0x49c   : > { %3355 = vpow2.f32 %v1178_v28  ;;  %v1193_v33 = vsel %vm1076_vm2, %v1188_v31, 0  ;;  %v1510_v28 = vpack.c.bf16 %v739_v26, %v739_v26  ;;  %v3261_v31 = vld [vmem:[%s4114_s9 + $0x30] sm:$0xff]  }
 0x49d   : > { %3089 = vmatpush3.bf16.msra.mxu1 %v1193_v33  ;;  %v3262_v33 = vld [vmem:[%s4114_s9 + $0x38] sm:$0xff]  }
 0x49e   : > { %3114 = vmatprep.subr.bf16.mxu1 %v3390_v4 }
 0x4a6   : > { %v3356_v34 = vpop.eup %3355 }
 0x4a7   : > { %v1180_v35 = vsel %vm1060_vm3, %v3356_v34, 0.0 }
 0x4a8   : > { %1181 = vadd.xlane.f32.xlu1 %v1180_v35 }
 0x535   : > { %v1182_v36 = vpop.xlane.xlu1 %1181 }
 0x536   : > { %3357 = vrcp.f32 %v1182_v36 }
 0x540   : > { %v3358_v37 = vpop.eup %3357 }
 0x541   : > { %v1184_v38 = vmul.f32 %v3358_v37, %v3356_v34 }
 0x543   : > { %v1185_v39 = vpack.c.bf16 %v1184_v38, %v1184_v38  ;;  %v2843_v38 = vld [vmem:[%s4146_s7] ss:$0 sm:$0xff] }
 0x545   : > { %3091 = vmatmul.mubr.msk.bf16.vlgmr.msra.gmra.mrb[16].mxu1 %vm1060_vm3, %v1185_v39 }
 0x546   : > { %3130 = vmatprep.mubr.msk.bf16.mxu1 %vm3391_vm0, %v3390_v4  ;;  %3115 = vmatpush3.bf16.msra.mxu1 %v3240_v3 }
 0x547   : > { %3116 = vmatprep.subr.bf16.mxu1 %v3390_v4 }
 0x54a   : > { %3117 = vmatpush3.bf16.msra.mxu1 %v3244_v6 }
 0x54b   : > { %3118 = vmatprep.subr.bf16.mxu1 %v3390_v4 }
 0x54e   : > { %3119 = vmatpush3.bf16.msra.mxu1 %v3248_v16 }
 0x54f   : > { %3120 = vmatprep.subr.bf16.mxu1 %v3390_v4 }
 0x552   : > { %3121 = vmatpush3.bf16.msra.mxu1 %v3252_v19 }
 0x553   : > { %3122 = vmatprep.subr.bf16.mxu1 %v3390_v4 }
 0x556   : > { %3123 = vmatpush3.bf16.msra.mxu1 %v3256_v22 }
 0x557   : > { %3124 = vmatprep.subr.bf16.mxu1 %v3390_v4 }
 0x55a   : > { %3125 = vmatpush3.bf16.msra.mxu1 %v3260_v27 }
 0x55b   : > { %3126 = vmatprep.subr.bf16.mxu1 %v3390_v4 }
 0x55e   : > { %3127 = vmatpush3.bf16.msra.mxu1 %v3261_v31 }
 0x55f   : > { %3128 = vmatprep.subr.bf16.mxu1 %v3390_v4 }
 0x562   : > { %3129 = vmatpush3.bf16.msra.mxu1 %v3262_v33 }
 0x563   : > { %3134 = vmatprep.subr.bf16.mxu1 %v3390_v4 }
 0x618   : > { %v1229_v49 = vpop.f32.mrb[16].mxu1 }
 0x619   : > { %1236 = vrot.lane.b32.xlu0 %v1229_v49, %s3392_s0  ;;  %v3092_v50 = vpop.f32.mrb[17].mxu1 }
 0x61a   : > { %v1232_v51 = vpop.f32.mrb[18].mxu1 }
 0x61b   : > { %v3093_v52 = vpop.f32.mrb[19].mxu1 }
 0x68b   : > { %v1237_v53 = vpop.permute.xlu0 %1236 }
 0x68c   : > { %v1239_v54 = vsel %vm1005_vm1, %v1114_v14, %v1237_v53 }
 0x68d   : > { %v1257_v55 = vpack.c.bf16 %v1239_v54, %v1239_v54  ;;  %v1519_v54 = vrot.slane %v1509_v45, %v3627_v30 }
 0x68f   : > { %3111 = vmatmul.mubr.bf16.vlgmr.msra.gmra.mrb[4].mxu0 %v1257_v55 }
 0x690   : > { %1634 = vmatprep.mubr.bf16.mxu0 %v3389_v2  ;;  %1603 = vmatpush1.bf16.msra.mxu0 %v3231_v63 }
 0x691   : > { %1604 = vmatprep.subr.bf16.mxu0 %v3236_v1 }
 0x762   : > { %v1346_v57 = vpop.f32.mrb[4].mxu0 }
 0x763   : > { %v1347_v58 = vadd.f32 %v2834_v56, %v1346_v57  ;;  %v3112_v59 = vpop.f32.mrb[5].mxu0  ;;  %v3393_v56 = vmov 65535  }
 0x764   : > { %v1349_v60 = vpop.f32.mrb[6].mxu0  ;;  %v1711_v57 = vsel %vm1709_vm4, 4294967295, %v3393_v56  ;;  %v3269_v56 = vld [vmem:[%s4118_s13 + $0x30] sm:$0xff]  }
 0x765   : > { %v3113_v61 = vpop.f32.mrb[7].mxu0  ;;  %v1352_v62 = vadd.f32 %v1347_v58, %v3599_v23  ;;  %v3234_v23 = vld [vmem:[%s4116_s11 + $0x10] ss:$8 sps:$4 sm:$0xff]   ;;  %v2845_v58 = vld [vmem:[%s4115_s10] ss:$0 sm:$0xff] }
 0x766   : > { %1605 = vmatpush1.bf16.msra.mxu0 %v3234_v23  ;;  %v1712_v61 = vsel %vm1710_vm5, %v1711_v57, 0  ;;  %v3270_v57 = vld [vmem:[%s4118_s13 + $0x38] sm:$0xff]  }
 0x767   : > { %1355 = vadd.xlane.f32.xlu0 %v1352_v62  ;;  %1606 = vmatprep.subr.bf16.mxu0 %v3239_v5 }
 0x76a   : > { %1607 = vmatpush1.bf16.msra.mxu0 %v3237_v7 }
 0x76b   : > { %1608 = vmatprep.subr.bf16.mxu0 %v3243_v8 }
 0x76e   : > { %1609 = vmatpush1.bf16.msra.mxu0 %v3241_v9 }
 0x76f   : > { %1610 = vmatprep.subr.bf16.mxu0 %v3247_v10 }
 0x772   : > { %1611 = vmatpush1.bf16.msra.mxu0 %v3245_v11 }
 0x773   : > { %1612 = vmatprep.subr.bf16.mxu0 %v3251_v17 }
 0x776   : > { %1613 = vmatpush1.bf16.msra.mxu0 %v3249_v18 }
 0x777   : > { %1614 = vmatprep.subr.bf16.mxu0 %v3255_v20 }
 0x77a   : > { %1615 = vmatpush1.bf16.msra.mxu0 %v3253_v21 }
 0x77b   : > { %1616 = vmatprep.subr.bf16.mxu0 %v3259_v24 }
 0x77e   : > { %1617 = vmatpush1.bf16.msra.mxu0 %v3257_v25 }
 0x77f   : > { %3158 = vmatprep.subr.bf16.mxu0 %v3390_v4 }
 0x781   : > { %1635 = vmatmul.mubr.bf16.vlgmr.msra.gmra.mrb[8].mxu0 %v1510_v28 }
 0x782   : > { %3174 = vmatprep.mubr.msk.bf16.mxu0 %vm3391_vm0, %v3390_v4 }
 0x7f4   : > { %v1356_v12 = vpop.xlane.xlu0 %1355 }
 0x7f5   : > { %v1358_v13 = vmul.f32 0.0078125, %v1356_v12 }
 0x7f7   : > { %v1359_v14 = vsub.f32 %v1352_v62, %v1358_v13 }
 0x7f9   : > { %v1360_v15 = vmul.f32 %v1359_v14, %v1359_v14 }
 0x7fb   : > { %1361 = vadd.xlane.f32.xlu1 %v1360_v15 }
 0x854   : > { %v1636_v47 = vpop.f32.mrb[8].mxu0 }
 0x855   : > { %v1637_v48 = vadd.f32 %v1636_v47, %v1515_v46  ;;  %v1638_v49 = vpop.f32.mrb[9].mxu0 }
 0x856   : > { %v1640_v50 = vpop.f32.mrb[10].mxu0  ;;  %v1639_v55 = vadd.f32 %v1638_v49, %v1519_v54  ;;  %v3267_v54 = vld [vmem:[%s4118_s13 + $0x20] sm:$0xff]  }
 0x857   : > { %v1644_v51 = vpack.c.bf16 %v1637_v48, %v1637_v48  ;;  %v1641_v52 = vpop.f32.mrb[11].mxu0  ;;  %v3263_v50 = vld [vmem:[%s4118_s13] sm:$0xff]  }
 0x858   : > { %v1645_v59 = vpack.c.bf16 %v1639_v55, %v1639_v55  ;;  %3159 = vmatpush3.bf16.msra.mxu0 %v3263_v50  ;;  %v3265_v52 = vld [vmem:[%s4118_s13 + $0x10] sm:$0xff]   ;;  %v3268_v55 = vld [vmem:[%s4118_s13 + $0x28] sm:$0xff]  }
 0x859   : > { %v1650_v53 = vsel %vm1005_vm1, %v1644_v51, 0  ;;  %3160 = vmatprep.subr.bf16.mxu0 %v3390_v4 }
 0x85a   : > { %v1714_v23 = vand.u32 %v1712_v61, %v1645_v59 }
 0x888   : > { %v1362_v34 = vpop.xlane.xlu1 %1361 }
 0x889   : > { %v1363_v35 = vmul.f32 0.0078125, %v1362_v34 }
 0x88b   : > { %v1364_v36 = vadd.f32 1e-12, %v1363_v35 }
 0x88d   : > { %3359 = vrsqrt.f32 %v1364_v36 }
 0x897   : > { %v3360_v37 = vpop.eup %3359 }
 0x898   : > { %v1366_v39 = vmul.f32 %v3360_v37, %v1359_v14 }
 0x89a   : > { %v1373_v41 = vmul.f32 %v2843_v38, %v1366_v39 }
 0x89c   : > { %v3803_v42 = vadd.f32 %v2844_v40, %v1373_v41 }
 0x89e   : > { %v1398_v43 = vpack.c.bf16 %v3803_v42, %v3803_v42 }
 0x8a0   : > { %3131 = vmatmul.mubr.bf16.vlgmr.msra.gmra.mrb[20].mxu1 %v1398_v43 }
 0x8a1   : > { %3136 = vmatprep.mubr.msk.bf16.mxu1 %vm3391_vm0, %v3390_v4  ;;  %3135 = vmatpush3.bf16.xpose.msra.mxu1 %v1650_v53  ;;  %v3266_v53 = vld [vmem:[%s4118_s13 + $0x18] sm:$0xff]  }
 0x8a2   : > { %3140 = vmatprep.subr.bf16.mxu1 %v3390_v4 }
 0x973   : > { %v1487_v60 = vpop.f32.mrb[20].mxu1 }
 0x974   : > { %v1488_v62 = vadd.f32 %v2845_v58, %v1487_v60  ;;  %v3132_v63 = vpop.f32.mrb[21].mxu1 }
 0x975   : > { %v1490_v0 = vpop.f32.mrb[22].mxu1 }
 0x976   : > { %v1643_v1 = vpack.c.bf16 %v1488_v62, %v1488_v62  ;;  %v3133_v3 = vpop.f32.mrb[23].mxu1 }
 0x978   : > { %1757 = vrot.lane.b32.xlu0 %v1643_v1, %s3392_s0  ;;  %3137 = vmatmul.mubr.msk.bf16.vlgmr.msra.gmra.mrb[24].mxu1 %vm1005_vm1, %v1643_v1 }
 0x979   : > { %3141 = vmatpush3.bf16.msra.mxu1 %v1714_v23  ;;  %3142 = vmatprep.mubr.msk.bf16.mxu1 %vm3391_vm0, %v3390_v4 }
 0x97a   : > { %3146 = vmatprep.subr.bf16.mxu1 %v3390_v4 }
 0x9ea   : > { %v1758_v22 = vpop.permute.xlu0 %1757 }
 0xa4b   : > { %v1686_v5 = vpop.f32.mrb[24].mxu1 }
 0xa4c   : > { %v1692_v6 = vmul.f32 0.125, %v1686_v5  ;;  %v3138_v7 = vpop.f32.mrb[25].mxu1 }
 0xa4d   : > { %v1689_v8 = vpop.f32.mrb[26].mxu1 }
 0xa4e   : > { %v3139_v9 = vpop.f32.mrb[27].mxu1  ;;  %v1694_v10 = vsel %vm1693_vm6, %v1692_v6, -inf  ;;  %v3271_v8 = vld [vmem:[%s4122_s17] ss:$16 sps:$4 sm:$0xff]  }
 0xa4f   : > { %1695 = vmax.xlane.f32.xlu1 %v1694_v10  ;;  %v3274_v9 = vld [vmem:[%s4122_s17 + $0x8] ss:$16 sps:$4 sm:$0xff]   ;;  %v3276_v10 = vld [vmem:[%s4122_s17 + $0xc] ss:$16 sps:$4 sm:$0xff]  }
 0xadc   : > { %v1696_v11 = vpop.xlane.xlu1 %1695 }
 0xadd   : > { %v1697_v12 = vsub.f32 %v1692_v6, %v1696_v11  ;;  %v3282_v11 = vld [vmem:[%s4122_s17 + $0x2c] ss:$16 sps:$4 sm:$0xff]  }
 0xadf   : > { %v1698_v13 = vmul.f32 1.442695, %v1697_v12  ;;  %v3277_v12 = vld [vmem:[%s4122_s17 + $0x20] ss:$16 sps:$4 sm:$0xff]  }
 0xae1   : > { %3361 = vpow2.f32 %v1698_v13  ;;  %v3280_v13 = vld [vmem:[%s4122_s17 + $0x28] ss:$16 sps:$4 sm:$0xff]  }
 0xaeb   : > { %v3362_v14 = vpop.eup %3361 }
 0xaec   : > { %v1700_v15 = vsel %vm1693_vm6, %v3362_v14, 0.0 }
 0xaed   : > { %1701 = vadd.xlane.f32.xlu1 %v1700_v15  ;;  %v3288_v15 = vld [vmem:[%s4122_s17 + $0x4c] ss:$16 sps:$4 sm:$0xff]  }
 0xafe   : > { %1760 = vrot.lane.b32.xlu1 %v1644_v51, %s3392_s0  ;;  %v3264_v51 = vld [vmem:[%s4118_s13 + $0x8] sm:$0xff]  }
 0xaff   : > { %3161 = vmatpush3.bf16.msra.mxu0 %v3264_v51 }
 0xb00   : > { %3162 = vmatprep.subr.bf16.mxu0 %v3390_v4 }
 0xb03   : > { %3163 = vmatpush3.bf16.msra.mxu0 %v3265_v52  ;;  %v2883_v52 = vld [vmem:[%s4120_s15] ss:$0 sm:$0xff] }
 0xb04   : > { %3164 = vmatprep.subr.bf16.mxu0 %v3390_v4 }
 0xb07   : > { %3165 = vmatpush3.bf16.msra.mxu0 %v3266_v53 }
 0xb08   : > { %3166 = vmatprep.subr.bf16.mxu0 %v3390_v4 }
 0xb0b   : > { %3167 = vmatpush3.bf16.msra.mxu0 %v3267_v54  ;;  %v2884_v54 = vld [vmem:[%s4121_s16] ss:$0 sm:$0xff] }
 0xb0c   : > { %3168 = vmatprep.subr.bf16.mxu0 %v3390_v4 }
 0xb0f   : > { %3169 = vmatpush3.bf16.msra.mxu0 %v3268_v55 }
 0xb10   : > { %3170 = vmatprep.subr.bf16.mxu0 %v3390_v4 }
 0xb13   : > { %3171 = vmatpush3.bf16.msra.mxu0 %v3269_v56 }
 0xb14   : > { %3172 = vmatprep.subr.bf16.mxu0 %v3390_v4 }
 0xb17   : > { %3173 = vmatpush3.bf16.msra.mxu0 %v3270_v57 }
 0xb18   : > { %2271 = vmatprep.subr.bf16.mxu0 %v3276_v10  ;;  %v3336_v10 = vld [vmem:[%s4124_s19 + $0xe0] sm:$0xff]  }
 0xb7a   : > { %v1702_v16 = vpop.xlane.xlu1 %1701 }
 0xb7b   : > { %3363 = vrcp.f32 %v1702_v16  ;;  %v3283_v16 = vld [vmem:[%s4122_s17 + $0x40] ss:$16 sps:$4 sm:$0xff]  }
 0xb7e   : > { %v1761_v19 = vpop.permute.xlu1 %1760 }
 0xb7f   : > { %v1766_v21 = vsel %vm1005_vm1, %v1761_v19, 0 }
 0xb85   : > { %v3364_v17 = vpop.eup %3363 }
 0xb86   : > { %v1704_v18 = vmul.f32 %v3364_v17, %v3362_v14  ;;  %v3285_v14 = vld [vmem:[%s4122_s17 + $0x44] ss:$16 sps:$4 sm:$0xff]   ;;  %v3286_v17 = vld [vmem:[%s4122_s17 + $0x48] ss:$16 sps:$4 sm:$0xff]  }
 0xb88   : > { %v1705_v20 = vpack.c.bf16 %v1704_v18, %v1704_v18 }
 0xb8a   : > { %3143 = vmatmul.mubr.msk.bf16.vlgmr.msra.gmra.mrb[28].mxu1 %vm1693_vm6, %v1705_v20 }
 0xb8b   : > { %3147 = vmatpush3.bf16.xpose.msra.mxu1 %v1766_v21  ;;  %3148 = vmatprep.mubr.msk.bf16.mxu1 %vm3391_vm0, %v3390_v4 }
 0xb8c   : > { %3152 = vmatprep.subr.bf16.mxu1 %v3390_v4 }
 0xb92   : > { %3149 = vmatmul.mubr.msk.bf16.vlgmr.msra.gmra.mrb[32].mxu1 %vm1005_vm1, %v1758_v22  ;;  %v3291_v22 = vld [vmem:[%s4122_s17 + $0x64] ss:$16 sps:$4 sm:$0xff]  }
 0xb93   : > { %3154 = vmatprep.mubr.msk.bf16.mxu1 %vm3391_vm0, %v3390_v4  ;;  %v2874_v4 = vld [vmem:[%s4119_s14] ss:$0 sm:$0xff] }
 0xc5d   : > { %v1750_v24 = vpop.f32.mrb[28].mxu1 }
 0xc5e   : > { %v3144_v25 = vpop.f32.mrb[29].mxu1 }
 0xc5f   : > { %v1753_v26 = vpop.f32.mrb[30].mxu1  ;;  %v3289_v25 = vld [vmem:[%s4122_s17 + $0x60] ss:$16 sps:$4 sm:$0xff]  }
 0xc60   : > { %v3145_v27 = vpop.f32.mrb[31].mxu1  ;;  %v3292_v26 = vld [vmem:[%s4122_s17 + $0x68] ss:$16 sps:$4 sm:$0xff]  }
 0xc61   : > { %v3297_v27 = vld [vmem:[%s4122_s17 + $0x84] ss:$16 sps:$4 sm:$0xff]  }
 0xc65   : > { %v1802_v28 = vpop.f32.mrb[32].mxu1 }
 0xc66   : > { %v1808_v31 = vmul.f32 0.125, %v1802_v28  ;;  %v3150_v33 = vpop.f32.mrb[33].mxu1  ;;  %v3300_v28 = vld [vmem:[%s4122_s17 + $0x8c] ss:$16 sps:$4 sm:$0xff]  }
 0xc67   : > { %v1805_v34 = vpop.f32.mrb[34].mxu1  ;;  %v3298_v33 = vld [vmem:[%s4122_s17 + $0x88] ss:$16 sps:$4 sm:$0xff]  }
 0xc68   : > { %v3151_v35 = vpop.f32.mrb[35].mxu1  ;;  %v1809_v36 = vsel %vm1693_vm6, %v1808_v31, -inf  ;;  %v3303_v34 = vld [vmem:[%s4122_s17 + $0xa4] ss:$16 sps:$4 sm:$0xff]  }
 0xc69   : > { %1810 = vmax.xlane.f32.xlu1 %v1809_v36  ;;  %v3306_v35 = vld [vmem:[%s4122_s17 + $0xac] ss:$16 sps:$4 sm:$0xff]   ;;  %v3301_v36 = vld [vmem:[%s4122_s17 + $0xa0] ss:$16 sps:$4 sm:$0xff]  }
 0xc7a   : > { %1822 = vrot.lane.b32.xlu1 %v1645_v59, %s3392_s0 }
 0xcf6   : > { %v1811_v37 = vpop.xlane.xlu1 %1810 }
 0xcf7   : > { %v1812_v38 = vsub.f32 %v1808_v31, %v1811_v37  ;;  %v3295_v31 = vld [vmem:[%s4122_s17 + $0x80] ss:$16 sps:$4 sm:$0xff]   ;;  %v3304_v37 = vld [vmem:[%s4122_s17 + $0xa8] ss:$16 sps:$4 sm:$0xff]  }
 0xcf9   : > { %v1813_v39 = vmul.f32 1.442695, %v1812_v38  ;;  %v3309_v38 = vld [vmem:[%s4122_s17 + $0xc4] ss:$16 sps:$4 sm:$0xff]  }
 0xcfa   : > { %v1823_v40 = vpop.permute.xlu1 %1822 }
 0xcfb   : > { %3365 = vpow2.f32 %v1813_v39  ;;  %v1828_v41 = vand.u32 %v1823_v40, %v1712_v61  ;;  %v3312_v39 = vld [vmem:[%s4122_s17 + $0xcc] ss:$16 sps:$4 sm:$0xff]   ;;  %v3307_v40 = vld [vmem:[%s4122_s17 + $0xc0] ss:$16 sps:$4 sm:$0xff]  }
 0xcfd   : > { %3153 = vmatpush3.bf16.msra.mxu1 %v1828_v41  ;;  %v3310_v41 = vld [vmem:[%s4122_s17 + $0xc8] ss:$16 sps:$4 sm:$0xff]  }
 0xd05   : > { %v3366_v43 = vpop.eup %3365 }
 0xd06   : > { %v1815_v45 = vsel %vm1693_vm6, %v3366_v43, 0.0 }
 0xd07   : > { %1816 = vadd.xlane.f32.xlu0 %v1815_v45  ;;  %v3318_v45 = vld [vmem:[%s4122_s17 + $0xec] ss:$16 sps:$4 sm:$0xff]  }
 0xd94   : > { %v1817_v46 = vpop.xlane.xlu0 %1816 }
 0xd95   : > { %3367 = vrcp.f32 %v1817_v46  ;;  %v3313_v46 = vld [vmem:[%s4122_s17 + $0xe0] ss:$16 sps:$4 sm:$0xff]  }
 0xd9f   : > { %v3368_v47 = vpop.eup %3367 }
 0xda0   : > { %v1819_v48 = vmul.f32 %v3368_v47, %v3366_v43  ;;  %v3315_v43 = vld [vmem:[%s4122_s17 + $0xe4] ss:$16 sps:$4 sm:$0xff]   ;;  %v3316_v47 = vld [vmem:[%s4122_s17 + $0xe8] ss:$16 sps:$4 sm:$0xff]  }
 0xda2   : > { %v1820_v49 = vpack.c.bf16 %v1819_v48, %v1819_v48 }
 0xda4   : > { %3155 = vmatmul.mubr.msk.bf16.vlgmr.msra.gmra.mrb[36].mxu1 %vm1693_vm6, %v1820_v49 }
 0xda5   : > { %2262 = vmatprep.mubr.bf16.mxu1 %v3389_v2 }
 0xe77   : > { %v1864_v58 = vpop.f32.mrb[36].mxu1 }
 0xe78   : > { %1871 = vrot.lane.b32.xlu0 %v1864_v58, %s3392_s0  ;;  %v3156_v59 = vpop.f32.mrb[37].mxu1  ;;  %v3319_v58 = vld [vmem:[%s4124_s19 + $0x40] sm:$0xff]  }
 0xe79   : > { %v1867_v60 = vpop.f32.mrb[38].mxu1  ;;  %v3320_v59 = vld [vmem:[%s4124_s19 + $0xc0] sm:$0xff]  }
 0xe7a   : > { %v3157_v61 = vpop.f32.mrb[39].mxu1  ;;  %v3321_v60 = vld [vmem:[%s4124_s19] sm:$0xff]  }
 0xe7b   : > { %v3322_v61 = vld [vmem:[%s4124_s19 + $0x80] sm:$0xff]  }
 0xeea   : > { %v1872_v62 = vpop.permute.xlu0 %1871 }
 0xeeb   : > { %v1874_v63 = vsel %vm1005_vm1, %v1750_v24, %v1872_v62  ;;  %v3294_v24 = vld [vmem:[%s4122_s17 + $0x6c] ss:$16 sps:$4 sm:$0xff]  }
 0xeec   : > { %v1892_v0 = vpack.c.bf16 %v1874_v63, %v1874_v63  ;;  %v3323_v62 = vld [vmem:[%s4124_s19 + $0x48] sm:$0xff]  }
 0xeed   : > { %v3324_v63 = vld [vmem:[%s4124_s19 + $0xc8] sm:$0xff]  }
 0xeee   : > { %3175 = vmatmul.mubr.bf16.vlgmr.msra.gmra.mrb[12].mxu0 %v1892_v0  ;;  %v3325_v0 = vld [vmem:[%s4124_s19 + $0x8] sm:$0xff]  }
 0xeef   : > { %2303 = vmatprep.mubr.bf16.mxu0 %v3389_v2  ;;  %v3273_v2 = vld [vmem:[%s4122_s17 + $0x4] ss:$16 sps:$4 sm:$0xff]   ;;  %2272 = vmatpush1.bf16.msra.mxu0 %v3274_v9 }
 0xef0   : > { %2230 = vmatprep.subr.bf16.mxu1 %v3273_v2  ;;  %2273 = vmatprep.subr.bf16.mxu0 %v3282_v11  ;;  %v3334_v2 = vld [vmem:[%s4124_s19 + $0x98] sm:$0xff]   ;;  %v3335_v9 = vld [vmem:[%s4124_s19 + $0x60] sm:$0xff]  }
 0xef1   : > { %2231 = vmatpush1.bf16.msra.mxu1 %v3271_v8  ;;  %v3333_v8 = vld [vmem:[%s4124_s19 + $0x18] sm:$0xff]   ;;  %v3338_v11 = vld [vmem:[%s4124_s19 + $0xa0] sm:$0xff]  }
 0xef3   : > { %2274 = vmatpush1.bf16.msra.mxu0 %v3280_v13  ;;  %v3340_v13 = vld [vmem:[%s4124_s19 + $0xe8] sm:$0xff]  }
 0xef4   : > { %2275 = vmatprep.subr.bf16.mxu0 %v3288_v15  ;;  %v3342_v15 = vld [vmem:[%s4124_s19 + $0xa8] sm:$0xff]  }
 0xef7   : > { %2276 = vmatpush1.bf16.msra.mxu0 %v3286_v17  ;;  %v3344_v17 = vld [vmem:[%s4124_s19 + $0xf0] sm:$0xff]  }
 0xef8   : > { %2277 = vmatprep.subr.bf16.mxu0 %v3294_v24  ;;  %v3350_v24 = vld [vmem:[%s4124_s19 + $0xb8] sm:$0xff]  }
 0xefb   : > { %2278 = vmatpush1.bf16.msra.mxu0 %v3292_v26  ;;  %v2064_v26 = vsub.s32 3, %v3624_v29 }
 0xefc   : > { %2279 = vmatprep.subr.bf16.mxu0 %v3300_v28 }
 0xeff   : > { %2280 = vmatpush1.bf16.msra.mxu0 %v3298_v33 }
 0xf00   : > { %2281 = vmatprep.subr.bf16.mxu0 %v3306_v35 }
 0xf03   : > { %2282 = vmatpush1.bf16.msra.mxu0 %v3304_v37 }
 0xf04   : > { %2283 = vmatprep.subr.bf16.mxu0 %v3312_v39 }
 0xf07   : > { %2284 = vmatpush1.bf16.msra.mxu0 %v3310_v41 }
 0xf08   : > { %2285 = vmatprep.subr.bf16.mxu0 %v3318_v45 }
 0xf0b   : > { %2286 = vmatpush1.bf16.msra.mxu0 %v3316_v47 }
 0xf0c   : > { %3028 = vmatprep.subr.bf16.mxu0 %v3320_v59 }
 0xfc1   : > { %v1981_v1 = vpop.f32.mrb[12].mxu0 }
 0xfc2   : > { %v1982_v3 = vadd.f32 %v2874_v4, %v1981_v1  ;;  %v3176_v23 = vpop.f32.mrb[13].mxu0  ;;  %v3326_v4 = vld [vmem:[%s4124_s19 + $0x88] sm:$0xff]   ;;  %v3327_v1 = vld [vmem:[%s4124_s19 + $0x50] sm:$0xff]  }
 0xfc3   : > { %v1984_v5 = vpop.f32.mrb[14].mxu0  ;;  %v3329_v23 = vld [vmem:[%s4124_s19 + $0x10] sm:$0xff]  }
 0xfc4   : > { %v3177_v6 = vpop.f32.mrb[15].mxu0  ;;  %v1987_v7 = vadd.f32 %v1982_v3, %v3803_v42  ;;  %v3279_v42 = vld [vmem:[%s4122_s17 + $0x24] ss:$16 sps:$4 sm:$0xff]  }
 0xfc5   : > { %2232 = vmatprep.subr.bf16.mxu1 %v3279_v42  ;;  %v3328_v3 = vld [vmem:[%s4124_s19 + $0xd0] sm:$0xff]   ;;  %v3331_v6 = vld [vmem:[%s4124_s19 + $0x58] sm:$0xff]   ;;  %v3337_v42 = vld [vmem:[%s4124_s19 + $0x20] sm:$0xff]  }
 0xfc6   : > { %1990 = vadd.xlane.f32.xlu1 %v1987_v7  ;;  %2233 = vmatpush1.bf16.msra.mxu1 %v3277_v12  ;;  %v3330_v5 = vld [vmem:[%s4124_s19 + $0x90] sm:$0xff]   ;;  %v3339_v12 = vld [vmem:[%s4124_s19 + $0x68] sm:$0xff]  }
 0xfc7   : > { %2234 = vmatprep.subr.bf16.mxu1 %v3285_v14  ;;  %v3341_v14 = vld [vmem:[%s4124_s19 + $0x28] sm:$0xff]  }
 0xfca   : > { %2235 = vmatpush1.bf16.msra.mxu1 %v3283_v16  ;;  %v3343_v16 = vld [vmem:[%s4124_s19 + $0x70] sm:$0xff]  }
 0xfcb   : > { %2236 = vmatprep.subr.bf16.mxu1 %v3291_v22  ;;  %v3349_v22 = vld [vmem:[%s4124_s19 + $0x38] sm:$0xff]  }
 0xfce   : > { %2237 = vmatpush1.bf16.msra.mxu1 %v3289_v25  ;;  %v2047_v25 = vld [vmem:[%s4123_s18] sm:$0xf] }
 0xfcf   : > { %2238 = vmatprep.subr.bf16.mxu1 %v3297_v27  ;;  %v2053_v27 = vrot.slane %v2047_v25, %v3633_v32  ;;  %v2061_v28 = vrot.slane %v2047_v25, %v788_v44  ;;  %v2065_v33 = vrot.slane %v2047_v25, %v2064_v26 }
 0xfd2   : > { %2239 = vmatpush1.bf16.msra.mxu1 %v3295_v31  ;;  %v2057_v31 = vrot.slane %v2047_v25, %v3627_v30 }
 0xfd3   : > { %2240 = vmatprep.subr.bf16.mxu1 %v3303_v34 }
 0xfd6   : > { %2241 = vmatpush1.bf16.msra.mxu1 %v3301_v36 }
 0xfd7   : > { %2242 = vmatprep.subr.bf16.mxu1 %v3309_v38 }
 0xfda   : > { %2243 = vmatpush1.bf16.msra.mxu1 %v3307_v40 }
 0xfdb   : > { %2244 = vmatprep.subr.bf16.mxu1 %v3315_v43 }
 0xfde   : > { %2245 = vmatpush1.bf16.msra.mxu1 %v3313_v46 }
 0xfdf   : > { %3006 = vmatprep.subr.bf16.mxu1 %v3319_v58 }
0x1053   : > { %v1991_v18 = vpop.xlane.xlu1 %1990 }
0x1054   : > { %v1992_v19 = vmul.f32 0.0078125, %v1991_v18  ;;  %v3345_v18 = vld [vmem:[%s4124_s19 + $0x30] sm:$0xff]  }
0x1056   : > { %v1993_v20 = vsub.f32 %v1987_v7, %v1992_v19  ;;  %v3332_v7 = vld [vmem:[%s4124_s19 + $0xd8] sm:$0xff]   ;;  %v3346_v19 = vld [vmem:[%s4124_s19 + $0xb0] sm:$0xff]  }
0x1058   : > { %v1994_v21 = vmul.f32 %v1993_v20, %v1993_v20 }
0x105a   : > { %1995 = vadd.xlane.f32.xlu0 %v1994_v21  ;;  %v3348_v21 = vld [vmem:[%s4124_s19 + $0xf8] sm:$0xff]  }
0x10e7   : > { %v1996_v48 = vpop.xlane.xlu0 %1995 }
0x10e8   : > { %v1997_v49 = vmul.f32 0.0078125, %v1996_v48 }
0x10ea   : > { %v1998_v50 = vadd.f32 1e-12, %v1997_v49 }
0x10ec   : > { %3369 = vrsqrt.f32 %v1998_v50 }
0x10f6   : > { %v3370_v51 = vpop.eup %3369 }
0x10f7   : > { %v2000_v53 = vmul.f32 %v3370_v51, %v1993_v20  ;;  %v3347_v20 = vld [vmem:[%s4124_s19 + $0x78] sm:$0xff]  }
0x10f9   : > { %v2007_v55 = vmul.f32 %v2883_v52, %v2000_v53 }
0x10fb   : > { %v3980_v56 = vadd.f32 %v2884_v54, %v2007_v55 }
0x10fd   : > { %v2048_v57 = vpack.c.bf16 %v3980_v56, %v3980_v56 }
0x10ff   : > { %2263 = vmatmul.mubr.bf16.vlgmr.msra.gmra.mrb[40].mxu1 %v2048_v57  ;;  %2304 = vmatmul.mubr.bf16.vlgmr.msra.gmra.mrb[16].mxu0 %v2048_v57 }
0x1100   : > { %3007 = vmatpush3.bf16.msra.mxu1 %v3321_v60  ;;  %3029 = vmatpush3.bf16.msra.mxu0 %v3322_v61 }
0x1101   : > { %3008 = vmatprep.subr.bf16.mxu1 %v3323_v62  ;;  %3030 = vmatprep.subr.bf16.mxu0 %v3324_v63 }
0x1104   : > { %3009 = vmatpush3.bf16.msra.mxu1 %v3325_v0  ;;  %3031 = vmatpush3.bf16.msra.mxu0 %v3326_v4 }
0x1105   : > { %3010 = vmatprep.subr.bf16.mxu1 %v3327_v1  ;;  %3032 = vmatprep.subr.bf16.mxu0 %v3328_v3 }
0x1108   : > { %3011 = vmatpush3.bf16.msra.mxu1 %v3329_v23  ;;  %3033 = vmatpush3.bf16.msra.mxu0 %v3330_v5 }
0x1109   : > { %3012 = vmatprep.subr.bf16.mxu1 %v3331_v6  ;;  %3034 = vmatprep.subr.bf16.mxu0 %v3332_v7 }
0x110c   : > { %3013 = vmatpush3.bf16.msra.mxu1 %v3333_v8  ;;  %3035 = vmatpush3.bf16.msra.mxu0 %v3334_v2 }
0x110d   : > { %3014 = vmatprep.subr.bf16.mxu1 %v3335_v9  ;;  %3036 = vmatprep.subr.bf16.mxu0 %v3336_v10 }
0x1110   : > { %3015 = vmatpush3.bf16.msra.mxu1 %v3337_v42  ;;  %3037 = vmatpush3.bf16.msra.mxu0 %v3338_v11 }
0x1111   : > { %3016 = vmatprep.subr.bf16.mxu1 %v3339_v12  ;;  %3038 = vmatprep.subr.bf16.mxu0 %v3340_v13 }
0x1114   : > { %3017 = vmatpush3.bf16.msra.mxu1 %v3341_v14  ;;  %3039 = vmatpush3.bf16.msra.mxu0 %v3342_v15 }
0x1115   : > { %3018 = vmatprep.subr.bf16.mxu1 %v3343_v16  ;;  %3040 = vmatprep.subr.bf16.mxu0 %v3344_v17 }
0x1118   : > { %3019 = vmatpush3.bf16.msra.mxu1 %v3345_v18  ;;  %3041 = vmatpush3.bf16.msra.mxu0 %v3346_v19 }
0x1119   : > { %3020 = vmatprep.subr.bf16.mxu1 %v3347_v20  ;;  %3042 = vmatprep.subr.bf16.mxu0 %v3348_v21  ;;  %v2917_v21 = vld [vmem:[%s4125_s20] ss:$0 sm:$0xff] }
0x111c   : > { %3021 = vmatpush3.bf16.msra.mxu1 %v3349_v22  ;;  %3043 = vmatpush3.bf16.msra.mxu0 %v3350_v24 }
0x11d2   : > { %v2264_v34 = vpop.f32.mrb[40].mxu1  ;;  %v2305_v35 = vpop.f32.mrb[16].mxu0 }
0x11d3   : > { %v2265_v36 = vadd.f32 %v2264_v34, %v2053_v27  ;;  %v2306_v37 = vadd.f32 %v2305_v35, %v2061_v28  ;;  %v2266_v38 = vpop.f32.mrb[41].mxu1  ;;  %v2307_v39 = vpop.f32.mrb[17].mxu0 }
0x11d4   : > { %v2267_v40 = vadd.f32 %v2266_v38, %v2057_v31  ;;  %v2308_v41 = vadd.f32 %v2307_v39, %v2065_v33  ;;  %v2268_v43 = vpop.f32.mrb[42].mxu1  ;;  %v2309_v45 = vpop.f32.mrb[18].mxu0 }
0x11d5   : > { %v2312_v46 = vmul.f32 %v2265_v36, %v2265_v36  ;;  %v2314_v47 = vmul.f32 %v2306_v37, %v2306_v37  ;;  %v2269_v48 = vpop.f32.mrb[43].mxu1  ;;  %v2310_v32 = vpop.f32.mrb[19].mxu0 }
0x11d6   : > { %v2313_v49 = vmul.f32 %v2267_v40, %v2267_v40  ;;  %v2315_v29 = vmul.f32 %v2308_v41, %v2308_v41 }
0x11d7   : > { %v2316_v44 = vmul.f32 %v2312_v46, %v2265_v36  ;;  %v2318_v50 = vmul.f32 %v2314_v47, %v2306_v37  ;;  %v2950_v47 = vld [vmem:[%s4126_s21] ss:$0 sm:$0xff] }
0x11d8   : > { %v2317_v30 = vmul.f32 %v2313_v49, %v2267_v40  ;;  %v2319_v51 = vmul.f32 %v2315_v29, %v2308_v41 }
0x11d9   : > { %v2320_v52 = vmul.f32 0.044715, %v2316_v44  ;;  %v2322_v53 = vmul.f32 0.044715, %v2318_v50 }
0x11da   : > { %v2321_v54 = vmul.f32 0.044715, %v2317_v30  ;;  %v2323_v55 = vmul.f32 0.044715, %v2319_v51 }
0x11db   : > { %v2324_v57 = vadd.f32 %v2320_v52, %v2265_v36  ;;  %v2326_v58 = vadd.f32 %v2322_v53, %v2306_v37 }
0x11dc   : > { %v2325_v59 = vadd.f32 %v2321_v54, %v2267_v40  ;;  %v2327_v60 = vadd.f32 %v2323_v55, %v2308_v41 }
0x11dd   : > { %v2328_v61 = vmul.f32 0.7978846, %v2324_v57  ;;  %v2330_v62 = vmul.f32 0.7978846, %v2326_v58 }
0x11de   : > { %v2329_v63 = vmul.f32 0.7978846, %v2325_v59  ;;  %v2331_v0 = vmul.f32 0.7978846, %v2327_v60 }
0x11df   : > { %3371 = vtanh.f32 %v2328_v61 }
0x11e0   : > { %3373 = vtanh.f32 %v2330_v62 }
0x11e1   : > { %3375 = vtanh.f32 %v2329_v63 }
0x11e2   : > { %3377 = vtanh.f32 %v2331_v0 }
0x11e9   : > { %v3372_v4 = vpop.eup %3371 }
0x11ea   : > { %v3374_v1 = vpop.eup %3373  ;;  %v2336_v3 = vadd.f32 1.0, %v3372_v4 }
0x11eb   : > { %v3376_v23 = vpop.eup %3375  ;;  %v2338_v5 = vadd.f32 1.0, %v3374_v1 }
0x11ec   : > { %v3378_v6 = vpop.eup %3377  ;;  %v2337_v7 = vadd.f32 1.0, %v3376_v23  ;;  %v2340_v8 = vmul.f32 0.5, %v2336_v3 }
0x11ed   : > { %v2339_v2 = vadd.f32 1.0, %v3378_v6  ;;  %v2342_v9 = vmul.f32 0.5, %v2338_v5 }
0x11ee   : > { %v2341_v10 = vmul.f32 0.5, %v2337_v7  ;;  %v2344_v11 = vmul.f32 %v2340_v8, %v2265_v36 }
0x11ef   : > { %v2343_v42 = vmul.f32 0.5, %v2339_v2  ;;  %v2346_v13 = vmul.f32 %v2342_v9, %v2306_v37 }
0x11f0   : > { %v2345_v12 = vmul.f32 %v2341_v10, %v2267_v40  ;;  %v2413_v17 = vpack.c.bf16 %v2344_v11, %v2344_v11 }
0x11f1   : > { %v2347_v14 = vmul.f32 %v2343_v42, %v2308_v41  ;;  %v2415_v18 = vpack.c.bf16 %v2346_v13, %v2346_v13 }
0x11f2   : > { %v2414_v15 = vpack.c.bf16 %v2345_v12, %v2345_v12 }
0x11f3   : > { %v2416_v16 = vpack.c.bf16 %v2347_v14, %v2347_v14 }
0x11f4   : > { %2647 = vmatprep.mubr.bf16.mxu1 %v2414_v15 }
0x11f5   : > { %2687 = vmatprep.mubr.bf16.mxu0 %v2416_v16  ;;  %2648 = vmatmul.mubr.bf16.vlgmr.msra.gmra.mrb[44].mxu1 %v2413_v17 }
0x11f6   : > { %2688 = vmatmul.mubr.bf16.vlgmr.msra.gmra.mrb[20].mxu0 %v2415_v18 }
0x12c8   : > { %v3022_v19 = vpop.f32.mrb[44].mxu1 }
0x12c9   : > { %v3044_v20 = vpop.f32.mrb[20].mxu0  ;;  %v3023_v22 = vpop.f32.mrb[45].mxu1 }
0x12ca   : > { %v3024_v24 = vadd.f32 %v3023_v22, %v3022_v19  ;;  %v3045_v25 = vpop.f32.mrb[21].mxu0  ;;  %v3025_v26 = vpop.f32.mrb[46].mxu1 }
0x12cb   : > { %v3046_v27 = vadd.f32 %v3045_v25, %v3044_v20  ;;  %v3047_v28 = vpop.f32.mrb[22].mxu0  ;;  %v3026_v31 = vpop.f32.mrb[47].mxu1 }
0x12cc   : > { %v2650_v33 = vadd.f32 %v3024_v24, %v2917_v21  ;;  %v3048_v34 = vpop.f32.mrb[23].mxu0 }
0x12ce   : > { %v2690_v35 = vadd.f32 %v3046_v27, %v2650_v33 }
0x12d0   : > { %v2695_v36 = vadd.f32 %v2690_v35, %v3980_v56  ;;  %v2951_v56 = vld [vmem:[%s4127_s22] ss:$0 sm:$0xff] }
0x12d2   : > { %2698 = vadd.xlane.f32.xlu1 %v2695_v36 }
0x135f   : > { %v2699_v37 = vpop.xlane.xlu1 %2698 }
0x1360   : > { %v2700_v38 = vmul.f32 0.0078125, %v2699_v37 }
0x1362   : > { %v2701_v39 = vsub.f32 %v2695_v36, %v2700_v38 }
0x1364   : > { %v2702_v40 = vmul.f32 %v2701_v39, %v2701_v39 }
0x1366   : > { %2703 = vadd.xlane.f32.xlu1 %v2702_v40 }
0x13f3   : > { %v2704_v41 = vpop.xlane.xlu1 %2703 }
0x13f4   : > { %v2705_v43 = vmul.f32 0.0078125, %v2704_v41 }
0x13f6   : > { %v2706_v45 = vadd.f32 1e-12, %v2705_v43 }
0x13f8   : > { %3379 = vrsqrt.f32 %v2706_v45 }
0x1402   : > { %v3380_v46 = vpop.eup %3379 }
0x1403   : > { %v2708_v48 = vmul.f32 %v3380_v46, %v2701_v39 }
0x1405   : > { %v2715_v32 = vmul.f32 %v2950_v47, %v2708_v48 }
0x1407   : > { %v2722_v49 = vadd.f32 %v2951_v56, %v2715_v32 }
0x1409   : > { %2723 = vst [vmem:[%s736_s25] sm:$0xff] %v2722_v49 }
0x140a PF: > { %s33_s4 = sadd.s32 1, %s3387_s4  }
0x140b   : > { %p30_p4 = scmp.ge.s32.totalorder %s33_s4, 4  }
0x140d   :  { %32 = sbr.rel (!%p30_p4) target bundleno = 9 (0x9), region = 148 }

// kernel: question_answer_classifier.18
= control target key start
LH: loop header
LB: loop body
LE: loop exit
PB: predicated region body
PF: predicated region fallthrough
CT: control target
= control target key end

     0   :  { %s4400_s0 = inlined_call_operand.vmem [shape: f32[2,8,128], index: 0, kind: input, shape index: {}]   ;;  %s4401_s1 = inlined_call_operand.vmem [shape: f32[2,5,128], index: 1, kind: input, shape index: {}]   ;;  %s4402_s2 = inlined_call_operand.vmem [shape: f32[2,1,8], index: 2, kind: input, shape index: {}]   ;;  %s4403_s3 = inlined_call_operand.vmem [shape: bf16[128,384], index: 3, kind: input, shape index: {}]   ;;  %s4404_s4 = inlined_call_operand.vmem [shape: f32[1,384], index: 4, kind: input, shape index: {}]   ;;  %s4405_s5 = inlined_call_operand.vmem [shape: bf16[128,128], index: 5, kind: input, shape index: {}]   ;;  %s4406_s6 = inlined_call_operand.vmem [shape: f32[1,128], index: 6, kind: input, shape index: {}]   ;;  %s4407_s7 = inlined_call_operand.vmem [shape: f32[1,128], index: 7, kind: input, shape index: {}]   ;;  %s4408_s8 = inlined_call_operand.vmem [shape: f32[1,128], index: 8, kind: input, shape index: {}]   ;;  %s4409_s9 = inlined_call_operand.vmem [shape: bf16[128,128], index: 9, kind: input, shape index: {}]   ;;  %s4410_s10 = inlined_call_operand.vmem [shape: f32[1,128], index: 10, kind: input, shape index: {}]   ;;  %s4411_s11 = inlined_call_operand.vmem [shape: bf16[128,256], index: 11, kind: input, shape index: {}]   ;;  %s4412_s12 = inlined_call_operand.vmem [shape: f32[1,256], index: 12, kind: input, shape index: {}]   ;;  %s4413_s13 = inlined_call_operand.vmem [shape: bf16[128,128], index: 13, kind: input, shape index: {}]   ;;  %s4414_s14 = inlined_call_operand.vmem [shape: f32[1,128], index: 14, kind: input, shape index: {}]   ;;  %s4415_s15 = inlined_call_operand.vmem [shape: f32[1,128], index: 15, kind: input, shape index: {}]   ;;  %s4416_s16 = inlined_call_operand.vmem [shape: f32[1,128], index: 16, kind: input, shape index: {}]   ;;  %s4417_s17 = inlined_call_operand.vmem [shape: bf16[128,512], index: 17, kind: input, shape index: {}]   ;;  %s4418_s18 = inlined_call_operand.vmem [shape: f32[1,512], index: 18, kind: input, shape index: {}]   ;;  %s4419_s19 = inlined_call_operand.vmem [shape: bf16[512,128], index: 19, kind: input, shape index: {}]   ;;  %s4420_s20 = inlined_call_operand.hbm [shape: f32[1,128], index: 20, kind: input, shape index: {}]   ;;  %s4421_s21 = inlined_call_operand.hbm [shape: f32[1,128], index: 21, kind: input, shape index: {}]   ;;  %s4422_s22 = inlined_call_operand.hbm [shape: f32[1,128], index: 22, kind: input, shape index: {}]   ;;  %s4423_s23 = inlined_call_operand.vmem [shape: f32[2,8,128], index: 23, kind: output, shape index: {}]  }
   0x1   :  { %4429 = sst [smem:[#allocation10_spill]] %s4400_s0 }
   0x2   :  { %4430 = sst [smem:[#allocation11_spill]] %s4401_s1 }
   0x3   :  { %4431 = sst [smem:[#allocation12_spill]] %s4402_s2 }
   0x4   :  { %4432 = sst [smem:[#allocation13_spill]] %s4403_s3 }
   0x5   :  { %4433 = sst [smem:[#allocation14_spill]] %s4404_s4 }
   0x6   :  { %4434 = sst [smem:[#allocation15_spill]] %s4405_s5 }
   0x7   :  { %4435 = sst [smem:[#allocation16_spill]] %s4406_s6 }
   0x8   :  { %4436 = sst [smem:[#allocation17_spill]] %s4407_s7 }
   0x9   :  { %4437 = sst [smem:[#allocation18_spill]] %s4423_s23 }
   0xa   :  { %28 = vsyncpa [#allocation3], 0 }
   0xb   :  { %29 = vsyncpa [#allocation5], 0  ;;  %s3715_s4 = smov 0  }
   0xc LB: > { %4438 = sst [smem:[#allocation9_spill]] %s3585_s4  ;;  %s3721_s30 = sadd.s32 4294967295, %s3585_s4   ;;  %s3585_s4 = sphi %s3715_s4, %s35_s4  }
   0xd   : > { %p2869_p0 = scmp.ge.s32.totalorder %s3585_s4, 1  ;;  %p564_p1 = scmp.lt.s32.totalorder %s3585_s4, 3 }
   0xe   : > { %p4426_p2 = scmp.eq.s32.totalorder %s3721_s30, 0  ;;  %s3587_s25 = smov [#allocation4]  }
   0xf   : > { %p3726_p3 = pnand %p2869_p0, %p564_p1  ;;  %s639_s5 = sshll.u32 %s3587_s25, 4  ;;  %s640_s5 = int_to_ptr.vmem [resolvable:$true] %s639_s5 }
  0x10   : > { %s3588_s1 = smov [#allocation2]   ;;  %s3589_s2 = smov [#allocation6]  }
  0x11   : > { %s4439_s24 = scalar_select %p3726_p3, 1, 0 }
  0x12   : > { %p3265_p4 = pneg %p3726_p3  ;;  %s628_s26 = sshll.u32 %s3588_s1, 4  ;;  %s3738_s26 = int_to_ptr.vmem [resolvable:$true] %s628_s26 }
  0x13   : > { %s650_s6 = sshll.u32 %s3589_s2, 4  ;;  %s3487_s29 = scalar_lea.hbm %s4421_s21, 16  ;;  %s3740_s6 = int_to_ptr.vmem [resolvable:$true] %s650_s6 }
  0x14   : > { %p3734_p5 = pnand %p4426_p2, %p3265_p4  ;;  %p3488_p6 = scmp.ne.s32.totalorder %s4421_s21, %s3487_s29 }
  0x15   : > { %p3494_p10 = scmp.lt.u32.totalorder %s3487_s29, %s4421_s21 }
  0x16   : > { %p3750_p7 = pneg %p3734_p5 }
  0x18   : > { %p3490_p8 = pnand %p3750_p7, %p3488_p6 }
  0x1a   : > { %p3491_p9 = pneg %p3490_p8 }
  0x1c   : > { %p3496_p11 = pnand %p3494_p10, %p3491_p9 }
  0x1e   : > { %3499 = shalt.err (!%p3496_p11)
}
  0x1f   : > { %s3500_s7 = scalar_lea.vmem %s640_s5, 16  ;;  %s3507_s28 = scalar_lea.vmem %s640_s5, 32 }
  0x20   : > { %p3501_p12 = scmp.ne.s32.totalorder %s640_s5, %s3500_s7  ;;  %p3508_p1 = scmp.lt.s32.totalorder %s640_s5, %s640_s5 }
  0x21   : > { %p3509_p4 = scmp.lt.s32.totalorder %s3507_s28, %s3500_s7 }
  0x22   : > { %p3503_p13 = pnand %p3501_p12, %p3750_p7 }
  0x23   : > { %p3510_p2 = por %p3509_p4, %p3508_p1 }
  0x24   : > { %p3504_p0 = pneg %p3503_p13 }
  0x26   : > { %p3511_p3 = pnand %p3510_p2, %p3504_p0 }
  0x28   : > { %3514 = shalt.err (!%p3511_p3)
}
  0x29   : > { %3271 = dma.hbm_to_vmem [thread:$0]  (!%p3734_p5), %s4421_s21, 16, %s640_s5, [#allocation5]  }
  0x2a   : > { %s3515_s2 = scalar_lea.hbm %s4420_s20, 16 }
  0x2b   : > { %p3516_p6 = scmp.ne.s32.totalorder %s4420_s20, %s3515_s2  ;;  %p3522_p2 = scmp.lt.u32.totalorder %s3515_s2, %s4420_s20 }
  0x2d   : > { %p3518_p8 = pnand %p3516_p6, %p3750_p7 }
  0x2f   : > { %p3519_p9 = pneg %p3518_p8 }
  0x31   : > { %p3524_p3 = pnand %p3522_p2, %p3519_p9 }
  0x33   : > { %3527 = shalt.err (!%p3524_p3)
}
  0x34   : > { %s3528_s5 = scalar_lea.vmem %s3738_s26, 16  ;;  %s3535_s23 = scalar_lea.vmem %s3738_s26, 32 }
  0x35   : > { %p3529_p10 = scmp.ne.s32.totalorder %s3738_s26, %s3528_s5  ;;  %p3536_p13 = scmp.lt.s32.totalorder %s3738_s26, %s3738_s26 }
  0x36   : > { %p3537_p0 = scmp.lt.s32.totalorder %s3535_s23, %s3528_s5 }
  0x37   : > { %p3531_p11 = pnand %p3529_p10, %p3750_p7 }
  0x38   : > { %p3538_p1 = por %p3537_p0, %p3536_p13 }
  0x39   : > { %p3532_p12 = pneg %p3531_p11 }
  0x3b   : > { %p3539_p4 = pnand %p3538_p1, %p3532_p12 }
  0x3d   : > { %3542 = shalt.err (!%p3539_p4)
}
  0x3e   : > { %3268 = dma.hbm_to_vmem [thread:$0]  (!%p3734_p5), %s4420_s20, 16, %s3738_s26, [#allocation3]  }
  0x3f   : > { %s3543_s1 = scalar_lea.hbm %s4422_s22, 16 }
  0x40   : > { %p3544_p6 = scmp.ne.s32.totalorder %s4422_s22, %s3543_s1  ;;  %p3550_p2 = scmp.lt.u32.totalorder %s3543_s1, %s4422_s22 }
  0x42   : > { %p3546_p8 = pnand %p3544_p6, %p3750_p7 }
  0x44   : > { %p3547_p9 = pneg %p3546_p8 }
  0x46   : > { %p3552_p3 = pnand %p3550_p2, %p3547_p9 }
  0x48   : > { %3555 = shalt.err (!%p3552_p3)
}
  0x49   : > { %s3556_s26 = scalar_lea.vmem %s3740_s6, 16  ;;  %s3563_s23 = scalar_lea.vmem %s3740_s6, 32 }
  0x4a   : > { %p3557_p10 = scmp.ne.s32.totalorder %s3740_s6, %s3556_s26  ;;  %p3564_p13 = scmp.lt.s32.totalorder %s3740_s6, %s3740_s6 }
  0x4b   : > { %p3565_p0 = scmp.lt.s32.totalorder %s3563_s23, %s3556_s26 }
  0x4c   : > { %p3559_p11 = pnand %p3557_p10, %p3750_p7 }
  0x4d   : > { %p3566_p1 = por %p3565_p0, %p3564_p13 }
  0x4e   : > { %p3560_p12 = pneg %p3559_p11 }
  0x50   : > { %p3567_p4 = pnand %p3566_p1, %p3560_p12 }
  0x52   : > { %3570 = shalt.err (!%p3567_p4)
}
  0x53   : > { %3274 = dma.hbm_to_vmem [thread:$0]  (!%p3734_p5), %s4422_s22, 16, %s3740_s6, [#allocation5]  }
  0x54   : > { %p4442_p6 = scmp.ne.s32.totalorder %s4439_s24, 0 }
  0x55   : > { %p4443_p7 = scmp.eq.s32.totalorder (!%p4442_p6), %s3721_s30, 0 }
  0x56   : > { %683 = sbr.rel (%p4442_p6) target bundleno = 5214 (0x145e), region = 112 }
  0x5d   : > { %3576 = dma.done.wait (%p4443_p7), [#allocation3], 16   ;;  %p4444_p8 = pmov %p4443_p7 }
  0x5e   : > { %p4445_p9 = pmov %p4443_p7 }
  0x5f   : > { %3578 = vsyncadd (%p4444_p8), [#allocation3], 4294967280 }
  0x60   : > { %3580 = dma.done.wait (%p4445_p9), [#allocation5], 32   ;;  %p4446_p2 = pmov %p4443_p7 }
  0x61   : > { %v3590_v0 = vmov 0   ;;  %v3591_v1 = vmov 0.0   ;;  %s4447_s27 = sld [smem:[#allocation13_spill]]  ;;  %p760_p5 = scmp.lt.s32.totalorder %s3721_s30, 1  ;;  %vm3592_vm0 = vmmov 0   ;;  %v816_v28 = vlaneseq }
  0x62   : > { %3582 = vsyncadd (%p4446_p2), [#allocation5], 4294967264  ;;  %991 = vmatprep.mubr.bf16.mxu0 %v3590_v0  ;;  %3125 = vmatprep.subr.bf16.mxu1 %v3591_v1  ;;  %s4448_s24 = sld [smem:[#allocation10_spill]]  ;;  %vm1043_vm1 = vcmask 523264   ;;  %s3593_s25 = smov 64   ;;  %vm1114_vm2 = vcmask 1043456  }
  0x63   : > { %s4458_s30 = smov (!%p760_p5, %s3721_s30), 1  ;;  %3141 = vmatprep.mubr.msk.bf16.mxu1 %vm3592_vm0, %v3591_v1  ;;  %v3928_v29 = vshrl.u32 %v816_v28, 7  ;;  %s4450_s1 = sld [smem:[#allocation12_spill]]  ;;  %vm1098_vm3 = vcmask 64512   ;;  %vm1747_vm4 = vcmask 1041408   ;;  %vm1748_vm5 = vcmask 1042432  }
  0x64   : > { %s3864_s28 = sshll.u32 %s4458_s30, 3  ;;  %s4451_s5 = sld [smem:[#allocation15_spill]]  ;;  %vm1731_vm6 = vcmask 39936  }
  0x65   : > { %v3931_v30 = vsub.s32 1, %v3928_v29  ;;  %v3937_v32 = vsub.s32 0, %v3928_v29  ;;  %v826_v44 = vsub.s32 2, %v3928_v29  ;;  %s4453_s23 = sld [smem:[#allocation11_spill]]  ;;  %s4454_s7 = sld [smem:[#allocation17_spill]] }
  0x67   : > { %v3297_v2 = vld [vmem:[%s4447_s27 + $0x4] ss:$12 sps:$4 sm:$0xff]   ;;  %v3299_v3 = vld [vmem:[%s4447_s27] ss:$12 sps:$4 sm:$0xff]   ;;  %v3300_v4 = vld [vmem:[%s4447_s27 + $0x1c] ss:$12 sps:$4 sm:$0xff]  }
  0x68   : > { %959 = vmatprep.subr.bf16.mxu0 %v3297_v2  ;;  %v3302_v5 = vld [vmem:[%s4447_s27 + $0x18] ss:$12 sps:$4 sm:$0xff]   ;;  %v3303_v6 = vld [vmem:[%s4447_s27 + $0x34] ss:$12 sps:$4 sm:$0xff]   ;;  %v3305_v7 = vld [vmem:[%s4447_s27 + $0x30] ss:$12 sps:$4 sm:$0xff]   ;;  %s763_s6 = scalar_lea.vmem %s4448_s24, %s3864_s28 }
  0x69   : > { %960 = vmatpush1.bf16.msra.mxu0 %v3299_v3  ;;  %v3306_v8 = vld [vmem:[%s4447_s27 + $0x4c] ss:$12 sps:$4 sm:$0xff]   ;;  %v3308_v9 = vld [vmem:[%s4447_s27 + $0x48] ss:$12 sps:$4 sm:$0xff]   ;;  %v3309_v11 = vld [vmem:[%s4447_s27 + $0x64] ss:$12 sps:$4 sm:$0xff]   ;;  %s770_s2 = scalar_lea.vmem %s4450_s1, %s4458_s30 }
  0x6a   : > { %961 = vmatprep.subr.bf16.mxu0 %v3300_v4  ;;  %v3321_v10 = vld [vmem:[%s4447_s27 + $0x8] ss:$12 sps:$4 sm:$0xff]   ;;  %v3322_v12 = vld [vmem:[%s4447_s27 + $0x20] ss:$12 sps:$4 sm:$0xff]   ;;  %v3314_v15 = vld [vmem:[%s4447_s27 + $0x78] ss:$12 sps:$4 sm:$0xff]  }
  0x6b   : > { %3126 = vmatpush3.bf16.msra.mxu1 %v3321_v10  ;;  %v3311_v13 = vld [vmem:[%s4447_s27 + $0x60] ss:$12 sps:$4 sm:$0xff]   ;;  %v3312_v14 = vld [vmem:[%s4447_s27 + $0x7c] ss:$12 sps:$4 sm:$0xff]   ;;  %v3323_v16 = vld [vmem:[%s4447_s27 + $0x38] ss:$12 sps:$4 sm:$0xff]   ;;  %s767_s4 = scalar_lea.vmem %s4453_s23, %s3864_s28 }
  0x6c   : > { %3127 = vmatprep.subr.bf16.mxu1 %v3591_v1  ;;  %v3315_v17 = vld [vmem:[%s4447_s27 + $0x94] ss:$12 sps:$4 sm:$0xff]   ;;  %v3324_v18 = vld [vmem:[%s4447_s27 + $0x50] ss:$12 sps:$4 sm:$0xff]   ;;  %v3318_v20 = vld [vmem:[%s4447_s27 + $0xac] ss:$12 sps:$4 sm:$0xff]  }
  0x6d   : > { %962 = vmatpush1.bf16.msra.mxu0 %v3302_v5  ;;  %v3317_v19 = vld [vmem:[%s4447_s27 + $0x90] ss:$12 sps:$4 sm:$0xff]   ;;  %v3325_v21 = vld [vmem:[%s4447_s27 + $0x68] ss:$12 sps:$4 sm:$0xff]   ;;  %v3903_v23 = vld [vmem:[%s763_s6] sm:$0xff]  ;;  %s4449_s6 = sld [smem:[#allocation14_spill]] }
  0x6e   : > { %963 = vmatprep.subr.bf16.mxu0 %v3303_v6  ;;  %v3320_v22 = vld [vmem:[%s4447_s27 + $0xa8] ss:$12 sps:$4 sm:$0xff]   ;;  %v3326_v24 = vld [vmem:[%s4447_s27 + $0x80] ss:$12 sps:$4 sm:$0xff]   ;;  %v814_v25 = vpack.c.bf16 %v3903_v23, %v3903_v23  ;;  %v3327_v26 = vld [vmem:[%s4447_s27 + $0x98] ss:$12 sps:$4 sm:$0xff]  }
  0x6f   : > { %3128 = vmatpush3.bf16.msra.mxu1 %v3322_v12  ;;  %v3328_v27 = vld [vmem:[%s4447_s27 + $0xb0] ss:$12 sps:$4 sm:$0xff]   ;;  %v778_v53 = vld [vmem:[%s770_s2] sm:$0x1]  ;;  %s4452_s24 = sld [smem:[#allocation16_spill]] }
  0x70   : > { %3129 = vmatprep.subr.bf16.mxu1 %v3591_v1  ;;  %v779_v54 = vsub.f32 1.0, %v778_v53 }
  0x71   : > { %964 = vmatpush1.bf16.msra.mxu0 %v3305_v7 }
  0x72   : > { %965 = vmatprep.subr.bf16.mxu0 %v3306_v8  ;;  %v780_v55 = vmul.f32 -10000.0, %v779_v54 }
  0x73   : > { %3130 = vmatpush3.bf16.msra.mxu1 %v3323_v16  ;;  %v813_v31 = vld [vmem:[%s4449_s6] sm:$0x7]  ;;  %s4455_s6 = sld [smem:[#allocation18_spill]] }
  0x74   : > { %3131 = vmatprep.subr.bf16.mxu1 %v3591_v1  ;;  %v823_v33 = vrot.slane %v813_v31, %v3931_v30  ;;  %v819_v34 = vrot.slane %v813_v31, %v3937_v32  ;;  %v827_v45 = vrot.slane %v813_v31, %v826_v44  ;;  %v1095_v56 = vrot.slane %v780_v55, %v3937_v32 }
  0x75   : > { %966 = vmatpush1.bf16.msra.mxu0 %v3308_v9 }
  0x76   : > { %967 = vmatprep.subr.bf16.mxu0 %v3309_v11 }
  0x77   : > { %3132 = vmatpush3.bf16.msra.mxu1 %v3324_v18 }
  0x78   : > { %3133 = vmatprep.subr.bf16.mxu1 %v3591_v1 }
  0x79   : > { %968 = vmatpush1.bf16.msra.mxu0 %v3311_v13  ;;  %s774_s0 = scalar_lea.vmem %s4455_s6, %s3864_s28 }
  0x7a   : > { %969 = vmatprep.subr.bf16.mxu0 %v3312_v14 }
  0x7b   : > { %3134 = vmatpush3.bf16.msra.mxu1 %v3325_v21 }
  0x7c   : > { %3135 = vmatprep.subr.bf16.mxu1 %v3591_v1 }
  0x7d   : > { %970 = vmatpush1.bf16.msra.mxu0 %v3314_v15 }
  0x7e   : > { %971 = vmatprep.subr.bf16.mxu0 %v3315_v17 }
  0x7f   : > { %3136 = vmatpush3.bf16.msra.mxu1 %v3326_v24 }
  0x80   : > { %3137 = vmatprep.subr.bf16.mxu1 %v3591_v1 }
  0x81   : > { %972 = vmatpush1.bf16.msra.mxu0 %v3317_v19 }
  0x82   : > { %973 = vmatprep.subr.bf16.mxu0 %v3318_v20 }
  0x83   : > { %3138 = vmatpush3.bf16.msra.mxu1 %v3327_v26 }
  0x84   : > { %3139 = vmatprep.subr.bf16.mxu1 %v3591_v1 }
  0x85   : > { %974 = vmatpush1.bf16.msra.mxu0 %v3320_v22 }
  0x86   : > { %3169 = vmatprep.subr.bf16.mxu0 %v3591_v1 }
  0x87   : > { %3140 = vmatpush3.bf16.msra.mxu1 %v3328_v27 }
  0x88   : > { %992 = vmatmul.mubr.bf16.vlgmr.msra.gmra.mrb[0].mxu0 %v814_v25  ;;  %3145 = vmatprep.subr.bf16.mxu1 %v3591_v1 }
  0x89   : > { %3185 = vmatprep.mubr.msk.bf16.mxu0 %vm3592_vm0, %v3591_v1 }
  0x8a   : > { %3142 = vmatmul.mubr.bf16.vlgmr.msra.gmra.mrb[0].mxu1 %v814_v25 }
  0x8b   : > { %3147 = vmatprep.mubr.msk.bf16.mxu1 %vm3592_vm0, %v3591_v1 }
 0x15b   : > { %v993_v35 = vpop.f32.mrb[0].mxu0 }
 0x15c   : > { %v995_v36 = vpop.f32.mrb[1].mxu0  ;;  %v994_v40 = vadd.f32 %v993_v35, %v819_v34 }
 0x15d   : > { %v996_v37 = vadd.f32 %v995_v36, %v823_v33  ;;  %v997_v38 = vpop.f32.mrb[2].mxu0  ;;  %v1034_v46 = vpop.f32.mrb[0].mxu1 }
 0x15e   : > { %v998_v39 = vpop.f32.mrb[3].mxu0  ;;  %v1040_v43 = vpack.c.bf16 %v994_v40, %v994_v40  ;;  %v1035_v47 = vadd.f32 %v1034_v46, %v827_v45  ;;  %v3143_v48 = vpop.f32.mrb[1].mxu1  ;;  %v3329_v40 = vld [vmem:[%s4451_s5] sm:$0xff]   ;;  %v3334_v46 = vld [vmem:[%s4451_s5 + $0x28] sm:$0xff]  }
 0x15f   : > { %v1041_v41 = vpack.c.bf16 %v996_v37, %v996_v37  ;;  %v1037_v49 = vpop.f32.mrb[2].mxu1  ;;  %3170 = vmatpush3.bf16.msra.mxu0 %v3329_v40  ;;  %v3333_v45 = vld [vmem:[%s4451_s5 + $0x20] sm:$0xff]   ;;  %v3336_v48 = vld [vmem:[%s4451_s5 + $0x38] sm:$0xff]  }
 0x160   : > { %v1042_v50 = vpack.c.bf16 %v1035_v47, %v1035_v47  ;;  %v3144_v51 = vpop.f32.mrb[3].mxu1  ;;  %3171 = vmatprep.subr.bf16.mxu0 %v3591_v1  ;;  %v3335_v47 = vld [vmem:[%s4451_s5 + $0x30] sm:$0xff]   ;;  %v2919_v40 = vld [vmem:[%s4408_s8] ss:$0 sm:$0xff] }
 0x161   : > { %v1048_v42 = vsel %vm1043_vm1, %v1041_v41, 0  ;;  %1162 = vrot.lane.b32.xlu1 %v1041_v41, %s3593_s25  ;;  %v3330_v41 = vld [vmem:[%s4451_s5 + $0x8] sm:$0xff]  }
 0x162   : > { %3146 = vmatpush3.bf16.xpose.msra.mxu1 %v1048_v42  ;;  %v1116_v52 = vsel %vm1114_vm2, %v1042_v50, 0  ;;  %v3331_v42 = vld [vmem:[%s4451_s5 + $0x10] sm:$0xff]  }
 0x163   : > { %3151 = vmatprep.subr.bf16.mxu1 %v3591_v1  ;;  %3172 = vmatpush3.bf16.msra.mxu0 %v3330_v41 }
 0x164   : > { %3173 = vmatprep.subr.bf16.mxu0 %v3591_v1 }
 0x165   : > { %1159 = vrot.lane.b32.xlu1 %v1040_v43, %s3593_s25 }
 0x167   : > { %3174 = vmatpush3.bf16.msra.mxu0 %v3331_v42 }
 0x168   : > { %3175 = vmatprep.subr.bf16.mxu0 %v3591_v1 }
 0x169   : > { %3148 = vmatmul.mubr.msk.bf16.vlgmr.msra.gmra.mrb[4].mxu1 %vm1043_vm1, %v1040_v43  ;;  %v3332_v43 = vld [vmem:[%s4451_s5 + $0x18] sm:$0xff]  }
 0x16a   : > { %3153 = vmatprep.mubr.msk.bf16.mxu1 %vm3592_vm0, %v3591_v1  ;;  %3152 = vmatpush3.bf16.msra.mxu1 %v1116_v52 }
 0x16b   : > { %3157 = vmatprep.subr.bf16.mxu1 %v3591_v1  ;;  %3176 = vmatpush3.bf16.msra.mxu0 %v3332_v43 }
 0x16c   : > { %3177 = vmatprep.subr.bf16.mxu0 %v3591_v1 }
 0x16f   : > { %3178 = vmatpush3.bf16.msra.mxu0 %v3333_v45  ;;  %v1547_v45 = vld [vmem:[%s4412_s12] sm:$0x3] }
 0x170   : > { %3179 = vmatprep.subr.bf16.mxu0 %v3591_v1 }
 0x173   : > { %3180 = vmatpush3.bf16.msra.mxu0 %v3334_v46  ;;  %v1553_v46 = vrot.slane %v1547_v45, %v3937_v32 }
 0x174   : > { %3181 = vmatprep.subr.bf16.mxu0 %v3591_v1 }
 0x177   : > { %3182 = vmatpush3.bf16.msra.mxu0 %v3335_v47 }
 0x178   : > { %3183 = vmatprep.subr.bf16.mxu0 %v3591_v1 }
 0x17b   : > { %3184 = vmatpush3.bf16.msra.mxu0 %v3336_v48 }
 0x1d3   : > { %v1163_v10 = vpop.permute.xlu1 %1162 }
 0x1d4   : > { %v1168_v12 = vsel %vm1043_vm1, %v1163_v10, 0  ;;  %v3353_v10 = vld [vmem:[%s4411_s11 + $0x44] ss:$8 sps:$4 sm:$0xff]  }
 0x1d7   : > { %v1160_v13 = vpop.permute.xlu1 %1159 }
 0x23c   : > { %v1084_v57 = vpop.f32.mrb[4].mxu1 }
 0x23d   : > { %v1090_v58 = vmul.f32 0.125, %v1084_v57  ;;  %v3149_v59 = vpop.f32.mrb[5].mxu1 }
 0x23e   : > { %v1087_v60 = vpop.f32.mrb[6].mxu1 }
 0x23f   : > { %v3150_v61 = vpop.f32.mrb[7].mxu1  ;;  %v1097_v62 = vadd.f32 %v1095_v56, %v1090_v58 }
 0x241   : > { %v1099_v63 = vsel %vm1098_vm3, %v1097_v62, -inf }
 0x242   : > { %1100 = vmax.xlane.f32.xlu0 %v1099_v63  ;;  %v3337_v63 = vld [vmem:[%s4411_s11] ss:$8 sps:$4 sm:$0xff]  }
 0x2cf   : > { %v1101_v2 = vpop.xlane.xlu0 %1100 }
 0x2d0   : > { %v1102_v3 = vsub.f32 %v1097_v62, %v1101_v2  ;;  %v3339_v2 = vld [vmem:[%s4411_s11 + $0x4] ss:$8 sps:$4 sm:$0xff]  }
 0x2d1   : > { %1640 = vmatprep.subr.bf16.mxu0 %v3339_v2 }
 0x2d2   : > { %v1103_v4 = vmul.f32 1.442695, %v1102_v3  ;;  %v3342_v3 = vld [vmem:[%s4411_s11 + $0x14] ss:$8 sps:$4 sm:$0xff]  }
 0x2d4   : > { %3457 = vpow2.f32 %v1103_v4  ;;  %v3346_v4 = vld [vmem:[%s4409_s9] sm:$0xff]  }
 0x2de   : > { %v3458_v5 = vpop.eup %3457 }
 0x2df   : > { %v1105_v6 = vsel %vm1098_vm3, %v3458_v5, 0.0 }
 0x2e0   : > { %1106 = vadd.xlane.f32.xlu0 %v1105_v6  ;;  %v3350_v6 = vld [vmem:[%s4409_s9 + $0x8] sm:$0xff]  }
 0x36d   : > { %v1107_v7 = vpop.xlane.xlu0 %1106 }
 0x36e   : > { %3459 = vrcp.f32 %v1107_v7  ;;  %v3343_v7 = vld [vmem:[%s4411_s11 + $0x20] ss:$8 sps:$4 sm:$0xff]  }
 0x378   : > { %v3460_v8 = vpop.eup %3459 }
 0x379   : > { %v1109_v9 = vmul.f32 %v3460_v8, %v3458_v5  ;;  %v3345_v5 = vld [vmem:[%s4411_s11 + $0x24] ss:$8 sps:$4 sm:$0xff]   ;;  %v3349_v8 = vld [vmem:[%s4411_s11 + $0x34] ss:$8 sps:$4 sm:$0xff]  }
 0x37b   : > { %v1110_v11 = vpack.c.bf16 %v1109_v9, %v1109_v9  ;;  %v3347_v9 = vld [vmem:[%s4411_s11 + $0x30] ss:$8 sps:$4 sm:$0xff]  }
 0x37d   : > { %3154 = vmatmul.mubr.msk.bf16.vlgmr.msra.gmra.mrb[8].mxu1 %vm1098_vm3, %v1110_v11  ;;  %v3351_v11 = vld [vmem:[%s4411_s11 + $0x40] ss:$8 sps:$4 sm:$0xff]  }
 0x37e   : > { %3158 = vmatpush3.bf16.xpose.msra.mxu1 %v1168_v12  ;;  %3159 = vmatprep.mubr.msk.bf16.mxu1 %vm3592_vm0, %v3591_v1 }
 0x37f   : > { %3163 = vmatprep.subr.bf16.mxu1 %v3591_v1 }
 0x385   : > { %3160 = vmatmul.mubr.msk.bf16.vlgmr.msra.gmra.mrb[12].mxu1 %vm1043_vm1, %v1160_v13 }
 0x386   : > { %3165 = vmatprep.mubr.msk.bf16.mxu1 %vm3592_vm0, %v3591_v1 }
 0x450   : > { %v1152_v14 = vpop.f32.mrb[8].mxu1 }
 0x451   : > { %v3155_v15 = vpop.f32.mrb[9].mxu1 }
 0x452   : > { %v1155_v16 = vpop.f32.mrb[10].mxu1 }
 0x453   : > { %v3156_v17 = vpop.f32.mrb[11].mxu1  ;;  %v3354_v16 = vld [vmem:[%s4409_s9 + $0x10] sm:$0xff]  }
 0x454   : > { %v3357_v17 = vld [vmem:[%s4411_s11 + $0x54] ss:$8 sps:$4 sm:$0xff]  }
 0x458   : > { %v1204_v18 = vpop.f32.mrb[12].mxu1 }
 0x459   : > { %v1210_v19 = vmul.f32 0.125, %v1204_v18  ;;  %v3161_v20 = vpop.f32.mrb[13].mxu1  ;;  %v3355_v18 = vld [vmem:[%s4411_s11 + $0x50] ss:$8 sps:$4 sm:$0xff]  }
 0x45a   : > { %v1207_v21 = vpop.f32.mrb[14].mxu1  ;;  %v3361_v20 = vld [vmem:[%s4411_s11 + $0x64] ss:$8 sps:$4 sm:$0xff]  }
 0x45b   : > { %v3162_v22 = vpop.f32.mrb[15].mxu1  ;;  %v1211_v24 = vadd.f32 %v1210_v19, %v1095_v56  ;;  %v2909_v56 = vld [vmem:[%s4452_s24] ss:$0 sm:$0xff]  ;;  %v3358_v19 = vld [vmem:[%s4409_s9 + $0x18] sm:$0xff]  }
 0x45c   : > { %v3359_v21 = vld [vmem:[%s4411_s11 + $0x60] ss:$8 sps:$4 sm:$0xff]  }
 0x45d   : > { %v1212_v25 = vsel %vm1098_vm3, %v1211_v24, -inf  ;;  %v3362_v22 = vld [vmem:[%s4409_s9 + $0x20] sm:$0xff]  }
 0x45e   : > { %1213 = vmax.xlane.f32.xlu0 %v1212_v25  ;;  %v3363_v25 = vld [vmem:[%s4411_s11 + $0x70] ss:$8 sps:$4 sm:$0xff]  }
 0x474   : > { %1225 = vrot.lane.b32.xlu0 %v1042_v50, %s3593_s25 }
 0x4eb   : > { %v1214_v26 = vpop.xlane.xlu0 %1213 }
 0x4ec   : > { %v1215_v27 = vsub.f32 %v1211_v24, %v1214_v26  ;;  %v3365_v24 = vld [vmem:[%s4411_s11 + $0x74] ss:$8 sps:$4 sm:$0xff]   ;;  %v777_v26 = vld [vmem:[%s767_s4] sm:$0x1f] }
 0x4ee   : > { %v1216_v28 = vmul.f32 1.442695, %v1215_v27  ;;  %v3366_v27 = vld [vmem:[%s4409_s9 + $0x28] sm:$0xff]  }
 0x4ef   : > { %v1226_v31 = vpop.permute.xlu0 %1225 }
 0x4f0   : > { %3461 = vpow2.f32 %v1216_v28  ;;  %v1231_v33 = vsel %vm1114_vm2, %v1226_v31, 0  ;;  %v1548_v28 = vpack.c.bf16 %v777_v26, %v777_v26  ;;  %v3367_v31 = vld [vmem:[%s4409_s9 + $0x30] sm:$0xff]  }
 0x4f1   : > { %3164 = vmatpush3.bf16.msra.mxu1 %v1231_v33  ;;  %v3368_v33 = vld [vmem:[%s4409_s9 + $0x38] sm:$0xff]  }
 0x4f2   : > { %3189 = vmatprep.subr.bf16.mxu1 %v3591_v1 }
 0x4fa   : > { %v3462_v34 = vpop.eup %3461 }
 0x4fb   : > { %v1218_v35 = vsel %vm1098_vm3, %v3462_v34, 0.0 }
 0x4fc   : > { %1219 = vadd.xlane.f32.xlu1 %v1218_v35 }
 0x589   : > { %v1220_v36 = vpop.xlane.xlu1 %1219 }
 0x58a   : > { %3463 = vrcp.f32 %v1220_v36 }
 0x594   : > { %v3464_v37 = vpop.eup %3463 }
 0x595   : > { %v1222_v38 = vmul.f32 %v3464_v37, %v3462_v34 }
 0x597   : > { %v1223_v39 = vpack.c.bf16 %v1222_v38, %v1222_v38  ;;  %v2918_v38 = vld [vmem:[%s4454_s7] ss:$0 sm:$0xff] }
 0x599   : > { %3166 = vmatmul.mubr.msk.bf16.vlgmr.msra.gmra.mrb[16].mxu1 %vm1098_vm3, %v1223_v39 }
 0x59a   : > { %3205 = vmatprep.mubr.msk.bf16.mxu1 %vm3592_vm0, %v3591_v1  ;;  %3190 = vmatpush3.bf16.msra.mxu1 %v3346_v4 }
 0x59b   : > { %3191 = vmatprep.subr.bf16.mxu1 %v3591_v1 }
 0x59e   : > { %3192 = vmatpush3.bf16.msra.mxu1 %v3350_v6 }
 0x59f   : > { %3193 = vmatprep.subr.bf16.mxu1 %v3591_v1 }
 0x5a2   : > { %3194 = vmatpush3.bf16.msra.mxu1 %v3354_v16 }
 0x5a3   : > { %3195 = vmatprep.subr.bf16.mxu1 %v3591_v1 }
 0x5a6   : > { %3196 = vmatpush3.bf16.msra.mxu1 %v3358_v19 }
 0x5a7   : > { %3197 = vmatprep.subr.bf16.mxu1 %v3591_v1 }
 0x5aa   : > { %3198 = vmatpush3.bf16.msra.mxu1 %v3362_v22 }
 0x5ab   : > { %3199 = vmatprep.subr.bf16.mxu1 %v3591_v1 }
 0x5ae   : > { %3200 = vmatpush3.bf16.msra.mxu1 %v3366_v27 }
 0x5af   : > { %3201 = vmatprep.subr.bf16.mxu1 %v3591_v1 }
 0x5b2   : > { %3202 = vmatpush3.bf16.msra.mxu1 %v3367_v31 }
 0x5b3   : > { %3203 = vmatprep.subr.bf16.mxu1 %v3591_v1 }
 0x5b6   : > { %3204 = vmatpush3.bf16.msra.mxu1 %v3368_v33 }
 0x5b7   : > { %3209 = vmatprep.subr.bf16.mxu1 %v3591_v1 }
 0x66c   : > { %v1267_v49 = vpop.f32.mrb[16].mxu1 }
 0x66d   : > { %1274 = vrot.lane.b32.xlu0 %v1267_v49, %s3593_s25  ;;  %v3167_v50 = vpop.f32.mrb[17].mxu1 }
 0x66e   : > { %v1270_v51 = vpop.f32.mrb[18].mxu1 }
 0x66f   : > { %v3168_v52 = vpop.f32.mrb[19].mxu1 }
 0x6df   : > { %v1275_v53 = vpop.permute.xlu0 %1274 }
 0x6e0   : > { %v1277_v54 = vsel %vm1043_vm1, %v1152_v14, %v1275_v53 }
 0x6e1   : > { %v1295_v55 = vpack.c.bf16 %v1277_v54, %v1277_v54  ;;  %v1557_v54 = vrot.slane %v1547_v45, %v3931_v30 }
 0x6e3   : > { %3186 = vmatmul.mubr.bf16.vlgmr.msra.gmra.mrb[4].mxu0 %v1295_v55 }
 0x6e4   : > { %1672 = vmatprep.mubr.bf16.mxu0 %v3590_v0  ;;  %1641 = vmatpush1.bf16.msra.mxu0 %v3337_v63 }
 0x6e5   : > { %1642 = vmatprep.subr.bf16.mxu0 %v3342_v3 }
 0x7b6   : > { %v1384_v57 = vpop.f32.mrb[4].mxu0 }
 0x7b7   : > { %v1385_v58 = vadd.f32 %v2909_v56, %v1384_v57  ;;  %v3187_v59 = vpop.f32.mrb[5].mxu0  ;;  %v3594_v56 = vmov 65535  }
 0x7b8   : > { %v1387_v60 = vpop.f32.mrb[6].mxu0  ;;  %v1749_v57 = vsel %vm1747_vm4, 4294967295, %v3594_v56  ;;  %v3375_v56 = vld [vmem:[%s4413_s13 + $0x30] sm:$0xff]  }
 0x7b9   : > { %v3188_v61 = vpop.f32.mrb[7].mxu0  ;;  %v1390_v62 = vadd.f32 %v1385_v58, %v3903_v23  ;;  %v3340_v23 = vld [vmem:[%s4411_s11 + $0x10] ss:$8 sps:$4 sm:$0xff]   ;;  %v2920_v58 = vld [vmem:[%s4410_s10] ss:$0 sm:$0xff] }
 0x7ba   : > { %1643 = vmatpush1.bf16.msra.mxu0 %v3340_v23  ;;  %v1750_v61 = vsel %vm1748_vm5, %v1749_v57, 0  ;;  %v3376_v57 = vld [vmem:[%s4413_s13 + $0x38] sm:$0xff]  }
 0x7bb   : > { %1393 = vadd.xlane.f32.xlu0 %v1390_v62  ;;  %1644 = vmatprep.subr.bf16.mxu0 %v3345_v5 }
 0x7be   : > { %1645 = vmatpush1.bf16.msra.mxu0 %v3343_v7 }
 0x7bf   : > { %1646 = vmatprep.subr.bf16.mxu0 %v3349_v8 }
 0x7c2   : > { %1647 = vmatpush1.bf16.msra.mxu0 %v3347_v9 }
 0x7c3   : > { %1648 = vmatprep.subr.bf16.mxu0 %v3353_v10 }
 0x7c6   : > { %1649 = vmatpush1.bf16.msra.mxu0 %v3351_v11 }
 0x7c7   : > { %1650 = vmatprep.subr.bf16.mxu0 %v3357_v17 }
 0x7ca   : > { %1651 = vmatpush1.bf16.msra.mxu0 %v3355_v18 }
 0x7cb   : > { %1652 = vmatprep.subr.bf16.mxu0 %v3361_v20 }
 0x7ce   : > { %1653 = vmatpush1.bf16.msra.mxu0 %v3359_v21 }
 0x7cf   : > { %1654 = vmatprep.subr.bf16.mxu0 %v3365_v24 }
 0x7d2   : > { %1655 = vmatpush1.bf16.msra.mxu0 %v3363_v25 }
 0x7d3   : > { %3233 = vmatprep.subr.bf16.mxu0 %v3591_v1 }
 0x7d5   : > { %1673 = vmatmul.mubr.bf16.vlgmr.msra.gmra.mrb[8].mxu0 %v1548_v28 }
 0x7d6   : > { %3249 = vmatprep.mubr.msk.bf16.mxu0 %vm3592_vm0, %v3591_v1 }
 0x848   : > { %v1394_v12 = vpop.xlane.xlu0 %1393 }
 0x849   : > { %v1396_v13 = vmul.f32 0.0078125, %v1394_v12 }
 0x84b   : > { %v1397_v14 = vsub.f32 %v1390_v62, %v1396_v13 }
 0x84d   : > { %v1398_v15 = vmul.f32 %v1397_v14, %v1397_v14 }
 0x84f   : > { %1399 = vadd.xlane.f32.xlu1 %v1398_v15 }
 0x8a8   : > { %v1674_v47 = vpop.f32.mrb[8].mxu0 }
 0x8a9   : > { %v1675_v48 = vadd.f32 %v1674_v47, %v1553_v46  ;;  %v1676_v49 = vpop.f32.mrb[9].mxu0 }
 0x8aa   : > { %v1678_v50 = vpop.f32.mrb[10].mxu0  ;;  %v1677_v55 = vadd.f32 %v1676_v49, %v1557_v54  ;;  %v3373_v54 = vld [vmem:[%s4413_s13 + $0x20] sm:$0xff]  }
 0x8ab   : > { %v1682_v51 = vpack.c.bf16 %v1675_v48, %v1675_v48  ;;  %v1679_v52 = vpop.f32.mrb[11].mxu0  ;;  %v3369_v50 = vld [vmem:[%s4413_s13] sm:$0xff]  }
 0x8ac   : > { %v1683_v59 = vpack.c.bf16 %v1677_v55, %v1677_v55  ;;  %3234 = vmatpush3.bf16.msra.mxu0 %v3369_v50  ;;  %v3371_v52 = vld [vmem:[%s4413_s13 + $0x10] sm:$0xff]   ;;  %v3374_v55 = vld [vmem:[%s4413_s13 + $0x28] sm:$0xff]  }
 0x8ad   : > { %v1688_v53 = vsel %vm1043_vm1, %v1682_v51, 0  ;;  %3235 = vmatprep.subr.bf16.mxu0 %v3591_v1 }
 0x8ae   : > { %v1752_v23 = vand.u32 %v1750_v61, %v1683_v59 }
 0x8dc   : > { %v1400_v34 = vpop.xlane.xlu1 %1399 }
 0x8dd   : > { %v1401_v35 = vmul.f32 0.0078125, %v1400_v34 }
 0x8df   : > { %v1402_v36 = vadd.f32 1e-12, %v1401_v35 }
 0x8e1   : > { %3465 = vrsqrt.f32 %v1402_v36 }
 0x8eb   : > { %v3466_v37 = vpop.eup %3465 }
 0x8ec   : > { %v1404_v39 = vmul.f32 %v3466_v37, %v1397_v14 }
 0x8ee   : > { %v1411_v41 = vmul.f32 %v2918_v38, %v1404_v39 }
 0x8f0   : > { %v4107_v42 = vadd.f32 %v2919_v40, %v1411_v41 }
 0x8f2   : > { %v1436_v43 = vpack.c.bf16 %v4107_v42, %v4107_v42 }
 0x8f4   : > { %3206 = vmatmul.mubr.bf16.vlgmr.msra.gmra.mrb[20].mxu1 %v1436_v43 }
 0x8f5   : > { %3211 = vmatprep.mubr.msk.bf16.mxu1 %vm3592_vm0, %v3591_v1  ;;  %3210 = vmatpush3.bf16.xpose.msra.mxu1 %v1688_v53  ;;  %v3372_v53 = vld [vmem:[%s4413_s13 + $0x18] sm:$0xff]  }
 0x8f6   : > { %3215 = vmatprep.subr.bf16.mxu1 %v3591_v1 }
 0x9c7   : > { %v1525_v60 = vpop.f32.mrb[20].mxu1 }
 0x9c8   : > { %v1526_v62 = vadd.f32 %v2920_v58, %v1525_v60  ;;  %v3207_v63 = vpop.f32.mrb[21].mxu1 }
 0x9c9   : > { %v1528_v2 = vpop.f32.mrb[22].mxu1 }
 0x9ca   : > { %v1681_v3 = vpack.c.bf16 %v1526_v62, %v1526_v62  ;;  %v3208_v4 = vpop.f32.mrb[23].mxu1 }
 0x9cc   : > { %1795 = vrot.lane.b32.xlu0 %v1681_v3, %s3593_s25  ;;  %3212 = vmatmul.mubr.msk.bf16.vlgmr.msra.gmra.mrb[24].mxu1 %vm1043_vm1, %v1681_v3 }
 0x9cd   : > { %3216 = vmatpush3.bf16.msra.mxu1 %v1752_v23  ;;  %3217 = vmatprep.mubr.msk.bf16.mxu1 %vm3592_vm0, %v3591_v1 }
 0x9ce   : > { %3221 = vmatprep.subr.bf16.mxu1 %v3591_v1 }
 0xa3e   : > { %v1796_v22 = vpop.permute.xlu0 %1795 }
 0xa9f   : > { %v1724_v5 = vpop.f32.mrb[24].mxu1 }
 0xaa0   : > { %v1730_v6 = vmul.f32 0.125, %v1724_v5  ;;  %v3213_v7 = vpop.f32.mrb[25].mxu1 }
 0xaa1   : > { %v1727_v8 = vpop.f32.mrb[26].mxu1 }
 0xaa2   : > { %v3214_v9 = vpop.f32.mrb[27].mxu1  ;;  %v1732_v10 = vsel %vm1731_vm6, %v1730_v6, -inf  ;;  %v3377_v8 = vld [vmem:[%s4417_s17] ss:$16 sps:$4 sm:$0xff]  }
 0xaa3   : > { %1733 = vmax.xlane.f32.xlu1 %v1732_v10  ;;  %v3380_v9 = vld [vmem:[%s4417_s17 + $0x8] ss:$16 sps:$4 sm:$0xff]   ;;  %v3382_v10 = vld [vmem:[%s4417_s17 + $0xc] ss:$16 sps:$4 sm:$0xff]  }
 0xb30   : > { %v1734_v11 = vpop.xlane.xlu1 %1733 }
 0xb31   : > { %v1735_v12 = vsub.f32 %v1730_v6, %v1734_v11  ;;  %v3388_v11 = vld [vmem:[%s4417_s17 + $0x2c] ss:$16 sps:$4 sm:$0xff]  }
 0xb33   : > { %v1736_v13 = vmul.f32 1.442695, %v1735_v12  ;;  %v3383_v12 = vld [vmem:[%s4417_s17 + $0x20] ss:$16 sps:$4 sm:$0xff]  }
 0xb35   : > { %3467 = vpow2.f32 %v1736_v13  ;;  %v3386_v13 = vld [vmem:[%s4417_s17 + $0x28] ss:$16 sps:$4 sm:$0xff]  }
 0xb3f   : > { %v3468_v14 = vpop.eup %3467 }
 0xb40   : > { %v1738_v15 = vsel %vm1731_vm6, %v3468_v14, 0.0 }
 0xb41   : > { %1739 = vadd.xlane.f32.xlu1 %v1738_v15  ;;  %v3394_v15 = vld [vmem:[%s4417_s17 + $0x4c] ss:$16 sps:$4 sm:$0xff]  }
 0xb52   : > { %1798 = vrot.lane.b32.xlu1 %v1682_v51, %s3593_s25  ;;  %v3370_v51 = vld [vmem:[%s4413_s13 + $0x8] sm:$0xff]  }
 0xb53   : > { %3236 = vmatpush3.bf16.msra.mxu0 %v3370_v51 }
 0xb54   : > { %3237 = vmatprep.subr.bf16.mxu0 %v3591_v1 }
 0xb57   : > { %3238 = vmatpush3.bf16.msra.mxu0 %v3371_v52  ;;  %v2958_v52 = vld [vmem:[%s4415_s15] ss:$0 sm:$0xff] }
 0xb58   : > { %3239 = vmatprep.subr.bf16.mxu0 %v3591_v1 }
 0xb5b   : > { %3240 = vmatpush3.bf16.msra.mxu0 %v3372_v53 }
 0xb5c   : > { %3241 = vmatprep.subr.bf16.mxu0 %v3591_v1 }
 0xb5f   : > { %3242 = vmatpush3.bf16.msra.mxu0 %v3373_v54  ;;  %v2959_v54 = vld [vmem:[%s4416_s16] ss:$0 sm:$0xff] }
 0xb60   : > { %3243 = vmatprep.subr.bf16.mxu0 %v3591_v1 }
 0xb63   : > { %3244 = vmatpush3.bf16.msra.mxu0 %v3374_v55 }
 0xb64   : > { %3245 = vmatprep.subr.bf16.mxu0 %v3591_v1 }
 0xb67   : > { %3246 = vmatpush3.bf16.msra.mxu0 %v3375_v56 }
 0xb68   : > { %3247 = vmatprep.subr.bf16.mxu0 %v3591_v1 }
 0xb6b   : > { %3248 = vmatpush3.bf16.msra.mxu0 %v3376_v57 }
 0xb6c   : > { %2309 = vmatprep.subr.bf16.mxu0 %v3382_v10  ;;  %v3442_v10 = vld [vmem:[%s4419_s19 + $0xe0] sm:$0xff]  }
 0xbce   : > { %v1740_v16 = vpop.xlane.xlu1 %1739 }
 0xbcf   : > { %3469 = vrcp.f32 %v1740_v16  ;;  %v3389_v16 = vld [vmem:[%s4417_s17 + $0x40] ss:$16 sps:$4 sm:$0xff]  }
 0xbd2   : > { %v1799_v19 = vpop.permute.xlu1 %1798 }
 0xbd3   : > { %v1804_v21 = vsel %vm1043_vm1, %v1799_v19, 0 }
 0xbd9   : > { %v3470_v17 = vpop.eup %3469 }
 0xbda   : > { %v1742_v18 = vmul.f32 %v3470_v17, %v3468_v14  ;;  %v3391_v14 = vld [vmem:[%s4417_s17 + $0x44] ss:$16 sps:$4 sm:$0xff]   ;;  %v3392_v17 = vld [vmem:[%s4417_s17 + $0x48] ss:$16 sps:$4 sm:$0xff]  }
 0xbdc   : > { %v1743_v20 = vpack.c.bf16 %v1742_v18, %v1742_v18 }
 0xbde   : > { %3218 = vmatmul.mubr.msk.bf16.vlgmr.msra.gmra.mrb[28].mxu1 %vm1731_vm6, %v1743_v20 }
 0xbdf   : > { %3222 = vmatpush3.bf16.xpose.msra.mxu1 %v1804_v21  ;;  %3223 = vmatprep.mubr.msk.bf16.mxu1 %vm3592_vm0, %v3591_v1 }
 0xbe0   : > { %3227 = vmatprep.subr.bf16.mxu1 %v3591_v1 }
 0xbe6   : > { %3224 = vmatmul.mubr.msk.bf16.vlgmr.msra.gmra.mrb[32].mxu1 %vm1043_vm1, %v1796_v22  ;;  %v3397_v22 = vld [vmem:[%s4417_s17 + $0x64] ss:$16 sps:$4 sm:$0xff]  }
 0xbe7   : > { %3229 = vmatprep.mubr.msk.bf16.mxu1 %vm3592_vm0, %v3591_v1  ;;  %v2949_v1 = vld [vmem:[%s4414_s14] ss:$0 sm:$0xff] }
 0xcb1   : > { %v1788_v24 = vpop.f32.mrb[28].mxu1 }
 0xcb2   : > { %v3219_v25 = vpop.f32.mrb[29].mxu1 }
 0xcb3   : > { %v1791_v26 = vpop.f32.mrb[30].mxu1  ;;  %v3395_v25 = vld [vmem:[%s4417_s17 + $0x60] ss:$16 sps:$4 sm:$0xff]  }
 0xcb4   : > { %v3220_v27 = vpop.f32.mrb[31].mxu1  ;;  %v3398_v26 = vld [vmem:[%s4417_s17 + $0x68] ss:$16 sps:$4 sm:$0xff]  }
 0xcb5   : > { %v3403_v27 = vld [vmem:[%s4417_s17 + $0x84] ss:$16 sps:$4 sm:$0xff]  }
 0xcb9   : > { %v1840_v28 = vpop.f32.mrb[32].mxu1 }
 0xcba   : > { %v1846_v31 = vmul.f32 0.125, %v1840_v28  ;;  %v3225_v33 = vpop.f32.mrb[33].mxu1  ;;  %v3406_v28 = vld [vmem:[%s4417_s17 + $0x8c] ss:$16 sps:$4 sm:$0xff]  }
 0xcbb   : > { %v1843_v34 = vpop.f32.mrb[34].mxu1  ;;  %v3404_v33 = vld [vmem:[%s4417_s17 + $0x88] ss:$16 sps:$4 sm:$0xff]  }
 0xcbc   : > { %v3226_v35 = vpop.f32.mrb[35].mxu1  ;;  %v1847_v36 = vsel %vm1731_vm6, %v1846_v31, -inf  ;;  %v3409_v34 = vld [vmem:[%s4417_s17 + $0xa4] ss:$16 sps:$4 sm:$0xff]  }
 0xcbd   : > { %1848 = vmax.xlane.f32.xlu1 %v1847_v36  ;;  %v3412_v35 = vld [vmem:[%s4417_s17 + $0xac] ss:$16 sps:$4 sm:$0xff]   ;;  %v3407_v36 = vld [vmem:[%s4417_s17 + $0xa0] ss:$16 sps:$4 sm:$0xff]  }
 0xcce   : > { %1860 = vrot.lane.b32.xlu1 %v1683_v59, %s3593_s25 }
 0xd4a   : > { %v1849_v37 = vpop.xlane.xlu1 %1848 }
 0xd4b   : > { %v1850_v38 = vsub.f32 %v1846_v31, %v1849_v37  ;;  %v3401_v31 = vld [vmem:[%s4417_s17 + $0x80] ss:$16 sps:$4 sm:$0xff]   ;;  %v3410_v37 = vld [vmem:[%s4417_s17 + $0xa8] ss:$16 sps:$4 sm:$0xff]  }
 0xd4d   : > { %v1851_v39 = vmul.f32 1.442695, %v1850_v38  ;;  %v3415_v38 = vld [vmem:[%s4417_s17 + $0xc4] ss:$16 sps:$4 sm:$0xff]  }
 0xd4e   : > { %v1861_v40 = vpop.permute.xlu1 %1860 }
 0xd4f   : > { %3471 = vpow2.f32 %v1851_v39  ;;  %v1866_v41 = vand.u32 %v1861_v40, %v1750_v61  ;;  %v3418_v39 = vld [vmem:[%s4417_s17 + $0xcc] ss:$16 sps:$4 sm:$0xff]   ;;  %v3413_v40 = vld [vmem:[%s4417_s17 + $0xc0] ss:$16 sps:$4 sm:$0xff]  }
 0xd51   : > { %3228 = vmatpush3.bf16.msra.mxu1 %v1866_v41  ;;  %v3416_v41 = vld [vmem:[%s4417_s17 + $0xc8] ss:$16 sps:$4 sm:$0xff]  }
 0xd59   : > { %v3472_v43 = vpop.eup %3471 }
 0xd5a   : > { %v1853_v45 = vsel %vm1731_vm6, %v3472_v43, 0.0 }
 0xd5b   : > { %1854 = vadd.xlane.f32.xlu0 %v1853_v45  ;;  %v3424_v45 = vld [vmem:[%s4417_s17 + $0xec] ss:$16 sps:$4 sm:$0xff]  }
 0xde8   : > { %v1855_v46 = vpop.xlane.xlu0 %1854 }
 0xde9   : > { %3473 = vrcp.f32 %v1855_v46  ;;  %v3419_v46 = vld [vmem:[%s4417_s17 + $0xe0] ss:$16 sps:$4 sm:$0xff]  }
 0xdf3   : > { %v3474_v47 = vpop.eup %3473 }
 0xdf4   : > { %v1857_v48 = vmul.f32 %v3474_v47, %v3472_v43  ;;  %v3421_v43 = vld [vmem:[%s4417_s17 + $0xe4] ss:$16 sps:$4 sm:$0xff]   ;;  %v3422_v47 = vld [vmem:[%s4417_s17 + $0xe8] ss:$16 sps:$4 sm:$0xff]  }
 0xdf6   : > { %v1858_v49 = vpack.c.bf16 %v1857_v48, %v1857_v48 }
 0xdf8   : > { %3230 = vmatmul.mubr.msk.bf16.vlgmr.msra.gmra.mrb[36].mxu1 %vm1731_vm6, %v1858_v49 }
 0xdf9   : > { %2300 = vmatprep.mubr.bf16.mxu1 %v3590_v0 }
 0xecb   : > { %v1902_v58 = vpop.f32.mrb[36].mxu1 }
 0xecc   : > { %1909 = vrot.lane.b32.xlu0 %v1902_v58, %s3593_s25  ;;  %v3231_v59 = vpop.f32.mrb[37].mxu1  ;;  %v3425_v58 = vld [vmem:[%s4419_s19 + $0x40] sm:$0xff]  }
 0xecd   : > { %v1905_v60 = vpop.f32.mrb[38].mxu1  ;;  %v3426_v59 = vld [vmem:[%s4419_s19 + $0xc0] sm:$0xff]  }
 0xece   : > { %v3232_v61 = vpop.f32.mrb[39].mxu1  ;;  %v3427_v60 = vld [vmem:[%s4419_s19] sm:$0xff]  }
 0xecf   : > { %v3428_v61 = vld [vmem:[%s4419_s19 + $0x80] sm:$0xff]  }
 0xf3e   : > { %v1910_v62 = vpop.permute.xlu0 %1909 }
 0xf3f   : > { %v1912_v63 = vsel %vm1043_vm1, %v1788_v24, %v1910_v62  ;;  %v3400_v24 = vld [vmem:[%s4417_s17 + $0x6c] ss:$16 sps:$4 sm:$0xff]  }
 0xf40   : > { %v1930_v2 = vpack.c.bf16 %v1912_v63, %v1912_v63  ;;  %v3429_v62 = vld [vmem:[%s4419_s19 + $0x48] sm:$0xff]  }
 0xf41   : > { %v3430_v63 = vld [vmem:[%s4419_s19 + $0xc8] sm:$0xff]  }
 0xf42   : > { %3250 = vmatmul.mubr.bf16.vlgmr.msra.gmra.mrb[12].mxu0 %v1930_v2  ;;  %v3431_v2 = vld [vmem:[%s4419_s19 + $0x8] sm:$0xff]  }
 0xf43   : > { %2341 = vmatprep.mubr.bf16.mxu0 %v3590_v0  ;;  %v3379_v0 = vld [vmem:[%s4417_s17 + $0x4] ss:$16 sps:$4 sm:$0xff]   ;;  %2310 = vmatpush1.bf16.msra.mxu0 %v3380_v9 }
 0xf44   : > { %2268 = vmatprep.subr.bf16.mxu1 %v3379_v0  ;;  %2311 = vmatprep.subr.bf16.mxu0 %v3388_v11  ;;  %v3440_v0 = vld [vmem:[%s4419_s19 + $0x98] sm:$0xff]   ;;  %v3441_v9 = vld [vmem:[%s4419_s19 + $0x60] sm:$0xff]  }
 0xf45   : > { %2269 = vmatpush1.bf16.msra.mxu1 %v3377_v8  ;;  %v3439_v8 = vld [vmem:[%s4419_s19 + $0x18] sm:$0xff]   ;;  %v3444_v11 = vld [vmem:[%s4419_s19 + $0xa0] sm:$0xff]  }
 0xf47   : > { %2312 = vmatpush1.bf16.msra.mxu0 %v3386_v13  ;;  %v3446_v13 = vld [vmem:[%s4419_s19 + $0xe8] sm:$0xff]  }
 0xf48   : > { %2313 = vmatprep.subr.bf16.mxu0 %v3394_v15  ;;  %v3448_v15 = vld [vmem:[%s4419_s19 + $0xa8] sm:$0xff]  }
 0xf4b   : > { %2314 = vmatpush1.bf16.msra.mxu0 %v3392_v17  ;;  %v3450_v17 = vld [vmem:[%s4419_s19 + $0xf0] sm:$0xff]  }
 0xf4c   : > { %2315 = vmatprep.subr.bf16.mxu0 %v3400_v24  ;;  %v3456_v24 = vld [vmem:[%s4419_s19 + $0xb8] sm:$0xff]  }
 0xf4f   : > { %2316 = vmatpush1.bf16.msra.mxu0 %v3398_v26  ;;  %v2102_v26 = vsub.s32 3, %v3928_v29 }
 0xf50   : > { %2317 = vmatprep.subr.bf16.mxu0 %v3406_v28 }
 0xf53   : > { %2318 = vmatpush1.bf16.msra.mxu0 %v3404_v33 }
 0xf54   : > { %2319 = vmatprep.subr.bf16.mxu0 %v3412_v35 }
 0xf57   : > { %2320 = vmatpush1.bf16.msra.mxu0 %v3410_v37 }
 0xf58   : > { %2321 = vmatprep.subr.bf16.mxu0 %v3418_v39 }
 0xf5b   : > { %2322 = vmatpush1.bf16.msra.mxu0 %v3416_v41 }
 0xf5c   : > { %2323 = vmatprep.subr.bf16.mxu0 %v3424_v45 }
 0xf5f   : > { %2324 = vmatpush1.bf16.msra.mxu0 %v3422_v47 }
 0xf60   : > { %3103 = vmatprep.subr.bf16.mxu0 %v3426_v59 }
0x1015   : > { %v2019_v3 = vpop.f32.mrb[12].mxu0 }
0x1016   : > { %v2020_v4 = vadd.f32 %v2949_v1, %v2019_v3  ;;  %v3251_v23 = vpop.f32.mrb[13].mxu0  ;;  %v3432_v1 = vld [vmem:[%s4419_s19 + $0x88] sm:$0xff]   ;;  %v3433_v3 = vld [vmem:[%s4419_s19 + $0x50] sm:$0xff]  }
0x1017   : > { %v2022_v5 = vpop.f32.mrb[14].mxu0  ;;  %v3435_v23 = vld [vmem:[%s4419_s19 + $0x10] sm:$0xff]  }
0x1018   : > { %v3252_v6 = vpop.f32.mrb[15].mxu0  ;;  %v2025_v7 = vadd.f32 %v2020_v4, %v4107_v42  ;;  %v3385_v42 = vld [vmem:[%s4417_s17 + $0x24] ss:$16 sps:$4 sm:$0xff]  }
0x1019   : > { %2270 = vmatprep.subr.bf16.mxu1 %v3385_v42  ;;  %v3434_v4 = vld [vmem:[%s4419_s19 + $0xd0] sm:$0xff]   ;;  %v3437_v6 = vld [vmem:[%s4419_s19 + $0x58] sm:$0xff]   ;;  %v3443_v42 = vld [vmem:[%s4419_s19 + $0x20] sm:$0xff]  }
0x101a   : > { %2028 = vadd.xlane.f32.xlu1 %v2025_v7  ;;  %2271 = vmatpush1.bf16.msra.mxu1 %v3383_v12  ;;  %v3436_v5 = vld [vmem:[%s4419_s19 + $0x90] sm:$0xff]   ;;  %v3445_v12 = vld [vmem:[%s4419_s19 + $0x68] sm:$0xff]  }
0x101b   : > { %2272 = vmatprep.subr.bf16.mxu1 %v3391_v14  ;;  %v3447_v14 = vld [vmem:[%s4419_s19 + $0x28] sm:$0xff]  }
0x101e   : > { %2273 = vmatpush1.bf16.msra.mxu1 %v3389_v16  ;;  %v3449_v16 = vld [vmem:[%s4419_s19 + $0x70] sm:$0xff]  }
0x101f   : > { %2274 = vmatprep.subr.bf16.mxu1 %v3397_v22  ;;  %v3455_v22 = vld [vmem:[%s4419_s19 + $0x38] sm:$0xff]  }
0x1022   : > { %2275 = vmatpush1.bf16.msra.mxu1 %v3395_v25  ;;  %v2085_v25 = vld [vmem:[%s4418_s18] sm:$0xf] }
0x1023   : > { %2276 = vmatprep.subr.bf16.mxu1 %v3403_v27  ;;  %v2091_v27 = vrot.slane %v2085_v25, %v3937_v32  ;;  %v2099_v28 = vrot.slane %v2085_v25, %v826_v44  ;;  %v2103_v33 = vrot.slane %v2085_v25, %v2102_v26 }
0x1026   : > { %2277 = vmatpush1.bf16.msra.mxu1 %v3401_v31  ;;  %v2095_v31 = vrot.slane %v2085_v25, %v3931_v30 }
0x1027   : > { %2278 = vmatprep.subr.bf16.mxu1 %v3409_v34 }
0x102a   : > { %2279 = vmatpush1.bf16.msra.mxu1 %v3407_v36 }
0x102b   : > { %2280 = vmatprep.subr.bf16.mxu1 %v3415_v38 }
0x102e   : > { %2281 = vmatpush1.bf16.msra.mxu1 %v3413_v40 }
0x102f   : > { %2282 = vmatprep.subr.bf16.mxu1 %v3421_v43 }
0x1032   : > { %2283 = vmatpush1.bf16.msra.mxu1 %v3419_v46 }
0x1033   : > { %3081 = vmatprep.subr.bf16.mxu1 %v3425_v58 }
0x10a7   : > { %v2029_v18 = vpop.xlane.xlu1 %2028 }
0x10a8   : > { %v2030_v19 = vmul.f32 0.0078125, %v2029_v18  ;;  %v3451_v18 = vld [vmem:[%s4419_s19 + $0x30] sm:$0xff]  }
0x10aa   : > { %v2031_v20 = vsub.f32 %v2025_v7, %v2030_v19  ;;  %v3438_v7 = vld [vmem:[%s4419_s19 + $0xd8] sm:$0xff]   ;;  %v3452_v19 = vld [vmem:[%s4419_s19 + $0xb0] sm:$0xff]  }
0x10ac   : > { %v2032_v21 = vmul.f32 %v2031_v20, %v2031_v20 }
0x10ae   : > { %2033 = vadd.xlane.f32.xlu0 %v2032_v21  ;;  %v3454_v21 = vld [vmem:[%s4419_s19 + $0xf8] sm:$0xff]  }
0x113b   : > { %v2034_v48 = vpop.xlane.xlu0 %2033 }
0x113c   : > { %v2035_v49 = vmul.f32 0.0078125, %v2034_v48 }
0x113e   : > { %v2036_v50 = vadd.f32 1e-12, %v2035_v49 }
0x1140   : > { %3475 = vrsqrt.f32 %v2036_v50 }
0x114a   : > { %v3476_v51 = vpop.eup %3475 }
0x114b   : > { %v2038_v53 = vmul.f32 %v3476_v51, %v2031_v20  ;;  %v3453_v20 = vld [vmem:[%s4419_s19 + $0x78] sm:$0xff]  }
0x114d   : > { %v2045_v55 = vmul.f32 %v2958_v52, %v2038_v53 }
0x114f   : > { %v4284_v56 = vadd.f32 %v2959_v54, %v2045_v55 }
0x1151   : > { %v2086_v57 = vpack.c.bf16 %v4284_v56, %v4284_v56 }
0x1153   : > { %2301 = vmatmul.mubr.bf16.vlgmr.msra.gmra.mrb[40].mxu1 %v2086_v57  ;;  %2342 = vmatmul.mubr.bf16.vlgmr.msra.gmra.mrb[16].mxu0 %v2086_v57 }
0x1154   : > { %3082 = vmatpush3.bf16.msra.mxu1 %v3427_v60  ;;  %3104 = vmatpush3.bf16.msra.mxu0 %v3428_v61 }
0x1155   : > { %3083 = vmatprep.subr.bf16.mxu1 %v3429_v62  ;;  %3105 = vmatprep.subr.bf16.mxu0 %v3430_v63 }
0x1158   : > { %3084 = vmatpush3.bf16.msra.mxu1 %v3431_v2  ;;  %3106 = vmatpush3.bf16.msra.mxu0 %v3432_v1 }
0x1159   : > { %3085 = vmatprep.subr.bf16.mxu1 %v3433_v3  ;;  %3107 = vmatprep.subr.bf16.mxu0 %v3434_v4 }
0x115c   : > { %3086 = vmatpush3.bf16.msra.mxu1 %v3435_v23  ;;  %3108 = vmatpush3.bf16.msra.mxu0 %v3436_v5 }
0x115d   : > { %3087 = vmatprep.subr.bf16.mxu1 %v3437_v6  ;;  %3109 = vmatprep.subr.bf16.mxu0 %v3438_v7 }
0x1160   : > { %3088 = vmatpush3.bf16.msra.mxu1 %v3439_v8  ;;  %3110 = vmatpush3.bf16.msra.mxu0 %v3440_v0 }
0x1161   : > { %3089 = vmatprep.subr.bf16.mxu1 %v3441_v9  ;;  %3111 = vmatprep.subr.bf16.mxu0 %v3442_v10 }
0x1164   : > { %3090 = vmatpush3.bf16.msra.mxu1 %v3443_v42  ;;  %3112 = vmatpush3.bf16.msra.mxu0 %v3444_v11 }
0x1165   : > { %3091 = vmatprep.subr.bf16.mxu1 %v3445_v12  ;;  %3113 = vmatprep.subr.bf16.mxu0 %v3446_v13 }
0x1168   : > { %3092 = vmatpush3.bf16.msra.mxu1 %v3447_v14  ;;  %3114 = vmatpush3.bf16.msra.mxu0 %v3448_v15 }
0x1169   : > { %3093 = vmatprep.subr.bf16.mxu1 %v3449_v16  ;;  %3115 = vmatprep.subr.bf16.mxu0 %v3450_v17 }
0x116c   : > { %3094 = vmatpush3.bf16.msra.mxu1 %v3451_v18  ;;  %3116 = vmatpush3.bf16.msra.mxu0 %v3452_v19 }
0x116d   : > { %3095 = vmatprep.subr.bf16.mxu1 %v3453_v20  ;;  %3117 = vmatprep.subr.bf16.mxu0 %v3454_v21  ;;  %v2992_v21 = vld [vmem:[#allocation2] ss:$0 sm:$0xff] }
0x1170   : > { %3096 = vmatpush3.bf16.msra.mxu1 %v3455_v22  ;;  %3118 = vmatpush3.bf16.msra.mxu0 %v3456_v24 }
0x1226   : > { %v2302_v34 = vpop.f32.mrb[40].mxu1  ;;  %v2343_v35 = vpop.f32.mrb[16].mxu0 }
0x1227   : > { %v2303_v36 = vadd.f32 %v2302_v34, %v2091_v27  ;;  %v2344_v37 = vadd.f32 %v2343_v35, %v2099_v28  ;;  %v2304_v38 = vpop.f32.mrb[41].mxu1  ;;  %v2345_v39 = vpop.f32.mrb[17].mxu0 }
0x1228   : > { %v2305_v40 = vadd.f32 %v2304_v38, %v2095_v31  ;;  %v2346_v41 = vadd.f32 %v2345_v39, %v2103_v33  ;;  %v2306_v43 = vpop.f32.mrb[42].mxu1  ;;  %v2347_v45 = vpop.f32.mrb[18].mxu0 }
0x1229   : > { %v2350_v46 = vmul.f32 %v2303_v36, %v2303_v36  ;;  %v2352_v47 = vmul.f32 %v2344_v37, %v2344_v37  ;;  %v2307_v48 = vpop.f32.mrb[43].mxu1  ;;  %v2348_v32 = vpop.f32.mrb[19].mxu0 }
0x122a   : > { %v2351_v49 = vmul.f32 %v2305_v40, %v2305_v40  ;;  %v2353_v29 = vmul.f32 %v2346_v41, %v2346_v41  ;;  %v3026_v32 = vld [vmem:[#allocation6] ss:$0 sm:$0xff] }
0x122b   : > { %v2354_v44 = vmul.f32 %v2350_v46, %v2303_v36  ;;  %v2356_v50 = vmul.f32 %v2352_v47, %v2344_v37  ;;  %v3025_v47 = vld [vmem:[#allocation4] ss:$0 sm:$0xff] }
0x122c   : > { %v2355_v30 = vmul.f32 %v2351_v49, %v2305_v40  ;;  %v2357_v51 = vmul.f32 %v2353_v29, %v2346_v41 }
0x122d   : > { %v2358_v52 = vmul.f32 0.044715, %v2354_v44  ;;  %v2360_v53 = vmul.f32 0.044715, %v2356_v50 }
0x122e   : > { %v2359_v54 = vmul.f32 0.044715, %v2355_v30  ;;  %v2361_v55 = vmul.f32 0.044715, %v2357_v51 }
0x122f   : > { %v2362_v57 = vadd.f32 %v2358_v52, %v2303_v36  ;;  %v2364_v58 = vadd.f32 %v2360_v53, %v2344_v37 }
0x1230   : > { %v2363_v59 = vadd.f32 %v2359_v54, %v2305_v40  ;;  %v2365_v60 = vadd.f32 %v2361_v55, %v2346_v41 }
0x1231   : > { %v2366_v61 = vmul.f32 0.7978846, %v2362_v57  ;;  %v2368_v62 = vmul.f32 0.7978846, %v2364_v58 }
0x1232   : > { %v2367_v63 = vmul.f32 0.7978846, %v2363_v59  ;;  %v2369_v2 = vmul.f32 0.7978846, %v2365_v60 }
0x1233   : > { %3477 = vtanh.f32 %v2366_v61 }
0x1234   : > { %3479 = vtanh.f32 %v2368_v62 }
0x1235   : > { %3481 = vtanh.f32 %v2367_v63 }
0x1236   : > { %3483 = vtanh.f32 %v2369_v2 }
0x123d   : > { %v3478_v1 = vpop.eup %3477 }
0x123e   : > { %v3480_v3 = vpop.eup %3479  ;;  %v2374_v4 = vadd.f32 1.0, %v3478_v1 }
0x123f   : > { %v3482_v23 = vpop.eup %3481  ;;  %v2376_v5 = vadd.f32 1.0, %v3480_v3 }
0x1240   : > { %v3484_v6 = vpop.eup %3483  ;;  %v2375_v7 = vadd.f32 1.0, %v3482_v23  ;;  %v2378_v8 = vmul.f32 0.5, %v2374_v4 }
0x1241   : > { %v2377_v0 = vadd.f32 1.0, %v3484_v6  ;;  %v2380_v9 = vmul.f32 0.5, %v2376_v5 }
0x1242   : > { %v2379_v10 = vmul.f32 0.5, %v2375_v7  ;;  %v2382_v11 = vmul.f32 %v2378_v8, %v2303_v36 }
0x1243   : > { %v2381_v42 = vmul.f32 0.5, %v2377_v0  ;;  %v2384_v13 = vmul.f32 %v2380_v9, %v2344_v37 }
0x1244   : > { %v2383_v12 = vmul.f32 %v2379_v10, %v2305_v40  ;;  %v2451_v17 = vpack.c.bf16 %v2382_v11, %v2382_v11 }
0x1245   : > { %v2385_v14 = vmul.f32 %v2381_v42, %v2346_v41  ;;  %v2453_v18 = vpack.c.bf16 %v2384_v13, %v2384_v13 }
0x1246   : > { %v2452_v15 = vpack.c.bf16 %v2383_v12, %v2383_v12 }
0x1247   : > { %v2454_v16 = vpack.c.bf16 %v2385_v14, %v2385_v14 }
0x1248   : > { %2685 = vmatprep.mubr.bf16.mxu1 %v2452_v15 }
0x1249   : > { %2725 = vmatprep.mubr.bf16.mxu0 %v2454_v16  ;;  %2686 = vmatmul.mubr.bf16.vlgmr.msra.gmra.mrb[44].mxu1 %v2451_v17 }
0x124a   : > { %2726 = vmatmul.mubr.bf16.vlgmr.msra.gmra.mrb[20].mxu0 %v2453_v18 }
0x131c   : > { %v3097_v19 = vpop.f32.mrb[44].mxu1 }
0x131d   : > { %v3119_v20 = vpop.f32.mrb[20].mxu0  ;;  %v3098_v22 = vpop.f32.mrb[45].mxu1 }
0x131e   : > { %v3099_v24 = vadd.f32 %v3098_v22, %v3097_v19  ;;  %v3120_v25 = vpop.f32.mrb[21].mxu0  ;;  %v3100_v26 = vpop.f32.mrb[46].mxu1 }
0x131f   : > { %v3121_v27 = vadd.f32 %v3120_v25, %v3119_v20  ;;  %v3122_v28 = vpop.f32.mrb[22].mxu0  ;;  %v3101_v31 = vpop.f32.mrb[47].mxu1 }
0x1320   : > { %v2688_v33 = vadd.f32 %v3099_v24, %v2992_v21  ;;  %v3123_v34 = vpop.f32.mrb[23].mxu0 }
0x1322   : > { %v2728_v35 = vadd.f32 %v3121_v27, %v2688_v33 }
0x1324   : > { %v2733_v36 = vadd.f32 %v2728_v35, %v4284_v56 }
0x1326   : > { %2736 = vadd.xlane.f32.xlu1 %v2733_v36 }
0x13b3   : > { %v2737_v37 = vpop.xlane.xlu1 %2736 }
0x13b4   : > { %v2738_v38 = vmul.f32 0.0078125, %v2737_v37 }
0x13b6   : > { %v2739_v39 = vsub.f32 %v2733_v36, %v2738_v38 }
0x13b8   : > { %v2740_v40 = vmul.f32 %v2739_v39, %v2739_v39 }
0x13ba   : > { %2741 = vadd.xlane.f32.xlu1 %v2740_v40 }
0x1447   : > { %v2742_v41 = vpop.xlane.xlu1 %2741 }
0x1448   : > { %v2743_v43 = vmul.f32 0.0078125, %v2742_v41 }
0x144a   : > { %v2744_v45 = vadd.f32 1e-12, %v2743_v43 }
0x144c   : > { %3485 = vrsqrt.f32 %v2744_v45 }
0x1456   : > { %v3486_v46 = vpop.eup %3485 }
0x1457   : > { %v2746_v48 = vmul.f32 %v3486_v46, %v2739_v39 }
0x1459   : > { %v2753_v49 = vmul.f32 %v3025_v47, %v2746_v48 }
0x145b   : > { %v2760_v56 = vadd.f32 %v3026_v32, %v2753_v49 }
0x145d   : > { %2761 = vst [vmem:[%s774_s0] sm:$0xff] %v2760_v56 }
0x145e PF: > { %s4456_s29 = sld [smem:[#allocation9_spill]] }
0x1464   : > { %s35_s4 = sadd.s32 1, %s4456_s29  }
0x1465   : > { %p32_p3 = scmp.ge.s32.totalorder %s35_s4, 4  }
0x1467   :  { %34 = sbr.rel (!%p32_p3) target bundleno = 12 (0xc), region = 161 }
0x146e   :  { %2781 = vsyncpa [#allocation3], 1 }
0x146f   :  { %2783 = vsyncpa [#allocation3 + $0x1], 1 }
0x1470   :  { %2784 = vsyncpa [#allocation5], 1 }

</bundles_post_ra>
